<compile_context>
chip_gen: v7x
topology: tpu7x:2x2x1
jax: 0.10.0
libtpu: 0.0.40
codegen_flags: <defaults>
</compile_context>

<pallas_src>
import math

import jax
import jax.numpy as jnp
from jax import lax
from jax.experimental import pallas as pl
from jax.experimental.pallas import tpu as pltpu

VMEM_SPEC = pl.BlockSpec(memory_space=pltpu.MemorySpace.VMEM)
KSIZE = 4  # every conv in this network is 4x4


def get_nb_layers_from_res(resolution):
    assert resolution in [8, 16, 32, 64, 128]
    return int(math.log(resolution, 2) - 1)


# ----------------------------- fused Pallas kernel ---------------------------

def _leaky(y):
    return jnp.where(y > 0, y, 0.2 * y)


def _make_fused_kernel(batch, mid_specs, last_c_in):
    """Builds the single fused forward kernel.

    Ref layout (in order):
      p1      : (K1, N*OH1*OW1)   im2col'd first-layer patches (host-prepared)
      w1      : (C1, K1)          first conv weights
      per middle layer l:
        targ_l  : (16, 1, M_out)  int32 flat input column per output column / tap (-1 = pad)
        w_l     : (16, C_out, C_in)
        gamma_l : (C_out, 1)
        beta_l  : (C_out, 1)
      w_last  : (C_last, 16)      final 4x4 conv weights, columns ordered kh*4+kw
      out     : (1, N)
    """
    n_mid = len(mid_specs)

    def kernel(*refs):
        p1_ref, w1_ref = refs[0], refs[1]
        w_last_ref = refs[-2]
        out_ref = refs[-1]

        # ---- layer 1: conv (patches prepared on host) + LeakyReLU -> (C1, M1)
        y = _leaky(jnp.dot(w1_ref[...], p1_ref[...],
                           preferred_element_type=jnp.float32))

        # ---- middle layers: in-kernel patch gather (one-hot MXU matmul) +
        #      conv matmul + one-pass train-mode BatchNorm + LeakyReLU.
        for l in range(n_mid):
            spec = mid_specs[l]
            targ_ref, w_ref, g_ref, b_ref = refs[2 + 4 * l: 2 + 4 * (l + 1)]
            m_in = batch * spec["IH"] * spec["IW"]
            m_out = batch * spec["OH"] * spec["OW"]

            rows = lax.broadcasted_iota(jnp.int32, (m_in, m_out), 0)  # hoisted
            acc = jnp.zeros((spec["C_out"], m_out), jnp.float32)
            for t in range(KSIZE * KSIZE):
                # one-hot gather: column m' selects input column targ[t, m'] (-1 -> all zero)
                gmat = (rows == targ_ref[t]).astype(jnp.float32)          # (M_in, M_out)
                patches = jnp.dot(y, gmat,
                                  preferred_element_type=jnp.float32)     # (C_in, M_out)
                acc = acc + jnp.dot(w_ref[t], patches,
                                    preferred_element_type=jnp.float32)   # (C_out, M_out)

            # BatchNorm (batch statistics, biased var), single pass, folded scale/shift.
            mean = jnp.mean(acc, axis=1, keepdims=True)
            var = jnp.mean(acc * acc, axis=1, keepdims=True) - mean * mean
            scale = g_ref[...] * lax.rsqrt(var + 1e-5)
            shift = b_ref[...] - mean * scale
            y = _leaky(acc * scale + shift)

        # ---- last layer: 4x4 stride-1 valid conv == full per-sample reduction.
        #      Main contraction on VPU/XLU (mul + reduces); tiny segment-sum matmul.
        s = KSIZE * KSIZE                                              # 16 positions / sample
        w_big = jnp.concatenate([w_last_ref[...]] * batch, axis=1)     # (C_last, N*16)
        colsum = jnp.sum(y * w_big, axis=0, keepdims=True)             # (1, N*16)
        ridx = lax.broadcasted_iota(jnp.int32, (batch * s, batch), 0)
        cidx = lax.broadcasted_iota(jnp.int32, (batch * s, batch), 1)
        gsum = ((ridx >= cidx * s) & (ridx < (cidx + 1) * s)).astype(jnp.float32)
        out_ref[...] = jax.nn.sigmoid(
            jnp.dot(colsum, gsum, preferred_element_type=jnp.float32))  # (1, N)

    return kernel


# ------------------------------- host-side prep ------------------------------

def _first_layer_patches(x_nhwc, out_hw):
    """im2col of the network input for the first conv (k4 s2 p1) as (K, N*OH*OW).

    Row order: (kh*4+kw)*C + c ; column order: (n*OH + oh)*OW + ow."""
    n, h, w, c = x_nhwc.shape
    oh = ow = out_hw
    xp = jnp.pad(x_nhwc, ((0, 0), (1, 1), (1, 1), (0, 0)))
    taps = []
    for kh in range(KSIZE):
        for kw in range(KSIZE):
            taps.append(xp[:, kh:kh + 2 * oh:2, kw:kw + 2 * ow:2, :])  # (N,OH,OW,C)
    p = jnp.stack(taps, axis=0)                   # (16, N, OH, OW, C)
    p = jnp.transpose(p, (0, 4, 1, 2, 3))         # (16, C, N, OH, OW)
    return p.reshape(KSIZE * KSIZE * c, n * oh * ow)


def _gather_targets(batch, ih, iw, oh, ow, stride, pad):
    """int32 (16, 1, batch*oh*ow): flat input column feeding each output column for
    each tap, or -1 where the tap lands in zero padding.  Pure shape arithmetic;
    constant-folded under jit."""
    n_idx, oh_idx, ow_idx = jnp.meshgrid(
        jnp.arange(batch), jnp.arange(oh), jnp.arange(ow), indexing="ij")
    n_idx, oh_idx, ow_idx = (a.reshape(-1) for a in (n_idx, oh_idx, ow_idx))
    targs = []
    for kh in range(KSIZE):
        for kw in range(KSIZE):
            ihh = stride * oh_idx + kh - pad
            iww = stride * ow_idx + kw - pad
            valid = (ihh >= 0) & (ihh < ih) & (iww >= 0) & (iww < iw)
            t = (n_idx * ih + ihh) * iw + iww
            targs.append(jnp.where(valid, t, -1))
    return jnp.stack(targs, axis=0).reshape(
        KSIZE * KSIZE, 1, batch * oh * ow).astype(jnp.int32)


# --------------------------------- parameters --------------------------------

def init_discriminator_params(key, img_channels=1, img_res=32, feature_map_size=16):
    """Synthetic init mirroring weights_init (conv ~ N(0, .02), BN gamma ~ N(1, .02),
    BN beta = 0).  Stores both raw HWIO conv weights (for the reference) and the
    kernel-formatted layouts."""
    nb_layers = get_nb_layers_from_res(img_res)
    convs = [dict(cin=img_channels, cout=feature_map_size, bn=False)]
    cin = feature_map_size
    for _ in range(nb_layers - 2):
        convs.append(dict(cin=cin, cout=cin * 2, bn=True))
        cin *= 2
    convs.append(dict(cin=cin, cout=1, bn=False))

    keys = jax.random.split(key, len(convs) + 1)
    params = dict(img_channels=img_channels, img_res=img_res,
                  feature_map_size=feature_map_size, raw=[], mid=[])

    # first conv -> (C_out, K) with K ordered (kh*4+kw)*cin + c
    w = 0.02 * jax.random.normal(
        keys[0], (KSIZE, KSIZE, convs[0]["cin"], convs[0]["cout"]), jnp.float32)
    params["raw"].append(w)
    params["w_first"] = jnp.transpose(w, (3, 0, 1, 2)).reshape(
        convs[0]["cout"], KSIZE * KSIZE * convs[0]["cin"])

    # middle convs -> (16, C_out, C_in) + BN params (C_out, 1)
    for i, spec in enumerate(convs[1:-1], start=1):
        kw_, kg_ = jax.random.split(keys[i])
        w = 0.02 * jax.random.normal(
            kw_, (KSIZE, KSIZE, spec["cin"], spec["cout"]), jnp.float32)
        params["raw"].append(w)
        wt = jnp.transpose(w, (0, 1, 3, 2)).reshape(
            KSIZE * KSIZE, spec["cout"], spec["cin"])
        gamma = 1.0 + 0.02 * jax.random.normal(kg_, (spec["cout"], 1), jnp.float32)
        beta = jnp.zeros((spec["cout"], 1), jnp.float32)
        params["mid"].append(dict(w=wt, gamma=gamma, beta=beta,
                                  cin=spec["cin"], cout=spec["cout"]))

    # last conv -> (C_in, 16), columns ordered kh*4+kw
    w = 0.02 * jax.random.normal(
        keys[-1], (KSIZE, KSIZE, convs[-1]["cin"], 1), jnp.float32)
    params["raw"].append(w)
    params["w_last"] = jnp.transpose(w, (2, 0, 1, 3)).reshape(
        convs[-1]["cin"], KSIZE * KSIZE)
    params["last_cin"] = convs[-1]["cin"]
    return params


# --------------------------------- forward -----------------------------------

def discriminator_forward(params, x_nchw):
    """x_nchw: (N, C, H, W) float32 -> (N,) float32 (matches .view(-1))."""
    n = x_nchw.shape[0]
    img_res = params["img_res"]
    x = jnp.transpose(x_nchw, (0, 2, 3, 1)).astype(jnp.float32)  # NHWC

    res1 = img_res // 2
    inputs = [_first_layer_patches(x, res1), params["w_first"]]

    mid_specs = []
    in_res = res1
    for m in params["mid"]:
        out_res = in_res // 2
        inputs += [_gather_targets(n, in_res, in_res, out_res, out_res, 2, 1),
                   m["w"], m["gamma"], m["beta"]]
        mid_specs.append(dict(C_in=m["cin"], C_out=m["cout"],
                              IH=in_res, IW=in_res, OH=out_res, OW=out_res))
        in_res = out_res
    assert in_res == KSIZE  # last conv consumes the full 4x4 map
    inputs.append(params["w_last"])

    kernel = _make_fused_kernel(n, mid_specs, params["last_cin"])
    out = pl.pallas_call(
        kernel,
        out_shape=jax.ShapeDtypeStruct((1, n), jnp.float32),
        in_specs=[VMEM_SPEC] * len(inputs),
        out_specs=VMEM_SPEC,
    )(*inputs)
    return out.reshape(-1)


# ------------------------------ pure-JAX reference ---------------------------

def _reference_forward(params, x_nchw):
    x = jnp.transpose(x_nchw, (0, 2, 3, 1)).astype(jnp.float32)  # NHWC

    def conv(v, w, stride, pad):
        return lax.conv_general_dilated(
            v, w, (stride, stride), [(pad, pad), (pad, pad)],
            dimension_numbers=("NHWC", "HWIO", "NHWC"))

    x = conv(x, params["raw"][0], 2, 1)
    x = jnp.where(x > 0, x, 0.2 * x)
    for i, m in enumerate(params["mid"]):
        x = conv(x, params["raw"][1 + i], 2, 1)
        mean = jnp.mean(x, axis=(0, 1, 2), keepdims=True)
        var = jnp.mean((x - mean) ** 2, axis=(0, 1, 2), keepdims=True)
        g = m["gamma"].reshape(1, 1, 1, -1)
        b = m["beta"].reshape(1, 1, 1, -1)
        x = (x - mean) * lax.rsqrt(var + 1e-5) * g + b
        x = jnp.where(x > 0, x, 0.2 * x)
    x = conv(x, params["raw"][-1], 1, 0)
    return jax.nn.sigmoid(x).reshape(-1)


# ----------------------------------- main -------------------------------------

if __name__ == "__main__":
    key = jax.random.PRNGKey(0)
    k_params, k_input = jax.random.split(key)

    params = init_discriminator_params(
        k_params, img_channels=1, img_res=32, feature_map_size=16)

    # NCHW input like PyTorch: batch=2, channels=1, 32x32 image.
    x = jax.random.normal(k_input, (2, 1, 32, 32), jnp.float32)

    fwd = jax.jit(lambda xx: discriminator_forward(params, xx))
    out = jax.block_until_ready(fwd(x))
    assert out.shape == (2,), out.shape
    assert bool(jnp.all(jnp.isfinite(out)))
    assert bool(jnp.all((out >= 0.0) & (out <= 1.0)))

    ref = _reference_forward(params, x)
    assert bool(jnp.allclose(out, ref, atol=5e-3, rtol=5e-3)), (out, ref)

    print("KERNEL_OK")
</pallas_src>

<mosaic_0001>
module attributes {stable_mosaic.version = 11 : i64} {
  func.func @kernel(%arg0: memref<16x512xf32, #tpu.memory_space<vmem>>, %arg1: memref<16x16xf32, #tpu.memory_space<vmem>>, %arg2: memref<16x1x128xi32, #tpu.memory_space<vmem>>, %arg3: memref<16x32x16xf32, #tpu.memory_space<vmem>>, %arg4: memref<32x1xf32, #tpu.memory_space<vmem>>, %arg5: memref<32x1xf32, #tpu.memory_space<vmem>>, %arg6: memref<16x1x32xi32, #tpu.memory_space<vmem>>, %arg7: memref<16x64x32xf32, #tpu.memory_space<vmem>>, %arg8: memref<64x1xf32, #tpu.memory_space<vmem>>, %arg9: memref<64x1xf32, #tpu.memory_space<vmem>>, %arg10: memref<64x16xf32, #tpu.memory_space<vmem>>, %arg11: memref<1x2xf32, #tpu.memory_space<vmem>>) attributes {dimension_semantics = [], scalar_prefetch = 0 : i64, scratch_operands = 0 : i64, tpu.core_type = #tpu.core_type<tc>} {
    %c0 = arith.constant 0 : index
    %c0_0 = arith.constant 0 : index
    %0 = vector.load %arg1[%c0, %c0_0] : memref<16x16xf32, #tpu.memory_space<vmem>>, vector<16x16xf32>
    %c0_1 = arith.constant 0 : index
    %c0_2 = arith.constant 0 : index
    %1 = vector.load %arg0[%c0_1, %c0_2] : memref<16x512xf32, #tpu.memory_space<vmem>>, vector<16x512xf32>
    %cst = arith.constant dense<0.000000e+00> : vector<16x512xf32>
    %2 = tpu.matmul %0, %1, %cst {dimension_numbers = #tpu.dot_dimension_numbers<[1], [0], [0], [1], [0, 0, 1, 1], [], []>} : vector<16x16xf32>, vector<16x512xf32>, vector<16x512xf32> -> vector<16x512xf32>
    %cst_3 = arith.constant 0.000000e+00 : f32
    %3 = vector.broadcast %cst_3 : f32 to vector<16x512xf32>
    %4 = arith.cmpf ogt, %2, %3 : vector<16x512xf32>
    %cst_4 = arith.constant 2.000000e-01 : f32
    %5 = vector.broadcast %cst_4 : f32 to vector<16x512xf32>
    %6 = arith.mulf %5, %2 : vector<16x512xf32>
    %7 = arith.select %4, %2, %6 : vector<16x512xi1>, vector<16x512xf32>
    %8 = tpu.iota {dimensions = array<i32: 0>} : vector<512x128xi32>
    %cst_5 = arith.constant 0.000000e+00 : f32
    %9 = vector.broadcast %cst_5 : f32 to vector<32x128xf32>
    %c0_6 = arith.constant 0 : index
    %c0_7 = arith.constant 0 : index
    %c0_8 = arith.constant 0 : index
    %10 = vector.load %arg2[%c0_6, %c0_7, %c0_8] : memref<16x1x128xi32, #tpu.memory_space<vmem>>, vector<1x1x128xi32>
    %11 = vector.shape_cast %10 : vector<1x1x128xi32> to vector<1x128xi32>
    %12 = vector.broadcast %11 : vector<1x128xi32> to vector<512x128xi32>
    %13 = arith.cmpi eq, %8, %12 : vector<512x128xi32>
    %14 = arith.extui %13 : vector<512x128xi1> to vector<512x128xi32>
    %15 = arith.sitofp %14 : vector<512x128xi32> to vector<512x128xf32>
    %cst_9 = arith.constant dense<0.000000e+00> : vector<16x128xf32>
    %16 = tpu.matmul %7, %15, %cst_9 {dimension_numbers = #tpu.dot_dimension_numbers<[1], [0], [0], [1], [0, 0, 1, 1], [], []>} : vector<16x512xf32>, vector<512x128xf32>, vector<16x128xf32> -> vector<16x128xf32>
    %c0_10 = arith.constant 0 : index
    %c0_11 = arith.constant 0 : index
    %c0_12 = arith.constant 0 : index
    %17 = vector.load %arg3[%c0_10, %c0_11, %c0_12] : memref<16x32x16xf32, #tpu.memory_space<vmem>>, vector<1x32x16xf32>
    %18 = vector.shape_cast %17 : vector<1x32x16xf32> to vector<32x16xf32>
    %cst_13 = arith.constant dense<0.000000e+00> : vector<32x128xf32>
    %19 = tpu.matmul %18, %16, %cst_13 {dimension_numbers = #tpu.dot_dimension_numbers<[1], [0], [0], [1], [0, 0, 1, 1], [], []>} : vector<32x16xf32>, vector<16x128xf32>, vector<32x128xf32> -> vector<32x128xf32>
    %20 = arith.addf %9, %19 : vector<32x128xf32>
    %c1 = arith.constant 1 : index
    %c0_14 = arith.constant 0 : index
    %c0_15 = arith.constant 0 : index
    %21 = vector.load %arg2[%c1, %c0_14, %c0_15] : memref<16x1x128xi32, #tpu.memory_space<vmem>>, vector<1x1x128xi32>
    %22 = vector.shape_cast %21 : vector<1x1x128xi32> to vector<1x128xi32>
    %23 = vector.broadcast %22 : vector<1x128xi32> to vector<512x128xi32>
    %24 = arith.cmpi eq, %8, %23 : vector<512x128xi32>
    %25 = arith.extui %24 : vector<512x128xi1> to vector<512x128xi32>
    %26 = arith.sitofp %25 : vector<512x128xi32> to vector<512x128xf32>
    %cst_16 = arith.constant dense<0.000000e+00> : vector<16x128xf32>
    %27 = tpu.matmul %7, %26, %cst_16 {dimension_numbers = #tpu.dot_dimension_numbers<[1], [0], [0], [1], [0, 0, 1, 1], [], []>} : vector<16x512xf32>, vector<512x128xf32>, vector<16x128xf32> -> vector<16x128xf32>
    %c1_17 = arith.constant 1 : index
    %c0_18 = arith.constant 0 : index
    %c0_19 = arith.constant 0 : index
    %28 = vector.load %arg3[%c1_17, %c0_18, %c0_19] : memref<16x32x16xf32, #tpu.memory_space<vmem>>, vector<1x32x16xf32>
    %29 = vector.shape_cast %28 : vector<1x32x16xf32> to vector<32x16xf32>
    %cst_20 = arith.constant dense<0.000000e+00> : vector<32x128xf32>
    %30 = tpu.matmul %29, %27, %cst_20 {dimension_numbers = #tpu.dot_dimension_numbers<[1], [0], [0], [1], [0, 0, 1, 1], [], []>} : vector<32x16xf32>, vector<16x128xf32>, vector<32x128xf32> -> vector<32x128xf32>
    %31 = arith.addf %20, %30 : vector<32x128xf32>
    %c2 = arith.constant 2 : index
    %c0_21 = arith.constant 0 : index
    %c0_22 = arith.constant 0 : index
    %32 = vector.load %arg2[%c2, %c0_21, %c0_22] : memref<16x1x128xi32, #tpu.memory_space<vmem>>, vector<1x1x128xi32>
    %33 = vector.shape_cast %32 : vector<1x1x128xi32> to vector<1x128xi32>
    %34 = vector.broadcast %33 : vector<1x128xi32> to vector<512x128xi32>
    %35 = arith.cmpi eq, %8, %34 : vector<512x128xi32>
    %36 = arith.extui %35 : vector<512x128xi1> to vector<512x128xi32>
    %37 = arith.sitofp %36 : vector<512x128xi32> to vector<512x128xf32>
    %cst_23 = arith.constant dense<0.000000e+00> : vector<16x128xf32>
    %38 = tpu.matmul %7, %37, %cst_23 {dimension_numbers = #tpu.dot_dimension_numbers<[1], [0], [0], [1], [0, 0, 1, 1], [], []>} : vector<16x512xf32>, vector<512x128xf32>, vector<16x128xf32> -> vector<16x128xf32>
    %c2_24 = arith.constant 2 : index
    %c0_25 = arith.constant 0 : index
    %c0_26 = arith.constant 0 : index
    %39 = vector.load %arg3[%c2_24, %c0_25, %c0_26] : memref<16x32x16xf32, #tpu.memory_space<vmem>>, vector<1x32x16xf32>
    %40 = vector.shape_cast %39 : vector<1x32x16xf32> to vector<32x16xf32>
    %cst_27 = arith.constant dense<0.000000e+00> : vector<32x128xf32>
    %41 = tpu.matmul %40, %38, %cst_27 {dimension_numbers = #tpu.dot_dimension_numbers<[1], [0], [0], [1], [0, 0, 1, 1], [], []>} : vector<32x16xf32>, vector<16x128xf32>, vector<32x128xf32> -> vector<32x128xf32>
    %42 = arith.addf %31, %41 : vector<32x128xf32>
    %c3 = arith.constant 3 : index
    %c0_28 = arith.constant 0 : index
    %c0_29 = arith.constant 0 : index
    %43 = vector.load %arg2[%c3, %c0_28, %c0_29] : memref<16x1x128xi32, #tpu.memory_space<vmem>>, vector<1x1x128xi32>
    %44 = vector.shape_cast %43 : vector<1x1x128xi32> to vector<1x128xi32>
    %45 = vector.broadcast %44 : vector<1x128xi32> to vector<512x128xi32>
    %46 = arith.cmpi eq, %8, %45 : vector<512x128xi32>
    %47 = arith.extui %46 : vector<512x128xi1> to vector<512x128xi32>
    %48 = arith.sitofp %47 : vector<512x128xi32> to vector<512x128xf32>
    %cst_30 = arith.constant dense<0.000000e+00> : vector<16x128xf32>
    %49 = tpu.matmul %7, %48, %cst_30 {dimension_numbers = #tpu.dot_dimension_numbers<[1], [0], [0], [1], [0, 0, 1, 1], [], []>} : vector<16x512xf32>, vector<512x128xf32>, vector<16x128xf32> -> vector<16x128xf32>
    %c3_31 = arith.constant 3 : index
    %c0_32 = arith.constant 0 : index
    %c0_33 = arith.constant 0 : index
    %50 = vector.load %arg3[%c3_31, %c0_32, %c0_33] : memref<16x32x16xf32, #tpu.memory_space<vmem>>, vector<1x32x16xf32>
    %51 = vector.shape_cast %50 : vector<1x32x16xf32> to vector<32x16xf32>
    %cst_34 = arith.constant dense<0.000000e+00> : vector<32x128xf32>
    %52 = tpu.matmul %51, %49, %cst_34 {dimension_numbers = #tpu.dot_dimension_numbers<[1], [0], [0], [1], [0, 0, 1, 1], [], []>} : vector<32x16xf32>, vector<16x128xf32>, vector<32x128xf32> -> vector<32x128xf32>
    %53 = arith.addf %42, %52 : vector<32x128xf32>
    %c4 = arith.constant 4 : index
    %c0_35 = arith.constant 0 : index
    %c0_36 = arith.constant 0 : index
    %54 = vector.load %arg2[%c4, %c0_35, %c0_36] : memref<16x1x128xi32, #tpu.memory_space<vmem>>, vector<1x1x128xi32>
    %55 = vector.shape_cast %54 : vector<1x1x128xi32> to vector<1x128xi32>
    %56 = vector.broadcast %55 : vector<1x128xi32> to vector<512x128xi32>
    %57 = arith.cmpi eq, %8, %56 : vector<512x128xi32>
    %58 = arith.extui %57 : vector<512x128xi1> to vector<512x128xi32>
    %59 = arith.sitofp %58 : vector<512x128xi32> to vector<512x128xf32>
    %cst_37 = arith.constant dense<0.000000e+00> : vector<16x128xf32>
    %60 = tpu.matmul %7, %59, %cst_37 {dimension_numbers = #tpu.dot_dimension_numbers<[1], [0], [0], [1], [0, 0, 1, 1], [], []>} : vector<16x512xf32>, vector<512x128xf32>, vector<16x128xf32> -> vector<16x128xf32>
    %c4_38 = arith.constant 4 : index
    %c0_39 = arith.constant 0 : index
    %c0_40 = arith.constant 0 : index
    %61 = vector.load %arg3[%c4_38, %c0_39, %c0_40] : memref<16x32x16xf32, #tpu.memory_space<vmem>>, vector<1x32x16xf32>
    %62 = vector.shape_cast %61 : vector<1x32x16xf32> to vector<32x16xf32>
    %cst_41 = arith.constant dense<0.000000e+00> : vector<32x128xf32>
    %63 = tpu.matmul %62, %60, %cst_41 {dimension_numbers = #tpu.dot_dimension_numbers<[1], [0], [0], [1], [0, 0, 1, 1], [], []>} : vector<32x16xf32>, vector<16x128xf32>, vector<32x128xf32> -> vector<32x128xf32>
    %64 = arith.addf %53, %63 : vector<32x128xf32>
    %c5 = arith.constant 5 : index
    %c0_42 = arith.constant 0 : index
    %c0_43 = arith.constant 0 : index
    %65 = vector.load %arg2[%c5, %c0_42, %c0_43] : memref<16x1x128xi32, #tpu.memory_space<vmem>>, vector<1x1x128xi32>
    %66 = vector.shape_cast %65 : vector<1x1x128xi32> to vector<1x128xi32>
    %67 = vector.broadcast %66 : vector<1x128xi32> to vector<512x128xi32>
    %68 = arith.cmpi eq, %8, %67 : vector<512x128xi32>
    %69 = arith.extui %68 : vector<512x128xi1> to vector<512x128xi32>
    %70 = arith.sitofp %69 : vector<512x128xi32> to vector<512x128xf32>
    %cst_44 = arith.constant dense<0.000000e+00> : vector<16x128xf32>
    %71 = tpu.matmul %7, %70, %cst_44 {dimension_numbers = #tpu.dot_dimension_numbers<[1], [0], [0], [1], [0, 0, 1, 1], [], []>} : vector<16x512xf32>, vector<512x128xf32>, vector<16x128xf32> -> vector<16x128xf32>
    %c5_45 = arith.constant 5 : index
    %c0_46 = arith.constant 0 : index
    %c0_47 = arith.constant 0 : index
    %72 = vector.load %arg3[%c5_45, %c0_46, %c0_47] : memref<16x32x16xf32, #tpu.memory_space<vmem>>, vector<1x32x16xf32>
    %73 = vector.shape_cast %72 : vector<1x32x16xf32> to vector<32x16xf32>
    %cst_48 = arith.constant dense<0.000000e+00> : vector<32x128xf32>
    %74 = tpu.matmul %73, %71, %cst_48 {dimension_numbers = #tpu.dot_dimension_numbers<[1], [0], [0], [1], [0, 0, 1, 1], [], []>} : vector<32x16xf32>, vector<16x128xf32>, vector<32x128xf32> -> vector<32x128xf32>
    %75 = arith.addf %64, %74 : vector<32x128xf32>
    %c6 = arith.constant 6 : index
    %c0_49 = arith.constant 0 : index
    %c0_50 = arith.constant 0 : index
    %76 = vector.load %arg2[%c6, %c0_49, %c0_50] : memref<16x1x128xi32, #tpu.memory_space<vmem>>, vector<1x1x128xi32>
    %77 = vector.shape_cast %76 : vector<1x1x128xi32> to vector<1x128xi32>
    %78 = vector.broadcast %77 : vector<1x128xi32> to vector<512x128xi32>
    %79 = arith.cmpi eq, %8, %78 : vector<512x128xi32>
    %80 = arith.extui %79 : vector<512x128xi1> to vector<512x128xi32>
    %81 = arith.sitofp %80 : vector<512x128xi32> to vector<512x128xf32>
    %cst_51 = arith.constant dense<0.000000e+00> : vector<16x128xf32>
    %82 = tpu.matmul %7, %81, %cst_51 {dimension_numbers = #tpu.dot_dimension_numbers<[1], [0], [0], [1], [0, 0, 1, 1], [], []>} : vector<16x512xf32>, vector<512x128xf32>, vector<16x128xf32> -> vector<16x128xf32>
    %c6_52 = arith.constant 6 : index
    %c0_53 = arith.constant 0 : index
    %c0_54 = arith.constant 0 : index
    %83 = vector.load %arg3[%c6_52, %c0_53, %c0_54] : memref<16x32x16xf32, #tpu.memory_space<vmem>>, vector<1x32x16xf32>
    %84 = vector.shape_cast %83 : vector<1x32x16xf32> to vector<32x16xf32>
    %cst_55 = arith.constant dense<0.000000e+00> : vector<32x128xf32>
    %85 = tpu.matmul %84, %82, %cst_55 {dimension_numbers = #tpu.dot_dimension_numbers<[1], [0], [0], [1], [0, 0, 1, 1], [], []>} : vector<32x16xf32>, vector<16x128xf32>, vector<32x128xf32> -> vector<32x128xf32>
    %86 = arith.addf %75, %85 : vector<32x128xf32>
    %c7 = arith.constant 7 : index
    %c0_56 = arith.constant 0 : index
    %c0_57 = arith.constant 0 : index
    %87 = vector.load %arg2[%c7, %c0_56, %c0_57] : memref<16x1x128xi32, #tpu.memory_space<vmem>>, vector<1x1x128xi32>
    %88 = vector.shape_cast %87 : vector<1x1x128xi32> to vector<1x128xi32>
    %89 = vector.broadcast %88 : vector<1x128xi32> to vector<512x128xi32>
    %90 = arith.cmpi eq, %8, %89 : vector<512x128xi32>
    %91 = arith.extui %90 : vector<512x128xi1> to vector<512x128xi32>
    %92 = arith.sitofp %91 : vector<512x128xi32> to vector<512x128xf32>
    %cst_58 = arith.constant dense<0.000000e+00> : vector<16x128xf32>
    %93 = tpu.matmul %7, %92, %cst_58 {dimension_numbers = #tpu.dot_dimension_numbers<[1], [0], [0], [1], [0, 0, 1, 1], [], []>} : vector<16x512xf32>, vector<512x128xf32>, vector<16x128xf32> -> vector<16x128xf32>
    %c7_59 = arith.constant 7 : index
    %c0_60 = arith.constant 0 : index
    %c0_61 = arith.constant 0 : index
    %94 = vector.load %arg3[%c7_59, %c0_60, %c0_61] : memref<16x32x16xf32, #tpu.memory_space<vmem>>, vector<1x32x16xf32>
    %95 = vector.shape_cast %94 : vector<1x32x16xf32> to vector<32x16xf32>
    %cst_62 = arith.constant dense<0.000000e+00> : vector<32x128xf32>
    %96 = tpu.matmul %95, %93, %cst_62 {dimension_numbers = #tpu.dot_dimension_numbers<[1], [0], [0], [1], [0, 0, 1, 1], [], []>} : vector<32x16xf32>, vector<16x128xf32>, vector<32x128xf32> -> vector<32x128xf32>
    %97 = arith.addf %86, %96 : vector<32x128xf32>
    %c8 = arith.constant 8 : index
    %c0_63 = arith.constant 0 : index
    %c0_64 = arith.constant 0 : index
    %98 = vector.load %arg2[%c8, %c0_63, %c0_64] : memref<16x1x128xi32, #tpu.memory_space<vmem>>, vector<1x1x128xi32>
    %99 = vector.shape_cast %98 : vector<1x1x128xi32> to vector<1x128xi32>
    %100 = vector.broadcast %99 : vector<1x128xi32> to vector<512x128xi32>
    %101 = arith.cmpi eq, %8, %100 : vector<512x128xi32>
    %102 = arith.extui %101 : vector<512x128xi1> to vector<512x128xi32>
    %103 = arith.sitofp %102 : vector<512x128xi32> to vector<512x128xf32>
    %cst_65 = arith.constant dense<0.000000e+00> : vector<16x128xf32>
    %104 = tpu.matmul %7, %103, %cst_65 {dimension_numbers = #tpu.dot_dimension_numbers<[1], [0], [0], [1], [0, 0, 1, 1], [], []>} : vector<16x512xf32>, vector<512x128xf32>, vector<16x128xf32> -> vector<16x128xf32>
    %c8_66 = arith.constant 8 : index
    %c0_67 = arith.constant 0 : index
    %c0_68 = arith.constant 0 : index
    %105 = vector.load %arg3[%c8_66, %c0_67, %c0_68] : memref<16x32x16xf32, #tpu.memory_space<vmem>>, vector<1x32x16xf32>
    %106 = vector.shape_cast %105 : vector<1x32x16xf32> to vector<32x16xf32>
    %cst_69 = arith.constant dense<0.000000e+00> : vector<32x128xf32>
    %107 = tpu.matmul %106, %104, %cst_69 {dimension_numbers = #tpu.dot_dimension_numbers<[1], [0], [0], [1], [0, 0, 1, 1], [], []>} : vector<32x16xf32>, vector<16x128xf32>, vector<32x128xf32> -> vector<32x128xf32>
    %108 = arith.addf %97, %107 : vector<32x128xf32>
    %c9 = arith.constant 9 : index
    %c0_70 = arith.constant 0 : index
    %c0_71 = arith.constant 0 : index
    %109 = vector.load %arg2[%c9, %c0_70, %c0_71] : memref<16x1x128xi32, #tpu.memory_space<vmem>>, vector<1x1x128xi32>
    %110 = vector.shape_cast %109 : vector<1x1x128xi32> to vector<1x128xi32>
    %111 = vector.broadcast %110 : vector<1x128xi32> to vector<512x128xi32>
    %112 = arith.cmpi eq, %8, %111 : vector<512x128xi32>
    %113 = arith.extui %112 : vector<512x128xi1> to vector<512x128xi32>
    %114 = arith.sitofp %113 : vector<512x128xi32> to vector<512x128xf32>
    %cst_72 = arith.constant dense<0.000000e+00> : vector<16x128xf32>
    %115 = tpu.matmul %7, %114, %cst_72 {dimension_numbers = #tpu.dot_dimension_numbers<[1], [0], [0], [1], [0, 0, 1, 1], [], []>} : vector<16x512xf32>, vector<512x128xf32>, vector<16x128xf32> -> vector<16x128xf32>
    %c9_73 = arith.constant 9 : index
    %c0_74 = arith.constant 0 : index
    %c0_75 = arith.constant 0 : index
    %116 = vector.load %arg3[%c9_73, %c0_74, %c0_75] : memref<16x32x16xf32, #tpu.memory_space<vmem>>, vector<1x32x16xf32>
    %117 = vector.shape_cast %116 : vector<1x32x16xf32> to vector<32x16xf32>
    %cst_76 = arith.constant dense<0.000000e+00> : vector<32x128xf32>
    %118 = tpu.matmul %117, %115, %cst_76 {dimension_numbers = #tpu.dot_dimension_numbers<[1], [0], [0], [1], [0, 0, 1, 1], [], []>} : vector<32x16xf32>, vector<16x128xf32>, vector<32x128xf32> -> vector<32x128xf32>
    %119 = arith.addf %108, %118 : vector<32x128xf32>
    %c10 = arith.constant 10 : index
    %c0_77 = arith.constant 0 : index
    %c0_78 = arith.constant 0 : index
    %120 = vector.load %arg2[%c10, %c0_77, %c0_78] : memref<16x1x128xi32, #tpu.memory_space<vmem>>, vector<1x1x128xi32>
    %121 = vector.shape_cast %120 : vector<1x1x128xi32> to vector<1x128xi32>
    %122 = vector.broadcast %121 : vector<1x128xi32> to vector<512x128xi32>
    %123 = arith.cmpi eq, %8, %122 : vector<512x128xi32>
    %124 = arith.extui %123 : vector<512x128xi1> to vector<512x128xi32>
    %125 = arith.sitofp %124 : vector<512x128xi32> to vector<512x128xf32>
    %cst_79 = arith.constant dense<0.000000e+00> : vector<16x128xf32>
    %126 = tpu.matmul %7, %125, %cst_79 {dimension_numbers = #tpu.dot_dimension_numbers<[1], [0], [0], [1], [0, 0, 1, 1], [], []>} : vector<16x512xf32>, vector<512x128xf32>, vector<16x128xf32> -> vector<16x128xf32>
    %c10_80 = arith.constant 10 : index
    %c0_81 = arith.constant 0 : index
    %c0_82 = arith.constant 0 : index
    %127 = vector.load %arg3[%c10_80, %c0_81, %c0_82] : memref<16x32x16xf32, #tpu.memory_space<vmem>>, vector<1x32x16xf32>
    %128 = vector.shape_cast %127 : vector<1x32x16xf32> to vector<32x16xf32>
    %cst_83 = arith.constant dense<0.000000e+00> : vector<32x128xf32>
    %129 = tpu.matmul %128, %126, %cst_83 {dimension_numbers = #tpu.dot_dimension_numbers<[1], [0], [0], [1], [0, 0, 1, 1], [], []>} : vector<32x16xf32>, vector<16x128xf32>, vector<32x128xf32> -> vector<32x128xf32>
    %130 = arith.addf %119, %129 : vector<32x128xf32>
    %c11 = arith.constant 11 : index
    %c0_84 = arith.constant 0 : index
    %c0_85 = arith.constant 0 : index
    %131 = vector.load %arg2[%c11, %c0_84, %c0_85] : memref<16x1x128xi32, #tpu.memory_space<vmem>>, vector<1x1x128xi32>
    %132 = vector.shape_cast %131 : vector<1x1x128xi32> to vector<1x128xi32>
    %133 = vector.broadcast %132 : vector<1x128xi32> to vector<512x128xi32>
    %134 = arith.cmpi eq, %8, %133 : vector<512x128xi32>
    %135 = arith.extui %134 : vector<512x128xi1> to vector<512x128xi32>
    %136 = arith.sitofp %135 : vector<512x128xi32> to vector<512x128xf32>
    %cst_86 = arith.constant dense<0.000000e+00> : vector<16x128xf32>
    %137 = tpu.matmul %7, %136, %cst_86 {dimension_numbers = #tpu.dot_dimension_numbers<[1], [0], [0], [1], [0, 0, 1, 1], [], []>} : vector<16x512xf32>, vector<512x128xf32>, vector<16x128xf32> -> vector<16x128xf32>
    %c11_87 = arith.constant 11 : index
    %c0_88 = arith.constant 0 : index
    %c0_89 = arith.constant 0 : index
    %138 = vector.load %arg3[%c11_87, %c0_88, %c0_89] : memref<16x32x16xf32, #tpu.memory_space<vmem>>, vector<1x32x16xf32>
    %139 = vector.shape_cast %138 : vector<1x32x16xf32> to vector<32x16xf32>
    %cst_90 = arith.constant dense<0.000000e+00> : vector<32x128xf32>
    %140 = tpu.matmul %139, %137, %cst_90 {dimension_numbers = #tpu.dot_dimension_numbers<[1], [0], [0], [1], [0, 0, 1, 1], [], []>} : vector<32x16xf32>, vector<16x128xf32>, vector<32x128xf32> -> vector<32x128xf32>
    %141 = arith.addf %130, %140 : vector<32x128xf32>
    %c12 = arith.constant 12 : index
    %c0_91 = arith.constant 0 : index
    %c0_92 = arith.constant 0 : index
    %142 = vector.load %arg2[%c12, %c0_91, %c0_92] : memref<16x1x128xi32, #tpu.memory_space<vmem>>, vector<1x1x128xi32>
    %143 = vector.shape_cast %142 : vector<1x1x128xi32> to vector<1x128xi32>
    %144 = vector.broadcast %143 : vector<1x128xi32> to vector<512x128xi32>
    %145 = arith.cmpi eq, %8, %144 : vector<512x128xi32>
    %146 = arith.extui %145 : vector<512x128xi1> to vector<512x128xi32>
    %147 = arith.sitofp %146 : vector<512x128xi32> to vector<512x128xf32>
    %cst_93 = arith.constant dense<0.000000e+00> : vector<16x128xf32>
    %148 = tpu.matmul %7, %147, %cst_93 {dimension_numbers = #tpu.dot_dimension_numbers<[1], [0], [0], [1], [0, 0, 1, 1], [], []>} : vector<16x512xf32>, vector<512x128xf32>, vector<16x128xf32> -> vector<16x128xf32>
    %c12_94 = arith.constant 12 : index
    %c0_95 = arith.constant 0 : index
    %c0_96 = arith.constant 0 : index
    %149 = vector.load %arg3[%c12_94, %c0_95, %c0_96] : memref<16x32x16xf32, #tpu.memory_space<vmem>>, vector<1x32x16xf32>
    %150 = vector.shape_cast %149 : vector<1x32x16xf32> to vector<32x16xf32>
    %cst_97 = arith.constant dense<0.000000e+00> : vector<32x128xf32>
    %151 = tpu.matmul %150, %148, %cst_97 {dimension_numbers = #tpu.dot_dimension_numbers<[1], [0], [0], [1], [0, 0, 1, 1], [], []>} : vector<32x16xf32>, vector<16x128xf32>, vector<32x128xf32> -> vector<32x128xf32>
    %152 = arith.addf %141, %151 : vector<32x128xf32>
    %c13 = arith.constant 13 : index
    %c0_98 = arith.constant 0 : index
    %c0_99 = arith.constant 0 : index
    %153 = vector.load %arg2[%c13, %c0_98, %c0_99] : memref<16x1x128xi32, #tpu.memory_space<vmem>>, vector<1x1x128xi32>
    %154 = vector.shape_cast %153 : vector<1x1x128xi32> to vector<1x128xi32>
    %155 = vector.broadcast %154 : vector<1x128xi32> to vector<512x128xi32>
    %156 = arith.cmpi eq, %8, %155 : vector<512x128xi32>
    %157 = arith.extui %156 : vector<512x128xi1> to vector<512x128xi32>
    %158 = arith.sitofp %157 : vector<512x128xi32> to vector<512x128xf32>
    %cst_100 = arith.constant dense<0.000000e+00> : vector<16x128xf32>
    %159 = tpu.matmul %7, %158, %cst_100 {dimension_numbers = #tpu.dot_dimension_numbers<[1], [0], [0], [1], [0, 0, 1, 1], [], []>} : vector<16x512xf32>, vector<512x128xf32>, vector<16x128xf32> -> vector<16x128xf32>
    %c13_101 = arith.constant 13 : index
    %c0_102 = arith.constant 0 : index
    %c0_103 = arith.constant 0 : index
    %160 = vector.load %arg3[%c13_101, %c0_102, %c0_103] : memref<16x32x16xf32, #tpu.memory_space<vmem>>, vector<1x32x16xf32>
    %161 = vector.shape_cast %160 : vector<1x32x16xf32> to vector<32x16xf32>
    %cst_104 = arith.constant dense<0.000000e+00> : vector<32x128xf32>
    %162 = tpu.matmul %161, %159, %cst_104 {dimension_numbers = #tpu.dot_dimension_numbers<[1], [0], [0], [1], [0, 0, 1, 1], [], []>} : vector<32x16xf32>, vector<16x128xf32>, vector<32x128xf32> -> vector<32x128xf32>
    %163 = arith.addf %152, %162 : vector<32x128xf32>
    %c14 = arith.constant 14 : index
    %c0_105 = arith.constant 0 : index
    %c0_106 = arith.constant 0 : index
    %164 = vector.load %arg2[%c14, %c0_105, %c0_106] : memref<16x1x128xi32, #tpu.memory_space<vmem>>, vector<1x1x128xi32>
    %165 = vector.shape_cast %164 : vector<1x1x128xi32> to vector<1x128xi32>
    %166 = vector.broadcast %165 : vector<1x128xi32> to vector<512x128xi32>
    %167 = arith.cmpi eq, %8, %166 : vector<512x128xi32>
    %168 = arith.extui %167 : vector<512x128xi1> to vector<512x128xi32>
    %169 = arith.sitofp %168 : vector<512x128xi32> to vector<512x128xf32>
    %cst_107 = arith.constant dense<0.000000e+00> : vector<16x128xf32>
    %170 = tpu.matmul %7, %169, %cst_107 {dimension_numbers = #tpu.dot_dimension_numbers<[1], [0], [0], [1], [0, 0, 1, 1], [], []>} : vector<16x512xf32>, vector<512x128xf32>, vector<16x128xf32> -> vector<16x128xf32>
    %c14_108 = arith.constant 14 : index
    %c0_109 = arith.constant 0 : index
    %c0_110 = arith.constant 0 : index
    %171 = vector.load %arg3[%c14_108, %c0_109, %c0_110] : memref<16x32x16xf32, #tpu.memory_space<vmem>>, vector<1x32x16xf32>
    %172 = vector.shape_cast %171 : vector<1x32x16xf32> to vector<32x16xf32>
    %cst_111 = arith.constant dense<0.000000e+00> : vector<32x128xf32>
    %173 = tpu.matmul %172, %170, %cst_111 {dimension_numbers = #tpu.dot_dimension_numbers<[1], [0], [0], [1], [0, 0, 1, 1], [], []>} : vector<32x16xf32>, vector<16x128xf32>, vector<32x128xf32> -> vector<32x128xf32>
    %174 = arith.addf %163, %173 : vector<32x128xf32>
    %c15 = arith.constant 15 : index
    %c0_112 = arith.constant 0 : index
    %c0_113 = arith.constant 0 : index
    %175 = vector.load %arg2[%c15, %c0_112, %c0_113] : memref<16x1x128xi32, #tpu.memory_space<vmem>>, vector<1x1x128xi32>
    %176 = vector.shape_cast %175 : vector<1x1x128xi32> to vector<1x128xi32>
    %177 = vector.broadcast %176 : vector<1x128xi32> to vector<512x128xi32>
    %178 = arith.cmpi eq, %8, %177 : vector<512x128xi32>
    %179 = arith.extui %178 : vector<512x128xi1> to vector<512x128xi32>
    %180 = arith.sitofp %179 : vector<512x128xi32> to vector<512x128xf32>
    %cst_114 = arith.constant dense<0.000000e+00> : vector<16x128xf32>
    %181 = tpu.matmul %7, %180, %cst_114 {dimension_numbers = #tpu.dot_dimension_numbers<[1], [0], [0], [1], [0, 0, 1, 1], [], []>} : vector<16x512xf32>, vector<512x128xf32>, vector<16x128xf32> -> vector<16x128xf32>
    %c15_115 = arith.constant 15 : index
    %c0_116 = arith.constant 0 : index
    %c0_117 = arith.constant 0 : index
    %182 = vector.load %arg3[%c15_115, %c0_116, %c0_117] : memref<16x32x16xf32, #tpu.memory_space<vmem>>, vector<1x32x16xf32>
    %183 = vector.shape_cast %182 : vector<1x32x16xf32> to vector<32x16xf32>
    %cst_118 = arith.constant dense<0.000000e+00> : vector<32x128xf32>
    %184 = tpu.matmul %183, %181, %cst_118 {dimension_numbers = #tpu.dot_dimension_numbers<[1], [0], [0], [1], [0, 0, 1, 1], [], []>} : vector<32x16xf32>, vector<16x128xf32>, vector<32x128xf32> -> vector<32x128xf32>
    %185 = arith.addf %174, %184 : vector<32x128xf32>
    %cst_119 = arith.constant dense<0.000000e+00> : vector<32xf32>
    %186 = vector.multi_reduction <add>, %185, %cst_119 [1] : vector<32x128xf32> to vector<32xf32>
    %187 = vector.shape_cast %186 : vector<32xf32> to vector<32x1xf32>
    %cst_120 = arith.constant 1.280000e+02 : f32
    %188 = vector.broadcast %cst_120 : f32 to vector<32x1xf32>
    %189 = arith.divf %187, %188 : vector<32x1xf32>
    %190 = arith.mulf %185, %185 : vector<32x128xf32>
    %cst_121 = arith.constant dense<0.000000e+00> : vector<32xf32>
    %191 = vector.multi_reduction <add>, %190, %cst_121 [1] : vector<32x128xf32> to vector<32xf32>
    %192 = vector.shape_cast %191 : vector<32xf32> to vector<32x1xf32>
    %cst_122 = arith.constant 1.280000e+02 : f32
    %193 = vector.broadcast %cst_122 : f32 to vector<32x1xf32>
    %194 = arith.divf %192, %193 : vector<32x1xf32>
    %195 = arith.mulf %189, %189 : vector<32x1xf32>
    %196 = arith.subf %194, %195 : vector<32x1xf32>
    %c0_123 = arith.constant 0 : index
    %c0_124 = arith.constant 0 : index
    %197 = vector.load %arg4[%c0_123, %c0_124] : memref<32x1xf32, #tpu.memory_space<vmem>>, vector<32x1xf32>
    %cst_125 = arith.constant 9.99999974E-6 : f32
    %198 = vector.broadcast %cst_125 : f32 to vector<32x1xf32>
    %199 = arith.addf %196, %198 : vector<32x1xf32>
    %200 = math.rsqrt %199 : vector<32x1xf32>
    %201 = arith.mulf %197, %200 : vector<32x1xf32>
    %c0_126 = arith.constant 0 : index
    %c0_127 = arith.constant 0 : index
    %202 = vector.load %arg5[%c0_126, %c0_127] : memref<32x1xf32, #tpu.memory_space<vmem>>, vector<32x1xf32>
    %203 = arith.mulf %189, %201 : vector<32x1xf32>
    %204 = arith.subf %202, %203 : vector<32x1xf32>
    %205 = vector.broadcast %201 : vector<32x1xf32> to vector<32x128xf32>
    %206 = arith.mulf %185, %205 : vector<32x128xf32>
    %207 = vector.broadcast %204 : vector<32x1xf32> to vector<32x128xf32>
    %208 = arith.addf %206, %207 : vector<32x128xf32>
    %cst_128 = arith.constant 0.000000e+00 : f32
    %209 = vector.broadcast %cst_128 : f32 to vector<32x128xf32>
    %210 = arith.cmpf ogt, %208, %209 : vector<32x128xf32>
    %cst_129 = arith.constant 2.000000e-01 : f32
    %211 = vector.broadcast %cst_129 : f32 to vector<32x128xf32>
    %212 = arith.mulf %211, %208 : vector<32x128xf32>
    %213 = arith.select %210, %208, %212 : vector<32x128xi1>, vector<32x128xf32>
    %214 = tpu.iota {dimensions = array<i32: 0>} : vector<128x32xi32>
    %cst_130 = arith.constant 0.000000e+00 : f32
    %215 = vector.broadcast %cst_130 : f32 to vector<64x32xf32>
    %c0_131 = arith.constant 0 : index
    %c0_132 = arith.constant 0 : index
    %c0_133 = arith.constant 0 : index
    %216 = vector.load %arg6[%c0_131, %c0_132, %c0_133] : memref<16x1x32xi32, #tpu.memory_space<vmem>>, vector<1x1x32xi32>
    %217 = vector.shape_cast %216 : vector<1x1x32xi32> to vector<1x32xi32>
    %218 = vector.broadcast %217 : vector<1x32xi32> to vector<128x32xi32>
    %219 = arith.cmpi eq, %214, %218 : vector<128x32xi32>
    %220 = arith.extui %219 : vector<128x32xi1> to vector<128x32xi32>
    %221 = arith.sitofp %220 : vector<128x32xi32> to vector<128x32xf32>
    %cst_134 = arith.constant dense<0.000000e+00> : vector<32x32xf32>
    %222 = tpu.matmul %213, %221, %cst_134 {dimension_numbers = #tpu.dot_dimension_numbers<[1], [0], [0], [1], [0, 0, 1, 1], [], []>} : vector<32x128xf32>, vector<128x32xf32>, vector<32x32xf32> -> vector<32x32xf32>
    %c0_135 = arith.constant 0 : index
    %c0_136 = arith.constant 0 : index
    %c0_137 = arith.constant 0 : index
    %223 = vector.load %arg7[%c0_135, %c0_136, %c0_137] : memref<16x64x32xf32, #tpu.memory_space<vmem>>, vector<1x64x32xf32>
    %224 = vector.shape_cast %223 : vector<1x64x32xf32> to vector<64x32xf32>
    %cst_138 = arith.constant dense<0.000000e+00> : vector<64x32xf32>
    %225 = tpu.matmul %224, %222, %cst_138 {dimension_numbers = #tpu.dot_dimension_numbers<[1], [0], [0], [1], [0, 0, 1, 1], [], []>} : vector<64x32xf32>, vector<32x32xf32>, vector<64x32xf32> -> vector<64x32xf32>
    %226 = arith.addf %215, %225 : vector<64x32xf32>
    %c1_139 = arith.constant 1 : index
    %c0_140 = arith.constant 0 : index
    %c0_141 = arith.constant 0 : index
    %227 = vector.load %arg6[%c1_139, %c0_140, %c0_141] : memref<16x1x32xi32, #tpu.memory_space<vmem>>, vector<1x1x32xi32>
    %228 = vector.shape_cast %227 : vector<1x1x32xi32> to vector<1x32xi32>
    %229 = vector.broadcast %228 : vector<1x32xi32> to vector<128x32xi32>
    %230 = arith.cmpi eq, %214, %229 : vector<128x32xi32>
    %231 = arith.extui %230 : vector<128x32xi1> to vector<128x32xi32>
    %232 = arith.sitofp %231 : vector<128x32xi32> to vector<128x32xf32>
    %cst_142 = arith.constant dense<0.000000e+00> : vector<32x32xf32>
    %233 = tpu.matmul %213, %232, %cst_142 {dimension_numbers = #tpu.dot_dimension_numbers<[1], [0], [0], [1], [0, 0, 1, 1], [], []>} : vector<32x128xf32>, vector<128x32xf32>, vector<32x32xf32> -> vector<32x32xf32>
    %c1_143 = arith.constant 1 : index
    %c0_144 = arith.constant 0 : index
    %c0_145 = arith.constant 0 : index
    %234 = vector.load %arg7[%c1_143, %c0_144, %c0_145] : memref<16x64x32xf32, #tpu.memory_space<vmem>>, vector<1x64x32xf32>
    %235 = vector.shape_cast %234 : vector<1x64x32xf32> to vector<64x32xf32>
    %cst_146 = arith.constant dense<0.000000e+00> : vector<64x32xf32>
    %236 = tpu.matmul %235, %233, %cst_146 {dimension_numbers = #tpu.dot_dimension_numbers<[1], [0], [0], [1], [0, 0, 1, 1], [], []>} : vector<64x32xf32>, vector<32x32xf32>, vector<64x32xf32> -> vector<64x32xf32>
    %237 = arith.addf %226, %236 : vector<64x32xf32>
    %c2_147 = arith.constant 2 : index
    %c0_148 = arith.constant 0 : index
    %c0_149 = arith.constant 0 : index
    %238 = vector.load %arg6[%c2_147, %c0_148, %c0_149] : memref<16x1x32xi32, #tpu.memory_space<vmem>>, vector<1x1x32xi32>
    %239 = vector.shape_cast %238 : vector<1x1x32xi32> to vector<1x32xi32>
    %240 = vector.broadcast %239 : vector<1x32xi32> to vector<128x32xi32>
    %241 = arith.cmpi eq, %214, %240 : vector<128x32xi32>
    %242 = arith.extui %241 : vector<128x32xi1> to vector<128x32xi32>
    %243 = arith.sitofp %242 : vector<128x32xi32> to vector<128x32xf32>
    %cst_150 = arith.constant dense<0.000000e+00> : vector<32x32xf32>
    %244 = tpu.matmul %213, %243, %cst_150 {dimension_numbers = #tpu.dot_dimension_numbers<[1], [0], [0], [1], [0, 0, 1, 1], [], []>} : vector<32x128xf32>, vector<128x32xf32>, vector<32x32xf32> -> vector<32x32xf32>
    %c2_151 = arith.constant 2 : index
    %c0_152 = arith.constant 0 : index
    %c0_153 = arith.constant 0 : index
    %245 = vector.load %arg7[%c2_151, %c0_152, %c0_153] : memref<16x64x32xf32, #tpu.memory_space<vmem>>, vector<1x64x32xf32>
    %246 = vector.shape_cast %245 : vector<1x64x32xf32> to vector<64x32xf32>
    %cst_154 = arith.constant dense<0.000000e+00> : vector<64x32xf32>
    %247 = tpu.matmul %246, %244, %cst_154 {dimension_numbers = #tpu.dot_dimension_numbers<[1], [0], [0], [1], [0, 0, 1, 1], [], []>} : vector<64x32xf32>, vector<32x32xf32>, vector<64x32xf32> -> vector<64x32xf32>
    %248 = arith.addf %237, %247 : vector<64x32xf32>
    %c3_155 = arith.constant 3 : index
    %c0_156 = arith.constant 0 : index
    %c0_157 = arith.constant 0 : index
    %249 = vector.load %arg6[%c3_155, %c0_156, %c0_157] : memref<16x1x32xi32, #tpu.memory_space<vmem>>, vector<1x1x32xi32>
    %250 = vector.shape_cast %249 : vector<1x1x32xi32> to vector<1x32xi32>
    %251 = vector.broadcast %250 : vector<1x32xi32> to vector<128x32xi32>
    %252 = arith.cmpi eq, %214, %251 : vector<128x32xi32>
    %253 = arith.extui %252 : vector<128x32xi1> to vector<128x32xi32>
    %254 = arith.sitofp %253 : vector<128x32xi32> to vector<128x32xf32>
    %cst_158 = arith.constant dense<0.000000e+00> : vector<32x32xf32>
    %255 = tpu.matmul %213, %254, %cst_158 {dimension_numbers = #tpu.dot_dimension_numbers<[1], [0], [0], [1], [0, 0, 1, 1], [], []>} : vector<32x128xf32>, vector<128x32xf32>, vector<32x32xf32> -> vector<32x32xf32>
    %c3_159 = arith.constant 3 : index
    %c0_160 = arith.constant 0 : index
    %c0_161 = arith.constant 0 : index
    %256 = vector.load %arg7[%c3_159, %c0_160, %c0_161] : memref<16x64x32xf32, #tpu.memory_space<vmem>>, vector<1x64x32xf32>
    %257 = vector.shape_cast %256 : vector<1x64x32xf32> to vector<64x32xf32>
    %cst_162 = arith.constant dense<0.000000e+00> : vector<64x32xf32>
    %258 = tpu.matmul %257, %255, %cst_162 {dimension_numbers = #tpu.dot_dimension_numbers<[1], [0], [0], [1], [0, 0, 1, 1], [], []>} : vector<64x32xf32>, vector<32x32xf32>, vector<64x32xf32> -> vector<64x32xf32>
    %259 = arith.addf %248, %258 : vector<64x32xf32>
    %c4_163 = arith.constant 4 : index
    %c0_164 = arith.constant 0 : index
    %c0_165 = arith.constant 0 : index
    %260 = vector.load %arg6[%c4_163, %c0_164, %c0_165] : memref<16x1x32xi32, #tpu.memory_space<vmem>>, vector<1x1x32xi32>
    %261 = vector.shape_cast %260 : vector<1x1x32xi32> to vector<1x32xi32>
    %262 = vector.broadcast %261 : vector<1x32xi32> to vector<128x32xi32>
    %263 = arith.cmpi eq, %214, %262 : vector<128x32xi32>
    %264 = arith.extui %263 : vector<128x32xi1> to vector<128x32xi32>
    %265 = arith.sitofp %264 : vector<128x32xi32> to vector<128x32xf32>
    %cst_166 = arith.constant dense<0.000000e+00> : vector<32x32xf32>
    %266 = tpu.matmul %213, %265, %cst_166 {dimension_numbers = #tpu.dot_dimension_numbers<[1], [0], [0], [1], [0, 0, 1, 1], [], []>} : vector<32x128xf32>, vector<128x32xf32>, vector<32x32xf32> -> vector<32x32xf32>
    %c4_167 = arith.constant 4 : index
    %c0_168 = arith.constant 0 : index
    %c0_169 = arith.constant 0 : index
    %267 = vector.load %arg7[%c4_167, %c0_168, %c0_169] : memref<16x64x32xf32, #tpu.memory_space<vmem>>, vector<1x64x32xf32>
    %268 = vector.shape_cast %267 : vector<1x64x32xf32> to vector<64x32xf32>
    %cst_170 = arith.constant dense<0.000000e+00> : vector<64x32xf32>
    %269 = tpu.matmul %268, %266, %cst_170 {dimension_numbers = #tpu.dot_dimension_numbers<[1], [0], [0], [1], [0, 0, 1, 1], [], []>} : vector<64x32xf32>, vector<32x32xf32>, vector<64x32xf32> -> vector<64x32xf32>
    %270 = arith.addf %259, %269 : vector<64x32xf32>
    %c5_171 = arith.constant 5 : index
    %c0_172 = arith.constant 0 : index
    %c0_173 = arith.constant 0 : index
    %271 = vector.load %arg6[%c5_171, %c0_172, %c0_173] : memref<16x1x32xi32, #tpu.memory_space<vmem>>, vector<1x1x32xi32>
    %272 = vector.shape_cast %271 : vector<1x1x32xi32> to vector<1x32xi32>
    %273 = vector.broadcast %272 : vector<1x32xi32> to vector<128x32xi32>
    %274 = arith.cmpi eq, %214, %273 : vector<128x32xi32>
    %275 = arith.extui %274 : vector<128x32xi1> to vector<128x32xi32>
    %276 = arith.sitofp %275 : vector<128x32xi32> to vector<128x32xf32>
    %cst_174 = arith.constant dense<0.000000e+00> : vector<32x32xf32>
    %277 = tpu.matmul %213, %276, %cst_174 {dimension_numbers = #tpu.dot_dimension_numbers<[1], [0], [0], [1], [0, 0, 1, 1], [], []>} : vector<32x128xf32>, vector<128x32xf32>, vector<32x32xf32> -> vector<32x32xf32>
    %c5_175 = arith.constant 5 : index
    %c0_176 = arith.constant 0 : index
    %c0_177 = arith.constant 0 : index
    %278 = vector.load %arg7[%c5_175, %c0_176, %c0_177] : memref<16x64x32xf32, #tpu.memory_space<vmem>>, vector<1x64x32xf32>
    %279 = vector.shape_cast %278 : vector<1x64x32xf32> to vector<64x32xf32>
    %cst_178 = arith.constant dense<0.000000e+00> : vector<64x32xf32>
    %280 = tpu.matmul %279, %277, %cst_178 {dimension_numbers = #tpu.dot_dimension_numbers<[1], [0], [0], [1], [0, 0, 1, 1], [], []>} : vector<64x32xf32>, vector<32x32xf32>, vector<64x32xf32> -> vector<64x32xf32>
    %281 = arith.addf %270, %280 : vector<64x32xf32>
    %c6_179 = arith.constant 6 : index
    %c0_180 = arith.constant 0 : index
    %c0_181 = arith.constant 0 : index
    %282 = vector.load %arg6[%c6_179, %c0_180, %c0_181] : memref<16x1x32xi32, #tpu.memory_space<vmem>>, vector<1x1x32xi32>
    %283 = vector.shape_cast %282 : vector<1x1x32xi32> to vector<1x32xi32>
    %284 = vector.broadcast %283 : vector<1x32xi32> to vector<128x32xi32>
    %285 = arith.cmpi eq, %214, %284 : vector<128x32xi32>
    %286 = arith.extui %285 : vector<128x32xi1> to vector<128x32xi32>
    %287 = arith.sitofp %286 : vector<128x32xi32> to vector<128x32xf32>
    %cst_182 = arith.constant dense<0.000000e+00> : vector<32x32xf32>
    %288 = tpu.matmul %213, %287, %cst_182 {dimension_numbers = #tpu.dot_dimension_numbers<[1], [0], [0], [1], [0, 0, 1, 1], [], []>} : vector<32x128xf32>, vector<128x32xf32>, vector<32x32xf32> -> vector<32x32xf32>
    %c6_183 = arith.constant 6 : index
    %c0_184 = arith.constant 0 : index
    %c0_185 = arith.constant 0 : index
    %289 = vector.load %arg7[%c6_183, %c0_184, %c0_185] : memref<16x64x32xf32, #tpu.memory_space<vmem>>, vector<1x64x32xf32>
    %290 = vector.shape_cast %289 : vector<1x64x32xf32> to vector<64x32xf32>
    %cst_186 = arith.constant dense<0.000000e+00> : vector<64x32xf32>
    %291 = tpu.matmul %290, %288, %cst_186 {dimension_numbers = #tpu.dot_dimension_numbers<[1], [0], [0], [1], [0, 0, 1, 1], [], []>} : vector<64x32xf32>, vector<32x32xf32>, vector<64x32xf32> -> vector<64x32xf32>
    %292 = arith.addf %281, %291 : vector<64x32xf32>
    %c7_187 = arith.constant 7 : index
    %c0_188 = arith.constant 0 : index
    %c0_189 = arith.constant 0 : index
    %293 = vector.load %arg6[%c7_187, %c0_188, %c0_189] : memref<16x1x32xi32, #tpu.memory_space<vmem>>, vector<1x1x32xi32>
    %294 = vector.shape_cast %293 : vector<1x1x32xi32> to vector<1x32xi32>
    %295 = vector.broadcast %294 : vector<1x32xi32> to vector<128x32xi32>
    %296 = arith.cmpi eq, %214, %295 : vector<128x32xi32>
    %297 = arith.extui %296 : vector<128x32xi1> to vector<128x32xi32>
    %298 = arith.sitofp %297 : vector<128x32xi32> to vector<128x32xf32>
    %cst_190 = arith.constant dense<0.000000e+00> : vector<32x32xf32>
    %299 = tpu.matmul %213, %298, %cst_190 {dimension_numbers = #tpu.dot_dimension_numbers<[1], [0], [0], [1], [0, 0, 1, 1], [], []>} : vector<32x128xf32>, vector<128x32xf32>, vector<32x32xf32> -> vector<32x32xf32>
    %c7_191 = arith.constant 7 : index
    %c0_192 = arith.constant 0 : index
    %c0_193 = arith.constant 0 : index
    %300 = vector.load %arg7[%c7_191, %c0_192, %c0_193] : memref<16x64x32xf32, #tpu.memory_space<vmem>>, vector<1x64x32xf32>
    %301 = vector.shape_cast %300 : vector<1x64x32xf32> to vector<64x32xf32>
    %cst_194 = arith.constant dense<0.000000e+00> : vector<64x32xf32>
    %302 = tpu.matmul %301, %299, %cst_194 {dimension_numbers = #tpu.dot_dimension_numbers<[1], [0], [0], [1], [0, 0, 1, 1], [], []>} : vector<64x32xf32>, vector<32x32xf32>, vector<64x32xf32> -> vector<64x32xf32>
    %303 = arith.addf %292, %302 : vector<64x32xf32>
    %c8_195 = arith.constant 8 : index
    %c0_196 = arith.constant 0 : index
    %c0_197 = arith.constant 0 : index
    %304 = vector.load %arg6[%c8_195, %c0_196, %c0_197] : memref<16x1x32xi32, #tpu.memory_space<vmem>>, vector<1x1x32xi32>
    %305 = vector.shape_cast %304 : vector<1x1x32xi32> to vector<1x32xi32>
    %306 = vector.broadcast %305 : vector<1x32xi32> to vector<128x32xi32>
    %307 = arith.cmpi eq, %214, %306 : vector<128x32xi32>
    %308 = arith.extui %307 : vector<128x32xi1> to vector<128x32xi32>
    %309 = arith.sitofp %308 : vector<128x32xi32> to vector<128x32xf32>
    %cst_198 = arith.constant dense<0.000000e+00> : vector<32x32xf32>
    %310 = tpu.matmul %213, %309, %cst_198 {dimension_numbers = #tpu.dot_dimension_numbers<[1], [0], [0], [1], [0, 0, 1, 1], [], []>} : vector<32x128xf32>, vector<128x32xf32>, vector<32x32xf32> -> vector<32x32xf32>
    %c8_199 = arith.constant 8 : index
    %c0_200 = arith.constant 0 : index
    %c0_201 = arith.constant 0 : index
    %311 = vector.load %arg7[%c8_199, %c0_200, %c0_201] : memref<16x64x32xf32, #tpu.memory_space<vmem>>, vector<1x64x32xf32>
    %312 = vector.shape_cast %311 : vector<1x64x32xf32> to vector<64x32xf32>
    %cst_202 = arith.constant dense<0.000000e+00> : vector<64x32xf32>
    %313 = tpu.matmul %312, %310, %cst_202 {dimension_numbers = #tpu.dot_dimension_numbers<[1], [0], [0], [1], [0, 0, 1, 1], [], []>} : vector<64x32xf32>, vector<32x32xf32>, vector<64x32xf32> -> vector<64x32xf32>
    %314 = arith.addf %303, %313 : vector<64x32xf32>
    %c9_203 = arith.constant 9 : index
    %c0_204 = arith.constant 0 : index
    %c0_205 = arith.constant 0 : index
    %315 = vector.load %arg6[%c9_203, %c0_204, %c0_205] : memref<16x1x32xi32, #tpu.memory_space<vmem>>, vector<1x1x32xi32>
    %316 = vector.shape_cast %315 : vector<1x1x32xi32> to vector<1x32xi32>
    %317 = vector.broadcast %316 : vector<1x32xi32> to vector<128x32xi32>
    %318 = arith.cmpi eq, %214, %317 : vector<128x32xi32>
    %319 = arith.extui %318 : vector<128x32xi1> to vector<128x32xi32>
    %320 = arith.sitofp %319 : vector<128x32xi32> to vector<128x32xf32>
    %cst_206 = arith.constant dense<0.000000e+00> : vector<32x32xf32>
    %321 = tpu.matmul %213, %320, %cst_206 {dimension_numbers = #tpu.dot_dimension_numbers<[1], [0], [0], [1], [0, 0, 1, 1], [], []>} : vector<32x128xf32>, vector<128x32xf32>, vector<32x32xf32> -> vector<32x32xf32>
    %c9_207 = arith.constant 9 : index
    %c0_208 = arith.constant 0 : index
    %c0_209 = arith.constant 0 : index
    %322 = vector.load %arg7[%c9_207, %c0_208, %c0_209] : memref<16x64x32xf32, #tpu.memory_space<vmem>>, vector<1x64x32xf32>
    %323 = vector.shape_cast %322 : vector<1x64x32xf32> to vector<64x32xf32>
    %cst_210 = arith.constant dense<0.000000e+00> : vector<64x32xf32>
    %324 = tpu.matmul %323, %321, %cst_210 {dimension_numbers = #tpu.dot_dimension_numbers<[1], [0], [0], [1], [0, 0, 1, 1], [], []>} : vector<64x32xf32>, vector<32x32xf32>, vector<64x32xf32> -> vector<64x32xf32>
    %325 = arith.addf %314, %324 : vector<64x32xf32>
    %c10_211 = arith.constant 10 : index
    %c0_212 = arith.constant 0 : index
    %c0_213 = arith.constant 0 : index
    %326 = vector.load %arg6[%c10_211, %c0_212, %c0_213] : memref<16x1x32xi32, #tpu.memory_space<vmem>>, vector<1x1x32xi32>
    %327 = vector.shape_cast %326 : vector<1x1x32xi32> to vector<1x32xi32>
    %328 = vector.broadcast %327 : vector<1x32xi32> to vector<128x32xi32>
    %329 = arith.cmpi eq, %214, %328 : vector<128x32xi32>
    %330 = arith.extui %329 : vector<128x32xi1> to vector<128x32xi32>
    %331 = arith.sitofp %330 : vector<128x32xi32> to vector<128x32xf32>
    %cst_214 = arith.constant dense<0.000000e+00> : vector<32x32xf32>
    %332 = tpu.matmul %213, %331, %cst_214 {dimension_numbers = #tpu.dot_dimension_numbers<[1], [0], [0], [1], [0, 0, 1, 1], [], []>} : vector<32x128xf32>, vector<128x32xf32>, vector<32x32xf32> -> vector<32x32xf32>
    %c10_215 = arith.constant 10 : index
    %c0_216 = arith.constant 0 : index
    %c0_217 = arith.constant 0 : index
    %333 = vector.load %arg7[%c10_215, %c0_216, %c0_217] : memref<16x64x32xf32, #tpu.memory_space<vmem>>, vector<1x64x32xf32>
    %334 = vector.shape_cast %333 : vector<1x64x32xf32> to vector<64x32xf32>
    %cst_218 = arith.constant dense<0.000000e+00> : vector<64x32xf32>
    %335 = tpu.matmul %334, %332, %cst_218 {dimension_numbers = #tpu.dot_dimension_numbers<[1], [0], [0], [1], [0, 0, 1, 1], [], []>} : vector<64x32xf32>, vector<32x32xf32>, vector<64x32xf32> -> vector<64x32xf32>
    %336 = arith.addf %325, %335 : vector<64x32xf32>
    %c11_219 = arith.constant 11 : index
    %c0_220 = arith.constant 0 : index
    %c0_221 = arith.constant 0 : index
    %337 = vector.load %arg6[%c11_219, %c0_220, %c0_221] : memref<16x1x32xi32, #tpu.memory_space<vmem>>, vector<1x1x32xi32>
    %338 = vector.shape_cast %337 : vector<1x1x32xi32> to vector<1x32xi32>
    %339 = vector.broadcast %338 : vector<1x32xi32> to vector<128x32xi32>
    %340 = arith.cmpi eq, %214, %339 : vector<128x32xi32>
    %341 = arith.extui %340 : vector<128x32xi1> to vector<128x32xi32>
    %342 = arith.sitofp %341 : vector<128x32xi32> to vector<128x32xf32>
    %cst_222 = arith.constant dense<0.000000e+00> : vector<32x32xf32>
    %343 = tpu.matmul %213, %342, %cst_222 {dimension_numbers = #tpu.dot_dimension_numbers<[1], [0], [0], [1], [0, 0, 1, 1], [], []>} : vector<32x128xf32>, vector<128x32xf32>, vector<32x32xf32> -> vector<32x32xf32>
    %c11_223 = arith.constant 11 : index
    %c0_224 = arith.constant 0 : index
    %c0_225 = arith.constant 0 : index
    %344 = vector.load %arg7[%c11_223, %c0_224, %c0_225] : memref<16x64x32xf32, #tpu.memory_space<vmem>>, vector<1x64x32xf32>
    %345 = vector.shape_cast %344 : vector<1x64x32xf32> to vector<64x32xf32>
    %cst_226 = arith.constant dense<0.000000e+00> : vector<64x32xf32>
    %346 = tpu.matmul %345, %343, %cst_226 {dimension_numbers = #tpu.dot_dimension_numbers<[1], [0], [0], [1], [0, 0, 1, 1], [], []>} : vector<64x32xf32>, vector<32x32xf32>, vector<64x32xf32> -> vector<64x32xf32>
    %347 = arith.addf %336, %346 : vector<64x32xf32>
    %c12_227 = arith.constant 12 : index
    %c0_228 = arith.constant 0 : index
    %c0_229 = arith.constant 0 : index
    %348 = vector.load %arg6[%c12_227, %c0_228, %c0_229] : memref<16x1x32xi32, #tpu.memory_space<vmem>>, vector<1x1x32xi32>
    %349 = vector.shape_cast %348 : vector<1x1x32xi32> to vector<1x32xi32>
    %350 = vector.broadcast %349 : vector<1x32xi32> to vector<128x32xi32>
    %351 = arith.cmpi eq, %214, %350 : vector<128x32xi32>
    %352 = arith.extui %351 : vector<128x32xi1> to vector<128x32xi32>
    %353 = arith.sitofp %352 : vector<128x32xi32> to vector<128x32xf32>
    %cst_230 = arith.constant dense<0.000000e+00> : vector<32x32xf32>
    %354 = tpu.matmul %213, %353, %cst_230 {dimension_numbers = #tpu.dot_dimension_numbers<[1], [0], [0], [1], [0, 0, 1, 1], [], []>} : vector<32x128xf32>, vector<128x32xf32>, vector<32x32xf32> -> vector<32x32xf32>
    %c12_231 = arith.constant 12 : index
    %c0_232 = arith.constant 0 : index
    %c0_233 = arith.constant 0 : index
    %355 = vector.load %arg7[%c12_231, %c0_232, %c0_233] : memref<16x64x32xf32, #tpu.memory_space<vmem>>, vector<1x64x32xf32>
    %356 = vector.shape_cast %355 : vector<1x64x32xf32> to vector<64x32xf32>
    %cst_234 = arith.constant dense<0.000000e+00> : vector<64x32xf32>
    %357 = tpu.matmul %356, %354, %cst_234 {dimension_numbers = #tpu.dot_dimension_numbers<[1], [0], [0], [1], [0, 0, 1, 1], [], []>} : vector<64x32xf32>, vector<32x32xf32>, vector<64x32xf32> -> vector<64x32xf32>
    %358 = arith.addf %347, %357 : vector<64x32xf32>
    %c13_235 = arith.constant 13 : index
    %c0_236 = arith.constant 0 : index
    %c0_237 = arith.constant 0 : index
    %359 = vector.load %arg6[%c13_235, %c0_236, %c0_237] : memref<16x1x32xi32, #tpu.memory_space<vmem>>, vector<1x1x32xi32>
    %360 = vector.shape_cast %359 : vector<1x1x32xi32> to vector<1x32xi32>
    %361 = vector.broadcast %360 : vector<1x32xi32> to vector<128x32xi32>
    %362 = arith.cmpi eq, %214, %361 : vector<128x32xi32>
    %363 = arith.extui %362 : vector<128x32xi1> to vector<128x32xi32>
    %364 = arith.sitofp %363 : vector<128x32xi32> to vector<128x32xf32>
    %cst_238 = arith.constant dense<0.000000e+00> : vector<32x32xf32>
    %365 = tpu.matmul %213, %364, %cst_238 {dimension_numbers = #tpu.dot_dimension_numbers<[1], [0], [0], [1], [0, 0, 1, 1], [], []>} : vector<32x128xf32>, vector<128x32xf32>, vector<32x32xf32> -> vector<32x32xf32>
    %c13_239 = arith.constant 13 : index
    %c0_240 = arith.constant 0 : index
    %c0_241 = arith.constant 0 : index
    %366 = vector.load %arg7[%c13_239, %c0_240, %c0_241] : memref<16x64x32xf32, #tpu.memory_space<vmem>>, vector<1x64x32xf32>
    %367 = vector.shape_cast %366 : vector<1x64x32xf32> to vector<64x32xf32>
    %cst_242 = arith.constant dense<0.000000e+00> : vector<64x32xf32>
    %368 = tpu.matmul %367, %365, %cst_242 {dimension_numbers = #tpu.dot_dimension_numbers<[1], [0], [0], [1], [0, 0, 1, 1], [], []>} : vector<64x32xf32>, vector<32x32xf32>, vector<64x32xf32> -> vector<64x32xf32>
    %369 = arith.addf %358, %368 : vector<64x32xf32>
    %c14_243 = arith.constant 14 : index
    %c0_244 = arith.constant 0 : index
    %c0_245 = arith.constant 0 : index
    %370 = vector.load %arg6[%c14_243, %c0_244, %c0_245] : memref<16x1x32xi32, #tpu.memory_space<vmem>>, vector<1x1x32xi32>
    %371 = vector.shape_cast %370 : vector<1x1x32xi32> to vector<1x32xi32>
    %372 = vector.broadcast %371 : vector<1x32xi32> to vector<128x32xi32>
    %373 = arith.cmpi eq, %214, %372 : vector<128x32xi32>
    %374 = arith.extui %373 : vector<128x32xi1> to vector<128x32xi32>
    %375 = arith.sitofp %374 : vector<128x32xi32> to vector<128x32xf32>
    %cst_246 = arith.constant dense<0.000000e+00> : vector<32x32xf32>
    %376 = tpu.matmul %213, %375, %cst_246 {dimension_numbers = #tpu.dot_dimension_numbers<[1], [0], [0], [1], [0, 0, 1, 1], [], []>} : vector<32x128xf32>, vector<128x32xf32>, vector<32x32xf32> -> vector<32x32xf32>
    %c14_247 = arith.constant 14 : index
    %c0_248 = arith.constant 0 : index
    %c0_249 = arith.constant 0 : index
    %377 = vector.load %arg7[%c14_247, %c0_248, %c0_249] : memref<16x64x32xf32, #tpu.memory_space<vmem>>, vector<1x64x32xf32>
    %378 = vector.shape_cast %377 : vector<1x64x32xf32> to vector<64x32xf32>
    %cst_250 = arith.constant dense<0.000000e+00> : vector<64x32xf32>
    %379 = tpu.matmul %378, %376, %cst_250 {dimension_numbers = #tpu.dot_dimension_numbers<[1], [0], [0], [1], [0, 0, 1, 1], [], []>} : vector<64x32xf32>, vector<32x32xf32>, vector<64x32xf32> -> vector<64x32xf32>
    %380 = arith.addf %369, %379 : vector<64x32xf32>
    %c15_251 = arith.constant 15 : index
    %c0_252 = arith.constant 0 : index
    %c0_253 = arith.constant 0 : index
    %381 = vector.load %arg6[%c15_251, %c0_252, %c0_253] : memref<16x1x32xi32, #tpu.memory_space<vmem>>, vector<1x1x32xi32>
    %382 = vector.shape_cast %381 : vector<1x1x32xi32> to vector<1x32xi32>
    %383 = vector.broadcast %382 : vector<1x32xi32> to vector<128x32xi32>
    %384 = arith.cmpi eq, %214, %383 : vector<128x32xi32>
    %385 = arith.extui %384 : vector<128x32xi1> to vector<128x32xi32>
    %386 = arith.sitofp %385 : vector<128x32xi32> to vector<128x32xf32>
    %cst_254 = arith.constant dense<0.000000e+00> : vector<32x32xf32>
    %387 = tpu.matmul %213, %386, %cst_254 {dimension_numbers = #tpu.dot_dimension_numbers<[1], [0], [0], [1], [0, 0, 1, 1], [], []>} : vector<32x128xf32>, vector<128x32xf32>, vector<32x32xf32> -> vector<32x32xf32>
    %c15_255 = arith.constant 15 : index
    %c0_256 = arith.constant 0 : index
    %c0_257 = arith.constant 0 : index
    %388 = vector.load %arg7[%c15_255, %c0_256, %c0_257] : memref<16x64x32xf32, #tpu.memory_space<vmem>>, vector<1x64x32xf32>
    %389 = vector.shape_cast %388 : vector<1x64x32xf32> to vector<64x32xf32>
    %cst_258 = arith.constant dense<0.000000e+00> : vector<64x32xf32>
    %390 = tpu.matmul %389, %387, %cst_258 {dimension_numbers = #tpu.dot_dimension_numbers<[1], [0], [0], [1], [0, 0, 1, 1], [], []>} : vector<64x32xf32>, vector<32x32xf32>, vector<64x32xf32> -> vector<64x32xf32>
    %391 = arith.addf %380, %390 : vector<64x32xf32>
    %cst_259 = arith.constant dense<0.000000e+00> : vector<64xf32>
    %392 = vector.multi_reduction <add>, %391, %cst_259 [1] : vector<64x32xf32> to vector<64xf32>
    %393 = vector.shape_cast %392 : vector<64xf32> to vector<64x1xf32>
    %cst_260 = arith.constant 3.200000e+01 : f32
    %394 = vector.broadcast %cst_260 : f32 to vector<64x1xf32>
    %395 = arith.divf %393, %394 : vector<64x1xf32>
    %396 = arith.mulf %391, %391 : vector<64x32xf32>
    %cst_261 = arith.constant dense<0.000000e+00> : vector<64xf32>
    %397 = vector.multi_reduction <add>, %396, %cst_261 [1] : vector<64x32xf32> to vector<64xf32>
    %398 = vector.shape_cast %397 : vector<64xf32> to vector<64x1xf32>
    %cst_262 = arith.constant 3.200000e+01 : f32
    %399 = vector.broadcast %cst_262 : f32 to vector<64x1xf32>
    %400 = arith.divf %398, %399 : vector<64x1xf32>
    %401 = arith.mulf %395, %395 : vector<64x1xf32>
    %402 = arith.subf %400, %401 : vector<64x1xf32>
    %c0_263 = arith.constant 0 : index
    %c0_264 = arith.constant 0 : index
    %403 = vector.load %arg8[%c0_263, %c0_264] : memref<64x1xf32, #tpu.memory_space<vmem>>, vector<64x1xf32>
    %cst_265 = arith.constant 9.99999974E-6 : f32
    %404 = vector.broadcast %cst_265 : f32 to vector<64x1xf32>
    %405 = arith.addf %402, %404 : vector<64x1xf32>
    %406 = math.rsqrt %405 : vector<64x1xf32>
    %407 = arith.mulf %403, %406 : vector<64x1xf32>
    %c0_266 = arith.constant 0 : index
    %c0_267 = arith.constant 0 : index
    %408 = vector.load %arg9[%c0_266, %c0_267] : memref<64x1xf32, #tpu.memory_space<vmem>>, vector<64x1xf32>
    %409 = arith.mulf %395, %407 : vector<64x1xf32>
    %410 = arith.subf %408, %409 : vector<64x1xf32>
    %411 = vector.broadcast %407 : vector<64x1xf32> to vector<64x32xf32>
    %412 = arith.mulf %391, %411 : vector<64x32xf32>
    %413 = vector.broadcast %410 : vector<64x1xf32> to vector<64x32xf32>
    %414 = arith.addf %412, %413 : vector<64x32xf32>
    %cst_268 = arith.constant 0.000000e+00 : f32
    %415 = vector.broadcast %cst_268 : f32 to vector<64x32xf32>
    %416 = arith.cmpf ogt, %414, %415 : vector<64x32xf32>
    %cst_269 = arith.constant 2.000000e-01 : f32
    %417 = vector.broadcast %cst_269 : f32 to vector<64x32xf32>
    %418 = arith.mulf %417, %414 : vector<64x32xf32>
    %419 = arith.select %416, %414, %418 : vector<64x32xi1>, vector<64x32xf32>
    %c0_270 = arith.constant 0 : index
    %c0_271 = arith.constant 0 : index
    %420 = vector.load %arg10[%c0_270, %c0_271] : memref<64x16xf32, #tpu.memory_space<vmem>>, vector<64x16xf32>
    %421 = tpu.concatenate %420, %420 in 1 : vector<64x16xf32>, vector<64x16xf32> -> vector<64x32xf32>
    %422 = arith.mulf %419, %421 : vector<64x32xf32>
    %cst_272 = arith.constant dense<0.000000e+00> : vector<32xf32>
    %423 = vector.multi_reduction <add>, %422, %cst_272 [0] : vector<64x32xf32> to vector<32xf32>
    %424 = vector.shape_cast %423 : vector<32xf32> to vector<1x32xf32>
    %425 = tpu.iota {dimensions = array<i32: 0>} : vector<32x2xi32>
    %426 = tpu.iota {dimensions = array<i32: 1>} : vector<32x2xi32>
    %c16_i32 = arith.constant 16 : i32
    %427 = vector.broadcast %c16_i32 : i32 to vector<32x2xi32>
    %428 = arith.muli %426, %427 : vector<32x2xi32>
    %429 = arith.cmpi sge, %425, %428 : vector<32x2xi32>
    %c1_i32 = arith.constant 1 : i32
    %430 = vector.broadcast %c1_i32 : i32 to vector<32x2xi32>
    %431 = arith.addi %426, %430 : vector<32x2xi32>
    %c16_i32_273 = arith.constant 16 : i32
    %432 = vector.broadcast %c16_i32_273 : i32 to vector<32x2xi32>
    %433 = arith.muli %431, %432 : vector<32x2xi32>
    %434 = arith.cmpi slt, %425, %433 : vector<32x2xi32>
    %435 = arith.andi %429, %434 : vector<32x2xi1>
    %436 = arith.extui %435 : vector<32x2xi1> to vector<32x2xi32>
    %437 = arith.sitofp %436 : vector<32x2xi32> to vector<32x2xf32>
    %cst_274 = arith.constant dense<0.000000e+00> : vector<1x2xf32>
    %438 = tpu.matmul %424, %437, %cst_274 {dimension_numbers = #tpu.dot_dimension_numbers<[1], [0], [0], [1], [0, 0, 1, 1], [], []>} : vector<1x32xf32>, vector<32x2xf32>, vector<1x2xf32> -> vector<1x2xf32>
    %439 = arith.negf %438 : vector<1x2xf32>
    %440 = math.exp %439 : vector<1x2xf32>
    %cst_275 = arith.constant 1.000000e+00 : f32
    %441 = vector.broadcast %cst_275 : f32 to vector<1x2xf32>
    %442 = arith.addf %441, %440 : vector<1x2xf32>
    %443 = arith.divf %441, %442 : vector<1x2xf32>
    %c0_276 = arith.constant 0 : index
    %c0_277 = arith.constant 0 : index
    %444 = vector.load %arg11[%c0_276, %c0_277] : memref<1x2xf32, #tpu.memory_space<vmem>>, vector<1x2xf32>
    tpu.vector_store %arg11[%c0_276, %c0_277], %443 {strides = array<i32>} : memref<1x2xf32, #tpu.memory_space<vmem>>, vector<1x2xf32>,
    return
  }
}

</mosaic_0001>

<bundles_post_ra>
// kernel: _lambda_.1
= control target key start
LH: loop header
LB: loop body
LE: loop exit
PB: predicated region body
PF: predicated region fallthrough
CT: control target
= control target key end

     0   :  { %v26242_v3 = vlaneseq  ;;  %v26241_v8 = vmov 0.0   ;;  %vm26263_vm0 = vcmask 130048   ;;  %s26229_s0 = inlined_call_operand.vmem [shape: f32[16,512], index: 0, kind: input, shape index: {}]   ;;  %s26230_s1 = inlined_call_operand.vmem [shape: f32[16,16], index: 1, kind: input, shape index: {}]   ;;  %s26231_s2 = inlined_call_operand.vmem [shape: s32[16,1,128], index: 2, kind: input, shape index: {}]   ;;  %s26232_s3 = inlined_call_operand.vmem [shape: f32[16,32,16], index: 3, kind: input, shape index: {}]   ;;  %s26233_s4 = inlined_call_operand.vmem [shape: f32[32,1], index: 4, kind: input, shape index: {}]   ;;  %s26234_s5 = inlined_call_operand.vmem [shape: f32[32,1], index: 5, kind: input, shape index: {}]   ;;  %s26235_s6 = inlined_call_operand.vmem [shape: s32[16,1,32], index: 6, kind: input, shape index: {}]   ;;  %s26236_s7 = inlined_call_operand.vmem [shape: f32[16,64,32], index: 7, kind: input, shape index: {}]   ;;  %s26237_s8 = inlined_call_operand.vmem [shape: f32[64,1], index: 8, kind: input, shape index: {}]   ;;  %s26238_s9 = inlined_call_operand.vmem [shape: f32[64,1], index: 9, kind: input, shape index: {}]   ;;  %s26239_s10 = inlined_call_operand.vmem [shape: f32[64,16], index: 10, kind: input, shape index: {}]   ;;  %s26240_s11 = inlined_call_operand.hbm [shape: f32[1,2], index: 11, kind: output, shape index: {}]  }
   0x1   :  { %v42_v0 = vld [vmem:[%s26229_s0 + $0x8] sm:$0xff]  ;;  %v44_v2 = vld [vmem:[%s26229_s0 + $0x18] sm:$0xff]  ;;  %v41_v6 = vld [vmem:[%s26229_s0] sm:$0xff]  ;;  %120 = vmatprep.mubr.f32.mxu0 %v26241_v8  ;;  %197 = vmatprep.mubr.f32.mxu1 %v26241_v8 }
   0x2   :  { %v46_v1 = vld [vmem:[%s26229_s0 + $0x28] sm:$0xff]  ;;  %v48_v5 = vld [vmem:[%s26229_s0 + $0x38] sm:$0xff]  ;;  %v45_v7 = vld [vmem:[%s26229_s0 + $0x20] sm:$0xff]  ;;  %v20708_v13 = vshrl.u32 %v26242_v3, 7 }
   0x3   :  { %v18619_v4 = vpack.c.bf16 %v46_v1, %v42_v0  ;;  %v18623_v9 = vpack.c.bf16 %v48_v5, %v44_v2  ;;  %v18621_v10 = vpack.c.bf16 %v45_v7, %v41_v6  ;;  %v43_v11 = vld [vmem:[%s26229_s0 + $0x10] sm:$0xff]  ;;  %v20713_v15 = vld [vmem:[%s26231_s2] ss:$0 sm:$0xff] }
   0x4   :  { %v47_v12 = vld [vmem:[%s26229_s0 + $0x30] sm:$0xff]  ;;  %26440 = vst [vmem:[#allocation5_spill] sm:$0xff] %v20708_v13 }
   0x5   :  { %18620 = vmatprep.subr.bf16.mxu0 %v18619_v4  ;;  %v18625_v14 = vpack.c.bf16 %v47_v12, %v43_v11 }
   0x6   :  { %16 = vsyncpa [#allocation3], 0  ;;  %18624 = vmatprep.subr.bf16.mxu1 %v18623_v9  ;;  %18622 = vmatpush1.bf16.msra.mxu0 %v18621_v10  ;;  %v39_v16 = vld [vmem:[%s26230_s1] sm:$0xff]  ;;  %v20719_v17 = vadd.s32 128, %v20708_v13  ;;  %v20722_v18 = vadd.s32 136, %v20708_v13  ;;  %v20725_v19 = vadd.s32 384, %v20708_v13  ;;  %vm304_vm1 = vcmp.eq.s32.totalorder %v20708_v13, %v20713_v15 }
   0x7   :  { %v20728_v20 = vadd.s32 392, %v20708_v13  ;;  %18626 = vmatpush1.bf16.msra.mxu1 %v18625_v14  ;;  %v20731_v21 = vadd.s32 8, %v20708_v13  ;;  %v20736_v22 = vadd.s32 256, %v20708_v13  ;;  %v20739_v23 = vadd.s32 264, %v20708_v13  ;;  %v40_v25 = vld [vmem:[%s26230_s1 + $0x8] sm:$0xff]  ;;  %s20617_s13 = smov 16  }
   0x8   :  { %26441 = vst [vmem:[#allocation6_spill] sm:$0xff] %v20719_v17  ;;  %26442 = vst [vmem:[#allocation7_spill] sm:$0xff] %v20722_v18  ;;  %vm320_vm2 = vcmp.eq.s32.totalorder %v20719_v17, %v20713_v15  ;;  %vm321_vm3 = vcmp.eq.s32.totalorder %v20722_v18, %v20713_v15  ;;  %vm352_vm4 = vcmp.eq.s32.totalorder %v20725_v19, %v20713_v15  ;;  %v20757_v24 = vadd.s32 144, %v20708_v13 }
   0x9   :  { %26443 = vst [vmem:[#allocation8_spill] sm:$0xff] %v20725_v19  ;;  %26444 = vst [vmem:[#allocation9_spill] sm:$0xff] %v20728_v20  ;;  %vm353_vm5 = vcmp.eq.s32.totalorder %v20728_v20, %v20713_v15  ;;  %12683 = vmatmul.mubr.msk.f32.vlgmr.msra.gmra.mrb[0].mxu0 %vm26263_vm0, %v39_v16  ;;  %vm305_vm7 = vcmp.eq.s32.totalorder %v20731_v21, %v20713_v15  ;;  %vm336_vm8 = vcmp.eq.s32.totalorder %v20736_v22, %v20713_v15  ;;  %v26243_v30 = vmov 1.0|1.0  }
   0xa   :  { %26445 = vst [vmem:[#allocation10_spill] sm:$0xff] %v20731_v21  ;;  %26446 = vst [vmem:[#allocation11_spill] sm:$0xff] %v20739_v23  ;;  %vm337_vm9 = vcmp.eq.s32.totalorder %v20739_v23, %v20713_v15  ;;  %12685 = vmatmul.mubr.msk.f32.vlgmr.msra.gmra.mrb[0].mxu1 %vm26263_vm0, %v39_v16  ;;  %126 = vmatprep.mubr.f32.mxu0 %v26241_v8  ;;  %v20765_v26 = vadd.s32 152, %v20708_v13  ;;  %v20768_v27 = vadd.s32 400, %v20708_v13  ;;  %v20771_v28 = vadd.s32 408, %v20708_v13 }
   0xb   :  { %vm18627_vm6 = vmpackc.low %vm321_vm3, %vm320_vm2  ;;  %26447 = vst [vmem:[#allocation12_spill] sm:$0xff] %v20757_v24  ;;  %v20774_v29 = vadd.s32 16, %v20708_v13  ;;  %203 = vmatprep.mubr.f32.mxu1 %v26241_v8  ;;  %vm322_vm12 = vcmp.eq.s32.totalorder %v20757_v24, %v20713_v15  ;;  %v20787_v31 = vadd.s32 24, %v20708_v13  ;;  %v20790_v32 = vadd.s32 272, %v20708_v13 }
   0xc   :  { %vm18659_vm10 = vmpackc.low %vm353_vm5, %vm352_vm4  ;;  %26448 = vst [vmem:[#allocation13_spill] sm:$0xff] %v20765_v26  ;;  %18628 = vmatprep.subr.msk.bf16.mxu0 %vm18627_vm6, %v26243_v30  ;;  %v20793_v33 = vadd.s32 280, %v20708_v13  ;;  %vm323_vm14 = vcmp.eq.s32.totalorder %v20765_v26, %v20713_v15  ;;  %vm354_vm15 = vcmp.eq.s32.totalorder %v20768_v27, %v20713_v15  ;;  %v20810_v34 = vadd.s32 160, %v20708_v13 }
   0xd   :  { %26449 = vst [vmem:[#allocation14_spill] sm:$0xff] %v20774_v29  ;;  %vm18629_vm11 = vmpackc.low %vm305_vm7, %vm304_vm1  ;;  %18660 = vmatprep.subr.msk.bf16.mxu1 %vm18659_vm10, %v26243_v30  ;;  %vm355_vm1 = vcmp.eq.s32.totalorder %v20771_v28, %v20713_v15  ;;  %12684 = vmatmul.mubr.msk.f32.gmra.mrb[2].mxu0 %vm26263_vm0, %v40_v25  ;;  %vm306_vm3 = vcmp.eq.s32.totalorder %v20774_v29, %v20713_v15  ;;  %v20821_v35 = vadd.s32 168, %v20708_v13  ;;  %v20830_v36 = vadd.s32 416, %v20708_v13 }
   0xe   :  { %26450 = vst [vmem:[#allocation15_spill] sm:$0xff] %v20787_v31  ;;  %18630 = vmatpush3.bf16.msk.msra.mxu0 %vm18629_vm11, %v26243_v30  ;;  %vm18661_vm13 = vmpackc.low %vm337_vm9, %vm336_vm8  ;;  %vm307_vm4 = vcmp.eq.s32.totalorder %v20787_v31, %v20713_v15  ;;  %vm338_vm5 = vcmp.eq.s32.totalorder %v20790_v32, %v20713_v15  ;;  %12686 = vmatmul.mubr.msk.f32.gmra.mrb[2].mxu1 %vm26263_vm0, %v40_v25  ;;  %v20833_v37 = vadd.s32 424, %v20708_v13  ;;  %v20839_v38 = vadd.s32 32, %v20708_v13 }
   0xf   :  { %26451 = vst [vmem:[#allocation16_spill] sm:$0xff] %v20810_v34  ;;  %18662 = vmatpush3.bf16.msk.msra.mxu1 %vm18661_vm13, %v26243_v30  ;;  %vm18631_vm2 = vmpackc.low %vm323_vm14, %vm322_vm12  ;;  %vm339_vm7 = vcmp.eq.s32.totalorder %v20793_v33, %v20713_v15  ;;  %vm324_vm8 = vcmp.eq.s32.totalorder %v20810_v34, %v20713_v15  ;;  %vm325_vm10 = vcmp.eq.s32.totalorder %v20821_v35, %v20713_v15  ;;  %v20842_v39 = vadd.s32 40, %v20708_v13 }
  0x10   :  { %26452 = vst [vmem:[#allocation17_spill] sm:$0xff] %v20821_v35  ;;  %18632 = vmatprep.subr.msk.bf16.mxu0 %vm18631_vm2, %v26243_v30  ;;  %vm18663_vm6 = vmpackc.low %vm355_vm1, %vm354_vm15  ;;  %v20845_v40 = vadd.s32 288, %v20708_v13  ;;  %vm356_vm12 = vcmp.eq.s32.totalorder %v20830_v36, %v20713_v15  ;;  %vm357_vm13 = vcmp.eq.s32.totalorder %v20833_v37, %v20713_v15  ;;  %v20856_v41 = vadd.s32 296, %v20708_v13 }
  0x11   :  { %18664 = vmatprep.subr.msk.bf16.mxu1 %vm18663_vm6, %v26243_v30  ;;  %vm18633_vm9 = vmpackc.low %vm307_vm4, %vm306_vm3  ;;  %26453 = vst [vmem:[#allocation18_spill] sm:$0xff] %v20839_v38  ;;  %v20859_v42 = vadd.s32 176, %v20708_v13  ;;  %vm308_vm15 = vcmp.eq.s32.totalorder %v20839_v38, %v20713_v15  ;;  %vm309_vm1 = vcmp.eq.s32.totalorder %v20842_v39, %v20713_v15  ;;  %v20872_v43 = vadd.s32 184, %v20708_v13 }
  0x12   :  { %26454 = vst [vmem:[#allocation19_spill] sm:$0xff] %v20842_v39  ;;  %18634 = vmatpush3.bf16.msk.msra.mxu0 %vm18633_vm9, %v26243_v30  ;;  %vm18665_vm11 = vmpackc.low %vm339_vm7, %vm338_vm5  ;;  %vm340_vm2 = vcmp.eq.s32.totalorder %v20845_v40, %v20713_v15  ;;  %vm341_vm4 = vcmp.eq.s32.totalorder %v20856_v41, %v20713_v15  ;;  %v20880_v44 = vadd.s32 432, %v20708_v13  ;;  %v20883_v45 = vadd.s32 440, %v20708_v13 }
  0x13   :  { %26455 = vst [vmem:[#allocation20_spill] sm:$0xff] %v20859_v42  ;;  %18666 = vmatpush3.bf16.msk.msra.mxu1 %vm18665_vm11, %v26243_v30  ;;  %vm18635_vm14 = vmpackc.low %vm325_vm10, %vm324_vm8  ;;  %vm326_vm5 = vcmp.eq.s32.totalorder %v20859_v42, %v20713_v15  ;;  %vm327_vm7 = vcmp.eq.s32.totalorder %v20872_v43, %v20713_v15  ;;  %v20889_v46 = vadd.s32 48, %v20708_v13  ;;  %v20892_v47 = vadd.s32 56, %v20708_v13 }
  0x14   :  { %26456 = vst [vmem:[#allocation21_spill] sm:$0xff] %v20872_v43  ;;  %18636 = vmatprep.subr.msk.bf16.mxu0 %vm18635_vm14, %v26243_v30  ;;  %vm18667_vm3 = vmpackc.low %vm357_vm13, %vm356_vm12  ;;  %v20895_v48 = vadd.s32 304, %v20708_v13  ;;  %vm358_vm9 = vcmp.eq.s32.totalorder %v20880_v44, %v20713_v15  ;;  %vm359_vm10 = vcmp.eq.s32.totalorder %v20883_v45, %v20713_v15  ;;  %v20906_v49 = vadd.s32 312, %v20708_v13 }
  0x15   :  { %18668 = vmatprep.subr.msk.bf16.mxu1 %vm18667_vm3, %v26243_v30  ;;  %vm18637_vm6 = vmpackc.low %vm309_vm1, %vm308_vm15  ;;  %26457 = vst [vmem:[#allocation22_spill] sm:$0xff] %v20889_v46  ;;  %v20909_v50 = vadd.s32 192, %v20708_v13  ;;  %vm310_vm12 = vcmp.eq.s32.totalorder %v20889_v46, %v20713_v15  ;;  %vm311_vm13 = vcmp.eq.s32.totalorder %v20892_v47, %v20713_v15  ;;  %v20922_v51 = vadd.s32 200, %v20708_v13 }
  0x16   :  { %26458 = vst [vmem:[#allocation23_spill] sm:$0xff] %v20892_v47  ;;  %26459 = vst [vmem:[#allocation24_spill] sm:$0xff] %v20895_v48  ;;  %18638 = vmatpush3.bf16.msk.msra.mxu0 %vm18637_vm6, %v26243_v30  ;;  %vm342_vm14 = vcmp.eq.s32.totalorder %v20895_v48, %v20713_v15  ;;  %vm343_vm1 = vcmp.eq.s32.totalorder %v20906_v49, %v20713_v15  ;;  %v20930_v52 = vadd.s32 448, %v20708_v13  ;;  %v20933_v53 = vadd.s32 456, %v20708_v13 }
  0x17   :  { %vm18669_vm8 = vmpackc.low %vm341_vm4, %vm340_vm2  ;;  %26460 = vst [vmem:[#allocation25_spill] sm:$0xff] %v20906_v49  ;;  %vm328_vm2 = vcmp.eq.s32.totalorder %v20909_v50, %v20713_v15  ;;  %vm329_vm4 = vcmp.eq.s32.totalorder %v20922_v51, %v20713_v15  ;;  %v20939_v54 = vadd.s32 64, %v20708_v13  ;;  %v20942_v55 = vadd.s32 72, %v20708_v13 }
  0x18   :  { %26461 = vst [vmem:[#allocation26_spill] sm:$0xff] %v20909_v50  ;;  %18670 = vmatpush3.bf16.msk.msra.mxu1 %vm18669_vm8, %v26243_v30  ;;  %vm18639_vm11 = vmpackc.low %vm327_vm7, %vm326_vm5  ;;  %v20945_v56 = vadd.s32 320, %v20708_v13  ;;  %vm360_vm6 = vcmp.eq.s32.totalorder %v20930_v52, %v20713_v15  ;;  %vm361_vm7 = vcmp.eq.s32.totalorder %v20933_v53, %v20713_v15  ;;  %v20956_v57 = vadd.s32 328, %v20708_v13 }
  0x19   :  { %26462 = vst [vmem:[#allocation27_spill] sm:$0xff] %v20922_v51  ;;  %18640 = vmatprep.subr.msk.bf16.mxu0 %vm18639_vm11, %v26243_v30  ;;  %vm18671_vm15 = vmpackc.low %vm359_vm10, %vm358_vm9  ;;  %v20959_v58 = vadd.s32 208, %v20708_v13  ;;  %vm312_vm9 = vcmp.eq.s32.totalorder %v20939_v54, %v20713_v15  ;;  %vm313_vm10 = vcmp.eq.s32.totalorder %v20942_v55, %v20713_v15  ;;  %v20972_v59 = vadd.s32 216, %v20708_v13 }
  0x1a   :  { %26463 = vst [vmem:[#allocation28_spill] sm:$0xff] %v20930_v52  ;;  %26464 = vst [vmem:[#allocation29_spill] sm:$0xff] %v20933_v53  ;;  %18672 = vmatprep.subr.msk.bf16.mxu1 %vm18671_vm15, %v26243_v30  ;;  %vm344_vm11 = vcmp.eq.s32.totalorder %v20945_v56, %v20713_v15  ;;  %v20980_v60 = vadd.s32 464, %v20708_v13  ;;  %v20983_v61 = vadd.s32 472, %v20708_v13  ;;  %v20989_v62 = vadd.s32 80, %v20708_v13 }
  0x1b   :  { %vm18641_vm3 = vmpackc.low %vm311_vm13, %vm310_vm12  ;;  %26465 = vst [vmem:[#allocation30_spill] sm:$0xff] %v20939_v54  ;;  %vm345_vm13 = vcmp.eq.s32.totalorder %v20956_v57, %v20713_v15  ;;  %v20992_v63 = vadd.s32 88, %v20708_v13  ;;  %v20995_v0 = vadd.s32 336, %v20708_v13  ;;  %v21006_v1 = vadd.s32 344, %v20708_v13 }
  0x1c   :  { %26466 = vst [vmem:[#allocation31_spill] sm:$0xff] %v20942_v55  ;;  %26467 = vst [vmem:[#allocation32_spill] sm:$0xff] %v20945_v56  ;;  %18642 = vmatpush3.bf16.msk.msra.mxu0 %vm18641_vm3, %v26243_v30  ;;  %vm362_vm3 = vcmp.eq.s32.totalorder %v20980_v60, %v20713_v15  ;;  %v21009_v2 = vadd.s32 224, %v20708_v13  ;;  %v21022_v4 = vadd.s32 232, %v20708_v13  ;;  %v21030_v5 = vadd.s32 480, %v20708_v13 }
  0x1d   :  { %vm18673_vm5 = vmpackc.low %vm343_vm1, %vm342_vm14  ;;  %26468 = vst [vmem:[#allocation33_spill] sm:$0xff] %v20956_v57  ;;  %vm330_vm14 = vcmp.eq.s32.totalorder %v20959_v58, %v20713_v15  ;;  %vm331_vm1 = vcmp.eq.s32.totalorder %v20972_v59, %v20713_v15  ;;  %v21033_v6 = vadd.s32 488, %v20708_v13  ;;  %v21039_v7 = vadd.s32 96, %v20708_v13 }
  0x1e   :  { %26469 = vst [vmem:[#allocation34_spill] sm:$0xff] %v20959_v58  ;;  %18674 = vmatpush3.bf16.msk.msra.mxu1 %vm18673_vm5, %v26243_v30  ;;  %vm18643_vm8 = vmpackc.low %vm329_vm4, %vm328_vm2  ;;  %vm363_vm4 = vcmp.eq.s32.totalorder %v20983_v61, %v20713_v15  ;;  %v21042_v9 = vadd.s32 104, %v20708_v13  ;;  %v21045_v10 = vadd.s32 352, %v20708_v13  ;;  %v21056_v11 = vadd.s32 360, %v20708_v13 }
  0x1f   :  { %26470 = vst [vmem:[#allocation35_spill] sm:$0xff] %v20972_v59  ;;  %18644 = vmatprep.subr.msk.bf16.mxu0 %vm18643_vm8, %v26243_v30  ;;  %vm18675_vm12 = vmpackc.low %vm361_vm7, %vm360_vm6  ;;  %vm314_vm6 = vcmp.eq.s32.totalorder %v20989_v62, %v20713_v15  ;;  %vm315_vm7 = vcmp.eq.s32.totalorder %v20992_v63, %v20713_v15  ;;  %vm346_vm8 = vcmp.eq.s32.totalorder %v20995_v0, %v20713_v15  ;;  %v21075_v12 = vadd.s32 240, %v20708_v13 }
  0x20   :  { %26471 = vst [vmem:[#allocation36_spill] sm:$0xff] %v20980_v60  ;;  %26472 = vst [vmem:[#allocation37_spill] sm:$0xff] %v20983_v61  ;;  %18676 = vmatprep.subr.msk.bf16.mxu1 %vm18675_vm12, %v26243_v30  ;;  %v21078_v14 = vadd.s32 248, %v20708_v13  ;;  %v21081_v16 = vadd.s32 496, %v20708_v13  ;;  %v21084_v25 = vadd.s32 504, %v20708_v13  ;;  %v21087_v8 = vadd.s32 112, %v20708_v13 }
  0x21   :  { %vm18645_vm15 = vmpackc.low %vm313_vm10, %vm312_vm9  ;;  %26473 = vst [vmem:[#allocation38_spill] sm:$0xff] %v20989_v62  ;;  %vm347_vm10 = vcmp.eq.s32.totalorder %v21006_v1, %v20713_v15  ;;  %v21090_v3 = vadd.s32 120, %v20708_v13 }
  0x22   :  { %26474 = vst [vmem:[#allocation39_spill] sm:$0xff] %v20992_v63  ;;  %26475 = vst [vmem:[#allocation40_spill] sm:$0xff] %v20995_v0  ;;  %18646 = vmatpush3.bf16.msk.msra.mxu0 %vm18645_vm15, %v26243_v30  ;;  %vm364_vm15 = vcmp.eq.s32.totalorder %v21030_v5, %v20713_v15 }
  0x23   :  { %vm18677_vm2 = vmpackc.low %vm345_vm13, %vm344_vm11  ;;  %26476 = vst [vmem:[#allocation41_spill] sm:$0xff] %v21006_v1  ;;  %vm332_vm11 = vcmp.eq.s32.totalorder %v21009_v2, %v20713_v15  ;;  %vm333_vm13 = vcmp.eq.s32.totalorder %v21022_v4, %v20713_v15 }
  0x24   :  { %26477 = vst [vmem:[#allocation42_spill] sm:$0xff] %v21009_v2  ;;  %18678 = vmatpush3.bf16.msk.msra.mxu1 %vm18677_vm2, %v26243_v30  ;;  %vm18647_vm5 = vmpackc.low %vm331_vm1, %vm330_vm14  ;;  %vm365_vm1 = vcmp.eq.s32.totalorder %v21033_v6, %v20713_v15 }
  0x25   :  { %26478 = vst [vmem:[#allocation43_spill] sm:$0xff] %v21022_v4  ;;  %18648 = vmatprep.subr.msk.bf16.mxu0 %vm18647_vm5, %v26243_v30  ;;  %vm18679_vm9 = vmpackc.low %vm363_vm4, %vm362_vm3  ;;  %vm316_vm3 = vcmp.eq.s32.totalorder %v21039_v7, %v20713_v15  ;;  %vm317_vm4 = vcmp.eq.s32.totalorder %v21042_v9, %v20713_v15  ;;  %vm348_vm5 = vcmp.eq.s32.totalorder %v21045_v10, %v20713_v15 }
  0x26   :  { %26479 = vst [vmem:[#allocation44_spill] sm:$0xff] %v21030_v5  ;;  %26480 = vst [vmem:[#allocation45_spill] sm:$0xff] %v21033_v6  ;;  %18680 = vmatprep.subr.msk.bf16.mxu1 %vm18679_vm9, %v26243_v30 }
  0x27   :  { %vm18649_vm12 = vmpackc.low %vm315_vm7, %vm314_vm6  ;;  %26481 = vst [vmem:[#allocation46_spill] sm:$0xff] %v21039_v7  ;;  %vm349_vm7 = vcmp.eq.s32.totalorder %v21056_v11, %v20713_v15 }
  0x28   :  { %26482 = vst [vmem:[#allocation47_spill] sm:$0xff] %v21042_v9  ;;  %26483 = vst [vmem:[#allocation48_spill] sm:$0xff] %v21045_v10  ;;  %18650 = vmatpush3.bf16.msk.msra.mxu0 %vm18649_vm12, %v26243_v30  ;;  %vm366_vm12 = vcmp.eq.s32.totalorder %v21081_v16, %v20713_v15 }
  0x29   :  { %vm18681_vm14 = vmpackc.low %vm347_vm10, %vm346_vm8  ;;  %26484 = vst [vmem:[#allocation49_spill] sm:$0xff] %v21056_v11  ;;  %v21096_v11 = vadd.s32 376, %v20708_v13  ;;  %vm334_vm10 = vcmp.eq.s32.totalorder %v21075_v12, %v20713_v15 }
  0x2a   :  { %18682 = vmatpush3.bf16.msk.msra.mxu1 %vm18681_vm14, %v26243_v30  ;;  %vm18651_vm2 = vmpackc.low %vm333_vm13, %vm332_vm11  ;;  %26485 = vst [vmem:[#allocation50_spill] sm:$0xff] %v21075_v12  ;;  %vm335_vm11 = vcmp.eq.s32.totalorder %v21078_v14, %v20713_v15  ;;  %vm367_vm13 = vcmp.eq.s32.totalorder %v21084_v25, %v20713_v15 }
  0x2b   :  { %18652 = vmatprep.subr.msk.bf16.mxu0 %vm18651_vm2, %v26243_v30  ;;  %vm18683_vm6 = vmpackc.low %vm365_vm1, %vm364_vm15  ;;  %26486 = vst [vmem:[#allocation51_spill] sm:$0xff] %v21078_v14  ;;  %vm318_vm15 = vcmp.eq.s32.totalorder %v21087_v8, %v20713_v15  ;;  %vm319_vm1 = vcmp.eq.s32.totalorder %v21090_v3, %v20713_v15  ;;  %v26493_v14 = vmov 1.0|1.0  }
  0x2c   :  { %18684 = vmatprep.subr.msk.bf16.mxu1 %vm18683_vm6, %v26243_v30  ;;  %vm18653_vm8 = vmpackc.low %vm317_vm4, %vm316_vm3  ;;  %26487 = vst [vmem:[#allocation52_spill] sm:$0xff] %v21081_v16  ;;  %vm351_vm3 = vcmp.eq.s32.totalorder %v21096_v11, %v20713_v15 }
  0x2d   :  { %18654 = vmatpush3.bf16.msk.msra.mxu0 %vm18653_vm8, %v26243_v30  ;;  %vm18685_vm9 = vmpackc.low %vm349_vm7, %vm348_vm5  ;;  %26488 = vst [vmem:[#allocation53_spill] sm:$0xff] %v21084_v25  ;;  %v21119_v25 = vld [vmem:[%s26231_s2 + $0x1] ss:$0 sm:$0xff] }
  0x2e   :  { %18686 = vmatpush3.bf16.msk.msra.mxu1 %vm18685_vm9, %v26243_v30  ;;  %26489 = vst [vmem:[#allocation54_spill] sm:$0xff] %v21087_v8  ;;  %26490 = vst [vmem:[#allocation55_spill] sm:$0xff] %v21090_v3  ;;  %v21093_v30 = vadd.s32 368, %v20708_v13  ;;  %vm672_vm7 = vcmp.eq.s32.totalorder %v20719_v17, %v21119_v25  ;;  %vm673_vm8 = vcmp.eq.s32.totalorder %v20722_v18, %v21119_v25 }
  0x2f   :  { %26492 = vst [vmem:[#allocation57_spill] sm:$0xff] %v21096_v11  ;;  %vm18655_vm14 = vmpackc.low %vm335_vm11, %vm334_vm10  ;;  %vm704_vm9 = vcmp.eq.s32.totalorder %v20725_v19, %v21119_v25  ;;  %vm705_vm10 = vcmp.eq.s32.totalorder %v20728_v20, %v21119_v25 }
  0x30   :  { %26491 = vst [vmem:[#allocation56_spill] sm:$0xff] %v21093_v30  ;;  %vm350_vm2 = vcmp.eq.s32.totalorder %v21093_v30, %v20713_v15  ;;  %18656 = vmatprep.subr.msk.bf16.mxu0 %vm18655_vm14, %v26493_v14  ;;  %vm18687_vm4 = vmpackc.low %vm367_vm13, %vm366_vm12  ;;  %vm656_vm13 = vcmp.eq.s32.totalorder %v20708_v13, %v21119_v25  ;;  %vm657_vm14 = vcmp.eq.s32.totalorder %v20731_v21, %v21119_v25 }
  0x31   :  { %18688 = vmatprep.subr.msk.bf16.mxu1 %vm18687_vm4, %v26493_v14  ;;  %vm18657_vm5 = vmpackc.low %vm319_vm1, %vm318_vm15  ;;  %vm688_vm15 = vcmp.eq.s32.totalorder %v20736_v22, %v21119_v25  ;;  %vm689_vm1 = vcmp.eq.s32.totalorder %v20739_v23, %v21119_v25  ;;  %vm706_vm4 = vcmp.eq.s32.totalorder %v20768_v27, %v21119_v25 }
  0x32   :  { %18658 = vmatpush3.bf16.msk.msra.mxu0 %vm18657_vm5, %v26493_v14  ;;  %vm18689_vm6 = vmpackc.low %vm351_vm3, %vm350_vm2  ;;  %vm674_vm2 = vcmp.eq.s32.totalorder %v20757_v24, %v21119_v25  ;;  %vm675_vm3 = vcmp.eq.s32.totalorder %v20765_v26, %v21119_v25  ;;  %vm707_vm5 = vcmp.eq.s32.totalorder %v20771_v28, %v21119_v25  ;;  %v21413_v26 = vld [vmem:[%s26231_s2 + $0x2] ss:$0 sm:$0xff] }
  0x33   :  { %18690 = vmatpush3.bf16.msk.msra.mxu1 %vm18689_vm6, %v26493_v14  ;;  %vm18691_vm11 = vmpackc.low %vm673_vm8, %vm672_vm7 }
  0x34   :  { %18692 = vmatprep.subr.msk.bf16.mxu0 %vm18691_vm11, %v26493_v14  ;;  %vm18723_vm12 = vmpackc.low %vm705_vm10, %vm704_vm9  ;;  %vm691_vm11 = vcmp.eq.s32.totalorder %v20793_v33, %v21119_v25 }
  0x35   :  { %18724 = vmatprep.subr.msk.bf16.mxu1 %vm18723_vm12, %v26493_v14  ;;  %vm676_vm12 = vcmp.eq.s32.totalorder %v20810_v34, %v21119_v25  ;;  %vm21169_vm10 = vmpackc.low %vm657_vm14, %vm656_vm13  ;;  %vm708_vm13 = vcmp.eq.s32.totalorder %v20830_v36, %v21119_v25  ;;  %v26532_v23 = vld [vmem:[#allocation54_spill] sm:$0xff] }
  0xdc   :  { %v122_v15 = vpop.f32.mrb[0].mxu0 }
  0xdd   :  { %v218_v20 = vmul.f32 0.2, %v122_v15  ;;  %v199_v19 = vpop.f32.mrb[0].mxu1  ;;  %v124_v18 = vpop.f32.mrb[1].mxu0  ;;  %vm210_vm8 = vcmp.gt.f32.partialorder %v122_v15, 0.0 }
  0xde   :  { %vm211_vm9 = vcmp.gt.f32.partialorder %v124_v18, 0.0  ;;  %v219_v17 = vmul.f32 0.2, %v124_v18  ;;  %v220_v11 = vmul.f32 0.2, %v199_v19  ;;  %v201_v30 = vpop.f32.mrb[1].mxu1 }
  0xdf   :  { %vm212_vm6 = vcmp.gt.f32.partialorder %v199_v19, 0.0  ;;  %vm213_vm7 = vcmp.gt.f32.partialorder %v201_v30, 0.0  ;;  %v221_v8 = vmul.f32 0.2, %v201_v30  ;;  %v21174_v10 = vsel %vm210_vm8, %v122_v15, %v218_v20 }
  0xe0   :  { %v21161_v3 = vsel %vm211_vm9, %v124_v18, %v219_v17  ;;  %v128_v16 = vpop.f32.mrb[2].mxu0  ;;  %26497 = vst [vmem:[#allocation59_spill] sm:$0xff] %v21174_v10  ;;  %vm21183_vm9 = vmpackc.low %vm675_vm3, %vm674_vm2  ;;  %v21203_v24 = vsel %vm212_vm6, %v199_v19, %v220_v11  ;;  %vm26507_vm6 = vcmp.eq.s32.totalorder %v20787_v31, %v21119_v25  ;;  %v26529_v11 = vld [vmem:[#allocation51_spill] sm:$0xff] }
  0xe1   :  { %26494 = vst [vmem:[#allocation58_spill] sm:$0xff] %v21161_v3  ;;  %vm214_vm0 = vcmp.gt.f32.partialorder %v128_v16, 0.0  ;;  %v222_v9 = vmul.f32 0.2, %v128_v16  ;;  %v205_v17 = vpop.f32.mrb[2].mxu1  ;;  %v130_v18 = vpop.f32.mrb[3].mxu0  ;;  %560 = vmatprep.mubr.f32.mxu0 %v21161_v3  ;;  %v21189_v20 = vsel %vm213_vm7, %v201_v30, %v221_v8  ;;  %vm21198_vm2 = vmpackc.low %vm689_vm1, %vm688_vm15  ;;  %vm26506_vm1 = vcmp.eq.s32.totalorder %v20774_v29, %v21119_v25 }
  0xe2   :  { %vm216_vm14 = vcmp.gt.f32.partialorder %v205_v17, 0.0  ;;  %v224_v15 = vmul.f32 0.2, %v205_v17  ;;  %vm215_vm8 = vcmp.gt.f32.partialorder %v130_v18, 0.0  ;;  %v207_v13 = vpop.f32.mrb[3].mxu1  ;;  %561 = vmatmul.mubr.f32.vlgmr.msra.gmra.mrb[4].mxu0 %v21174_v10  ;;  %26502 = vst [vmem:[#allocation60_spill] sm:$0xff] %v21203_v24  ;;  %635 = vmatprep.mubr.f32.mxu1 %v21189_v20  ;;  %vm21215_vm15 = vmpackc.low %vm707_vm5, %vm706_vm4  ;;  %vm660_vm4 = vcmp.eq.s32.totalorder %v20839_v38, %v21119_v25 }
  0xe3   :  { %v223_v8 = vmul.f32 0.2, %v130_v18  ;;  %vm217_vm3 = vcmp.gt.f32.partialorder %v207_v13, 0.0  ;;  %v225_v30 = vmul.f32 0.2, %v207_v13  ;;  %18694 = vmatpush3.bf16.msk.msra.mxu0 %vm21169_vm10, %v26493_v14  ;;  %v21220_v19 = vsel %vm214_vm0, %v128_v16, %v222_v9  ;;  %636 = vmatmul.mubr.f32.vlgmr.msra.gmra.mrb[4].mxu1 %v21203_v24  ;;  %vm21232_vm7 = vmpackc.low %vm26507_vm6, %vm26506_vm1  ;;  %v26530_v16 = vld [vmem:[#allocation52_spill] sm:$0xff] }
  0xe4   :  { %26505 = vst [vmem:[#allocation61_spill] sm:$0xff] %v21220_v19  ;;  %18696 = vmatprep.subr.msk.bf16.mxu0 %vm21183_vm9, %v26493_v14  ;;  %vm709_vm0 = vcmp.eq.s32.totalorder %v20833_v37, %v21119_v25  ;;  %v21241_v9 = vsel %vm216_vm14, %v205_v17, %v224_v15  ;;  %18726 = vmatpush3.bf16.msk.msra.mxu1 %vm21198_vm2, %v26493_v14  ;;  %v26526_v15 = vld [vmem:[#allocation48_spill] sm:$0xff]  ;;  %v26533_v17 = vld [vmem:[#allocation55_spill] sm:$0xff] }
  0xe5   :  { %26510 = vst [vmem:[#allocation62_spill] sm:$0xff] %v21241_v9  ;;  %v21244_v21 = vsel %vm215_vm8, %v130_v18, %v223_v8  ;;  %v21246_v12 = vsel %vm217_vm3, %v207_v13, %v225_v30  ;;  %vm26513_vm5 = vcmp.eq.s32.totalorder %v20790_v32, %v21119_v25  ;;  %vm661_vm9 = vcmp.eq.s32.totalorder %v20842_v39, %v21119_v25  ;;  %v26525_v18 = vld [vmem:[#allocation47_spill] sm:$0xff]  ;;  %v26527_v8 = vld [vmem:[#allocation49_spill] sm:$0xff]  ;;  %v26528_v30 = vld [vmem:[#allocation50_spill] sm:$0xff] }
  0xe6   :  { %26511 = vst [vmem:[#allocation63_spill] sm:$0xff] %v21244_v21  ;;  %26512 = vst [vmem:[#allocation64_spill] sm:$0xff] %v21246_v12  ;;  %565 = vmatprep.mubr.f32.mxu0 %v21244_v21  ;;  %640 = vmatprep.mubr.f32.mxu1 %v21246_v12  ;;  %vm26516_vm14 = vcmp.eq.s32.totalorder %v20821_v35, %v21119_v25  ;;  %vm693_vm2 = vcmp.eq.s32.totalorder %v20856_v41, %v21119_v25  ;;  %v26531_v13 = vld [vmem:[#allocation53_spill] sm:$0xff] }
  0xe7   :  { %vm21257_vm10 = vmpackc.low %vm691_vm11, %vm26513_vm5  ;;  %vm692_vm11 = vcmp.eq.s32.totalorder %v20845_v40, %v21119_v25  ;;  %18728 = vmatprep.subr.msk.bf16.mxu1 %vm21215_vm15, %v26493_v14  ;;  %566 = vmatmul.mubr.f32.gmra.mrb[6].mxu0 %v21220_v19  ;;  %vm678_vm3 = vcmp.eq.s32.totalorder %v20859_v42, %v21119_v25  ;;  %vm679_vm1 = vcmp.eq.s32.totalorder %v20872_v43, %v21119_v25 }
  0xe8   :  { %vm21271_vm8 = vmpackc.low %vm26516_vm14, %vm676_vm12  ;;  %641 = vmatmul.mubr.f32.gmra.mrb[6].mxu1 %v21241_v9  ;;  %18698 = vmatpush3.bf16.msk.msra.mxu0 %vm21232_vm7, %v26493_v14  ;;  %vm711_vm6 = vcmp.eq.s32.totalorder %v20883_v45, %v21119_v25 }
  0xe9   :  { %vm21289_vm12 = vmpackc.low %vm709_vm0, %vm708_vm13  ;;  %vm710_vm13 = vcmp.eq.s32.totalorder %v20880_v44, %v21119_v25  ;;  %18730 = vmatpush3.bf16.msk.msra.mxu1 %vm21257_vm10, %v26493_v14  ;;  %912 = vmatprep.mubr.f32.mxu0 %v21161_v3  ;;  %vm662_vm0 = vcmp.eq.s32.totalorder %v20889_v46, %v21119_v25  ;;  %vm694_vm10 = vcmp.eq.s32.totalorder %v20895_v48, %v21119_v25 }
  0xea   :  { %vm21304_vm15 = vmpackc.low %vm661_vm9, %vm660_vm4  ;;  %vm663_vm4 = vcmp.eq.s32.totalorder %v20892_v47, %v21119_v25  ;;  %987 = vmatprep.mubr.f32.mxu1 %v21189_v20  ;;  %18700 = vmatprep.subr.msk.bf16.mxu0 %vm21271_vm8, %v26493_v14  ;;  %vm695_vm9 = vcmp.eq.s32.totalorder %v20906_v49, %v21119_v25 }
  0xeb   :  { %vm21316_vm7 = vmpackc.low %vm693_vm2, %vm692_vm11  ;;  %18732 = vmatprep.subr.msk.bf16.mxu1 %vm21289_vm12, %v26493_v14  ;;  %vm680_vm11 = vcmp.eq.s32.totalorder %v20909_v50, %v21119_v25  ;;  %vm681_vm2 = vcmp.eq.s32.totalorder %v20922_v51, %v21119_v25 }
  0xec   :  { %vm18703_vm5 = vmpackc.low %vm679_vm1, %vm678_vm3  ;;  %18702 = vmatpush3.bf16.msk.msra.mxu0 %vm21304_vm15, %v26493_v14  ;;  %vm712_vm3 = vcmp.eq.s32.totalorder %v20930_v52, %v21119_v25  ;;  %vm713_vm1 = vcmp.eq.s32.totalorder %v20933_v53, %v21119_v25  ;;  %vm665_vm15 = vcmp.eq.s32.totalorder %v20942_v55, %v21119_v25 }
  0xed   :  { %vm18735_vm14 = vmpackc.low %vm711_vm6, %vm710_vm13  ;;  %18734 = vmatpush3.bf16.msk.msra.mxu1 %vm21316_vm7, %v26493_v14  ;;  %18704 = vmatprep.subr.msk.bf16.mxu0 %vm18703_vm5, %v26493_v14  ;;  %vm664_vm13 = vcmp.eq.s32.totalorder %v20939_v54, %v21119_v25  ;;  %vm682_vm5 = vcmp.eq.s32.totalorder %v20959_v58, %v21119_v25 }
  0xee   :  { %vm18705_vm8 = vmpackc.low %vm663_vm4, %vm662_vm0  ;;  %18736 = vmatprep.subr.msk.bf16.mxu1 %vm18735_vm14, %v26493_v14  ;;  %vm696_vm0 = vcmp.eq.s32.totalorder %v20945_v56, %v21119_v25  ;;  %vm697_vm4 = vcmp.eq.s32.totalorder %v20956_v57, %v21119_v25  ;;  %vm714_vm14 = vcmp.eq.s32.totalorder %v20980_v60, %v21119_v25 }
  0xef   :  { %vm18737_vm12 = vmpackc.low %vm695_vm9, %vm694_vm10  ;;  %vm683_vm10 = vcmp.eq.s32.totalorder %v20972_v59, %v21119_v25 }
  0xf0   :  { %vm18707_vm6 = vmpackc.low %vm681_vm2, %vm680_vm11  ;;  %18706 = vmatpush3.bf16.msk.msra.mxu0 %vm18705_vm8, %v26493_v14  ;;  %vm715_vm11 = vcmp.eq.s32.totalorder %v20983_v61, %v21119_v25 }
  0xf1   :  { %vm18739_vm7 = vmpackc.low %vm713_vm1, %vm712_vm3  ;;  %18738 = vmatpush3.bf16.msk.msra.mxu1 %vm18737_vm12, %v26493_v14  ;;  %18708 = vmatprep.subr.msk.bf16.mxu0 %vm18707_vm6, %v26493_v14  ;;  %vm666_vm3 = vcmp.eq.s32.totalorder %v20989_v62, %v21119_v25  ;;  %vm667_vm1 = vcmp.eq.s32.totalorder %v20992_v63, %v21119_v25  ;;  %vm684_vm6 = vcmp.eq.s32.totalorder %v21009_v2, %v21119_v25 }
  0xf2   :  { %vm18709_vm9 = vmpackc.low %vm665_vm15, %vm664_vm13  ;;  %18740 = vmatprep.subr.msk.bf16.mxu1 %vm18739_vm7, %v26493_v14  ;;  %vm698_vm13 = vcmp.eq.s32.totalorder %v20995_v0, %v21119_v25  ;;  %vm699_vm15 = vcmp.eq.s32.totalorder %v21006_v1, %v21119_v25  ;;  %vm716_vm7 = vcmp.eq.s32.totalorder %v21030_v5, %v21119_v25 }
  0xf3   :  { %vm18741_vm2 = vmpackc.low %vm697_vm4, %vm696_vm0  ;;  %vm685_vm0 = vcmp.eq.s32.totalorder %v21022_v4, %v21119_v25 }
  0xf4   :  { %vm18711_vm8 = vmpackc.low %vm683_vm10, %vm682_vm5  ;;  %18710 = vmatpush3.bf16.msk.msra.mxu0 %vm18709_vm9, %v26493_v14  ;;  %vm717_vm5 = vcmp.eq.s32.totalorder %v21033_v6, %v21119_v25  ;;  %v26541_v6 = vld [vmem:[#allocation13_spill] sm:$0xff] }
  0xf5   :  { %vm18743_vm12 = vmpackc.low %vm715_vm11, %vm714_vm14  ;;  %18742 = vmatpush3.bf16.msk.msra.mxu1 %vm18741_vm2, %v26493_v14  ;;  %18712 = vmatprep.subr.msk.bf16.mxu0 %vm18711_vm8, %v26493_v14  ;;  %vm668_vm14 = vcmp.eq.s32.totalorder %v21039_v7, %v21119_v25  ;;  %vm669_vm11 = vcmp.eq.s32.totalorder %v26525_v18, %v21119_v25  ;;  %vm686_vm8 = vcmp.eq.s32.totalorder %v26528_v30, %v21119_v25 }
  0xf6   :  { %vm18713_vm4 = vmpackc.low %vm667_vm1, %vm666_vm3  ;;  %18744 = vmatprep.subr.msk.bf16.mxu1 %vm18743_vm12, %v26493_v14  ;;  %vm700_vm3 = vcmp.eq.s32.totalorder %v26526_v15, %v21119_v25  ;;  %vm701_vm1 = vcmp.eq.s32.totalorder %v26527_v8, %v21119_v25  ;;  %vm718_vm12 = vcmp.eq.s32.totalorder %v26530_v16, %v21119_v25  ;;  %v26535_v16 = vld [vmem:[#allocation57_spill] sm:$0xff]  ;;  %v26536_v8 = vld [vmem:[#allocation6_spill] sm:$0xff] }
  0xf7   :  { %vm18745_vm10 = vmpackc.low %vm699_vm15, %vm698_vm13  ;;  %vm687_vm13 = vcmp.eq.s32.totalorder %v26529_v11, %v21119_v25  ;;  %v26537_v15 = vld [vmem:[#allocation7_spill] sm:$0xff] }
  0xf8   :  { %vm18715_vm9 = vmpackc.low %vm685_vm0, %vm684_vm6  ;;  %18714 = vmatpush3.bf16.msk.msra.mxu0 %vm18713_vm4, %v26493_v14  ;;  %vm719_vm6 = vcmp.eq.s32.totalorder %v26531_v13, %v21119_v25  ;;  %v26534_v13 = vld [vmem:[#allocation56_spill] sm:$0xff] }
  0xf9   :  { %vm18747_vm2 = vmpackc.low %vm717_vm5, %vm716_vm7  ;;  %18746 = vmatpush3.bf16.msk.msra.mxu1 %vm18745_vm10, %v26493_v14  ;;  %18716 = vmatprep.subr.msk.bf16.mxu0 %vm18715_vm9, %v26493_v14  ;;  %vm670_vm7 = vcmp.eq.s32.totalorder %v26532_v23, %v21119_v25  ;;  %vm671_vm5 = vcmp.eq.s32.totalorder %v26533_v17, %v21119_v25  ;;  %vm702_vm10 = vcmp.eq.s32.totalorder %v26534_v13, %v21119_v25  ;;  %v26538_v13 = vld [vmem:[#allocation5_spill] sm:$0xff] }
  0xfa   :  { %vm18717_vm15 = vmpackc.low %vm669_vm11, %vm668_vm14  ;;  %18748 = vmatprep.subr.msk.bf16.mxu1 %vm18747_vm2, %v26493_v14  ;;  %vm703_vm11 = vcmp.eq.s32.totalorder %v26535_v16, %v21119_v25  ;;  %vm1219_vm9 = vcmp.eq.s32.totalorder %v26536_v8, %v21413_v26  ;;  %v26539_v25 = vld [vmem:[#allocation10_spill] sm:$0xff]  ;;  %v26540_v16 = vld [vmem:[#allocation12_spill] sm:$0xff] }
  0xfb   :  { %vm18749_vm0 = vmpackc.low %vm701_vm1, %vm700_vm3  ;;  %vm1220_vm3 = vcmp.eq.s32.totalorder %v26537_v15, %v21413_v26 }
  0xfc   :  { %vm18719_vm4 = vmpackc.low %vm687_vm13, %vm686_vm8  ;;  %18718 = vmatpush3.bf16.msk.msra.mxu0 %vm18717_vm15, %v26493_v14  ;;  %vm1203_vm13 = vcmp.eq.s32.totalorder %v26538_v13, %v21413_v26  ;;  %vm1204_vm15 = vcmp.eq.s32.totalorder %v26539_v25, %v21413_v26 }
  0xfd   :  { %vm18751_vm14 = vmpackc.low %vm719_vm6, %vm718_vm12  ;;  %18750 = vmatpush3.bf16.msk.msra.mxu1 %vm18749_vm0, %v26493_v14  ;;  %18720 = vmatprep.subr.msk.bf16.mxu0 %vm18719_vm4, %v26493_v14  ;;  %vm1221_vm12 = vcmp.eq.s32.totalorder %v26540_v16, %v21413_v26  ;;  %vm1222_vm6 = vcmp.eq.s32.totalorder %v26541_v6, %v21413_v26 }
  0xfe   :  { %vm18721_vm1 = vmpackc.low %vm671_vm5, %vm670_vm7  ;;  %18752 = vmatprep.subr.msk.bf16.mxu1 %vm18751_vm14, %v26493_v14  ;;  %vm1205_vm7 = vcmp.eq.s32.totalorder %v20774_v29, %v21413_v26  ;;  %vm1206_vm5 = vcmp.eq.s32.totalorder %v20787_v31, %v21413_v26  ;;  %vm1223_vm14 = vcmp.eq.s32.totalorder %v20810_v34, %v21413_v26 }
  0xff   :  { %vm18753_vm2 = vmpackc.low %vm703_vm11, %vm702_vm10  ;;  %vm1224_vm10 = vcmp.eq.s32.totalorder %v20821_v35, %v21413_v26 }
 0x100   :  { %vm18763_vm8 = vmpackc.low %vm1220_vm3, %vm1219_vm9  ;;  %18722 = vmatpush3.bf16.msk.msra.mxu0 %vm18721_vm1, %v26493_v14  ;;  %vm1207_vm3 = vcmp.eq.s32.totalorder %v20839_v38, %v21413_v26  ;;  %vm1208_vm1 = vcmp.eq.s32.totalorder %v20842_v39, %v21413_v26 }
 0x101   :  { %18754 = vmatpush3.bf16.msk.msra.mxu1 %vm18753_vm2, %v26493_v14  ;;  %vm18765_vm0 = vmpackc.low %vm1204_vm15, %vm1203_vm13  ;;  %vm1225_vm2 = vcmp.eq.s32.totalorder %v20859_v42, %v21413_v26 }
 0x102   :  { %18764 = vmatprep.subr.msk.bf16.mxu1 %vm18763_vm8, %v26493_v14  ;;  %vm18767_vm4 = vmpackc.low %vm1222_vm6, %vm1221_vm12  ;;  %vm1226_vm8 = vcmp.eq.s32.totalorder %v20872_v43, %v21413_v26  ;;  %vm1209_vm12 = vcmp.eq.s32.totalorder %v20889_v46, %v21413_v26  ;;  %vm1210_vm6 = vcmp.eq.s32.totalorder %v20892_v47, %v21413_v26 }
 0x103   :  { %913 = vmatmul.mubr.f32.vlgmr.msra.gmra.mrb[8].mxu0 %v21174_v10  ;;  %vm18769_vm11 = vmpackc.low %vm1206_vm5, %vm1205_vm7 }
 0x104   :  { %988 = vmatmul.mubr.f32.vlgmr.msra.gmra.mrb[8].mxu1 %v21203_v24  ;;  %917 = vmatprep.mubr.f32.mxu0 %v21244_v21  ;;  %vm18771_vm9 = vmpackc.low %vm1224_vm10, %vm1223_vm14  ;;  %vm1211_vm14 = vcmp.eq.s32.totalorder %v20939_v54, %v21413_v26  ;;  %vm1212_vm10 = vcmp.eq.s32.totalorder %v20942_v55, %v21413_v26 }
 0x105   :  { %992 = vmatprep.mubr.f32.mxu1 %v21246_v12  ;;  %18766 = vmatpush3.bf16.msk.msra.mxu1 %vm18765_vm0, %v26493_v14  ;;  %vm18773_vm13 = vmpackc.low %vm1208_vm1, %vm1207_vm3  ;;  %vm1227_vm0 = vcmp.eq.s32.totalorder %v20909_v50, %v21413_v26 }
 0x106   :  { %18768 = vmatprep.subr.msk.bf16.mxu1 %vm18767_vm4, %v26493_v14  ;;  %vm18775_vm15 = vmpackc.low %vm1226_vm8, %vm1225_vm2  ;;  %vm1228_vm4 = vcmp.eq.s32.totalorder %v20922_v51, %v21413_v26  ;;  %vm1213_vm2 = vcmp.eq.s32.totalorder %v20989_v62, %v21413_v26  ;;  %vm1214_vm8 = vcmp.eq.s32.totalorder %v20992_v63, %v21413_v26 }
 0x107   :  { %918 = vmatmul.mubr.f32.gmra.mrb[10].mxu0 %v21220_v19  ;;  %vm18777_vm7 = vmpackc.low %vm1210_vm6, %vm1209_vm12 }
 0x108   :  { %993 = vmatmul.mubr.f32.gmra.mrb[10].mxu1 %v21241_v9  ;;  %vm18779_vm5 = vmpackc.low %vm1228_vm4, %vm1227_vm0  ;;  %vm1215_vm0 = vcmp.eq.s32.totalorder %v21039_v7, %v21413_v26  ;;  %vm1216_vm4 = vcmp.eq.s32.totalorder %v26525_v18, %v21413_v26  ;;  %v21512_v9 = vld [vmem:[%s26231_s2 + $0x3] ss:$0 sm:$0xff] }
 0x109   :  { %18770 = vmatpush3.bf16.msk.msra.mxu1 %vm18769_vm11, %v26493_v14  ;;  %1459 = vmatprep.mubr.f32.mxu1 %v21161_v3  ;;  %vm1229_vm11 = vcmp.eq.s32.totalorder %v20959_v58, %v21413_v26  ;;  %vm18781_vm3 = vmpackc.low %vm1212_vm10, %vm1211_vm14 }
 0x10a   :  { %18772 = vmatprep.subr.msk.bf16.mxu1 %vm18771_vm9, %v26493_v14  ;;  %vm1230_vm9 = vcmp.eq.s32.totalorder %v20972_v59, %v21413_v26  ;;  %vm18785_vm12 = vmpackc.low %vm1214_vm8, %vm1213_vm2 }
 0x10b   :  { %vm18783_vm1 = vmpackc.low %vm1230_vm9, %vm1229_vm11  ;;  %vm1217_vm11 = vcmp.eq.s32.totalorder %v26532_v23, %v21413_v26  ;;  %vm1218_vm9 = vcmp.eq.s32.totalorder %v26533_v17, %v21413_v26 }
 0x10c   :  { %vm18789_vm14 = vmpackc.low %vm1216_vm4, %vm1215_vm0 }
 0x10d   :  { %18774 = vmatpush3.bf16.msk.msra.mxu1 %vm18773_vm13, %v26493_v14  ;;  %vm1231_vm13 = vcmp.eq.s32.totalorder %v21009_v2, %v21413_v26  ;;  %vm18793_vm2 = vmpackc.low %vm1218_vm9, %vm1217_vm11 }
 0x10e   :  { %18776 = vmatprep.subr.msk.bf16.mxu1 %vm18775_vm15, %v26493_v14  ;;  %vm1232_vm15 = vcmp.eq.s32.totalorder %v21022_v4, %v21413_v26 }
 0x10f   :  { %vm18787_vm6 = vmpackc.low %vm1232_vm15, %vm1231_vm13  ;;  %vm1657_vm13 = vcmp.eq.s32.totalorder %v26538_v13, %v21512_v9  ;;  %vm1658_vm15 = vcmp.eq.s32.totalorder %v26539_v25, %v21512_v9 }
 0x110   :  { %vm18833_vm0 = vmpackc.low %vm1658_vm15, %vm1657_vm13 }
 0x111   :  { %18778 = vmatpush3.bf16.msk.msra.mxu1 %vm18777_vm7, %v26493_v14  ;;  %vm1233_vm7 = vcmp.eq.s32.totalorder %v26528_v30, %v21413_v26 }
 0x112   :  { %18780 = vmatprep.subr.msk.bf16.mxu1 %vm18779_vm5, %v26493_v14  ;;  %vm1234_vm5 = vcmp.eq.s32.totalorder %v26529_v11, %v21413_v26  ;;  %v21601_v26 = vld [vmem:[%s26231_s2 + $0x4] ss:$0 sm:$0xff] }
 0x113   :  { %vm18791_vm10 = vmpackc.low %vm1234_vm5, %vm1233_vm7  ;;  %vm1659_vm7 = vcmp.eq.s32.totalorder %v20774_v29, %v21512_v9  ;;  %vm1660_vm5 = vcmp.eq.s32.totalorder %v20787_v31, %v21512_v9 }
 0x114   :  { %vm18837_vm11 = vmpackc.low %vm1660_vm5, %vm1659_vm7 }
 0x115   :  { %18782 = vmatpush3.bf16.msk.msra.mxu1 %vm18781_vm3, %v26493_v14  ;;  %vm1673_vm3 = vcmp.eq.s32.totalorder %v26536_v8, %v21512_v9 }
 0x116   :  { %18784 = vmatprep.subr.msk.bf16.mxu1 %vm18783_vm1, %v26493_v14  ;;  %vm1674_vm1 = vcmp.eq.s32.totalorder %v26537_v15, %v21512_v9 }
 0x117   :  { %vm18831_vm8 = vmpackc.low %vm1674_vm1, %vm1673_vm3  ;;  %vm1661_vm3 = vcmp.eq.s32.totalorder %v20839_v38, %v21512_v9  ;;  %vm1662_vm1 = vcmp.eq.s32.totalorder %v20842_v39, %v21512_v9 }
 0x118   :  { %vm18841_vm13 = vmpackc.low %vm1662_vm1, %vm1661_vm3 }
 0x119   :  { %18786 = vmatpush3.bf16.msk.msra.mxu1 %vm18785_vm12, %v26493_v14  ;;  %vm1675_vm12 = vcmp.eq.s32.totalorder %v26540_v16, %v21512_v9 }
 0x11a   :  { %18788 = vmatprep.subr.msk.bf16.mxu1 %vm18787_vm6, %v26493_v14  ;;  %vm1676_vm6 = vcmp.eq.s32.totalorder %v26541_v6, %v21512_v9 }
 0x11b   :  { %vm18835_vm4 = vmpackc.low %vm1676_vm6, %vm1675_vm12  ;;  %vm1663_vm12 = vcmp.eq.s32.totalorder %v20889_v46, %v21512_v9  ;;  %vm1664_vm6 = vcmp.eq.s32.totalorder %v20892_v47, %v21512_v9 }
 0x11c   :  { %vm18845_vm7 = vmpackc.low %vm1664_vm6, %vm1663_vm12 }
 0x11d   :  { %18790 = vmatpush3.bf16.msk.msra.mxu1 %vm18789_vm14, %v26493_v14  ;;  %vm1677_vm14 = vcmp.eq.s32.totalorder %v20810_v34, %v21512_v9 }
 0x11e   :  { %18792 = vmatprep.subr.msk.bf16.mxu1 %vm18791_vm10, %v26493_v14  ;;  %vm1678_vm10 = vcmp.eq.s32.totalorder %v20821_v35, %v21512_v9 }
 0x11f   :  { %vm18839_vm9 = vmpackc.low %vm1678_vm10, %vm1677_vm14  ;;  %vm1665_vm14 = vcmp.eq.s32.totalorder %v20939_v54, %v21512_v9  ;;  %vm1666_vm10 = vcmp.eq.s32.totalorder %v20942_v55, %v21512_v9 }
 0x120   :  { %vm18849_vm3 = vmpackc.low %vm1666_vm10, %vm1665_vm14 }
 0x121   :  { %18794 = vmatpush3.bf16.msk.msra.mxu1 %vm18793_vm2, %v26493_v14  ;;  %vm1679_vm2 = vcmp.eq.s32.totalorder %v20859_v42, %v21512_v9 }
 0x122   :  { %18832 = vmatprep.subr.msk.bf16.mxu1 %vm18831_vm8, %v26493_v14  ;;  %vm1680_vm8 = vcmp.eq.s32.totalorder %v20872_v43, %v21512_v9 }
 0x123   :  { %vm18843_vm15 = vmpackc.low %vm1680_vm8, %vm1679_vm2  ;;  %vm1667_vm2 = vcmp.eq.s32.totalorder %v20989_v62, %v21512_v9  ;;  %vm1668_vm8 = vcmp.eq.s32.totalorder %v20992_v63, %v21512_v9 }
 0x124   :  { %1460 = vmatmul.mubr.f32.vlgmr.msra.gmra.mrb[12].mxu1 %v21174_v10  ;;  %vm18853_vm12 = vmpackc.low %vm1668_vm8, %vm1667_vm2 }
 0x125   :  { %1464 = vmatprep.mubr.f32.mxu1 %v21244_v21  ;;  %18834 = vmatpush3.bf16.msk.msra.mxu1 %vm18833_vm0, %v26493_v14  ;;  %vm1681_vm0 = vcmp.eq.s32.totalorder %v20909_v50, %v21512_v9 }
 0x126   :  { %18836 = vmatprep.subr.msk.bf16.mxu1 %vm18835_vm4, %v26493_v14  ;;  %vm1682_vm4 = vcmp.eq.s32.totalorder %v20922_v51, %v21512_v9 }
 0x127   :  { %vm18847_vm5 = vmpackc.low %vm1682_vm4, %vm1681_vm0  ;;  %vm1669_vm0 = vcmp.eq.s32.totalorder %v21039_v7, %v21512_v9  ;;  %vm1670_vm4 = vcmp.eq.s32.totalorder %v26525_v18, %v21512_v9 }
 0x128   :  { %1465 = vmatmul.mubr.f32.gmra.mrb[14].mxu1 %v21220_v19  ;;  %vm18857_vm14 = vmpackc.low %vm1670_vm4, %vm1669_vm0 }
 0x129   :  { %18838 = vmatpush3.bf16.msk.msra.mxu1 %vm18837_vm11, %v26493_v14  ;;  %1913 = vmatprep.mubr.f32.mxu1 %v21161_v3  ;;  %vm1683_vm11 = vcmp.eq.s32.totalorder %v20959_v58, %v21512_v9 }
 0x12a   :  { %18840 = vmatprep.subr.msk.bf16.mxu1 %vm18839_vm9, %v26493_v14  ;;  %vm1684_vm9 = vcmp.eq.s32.totalorder %v20972_v59, %v21512_v9 }
 0x12b   :  { %vm18851_vm1 = vmpackc.low %vm1684_vm9, %vm1683_vm11  ;;  %vm1671_vm11 = vcmp.eq.s32.totalorder %v26532_v23, %v21512_v9  ;;  %vm1672_vm9 = vcmp.eq.s32.totalorder %v26533_v17, %v21512_v9 }
 0x12c   :  { %vm18861_vm2 = vmpackc.low %vm1672_vm9, %vm1671_vm11 }
 0x12d   :  { %18842 = vmatpush3.bf16.msk.msra.mxu1 %vm18841_vm13, %v26493_v14  ;;  %vm1685_vm13 = vcmp.eq.s32.totalorder %v21009_v2, %v21512_v9 }
 0x12e   :  { %18844 = vmatprep.subr.msk.bf16.mxu1 %vm18843_vm15, %v26493_v14  ;;  %vm1686_vm15 = vcmp.eq.s32.totalorder %v21022_v4, %v21512_v9 }
 0x12f   :  { %vm18855_vm6 = vmpackc.low %vm1686_vm15, %vm1685_vm13  ;;  %vm2111_vm13 = vcmp.eq.s32.totalorder %v26538_v13, %v21601_v26  ;;  %vm2112_vm15 = vcmp.eq.s32.totalorder %v26539_v25, %v21601_v26 }
 0x130   :  { %vm18901_vm0 = vmpackc.low %vm2112_vm15, %vm2111_vm13 }
 0x131   :  { %18846 = vmatpush3.bf16.msk.msra.mxu1 %vm18845_vm7, %v26493_v14  ;;  %vm1687_vm7 = vcmp.eq.s32.totalorder %v26528_v30, %v21512_v9 }
 0x132   :  { %18848 = vmatprep.subr.msk.bf16.mxu1 %vm18847_vm5, %v26493_v14  ;;  %vm1688_vm5 = vcmp.eq.s32.totalorder %v26529_v11, %v21512_v9  ;;  %v21690_v9 = vld [vmem:[%s26231_s2 + $0x5] ss:$0 sm:$0xff] }
 0x133   :  { %vm18859_vm10 = vmpackc.low %vm1688_vm5, %vm1687_vm7  ;;  %vm2113_vm7 = vcmp.eq.s32.totalorder %v20774_v29, %v21601_v26  ;;  %vm2114_vm5 = vcmp.eq.s32.totalorder %v20787_v31, %v21601_v26 }
 0x134   :  { %vm18905_vm11 = vmpackc.low %vm2114_vm5, %vm2113_vm7 }
 0x135   :  { %18850 = vmatpush3.bf16.msk.msra.mxu1 %vm18849_vm3, %v26493_v14  ;;  %vm2127_vm3 = vcmp.eq.s32.totalorder %v26536_v8, %v21601_v26 }
 0x136   :  { %18852 = vmatprep.subr.msk.bf16.mxu1 %vm18851_vm1, %v26493_v14  ;;  %vm2128_vm1 = vcmp.eq.s32.totalorder %v26537_v15, %v21601_v26 }
 0x137   :  { %vm18899_vm8 = vmpackc.low %vm2128_vm1, %vm2127_vm3  ;;  %vm2115_vm3 = vcmp.eq.s32.totalorder %v20839_v38, %v21601_v26  ;;  %vm2116_vm1 = vcmp.eq.s32.totalorder %v20842_v39, %v21601_v26 }
 0x138   :  { %vm18909_vm13 = vmpackc.low %vm2116_vm1, %vm2115_vm3 }
 0x139   :  { %18854 = vmatpush3.bf16.msk.msra.mxu1 %vm18853_vm12, %v26493_v14  ;;  %vm2129_vm12 = vcmp.eq.s32.totalorder %v26540_v16, %v21601_v26 }
 0x13a   :  { %18856 = vmatprep.subr.msk.bf16.mxu1 %vm18855_vm6, %v26493_v14  ;;  %vm2130_vm6 = vcmp.eq.s32.totalorder %v26541_v6, %v21601_v26 }
 0x13b   :  { %vm18903_vm4 = vmpackc.low %vm2130_vm6, %vm2129_vm12  ;;  %vm2117_vm12 = vcmp.eq.s32.totalorder %v20889_v46, %v21601_v26  ;;  %vm2118_vm6 = vcmp.eq.s32.totalorder %v20892_v47, %v21601_v26 }
 0x13c   :  { %vm18913_vm7 = vmpackc.low %vm2118_vm6, %vm2117_vm12 }
 0x13d   :  { %18858 = vmatpush3.bf16.msk.msra.mxu1 %vm18857_vm14, %v26493_v14  ;;  %vm2131_vm14 = vcmp.eq.s32.totalorder %v20810_v34, %v21601_v26 }
 0x13e   :  { %18860 = vmatprep.subr.msk.bf16.mxu1 %vm18859_vm10, %v26493_v14  ;;  %vm2132_vm10 = vcmp.eq.s32.totalorder %v20821_v35, %v21601_v26 }
 0x13f   :  { %vm18907_vm9 = vmpackc.low %vm2132_vm10, %vm2131_vm14  ;;  %vm2119_vm14 = vcmp.eq.s32.totalorder %v20939_v54, %v21601_v26  ;;  %vm2120_vm10 = vcmp.eq.s32.totalorder %v20942_v55, %v21601_v26 }
 0x140   :  { %vm18917_vm3 = vmpackc.low %vm2120_vm10, %vm2119_vm14 }
 0x141   :  { %18862 = vmatpush3.bf16.msk.msra.mxu1 %vm18861_vm2, %v26493_v14  ;;  %vm2133_vm2 = vcmp.eq.s32.totalorder %v20859_v42, %v21601_v26 }
 0x142   :  { %18900 = vmatprep.subr.msk.bf16.mxu1 %vm18899_vm8, %v26493_v14  ;;  %vm2134_vm8 = vcmp.eq.s32.totalorder %v20872_v43, %v21601_v26 }
 0x143   :  { %vm18911_vm15 = vmpackc.low %vm2134_vm8, %vm2133_vm2  ;;  %vm2121_vm2 = vcmp.eq.s32.totalorder %v20989_v62, %v21601_v26  ;;  %vm2122_vm8 = vcmp.eq.s32.totalorder %v20992_v63, %v21601_v26 }
 0x144   :  { %1914 = vmatmul.mubr.f32.vlgmr.msra.gmra.mrb[16].mxu1 %v21174_v10  ;;  %vm18921_vm12 = vmpackc.low %vm2122_vm8, %vm2121_vm2 }
 0x145   :  { %1918 = vmatprep.mubr.f32.mxu1 %v21244_v21  ;;  %18902 = vmatpush3.bf16.msk.msra.mxu1 %vm18901_vm0, %v26493_v14  ;;  %vm2135_vm0 = vcmp.eq.s32.totalorder %v20909_v50, %v21601_v26 }
 0x146   :  { %18904 = vmatprep.subr.msk.bf16.mxu1 %vm18903_vm4, %v26493_v14  ;;  %vm2136_vm4 = vcmp.eq.s32.totalorder %v20922_v51, %v21601_v26 }
 0x147   :  { %vm18915_vm5 = vmpackc.low %vm2136_vm4, %vm2135_vm0  ;;  %vm2123_vm0 = vcmp.eq.s32.totalorder %v21039_v7, %v21601_v26  ;;  %vm2124_vm4 = vcmp.eq.s32.totalorder %v26525_v18, %v21601_v26 }
 0x148   :  { %1919 = vmatmul.mubr.f32.gmra.mrb[18].mxu1 %v21220_v19  ;;  %vm18925_vm14 = vmpackc.low %vm2124_vm4, %vm2123_vm0 }
 0x149   :  { %18906 = vmatpush3.bf16.msk.msra.mxu1 %vm18905_vm11, %v26493_v14  ;;  %2367 = vmatprep.mubr.f32.mxu1 %v21161_v3  ;;  %vm2137_vm11 = vcmp.eq.s32.totalorder %v20959_v58, %v21601_v26 }
 0x14a   :  { %18908 = vmatprep.subr.msk.bf16.mxu1 %vm18907_vm9, %v26493_v14  ;;  %vm2138_vm9 = vcmp.eq.s32.totalorder %v20972_v59, %v21601_v26 }
 0x14b   :  { %vm18919_vm1 = vmpackc.low %vm2138_vm9, %vm2137_vm11  ;;  %vm2125_vm11 = vcmp.eq.s32.totalorder %v26532_v23, %v21601_v26  ;;  %vm2126_vm9 = vcmp.eq.s32.totalorder %v26533_v17, %v21601_v26 }
 0x14c   :  { %vm18929_vm2 = vmpackc.low %vm2126_vm9, %vm2125_vm11 }
 0x14d   :  { %18910 = vmatpush3.bf16.msk.msra.mxu1 %vm18909_vm13, %v26493_v14  ;;  %vm2139_vm13 = vcmp.eq.s32.totalorder %v21009_v2, %v21601_v26 }
 0x14e   :  { %18912 = vmatprep.subr.msk.bf16.mxu1 %vm18911_vm15, %v26493_v14  ;;  %vm2140_vm15 = vcmp.eq.s32.totalorder %v21022_v4, %v21601_v26 }
 0x14f   :  { %vm18923_vm6 = vmpackc.low %vm2140_vm15, %vm2139_vm13  ;;  %vm2565_vm13 = vcmp.eq.s32.totalorder %v26538_v13, %v21690_v9  ;;  %vm2566_vm15 = vcmp.eq.s32.totalorder %v26539_v25, %v21690_v9 }
 0x150   :  { %vm18969_vm0 = vmpackc.low %vm2566_vm15, %vm2565_vm13  ;;  %vm2588_vm13 = vcmp.eq.s32.totalorder %v20872_v43, %v21690_v9 }
 0x151   :  { %18914 = vmatpush3.bf16.msk.msra.mxu1 %vm18913_vm7, %v26493_v14  ;;  %vm2141_vm7 = vcmp.eq.s32.totalorder %v26528_v30, %v21601_v26 }
 0x152   :  { %18916 = vmatprep.subr.msk.bf16.mxu1 %vm18915_vm5, %v26493_v14  ;;  %vm2142_vm5 = vcmp.eq.s32.totalorder %v26529_v11, %v21601_v26  ;;  %v12946_v26 = vld [vmem:[%s26232_s3 + $0x20] sm:$0xff] }
 0x153   :  { %vm18927_vm10 = vmpackc.low %vm2142_vm5, %vm2141_vm7  ;;  %vm2567_vm7 = vcmp.eq.s32.totalorder %v20774_v29, %v21690_v9  ;;  %vm2568_vm5 = vcmp.eq.s32.totalorder %v20787_v31, %v21690_v9 }
 0x154   :  { %vm18973_vm11 = vmpackc.low %vm2568_vm5, %vm2567_vm7  ;;  %vm2590_vm7 = vcmp.eq.s32.totalorder %v20922_v51, %v21690_v9 }
 0x155   :  { %18918 = vmatpush3.bf16.msk.msra.mxu1 %vm18917_vm3, %v26493_v14  ;;  %vm2581_vm3 = vcmp.eq.s32.totalorder %v26536_v8, %v21690_v9 }
 0x156   :  { %18920 = vmatprep.subr.msk.bf16.mxu1 %vm18919_vm1, %v26493_v14  ;;  %vm2582_vm1 = vcmp.eq.s32.totalorder %v26537_v15, %v21690_v9 }
 0x157   :  { %vm18967_vm8 = vmpackc.low %vm2582_vm1, %vm2581_vm3  ;;  %vm2569_vm3 = vcmp.eq.s32.totalorder %v20839_v38, %v21690_v9  ;;  %vm2570_vm1 = vcmp.eq.s32.totalorder %v20842_v39, %v21690_v9 }
 0x158   :  { %vm18977_vm15 = vmpackc.low %vm2570_vm1, %vm2569_vm3  ;;  %vm2592_vm3 = vcmp.eq.s32.totalorder %v20972_v59, %v21690_v9 }
 0x159   :  { %18922 = vmatpush3.bf16.msk.msra.mxu1 %vm18921_vm12, %v26493_v14  ;;  %vm2583_vm12 = vcmp.eq.s32.totalorder %v26540_v16, %v21690_v9 }
 0x15a   :  { %18924 = vmatprep.subr.msk.bf16.mxu1 %vm18923_vm6, %v26493_v14  ;;  %vm2584_vm6 = vcmp.eq.s32.totalorder %v26541_v6, %v21690_v9 }
 0x15b   :  { %vm18971_vm4 = vmpackc.low %vm2584_vm6, %vm2583_vm12  ;;  %vm2571_vm6 = vcmp.eq.s32.totalorder %v20889_v46, %v21690_v9 }
 0x15d   :  { %18926 = vmatpush3.bf16.msk.msra.mxu1 %vm18925_vm14, %v26493_v14  ;;  %vm2585_vm14 = vcmp.eq.s32.totalorder %v20810_v34, %v21690_v9 }
 0x15e   :  { %18928 = vmatprep.subr.msk.bf16.mxu1 %vm18927_vm10, %v26493_v14  ;;  %vm2586_vm10 = vcmp.eq.s32.totalorder %v20821_v35, %v21690_v9 }
 0x15f   :  { %vm18975_vm9 = vmpackc.low %vm2586_vm10, %vm2585_vm14  ;;  %vm2573_vm10 = vcmp.eq.s32.totalorder %v20939_v54, %v21690_v9 }
 0x161   :  { %18930 = vmatpush3.bf16.msk.msra.mxu1 %vm18929_vm2, %v26493_v14  ;;  %vm26542_vm2 = vcmask 130048  }
 0x162   :  { %18968 = vmatprep.subr.msk.bf16.mxu1 %vm18967_vm8, %v26493_v14  ;;  %17524 = vmatprep.mubr.msk.f32.mxu0 %vm26542_vm2, %v12946_v26  ;;  %vm2587_vm8 = vcmp.eq.s32.totalorder %v20859_v42, %v21690_v9  ;;  %v26543_v26 = vld [vmem:[#allocation8_spill] sm:$0xff] }
 0x163   :  { %vm18979_vm12 = vmpackc.low %vm2588_vm13, %vm2587_vm8  ;;  %vm2575_vm8 = vcmp.eq.s32.totalorder %v20989_v62, %v21690_v9  ;;  %vm2576_vm13 = vcmp.eq.s32.totalorder %v20992_v63, %v21690_v9 }
 0x164   :  { %2368 = vmatmul.mubr.f32.vlgmr.msra.gmra.mrb[20].mxu1 %v21174_v10 }
 0x165   :  { %2372 = vmatprep.mubr.f32.mxu1 %v21244_v21  ;;  %18970 = vmatpush3.bf16.msk.msra.mxu1 %vm18969_vm0, %v26493_v14  ;;  %vm2572_vm0 = vcmp.eq.s32.totalorder %v20892_v47, %v21690_v9 }
 0x166   :  { %18972 = vmatprep.subr.msk.bf16.mxu1 %vm18971_vm4, %v26493_v14  ;;  %vm2589_vm4 = vcmp.eq.s32.totalorder %v20909_v50, %v21690_v9  ;;  %vm18981_vm5 = vmpackc.low %vm2572_vm0, %vm2571_vm6 }
 0x167   :  { %vm18983_vm14 = vmpackc.low %vm2590_vm7, %vm2589_vm4  ;;  %vm2577_vm4 = vcmp.eq.s32.totalorder %v21039_v7, %v21690_v9  ;;  %vm2578_vm7 = vcmp.eq.s32.totalorder %v26525_v18, %v21690_v9  ;;  %v21867_v18 = vld [vmem:[%s26231_s2 + $0x6] ss:$0 sm:$0xff]  ;;  %v26551_v7 = vld [vmem:[#allocation56_spill] sm:$0xff] }
 0x168   :  { %2373 = vmatmul.mubr.f32.gmra.mrb[22].mxu1 %v21220_v19  ;;  %vm18989_vm6 = vmpackc.low %vm2576_vm13, %vm2575_vm8 }
 0x169   :  { %18974 = vmatpush3.bf16.msk.msra.mxu1 %vm18973_vm11, %v26493_v14  ;;  %2821 = vmatprep.mubr.f32.mxu1 %v21161_v3  ;;  %vm2574_vm11 = vcmp.eq.s32.totalorder %v20942_v55, %v21690_v9 }
 0x16a   :  { %18976 = vmatprep.subr.msk.bf16.mxu1 %vm18975_vm9, %v26493_v14  ;;  %vm2591_vm9 = vcmp.eq.s32.totalorder %v20959_v58, %v21690_v9  ;;  %vm18985_vm1 = vmpackc.low %vm2574_vm11, %vm2573_vm10 }
 0x16b   :  { %vm18987_vm2 = vmpackc.low %vm2592_vm3, %vm2591_vm9  ;;  %vm2579_vm9 = vcmp.eq.s32.totalorder %v26532_v23, %v21690_v9  ;;  %vm2580_vm3 = vcmp.eq.s32.totalorder %v26533_v17, %v21690_v9  ;;  %v26545_v23 = vld [vmem:[#allocation11_spill] sm:$0xff]  ;;  %v26549_v17 = vld [vmem:[#allocation52_spill] sm:$0xff] }
 0x16c   :  { %vm18993_vm10 = vmpackc.low %vm2578_vm7, %vm2577_vm4 }
 0x16d   :  { %18978 = vmatpush3.bf16.msk.msra.mxu1 %vm18977_vm15, %v26493_v14  ;;  %vm2593_vm15 = vcmp.eq.s32.totalorder %v21009_v2, %v21690_v9  ;;  %vm18997_vm8 = vmpackc.low %vm2580_vm3, %vm2579_vm9 }
 0x16e   :  { %18980 = vmatprep.subr.msk.bf16.mxu1 %vm18979_vm12, %v26493_v14  ;;  %vm2594_vm12 = vcmp.eq.s32.totalorder %v21022_v4, %v21690_v9  ;;  %v26552_v4 = vld [vmem:[#allocation57_spill] sm:$0xff] }
 0x16f   :  { %vm18991_vm0 = vmpackc.low %vm2594_vm12, %vm2593_vm15  ;;  %vm2597_vm15 = vcmp.eq.s32.totalorder %v20736_v22, %v21690_v9  ;;  %vm2598_vm12 = vcmp.eq.s32.totalorder %v26545_v23, %v21690_v9 }
 0x170   :  { %vm19001_vm4 = vmpackc.low %vm2598_vm12, %vm2597_vm15 }
 0x171   :  { %18982 = vmatpush3.bf16.msk.msra.mxu1 %vm18981_vm5, %v26493_v14  ;;  %vm2595_vm5 = vcmp.eq.s32.totalorder %v26528_v30, %v21690_v9  ;;  %v26544_v30 = vld [vmem:[#allocation9_spill] sm:$0xff] }
 0x172   :  { %18984 = vmatprep.subr.msk.bf16.mxu1 %vm18983_vm14, %v26493_v14  ;;  %vm2596_vm14 = vcmp.eq.s32.totalorder %v26529_v11, %v21690_v9  ;;  %v26550_v11 = vld [vmem:[#allocation53_spill] sm:$0xff] }
 0x173   :  { %vm18995_vm11 = vmpackc.low %vm2596_vm14, %vm2595_vm5  ;;  %vm2599_vm5 = vcmp.eq.s32.totalorder %v20790_v32, %v21690_v9  ;;  %vm2600_vm14 = vcmp.eq.s32.totalorder %v20793_v33, %v21690_v9 }
 0x174   :  { %vm19005_vm9 = vmpackc.low %vm2600_vm14, %vm2599_vm5 }
 0x175   :  { %18986 = vmatpush3.bf16.msk.msra.mxu1 %vm18985_vm1, %v26493_v14  ;;  %vm2613_vm1 = vcmp.eq.s32.totalorder %v26543_v26, %v21690_v9 }
 0x176   :  { %18988 = vmatprep.subr.msk.bf16.mxu1 %vm18987_vm2, %v26493_v14  ;;  %vm2614_vm2 = vcmp.eq.s32.totalorder %v26544_v30, %v21690_v9 }
 0x177   :  { %vm18999_vm13 = vmpackc.low %vm2614_vm2, %vm2613_vm1  ;;  %vm2601_vm1 = vcmp.eq.s32.totalorder %v20845_v40, %v21690_v9  ;;  %vm2602_vm2 = vcmp.eq.s32.totalorder %v20856_v41, %v21690_v9 }
 0x178   :  { %vm19009_vm15 = vmpackc.low %vm2602_vm2, %vm2601_vm1 }
 0x179   :  { %18990 = vmatpush3.bf16.msk.msra.mxu1 %vm18989_vm6, %v26493_v14  ;;  %vm2615_vm6 = vcmp.eq.s32.totalorder %v20768_v27, %v21690_v9 }
 0x17a   :  { %18992 = vmatprep.subr.msk.bf16.mxu1 %vm18991_vm0, %v26493_v14  ;;  %vm2616_vm0 = vcmp.eq.s32.totalorder %v20771_v28, %v21690_v9 }
 0x17b   :  { %vm19003_vm7 = vmpackc.low %vm2616_vm0, %vm2615_vm6  ;;  %vm2603_vm6 = vcmp.eq.s32.totalorder %v20895_v48, %v21690_v9  ;;  %vm2604_vm0 = vcmp.eq.s32.totalorder %v20906_v49, %v21690_v9 }
 0x17c   :  { %vm19013_vm5 = vmpackc.low %vm2604_vm0, %vm2603_vm6 }
 0x17d   :  { %18994 = vmatpush3.bf16.msk.msra.mxu1 %vm18993_vm10, %v26493_v14  ;;  %vm2617_vm10 = vcmp.eq.s32.totalorder %v20830_v36, %v21690_v9 }
 0x17e   :  { %18996 = vmatprep.subr.msk.bf16.mxu1 %vm18995_vm11, %v26493_v14  ;;  %vm2618_vm11 = vcmp.eq.s32.totalorder %v20833_v37, %v21690_v9 }
 0x17f   :  { %vm19007_vm3 = vmpackc.low %vm2618_vm11, %vm2617_vm10  ;;  %vm2605_vm10 = vcmp.eq.s32.totalorder %v20945_v56, %v21690_v9  ;;  %vm2606_vm11 = vcmp.eq.s32.totalorder %v20956_v57, %v21690_v9 }
 0x180   :  { %vm19017_vm1 = vmpackc.low %vm2606_vm11, %vm2605_vm10 }
 0x181   :  { %18998 = vmatpush3.bf16.msk.msra.mxu1 %vm18997_vm8, %v26493_v14  ;;  %vm2619_vm8 = vcmp.eq.s32.totalorder %v20880_v44, %v21690_v9 }
 0x182   :  { %19000 = vmatprep.subr.msk.bf16.mxu1 %vm18999_vm13, %v26493_v14  ;;  %vm2620_vm13 = vcmp.eq.s32.totalorder %v20883_v45, %v21690_v9 }
 0x183   :  { %vm19011_vm12 = vmpackc.low %vm2620_vm13, %vm2619_vm8  ;;  %vm2607_vm8 = vcmp.eq.s32.totalorder %v20995_v0, %v21690_v9  ;;  %vm2608_vm13 = vcmp.eq.s32.totalorder %v21006_v1, %v21690_v9 }
 0x184   :  { %2822 = vmatmul.mubr.f32.vlgmr.msra.gmra.mrb[24].mxu1 %v21174_v10  ;;  %vm19021_vm6 = vmpackc.low %vm2608_vm13, %vm2607_vm8  ;;  %v26548_v10 = vld [vmem:[#allocation49_spill] sm:$0xff] }
 0x185   :  { %2826 = vmatprep.mubr.f32.mxu1 %v21244_v21  ;;  %19002 = vmatpush3.bf16.msk.msra.mxu1 %vm19001_vm4, %v26493_v14  ;;  %vm2621_vm4 = vcmp.eq.s32.totalorder %v20930_v52, %v21690_v9  ;;  %v26547_v21 = vld [vmem:[#allocation48_spill] sm:$0xff] }
 0x186   :  { %19004 = vmatprep.subr.msk.bf16.mxu1 %vm19003_vm7, %v26493_v14  ;;  %vm2622_vm7 = vcmp.eq.s32.totalorder %v20933_v53, %v21690_v9 }
 0x187   :  { %vm19015_vm14 = vmpackc.low %vm2622_vm7, %vm2621_vm4  ;;  %vm2609_vm4 = vcmp.eq.s32.totalorder %v26547_v21, %v21690_v9  ;;  %vm2610_vm7 = vcmp.eq.s32.totalorder %v26548_v10, %v21690_v9 }
 0x188   :  { %2827 = vmatmul.mubr.f32.gmra.mrb[26].mxu1 %v21220_v19  ;;  %v26546_v19 = vld [vmem:[#allocation45_spill] sm:$0xff]  ;;  %vm19025_vm10 = vmpackc.low %vm2610_vm7, %vm2609_vm4 }
 0x189   :  { %19006 = vmatpush3.bf16.msk.msra.mxu1 %vm19005_vm9, %v26493_v14  ;;  %2896 = vmatprep.mubr.f32.mxu1 %v21189_v20  ;;  %vm2623_vm9 = vcmp.eq.s32.totalorder %v20980_v60, %v21690_v9 }
 0x18a   :  { %19008 = vmatprep.subr.msk.bf16.mxu1 %vm19007_vm3, %v26493_v14  ;;  %vm2624_vm3 = vcmp.eq.s32.totalorder %v20983_v61, %v21690_v9 }
 0x18b   :  { %vm19019_vm2 = vmpackc.low %vm2624_vm3, %vm2623_vm9  ;;  %vm2611_vm9 = vcmp.eq.s32.totalorder %v26551_v7, %v21690_v9  ;;  %vm2612_vm3 = vcmp.eq.s32.totalorder %v26552_v4, %v21690_v9 }
 0x18c   :  { %vm19029_vm8 = vmpackc.low %vm2612_vm3, %vm2611_vm9 }
 0x18d   :  { %19010 = vmatpush3.bf16.msk.msra.mxu1 %vm19009_vm15, %v26493_v14  ;;  %vm2625_vm15 = vcmp.eq.s32.totalorder %v21030_v5, %v21690_v9 }
 0x18e   :  { %19012 = vmatprep.subr.msk.bf16.mxu1 %vm19011_vm12, %v26493_v14  ;;  %vm2626_vm12 = vcmp.eq.s32.totalorder %v26546_v19, %v21690_v9 }
 0x18f   :  { %vm19023_vm0 = vmpackc.low %vm2626_vm12, %vm2625_vm15  ;;  %vm3051_vm15 = vcmp.eq.s32.totalorder %v20736_v22, %v21867_v18  ;;  %vm3052_vm12 = vcmp.eq.s32.totalorder %v26545_v23, %v21867_v18 }
 0x190   :  { %vm19069_vm4 = vmpackc.low %vm3052_vm12, %vm3051_vm15 }
 0x191   :  { %19014 = vmatpush3.bf16.msk.msra.mxu1 %vm19013_vm5, %v26493_v14  ;;  %vm2627_vm5 = vcmp.eq.s32.totalorder %v26549_v17, %v21690_v9 }
 0x192   :  { %19016 = vmatprep.subr.msk.bf16.mxu1 %vm19015_vm14, %v26493_v14  ;;  %vm2628_vm14 = vcmp.eq.s32.totalorder %v26550_v11, %v21690_v9  ;;  %v26553_v9 = vld [vmem:[#allocation62_spill] sm:$0xff] }
 0x193   :  { %vm19027_vm11 = vmpackc.low %vm2628_vm14, %vm2627_vm5  ;;  %vm3053_vm5 = vcmp.eq.s32.totalorder %v20790_v32, %v21867_v18  ;;  %vm3054_vm14 = vcmp.eq.s32.totalorder %v20793_v33, %v21867_v18 }
 0x194   :  { %vm19073_vm9 = vmpackc.low %vm3054_vm14, %vm3053_vm5 }
 0x195   :  { %19018 = vmatpush3.bf16.msk.msra.mxu1 %vm19017_vm1, %v26493_v14  ;;  %vm3067_vm1 = vcmp.eq.s32.totalorder %v26543_v26, %v21867_v18 }
 0x196   :  { %19020 = vmatprep.subr.msk.bf16.mxu1 %vm19019_vm2, %v26493_v14  ;;  %vm3068_vm2 = vcmp.eq.s32.totalorder %v26544_v30, %v21867_v18 }
 0x197   :  { %vm19067_vm13 = vmpackc.low %vm3068_vm2, %vm3067_vm1  ;;  %vm3055_vm1 = vcmp.eq.s32.totalorder %v20845_v40, %v21867_v18  ;;  %vm3056_vm2 = vcmp.eq.s32.totalorder %v20856_v41, %v21867_v18 }
 0x198   :  { %vm19077_vm15 = vmpackc.low %vm3056_vm2, %vm3055_vm1 }
 0x199   :  { %19022 = vmatpush3.bf16.msk.msra.mxu1 %vm19021_vm6, %v26493_v14  ;;  %vm3069_vm6 = vcmp.eq.s32.totalorder %v20768_v27, %v21867_v18 }
 0x19a   :  { %19024 = vmatprep.subr.msk.bf16.mxu1 %vm19023_vm0, %v26493_v14  ;;  %vm3070_vm0 = vcmp.eq.s32.totalorder %v20771_v28, %v21867_v18 }
 0x19b   :  { %vm19071_vm7 = vmpackc.low %vm3070_vm0, %vm3069_vm6  ;;  %vm3057_vm6 = vcmp.eq.s32.totalorder %v20895_v48, %v21867_v18  ;;  %vm3058_vm0 = vcmp.eq.s32.totalorder %v20906_v49, %v21867_v18 }
 0x19c   :  { %vm19081_vm5 = vmpackc.low %vm3058_vm0, %vm3057_vm6 }
 0x19d   :  { %19026 = vmatpush3.bf16.msk.msra.mxu1 %vm19025_vm10, %v26493_v14  ;;  %vm3071_vm10 = vcmp.eq.s32.totalorder %v20830_v36, %v21867_v18 }
 0x19e   :  { %19028 = vmatprep.subr.msk.bf16.mxu1 %vm19027_vm11, %v26493_v14  ;;  %vm3072_vm11 = vcmp.eq.s32.totalorder %v20833_v37, %v21867_v18 }
 0x19f   :  { %vm19075_vm3 = vmpackc.low %vm3072_vm11, %vm3071_vm10  ;;  %vm3059_vm10 = vcmp.eq.s32.totalorder %v20945_v56, %v21867_v18  ;;  %vm3060_vm11 = vcmp.eq.s32.totalorder %v20956_v57, %v21867_v18 }
 0x1a0   :  { %vm19085_vm1 = vmpackc.low %vm3060_vm11, %vm3059_vm10 }
 0x1a1   :  { %19030 = vmatpush3.bf16.msk.msra.mxu1 %vm19029_vm8, %v26493_v14  ;;  %vm3073_vm8 = vcmp.eq.s32.totalorder %v20880_v44, %v21867_v18 }
 0x1a2   :  { %19068 = vmatprep.subr.msk.bf16.mxu1 %vm19067_vm13, %v26493_v14  ;;  %vm3074_vm13 = vcmp.eq.s32.totalorder %v20883_v45, %v21867_v18 }
 0x1a3   :  { %vm19079_vm12 = vmpackc.low %vm3074_vm13, %vm3073_vm8  ;;  %vm3061_vm8 = vcmp.eq.s32.totalorder %v20995_v0, %v21867_v18  ;;  %vm3062_vm13 = vcmp.eq.s32.totalorder %v21006_v1, %v21867_v18 }
 0x1a4   :  { %2897 = vmatmul.mubr.f32.vlgmr.msra.gmra.mrb[28].mxu1 %v21203_v24  ;;  %vm19089_vm6 = vmpackc.low %vm3062_vm13, %vm3061_vm8 }
 0x1a5   :  { %2901 = vmatprep.mubr.f32.mxu1 %v21246_v12  ;;  %19070 = vmatpush3.bf16.msk.msra.mxu1 %vm19069_vm4, %v26493_v14  ;;  %vm3075_vm4 = vcmp.eq.s32.totalorder %v20930_v52, %v21867_v18 }
 0x1a6   :  { %19072 = vmatprep.subr.msk.bf16.mxu1 %vm19071_vm7, %v26493_v14  ;;  %vm3076_vm7 = vcmp.eq.s32.totalorder %v20933_v53, %v21867_v18 }
 0x1a7   :  { %vm19083_vm14 = vmpackc.low %vm3076_vm7, %vm3075_vm4  ;;  %vm3063_vm4 = vcmp.eq.s32.totalorder %v26547_v21, %v21867_v18  ;;  %vm3064_vm7 = vcmp.eq.s32.totalorder %v26548_v10, %v21867_v18 }
 0x1a8   :  { %2902 = vmatmul.mubr.f32.gmra.mrb[30].mxu1 %v26553_v9  ;;  %vm19093_vm10 = vmpackc.low %vm3064_vm7, %vm3063_vm4 }
 0x1a9   :  { %19074 = vmatpush3.bf16.msk.msra.mxu1 %vm19073_vm9, %v26493_v14  ;;  %3350 = vmatprep.mubr.f32.mxu1 %v21189_v20  ;;  %vm3077_vm9 = vcmp.eq.s32.totalorder %v20980_v60, %v21867_v18 }
 0x1aa   :  { %19076 = vmatprep.subr.msk.bf16.mxu1 %vm19075_vm3, %v26493_v14  ;;  %vm3078_vm3 = vcmp.eq.s32.totalorder %v20983_v61, %v21867_v18 }
 0x1ab   :  { %vm19087_vm2 = vmpackc.low %vm3078_vm3, %vm3077_vm9  ;;  %vm3065_vm9 = vcmp.eq.s32.totalorder %v26551_v7, %v21867_v18  ;;  %vm3066_vm3 = vcmp.eq.s32.totalorder %v26552_v4, %v21867_v18 }
 0x1ac   :  { %vm19097_vm8 = vmpackc.low %vm3066_vm3, %vm3065_vm9 }
 0x1ad   :  { %19078 = vmatpush3.bf16.msk.msra.mxu1 %vm19077_vm15, %v26493_v14  ;;  %vm3079_vm15 = vcmp.eq.s32.totalorder %v21030_v5, %v21867_v18 }
 0x1ae   :  { %19080 = vmatprep.subr.msk.bf16.mxu1 %vm19079_vm12, %v26493_v14  ;;  %vm3080_vm12 = vcmp.eq.s32.totalorder %v26546_v19, %v21867_v18 }
 0x1af   :  { %vm19091_vm0 = vmpackc.low %vm3080_vm12, %vm3079_vm15 }
 0x1b1   :  { %19082 = vmatpush3.bf16.msk.msra.mxu1 %vm19081_vm5, %v26493_v14  ;;  %vm3081_vm5 = vcmp.eq.s32.totalorder %v26549_v17, %v21867_v18 }
 0x1b2   :  { %19084 = vmatprep.subr.msk.bf16.mxu1 %vm19083_vm14, %v26493_v14  ;;  %vm3082_vm14 = vcmp.eq.s32.totalorder %v26550_v11, %v21867_v18 }
 0x1b3   :  { %vm19095_vm11 = vmpackc.low %vm3082_vm14, %vm3081_vm5 }
 0x1b5   :  { %19086 = vmatpush3.bf16.msk.msra.mxu1 %vm19085_vm1, %v26493_v14  ;;  %v15723_v2 = vpop.f32.mrb[4].mxu0 }
 0x1b6   :  { %19088 = vmatprep.subr.msk.bf16.mxu1 %vm19087_vm2, %v26493_v14  ;;  %v15724_v63 = vpop.f32.mrb[5].mxu0  ;;  %v15761_v62 = vpop.f32.mrb[4].mxu1 }
 0x1b7   :  { %v15725_v59 = vadd.f32 %v15724_v63, %v15723_v2  ;;  %v15762_v58 = vpop.f32.mrb[5].mxu1  ;;  %v21956_v63 = vld [vmem:[%s26231_s2 + $0x7] ss:$0 sm:$0xff] }
 0x1b8   :  { %v15763_v55 = vadd.f32 %v15762_v58, %v15761_v62  ;;  %vm3521_vm1 = vcmp.eq.s32.totalorder %v26543_v26, %v21956_v63  ;;  %vm3522_vm2 = vcmp.eq.s32.totalorder %v26544_v30, %v21956_v63  ;;  %vm3505_vm15 = vcmp.eq.s32.totalorder %v20736_v22, %v21956_v63 }
 0x1b9   :  { %19090 = vmatpush3.bf16.msk.msra.mxu1 %vm19089_vm6, %v26493_v14  ;;  %vm19135_vm13 = vmpackc.low %vm3522_vm2, %vm3521_vm1  ;;  %vm3506_vm12 = vcmp.eq.s32.totalorder %v26545_v23, %v21956_v63  ;;  %vm3523_vm6 = vcmp.eq.s32.totalorder %v20768_v27, %v21956_v63  ;;  %vm3507_vm5 = vcmp.eq.s32.totalorder %v20790_v32, %v21956_v63  ;;  %vm3508_vm14 = vcmp.eq.s32.totalorder %v20793_v33, %v21956_v63 }
 0x1ba   :  { %v15726_v2 = vpop.f32.mrb[6].mxu0  ;;  %19092 = vmatprep.subr.msk.bf16.mxu1 %vm19091_vm0, %v26493_v14  ;;  %v638_v54 = vadd.f32 %v15763_v55, %v15725_v59  ;;  %vm3524_vm0 = vcmp.eq.s32.totalorder %v20771_v28, %v21956_v63  ;;  %vm19137_vm4 = vmpackc.low %vm3506_vm12, %vm3505_vm15  ;;  %vm3509_vm1 = vcmp.eq.s32.totalorder %v20845_v40, %v21956_v63  ;;  %vm3510_vm2 = vcmp.eq.s32.totalorder %v20856_v41, %v21956_v63 }
 0x1bb   :  { %v15764_v51 = vpop.f32.mrb[6].mxu1  ;;  %v15727_v50 = vpop.f32.mrb[7].mxu0  ;;  %vm19139_vm7 = vmpackc.low %vm3524_vm0, %vm3523_vm6  ;;  %vm3511_vm6 = vcmp.eq.s32.totalorder %v20895_v48, %v21956_v63  ;;  %vm3512_vm0 = vcmp.eq.s32.totalorder %v20906_v49, %v21956_v63 }
 0x1bc   :  { %v15728_v58 = vadd.f32 %v15727_v50, %v15726_v2  ;;  %v15765_v62 = vpop.f32.mrb[7].mxu1  ;;  %vm19141_vm9 = vmpackc.low %vm3508_vm14, %vm3507_vm5 }
 0x1bd   :  { %v15766_v47 = vadd.f32 %v15765_v62, %v15764_v51  ;;  %19094 = vmatpush3.bf16.msk.msra.mxu1 %vm19093_vm10, %v26493_v14  ;;  %vm3525_vm10 = vcmp.eq.s32.totalorder %v20830_v36, %v21956_v63  ;;  %vm19145_vm15 = vmpackc.low %vm3510_vm2, %vm3509_vm1 }
 0x1be   :  { %19096 = vmatprep.subr.msk.bf16.mxu1 %vm19095_vm11, %v26493_v14  ;;  %vm3526_vm11 = vcmp.eq.s32.totalorder %v20833_v37, %v21956_v63  ;;  %vm19149_vm5 = vmpackc.low %vm3512_vm0, %vm3511_vm6 }
 0x1bf   :  { %v643_v55 = vadd.f32 %v15766_v47, %v15728_v58  ;;  %vm19143_vm3 = vmpackc.low %vm3526_vm11, %vm3525_vm10  ;;  %vm3513_vm10 = vcmp.eq.s32.totalorder %v20945_v56, %v21956_v63  ;;  %vm3514_vm11 = vcmp.eq.s32.totalorder %v20956_v57, %v21956_v63  ;;  %v22047_v58 = vld [vmem:[%s26231_s2 + $0x8] ss:$0 sm:$0xff] }
 0x1c0   :  { %vm19153_vm1 = vmpackc.low %vm3514_vm11, %vm3513_vm10 }
 0x1c1   :  { %19098 = vmatpush3.bf16.msk.msra.mxu1 %vm19097_vm8, %v26493_v14  ;;  %v21978_v50 = vpack.c.bf16 %v643_v55, %v638_v54  ;;  %vm3527_vm8 = vcmp.eq.s32.totalorder %v20880_v44, %v21956_v63 }
 0x1c2   :  { %19136 = vmatprep.subr.msk.bf16.mxu1 %vm19135_vm13, %v26493_v14  ;;  %vm3528_vm13 = vcmp.eq.s32.totalorder %v20883_v45, %v21956_v63 }
 0x1c3   :  { %vm19147_vm12 = vmpackc.low %vm3528_vm13, %vm3527_vm8  ;;  %vm3515_vm8 = vcmp.eq.s32.totalorder %v20995_v0, %v21956_v63  ;;  %vm3516_vm13 = vcmp.eq.s32.totalorder %v21006_v1, %v21956_v63 }
 0x1c4   :  { %3351 = vmatmul.mubr.f32.vlgmr.msra.gmra.mrb[32].mxu1 %v21203_v24  ;;  %vm19157_vm6 = vmpackc.low %vm3516_vm13, %vm3515_vm8 }
 0x1c5   :  { %3355 = vmatprep.mubr.f32.mxu1 %v21246_v12  ;;  %19138 = vmatpush3.bf16.msk.msra.mxu1 %vm19137_vm4, %v26493_v14  ;;  %vm3529_vm4 = vcmp.eq.s32.totalorder %v20930_v52, %v21956_v63 }
 0x1c6   :  { %19140 = vmatprep.subr.msk.bf16.mxu1 %vm19139_vm7, %v26493_v14  ;;  %vm3530_vm7 = vcmp.eq.s32.totalorder %v20933_v53, %v21956_v63 }
 0x1c7   :  { %vm19151_vm14 = vmpackc.low %vm3530_vm7, %vm3529_vm4  ;;  %vm3517_vm4 = vcmp.eq.s32.totalorder %v26547_v21, %v21956_v63  ;;  %vm3518_vm7 = vcmp.eq.s32.totalorder %v26548_v10, %v21956_v63 }
 0x1c8   :  { %3356 = vmatmul.mubr.f32.gmra.mrb[34].mxu1 %v26553_v9  ;;  %vm19161_vm10 = vmpackc.low %vm3518_vm7, %vm3517_vm4  ;;  %vm3961_vm7 = vcmp.eq.s32.totalorder %v20790_v32, %v22047_v58 }
 0x1c9   :  { %19142 = vmatpush3.bf16.msk.msra.mxu1 %vm19141_vm9, %v26493_v14  ;;  %3804 = vmatprep.mubr.f32.mxu1 %v21189_v20  ;;  %vm3531_vm9 = vcmp.eq.s32.totalorder %v20980_v60, %v21956_v63 }
 0x1ca   :  { %19144 = vmatprep.subr.msk.bf16.mxu1 %vm19143_vm3, %v26493_v14  ;;  %vm3532_vm3 = vcmp.eq.s32.totalorder %v20983_v61, %v21956_v63 }
 0x1cb   :  { %vm19155_vm2 = vmpackc.low %vm3532_vm3, %vm3531_vm9  ;;  %vm3519_vm9 = vcmp.eq.s32.totalorder %v26551_v7, %v21956_v63  ;;  %vm3520_vm3 = vcmp.eq.s32.totalorder %v26552_v4, %v21956_v63 }
 0x1cc   :  { %vm19165_vm8 = vmpackc.low %vm3520_vm3, %vm3519_vm9  ;;  %vm3979_vm9 = vcmp.eq.s32.totalorder %v20830_v36, %v22047_v58  ;;  %vm3980_vm3 = vcmp.eq.s32.totalorder %v20833_v37, %v22047_v58 }
 0x1cd   :  { %19146 = vmatpush3.bf16.msk.msra.mxu1 %vm19145_vm15, %v26493_v14  ;;  %vm3533_vm15 = vcmp.eq.s32.totalorder %v21030_v5, %v21956_v63 }
 0x1ce   :  { %19148 = vmatprep.subr.msk.bf16.mxu1 %vm19147_vm12, %v26493_v14  ;;  %vm3534_vm12 = vcmp.eq.s32.totalorder %v26546_v19, %v21956_v63 }
 0x1cf   :  { %vm19159_vm0 = vmpackc.low %vm3534_vm12, %vm3533_vm15  ;;  %vm3959_vm15 = vcmp.eq.s32.totalorder %v20736_v22, %v22047_v58  ;;  %vm3960_vm12 = vcmp.eq.s32.totalorder %v26545_v23, %v22047_v58 }
 0x1d0   :  { %vm19205_vm4 = vmpackc.low %vm3960_vm12, %vm3959_vm15  ;;  %vm3963_vm15 = vcmp.eq.s32.totalorder %v20845_v40, %v22047_v58  ;;  %vm3964_vm12 = vcmp.eq.s32.totalorder %v20856_v41, %v22047_v58 }
 0x1d1   :  { %19150 = vmatpush3.bf16.msk.msra.mxu1 %vm19149_vm5, %v26493_v14  ;;  %vm3535_vm5 = vcmp.eq.s32.totalorder %v26549_v17, %v21956_v63 }
 0x1d2   :  { %19152 = vmatprep.subr.msk.bf16.mxu1 %vm19151_vm14, %v26493_v14  ;;  %vm3536_vm14 = vcmp.eq.s32.totalorder %v26550_v11, %v21956_v63 }
 0x1d3   :  { %vm19163_vm11 = vmpackc.low %vm3536_vm14, %vm3535_vm5  ;;  %vm3962_vm5 = vcmp.eq.s32.totalorder %v20793_v33, %v22047_v58 }
 0x1d5   :  { %19154 = vmatpush3.bf16.msk.msra.mxu1 %vm19153_vm1, %v26493_v14  ;;  %vm3975_vm1 = vcmp.eq.s32.totalorder %v26543_v26, %v22047_v58 }
 0x1d6   :  { %v15799_v47 = vpop.f32.mrb[8].mxu0  ;;  %19156 = vmatprep.subr.msk.bf16.mxu1 %vm19155_vm2, %v26493_v14  ;;  %vm3976_vm2 = vcmp.eq.s32.totalorder %v26544_v30, %v22047_v58 }
 0x1d7   :  { %v15837_v51 = vpop.f32.mrb[8].mxu1  ;;  %v15800_v54 = vpop.f32.mrb[9].mxu0  ;;  %vm19203_vm13 = vmpackc.low %vm3976_vm2, %vm3975_vm1  ;;  %vm26556_vm2 = vcmask 130048  }
 0x1d8   :  { %v15801_v59 = vadd.f32 %v15800_v54, %v15799_v47  ;;  %v15838_v18 = vpop.f32.mrb[9].mxu1  ;;  %vm22094_vm1 = vmpackc.low %vm3962_vm5, %vm3961_vm7 }
 0x1d9   :  { %v15839_v2 = vadd.f32 %v15838_v18, %v15837_v51  ;;  %19158 = vmatpush3.bf16.msk.msra.mxu1 %vm19157_vm6, %v26493_v14  ;;  %vm3977_vm6 = vcmp.eq.s32.totalorder %v20768_v27, %v22047_v58 }
 0x1da   :  { %v15802_v62 = vpop.f32.mrb[10].mxu0  ;;  %19160 = vmatprep.subr.msk.bf16.mxu1 %vm19159_vm0, %v26493_v14  ;;  %vm3978_vm0 = vcmp.eq.s32.totalorder %v20771_v28, %v22047_v58 }
 0x1db   :  { %v990_v55 = vadd.f32 %v15839_v2, %v15801_v59  ;;  %v15840_v47 = vpop.f32.mrb[10].mxu1  ;;  %v15803_v54 = vpop.f32.mrb[11].mxu0  ;;  %vm19207_vm14 = vmpackc.low %vm3978_vm0, %vm3977_vm6  ;;  %v22081_v2 = vld [vmem:[%s26231_s2 + $0x2] ss:$0 sm:$0xff]  ;;  %vm3981_vm0 = vcmp.eq.s32.totalorder %v20880_v44, %v22047_v58 }
 0x1dc   :  { %v15804_v51 = vadd.f32 %v15803_v54, %v15802_v62  ;;  %v15841_v18 = vpop.f32.mrb[11].mxu1  ;;  %vm26557_vm6 = vmmov %vm26556_vm2  ;;  %vm1235_vm7 = vcmp.eq.s32.totalorder %v20736_v22, %v22081_v2  ;;  %vm1236_vm5 = vcmp.eq.s32.totalorder %v26545_v23, %v22081_v2  ;;  %v647_v54 = vld [vmem:[%s26232_s3 + $0x8] sm:$0xff] }
 0x1dd   :  { %v15842_v46 = vadd.f32 %v15841_v18, %v15840_v47  ;;  %19162 = vmatpush3.bf16.msk.msra.mxu1 %vm19161_vm10, %v26493_v14  ;;  %vm1251_vm10 = vcmp.eq.s32.totalorder %v26543_v26, %v22081_v2  ;;  %v12949_v47 = vld [vmem:[%s26232_s3 + $0x38] sm:$0xff]  ;;  %v22227_v62 = vld [vmem:[%s26231_s2 + $0x9] ss:$0 sm:$0xff] }
 0x1de   :  { %19164 = vmatprep.subr.msk.bf16.mxu1 %vm19163_vm11, %v26493_v14  ;;  %vm1252_vm11 = vcmp.eq.s32.totalorder %v26544_v30, %v22081_v2  ;;  %v649_v18 = vld [vmem:[%s26232_s3 + $0x18] sm:$0xff] }
 0x1df   :  { %v995_v59 = vadd.f32 %v15842_v46, %v15804_v51  ;;  %v12947_v46 = vld [vmem:[%s26232_s3 + $0x28] sm:$0xff]  ;;  %v648_v51 = vld [vmem:[%s26232_s3 + $0x10] sm:$0xff] }
 0x1e1   :  { %19166 = vmatpush3.bf16.msk.msra.mxu1 %vm19165_vm8, %v26493_v14  ;;  %v18755_v63 = vpack.c.bf16 %v995_v59, %v990_v55  ;;  %v12948_v55 = vld [vmem:[%s26232_s3 + $0x30] sm:$0xff]  ;;  %vm18795_vm8 = vmpackc.low %vm1252_vm11, %vm1251_vm10  ;;  %vm1253_vm11 = vcmp.eq.s32.totalorder %v20768_v27, %v22081_v2 }
 0x1e2   :  { %19204 = vmatprep.subr.msk.bf16.mxu1 %vm19203_vm13, %v26493_v14  ;;  %vm19211_vm13 = vmpackc.low %vm3980_vm3, %vm3979_vm9  ;;  %vm1254_vm9 = vcmp.eq.s32.totalorder %v20771_v28, %v22081_v2 }
 0x1e3   :  { %18756 = vmatprep.subr.bf16.mxu0 %v18755_v63  ;;  %vm19213_vm10 = vmpackc.low %vm3964_vm12, %vm3963_vm15  ;;  %vm3983_vm15 = vcmp.eq.s32.totalorder %v20930_v52, %v22047_v58  ;;  %vm3984_vm12 = vcmp.eq.s32.totalorder %v20933_v53, %v22047_v58 }
 0x1e4   :  { %18758 = vmatpush3.bf16.msra.mxu0 %v18755_v63  ;;  %3805 = vmatmul.mubr.f32.vlgmr.msra.gmra.mrb[36].mxu1 %v21203_v24  ;;  %vm26559_vm3 = vmmov %vm26556_vm2 }
 0x1e5   :  { %18760 = vmatprep.subr.bf16.mxu0 %v21978_v50  ;;  %3809 = vmatprep.mubr.f32.mxu1 %v21246_v12 }
 0x1e6   :  { %19206 = vmatpush3.bf16.msk.msra.mxu1 %vm19205_vm4, %v26493_v14  ;;  %vm3982_vm4 = vcmp.eq.s32.totalorder %v20883_v45, %v22047_v58 }
 0x1e7   :  { %17525 = vmatmul.mubr.msk.f32.vlgmr.msra.gmra.mrb[12].mxu0 %vm26556_vm2, %v12947_v46  ;;  %19208 = vmatprep.subr.msk.bf16.mxu1 %vm19207_vm14, %v26493_v14  ;;  %vm26558_vm14 = vmmov %vm26556_vm2  ;;  %vm3965_vm2 = vcmp.eq.s32.totalorder %v20895_v48, %v22047_v58 }
 0x1e8   :  { %18762 = vmatpush3.bf16.msra.mxu0 %v21978_v50  ;;  %3810 = vmatmul.mubr.f32.gmra.mrb[38].mxu1 %v26553_v9  ;;  %v646_v50 = vld [vmem:[%s26232_s3] sm:$0xff] }
 0x1e9   :  { %4258 = vmatprep.mubr.f32.mxu1 %v21189_v20  ;;  %17527 = vmatprep.mubr.msk.f32.mxu0 %vm26557_vm6, %v12948_v55  ;;  %vm18799_vm6 = vmpackc.low %vm1254_vm9, %vm1253_vm11  ;;  %vm3967_vm9 = vcmp.eq.s32.totalorder %v20945_v56, %v22047_v58 }
 0x1ea   :  { %19210 = vmatpush3.bf16.msk.msra.mxu1 %vm22094_vm1, %v26493_v14  ;;  %18796 = vmatprep.subr.msk.bf16.mxu0 %vm18795_vm8, %v26493_v14  ;;  %vm19215_vm1 = vmpackc.low %vm3982_vm4, %vm3981_vm0  ;;  %vm3966_vm8 = vcmp.eq.s32.totalorder %v20906_v49, %v22047_v58  ;;  %vm1237_vm0 = vcmp.eq.s32.totalorder %v20790_v32, %v22081_v2  ;;  %vm1238_vm4 = vcmp.eq.s32.totalorder %v20793_v33, %v22081_v2 }
 0x1eb   :  { %17528 = vmatmul.mubr.msk.f32.gmra.mrb[14].mxu0 %vm26558_vm14, %v12949_v47  ;;  %19212 = vmatprep.subr.msk.bf16.mxu1 %vm19211_vm13, %v26493_v14  ;;  %vm18797_vm13 = vmpackc.low %vm1236_vm5, %vm1235_vm7  ;;  %vm1255_vm14 = vcmp.eq.s32.totalorder %v20830_v36, %v22081_v2 }
 0x1ec   :  { %17534 = vmatprep.mubr.msk.f32.mxu0 %vm26559_vm3, %v646_v50  ;;  %vm26560_vm7 = vmmov %vm26559_vm3  ;;  %vm1256_vm3 = vcmp.eq.s32.totalorder %v20833_v37, %v22081_v2 }
 0x1ed   :  { %vm19217_vm5 = vmpackc.low %vm3966_vm8, %vm3965_vm2  ;;  %vm3985_vm8 = vcmp.eq.s32.totalorder %v20980_v60, %v22047_v58 }
 0x1ee   :  { %19214 = vmatpush3.bf16.msk.msra.mxu1 %vm19213_vm10, %v26493_v14  ;;  %vm26561_vm10 = vmmov %vm26560_vm7 }
 0x1ef   :  { %17535 = vmatmul.mubr.msk.f32.vlgmr.msra.gmra.mrb[12].mxu0 %vm26560_vm7, %v647_v54  ;;  %19216 = vmatprep.subr.msk.bf16.mxu1 %vm19215_vm1, %v26493_v14  ;;  %vm19219_vm11 = vmpackc.low %vm3984_vm12, %vm3983_vm15  ;;  %vm3968_vm1 = vcmp.eq.s32.totalorder %v20956_v57, %v22047_v58  ;;  %vm1239_vm15 = vcmp.eq.s32.totalorder %v20845_v40, %v22081_v2  ;;  %vm1240_vm12 = vcmp.eq.s32.totalorder %v20856_v41, %v22081_v2  ;;  %v26566_v54 = vld [vmem:[#allocation26_spill] sm:$0xff] }
 0x1f0   :  { %18798 = vmatpush3.bf16.msk.msra.mxu0 %vm18797_vm13, %v26493_v14  ;;  %17537 = vmatprep.mubr.msk.f32.mxu0 %vm26561_vm10, %v648_v51  ;;  %vm18801_vm2 = vmpackc.low %vm1238_vm4, %vm1237_vm0  ;;  %vm3986_vm13 = vcmp.eq.s32.totalorder %v20983_v61, %v22047_v58  ;;  %vm1257_vm0 = vcmp.eq.s32.totalorder %v20880_v44, %v22081_v2  ;;  %vm1258_vm4 = vcmp.eq.s32.totalorder %v20883_v45, %v22081_v2  ;;  %v26567_v51 = vld [vmem:[#allocation27_spill] sm:$0xff] }
 0x1f1   :  { %18800 = vmatprep.subr.msk.bf16.mxu0 %vm18799_vm6, %v26493_v14  ;;  %vm18803_vm7 = vmpackc.low %vm1256_vm3, %vm1255_vm14  ;;  %vm3969_vm14 = vcmp.eq.s32.totalorder %v20995_v0, %v22047_v58  ;;  %vm3970_vm3 = vcmp.eq.s32.totalorder %v21006_v1, %v22047_v58 }
 0x1f2   :  { %19218 = vmatpush3.bf16.msk.msra.mxu1 %vm19217_vm5, %v26493_v14  ;;  %vm19221_vm6 = vmpackc.low %vm3968_vm1, %vm3967_vm9  ;;  %vm3987_vm9 = vcmp.eq.s32.totalorder %v21030_v5, %v22047_v58  ;;  %vm3988_vm1 = vcmp.eq.s32.totalorder %v26546_v19, %v22047_v58 }
 0x1f3   :  { %17538 = vmatmul.mubr.msk.f32.gmra.mrb[14].mxu0 %vm26561_vm10, %v649_v18  ;;  %19220 = vmatprep.subr.msk.bf16.mxu1 %vm19219_vm11, %v26493_v14  ;;  %vm19223_vm5 = vmpackc.low %vm3986_vm13, %vm3985_vm8  ;;  %vm1241_vm8 = vcmp.eq.s32.totalorder %v20895_v48, %v22081_v2  ;;  %vm1242_vm13 = vcmp.eq.s32.totalorder %v20906_v49, %v22081_v2  ;;  %v26568_v18 = vld [vmem:[#allocation30_spill] sm:$0xff] }
 0x1f4   :  { %18802 = vmatpush3.bf16.msk.msra.mxu0 %vm18801_vm2, %v26493_v14  ;;  %1534 = vmatprep.mubr.f32.mxu0 %v21189_v20  ;;  %vm18805_vm11 = vmpackc.low %vm1240_vm12, %vm1239_vm15  ;;  %vm1259_vm15 = vcmp.eq.s32.totalorder %v20930_v52, %v22081_v2  ;;  %vm1260_vm12 = vcmp.eq.s32.totalorder %v20933_v53, %v22081_v2 }
 0x1f5   :  { %18804 = vmatprep.subr.msk.bf16.mxu0 %vm18803_vm7, %v26493_v14  ;;  %vm18807_vm2 = vmpackc.low %vm1258_vm4, %vm1257_vm0  ;;  %vm3972_vm0 = vcmp.eq.s32.totalorder %v26548_v10, %v22047_v58 }
 0x1f6   :  { %19222 = vmatpush3.bf16.msk.msra.mxu1 %vm19221_vm6, %v26493_v14  ;;  %vm19225_vm7 = vmpackc.low %vm3970_vm3, %vm3969_vm14  ;;  %vm3971_vm6 = vcmp.eq.s32.totalorder %v26547_v21, %v22047_v58  ;;  %vm3990_vm14 = vcmp.eq.s32.totalorder %v26550_v11, %v22047_v58 }
 0x1f7   :  { %v15887_v59 = vpop.f32.mrb[12].mxu1  ;;  %19224 = vmatprep.subr.msk.bf16.mxu1 %vm19223_vm5, %v26493_v14  ;;  %vm19227_vm10 = vmpackc.low %vm3988_vm1, %vm3987_vm9  ;;  %vm3989_vm5 = vcmp.eq.s32.totalorder %v26549_v17, %v22047_v58  ;;  %vm1244_vm9 = vcmp.eq.s32.totalorder %v20956_v57, %v22081_v2 }
 0x1f8   :  { %18806 = vmatpush3.bf16.msk.msra.mxu0 %vm18805_vm11, %v26493_v14  ;;  %v15888_v63 = vpop.f32.mrb[13].mxu1  ;;  %vm18809_vm4 = vmpackc.low %vm1242_vm13, %vm1241_vm8  ;;  %vm1243_vm11 = vcmp.eq.s32.totalorder %v20945_v56, %v22081_v2  ;;  %vm1262_vm8 = vcmp.eq.s32.totalorder %v20983_v61, %v22081_v2  ;;  %v22452_v61 = vld [vmem:[%s26231_s2 + $0xb] ss:$0 sm:$0xff] }
 0x1f9   :  { %v22212_v46 = vadd.f32 %v15888_v63, %v15887_v59  ;;  %18808 = vmatprep.subr.msk.bf16.mxu0 %vm18807_vm2, %v26493_v14  ;;  %vm18811_vm3 = vmpackc.low %vm1260_vm12, %vm1259_vm15  ;;  %vm1261_vm2 = vcmp.eq.s32.totalorder %v20980_v60, %v22081_v2  ;;  %vm3974_vm15 = vcmp.eq.s32.totalorder %v26552_v4, %v22047_v58  ;;  %v26569_v59 = vld [vmem:[#allocation31_spill] sm:$0xff]  ;;  %v26570_v63 = vld [vmem:[#allocation34_spill] sm:$0xff] }
 0x1fa   :  { %19226 = vmatpush3.bf16.msk.msra.mxu1 %vm19225_vm7, %v26493_v14  ;;  %vm19229_vm1 = vmpackc.low %vm3972_vm0, %vm3971_vm6  ;;  %vm3973_vm7 = vcmp.eq.s32.totalorder %v26551_v7, %v22047_v58  ;;  %vm4398_vm6 = vcmp.eq.s32.totalorder %v26537_v15, %v22227_v62  ;;  %v26564_v58 = vld [vmem:[#allocation22_spill] sm:$0xff] }
 0x1fb   :  { %26562 = vst [vmem:[#allocation6_spill] sm:$0xff] %v22212_v46  ;;  %v15890_v55 = vpop.f32.mrb[14].mxu1  ;;  %19228 = vmatprep.subr.msk.bf16.mxu1 %vm19227_vm10, %v26493_v14  ;;  %vm19231_vm13 = vmpackc.low %vm3990_vm14, %vm3989_vm5  ;;  %vm4397_vm10 = vcmp.eq.s32.totalorder %v26536_v8, %v22227_v62  ;;  %vm1246_vm5 = vcmp.eq.s32.totalorder %v21006_v1, %v22081_v2  ;;  %v26574_v46 = vld [vmem:[#allocation42_spill] sm:$0xff] }
 0x1fc   :  { %18810 = vmatpush3.bf16.msk.msra.mxu0 %vm18809_vm4, %v26493_v14  ;;  %v15891_v47 = vpop.f32.mrb[15].mxu1  ;;  %vm18813_vm12 = vmpackc.low %vm1244_vm9, %vm1243_vm11  ;;  %vm1245_vm4 = vcmp.eq.s32.totalorder %v20995_v0, %v22081_v2  ;;  %vm1264_vm11 = vcmp.eq.s32.totalorder %v26546_v19, %v22081_v2 }
 0x1fd   :  { %v22239_v50 = vadd.f32 %v15891_v47, %v15890_v55  ;;  %18812 = vmatprep.subr.msk.bf16.mxu0 %vm18811_vm3, %v26493_v14  ;;  %vm18815_vm0 = vmpackc.low %vm1262_vm8, %vm1261_vm2  ;;  %vm1263_vm3 = vcmp.eq.s32.totalorder %v21030_v5, %v22081_v2  ;;  %vm4382_vm2 = vcmp.eq.s32.totalorder %v26539_v25, %v22227_v62  ;;  %v26571_v55 = vld [vmem:[#allocation35_spill] sm:$0xff]  ;;  %v26572_v47 = vld [vmem:[#allocation38_spill] sm:$0xff] }
 0x1fe   :  { %19230 = vmatpush3.bf16.msk.msra.mxu1 %vm19229_vm1, %v26493_v14  ;;  %vm19233_vm14 = vmpackc.low %vm3974_vm15, %vm3973_vm7  ;;  %vm4381_vm1 = vcmp.eq.s32.totalorder %v26538_v13, %v22227_v62  ;;  %vm4400_vm7 = vcmp.eq.s32.totalorder %v26541_v6, %v22227_v62 }
 0x1ff   :  { %26563 = vst [vmem:[#allocation7_spill] sm:$0xff] %v22239_v50  ;;  %19232 = vmatprep.subr.msk.bf16.mxu1 %vm19231_vm13, %v26493_v14  ;;  %vm19239_vm9 = vmpackc.low %vm4398_vm6, %vm4397_vm10  ;;  %vm4399_vm13 = vcmp.eq.s32.totalorder %v26540_v16, %v22227_v62  ;;  %vm1248_vm10 = vcmp.eq.s32.totalorder %v26548_v10, %v22081_v2  ;;  %v26573_v50 = vld [vmem:[#allocation39_spill] sm:$0xff] }
 0x200   :  { %18814 = vmatpush3.bf16.msk.msra.mxu0 %vm18813_vm12, %v26493_v14  ;;  %vm18817_vm8 = vmpackc.low %vm1246_vm5, %vm1245_vm4  ;;  %vm1247_vm12 = vcmp.eq.s32.totalorder %v26547_v21, %v22081_v2  ;;  %vm1266_vm4 = vcmp.eq.s32.totalorder %v26550_v11, %v22081_v2  ;;  %v26580_v10 = vld [vmem:[#allocation51_spill] sm:$0xff]  ;;  %v22359_v21 = vld [vmem:[%s26231_s2 + $0xa] ss:$0 sm:$0xff] }
 0x201   :  { %18816 = vmatprep.subr.msk.bf16.mxu0 %vm18815_vm0, %v26493_v14  ;;  %vm18819_vm15 = vmpackc.low %vm1264_vm11, %vm1263_vm3  ;;  %vm1265_vm0 = vcmp.eq.s32.totalorder %v26549_v17, %v22081_v2  ;;  %vm4384_vm3 = vcmp.eq.s32.totalorder %v20787_v31, %v22227_v62  ;;  %v26579_v17 = vld [vmem:[#allocation50_spill] sm:$0xff] }
 0x202   :  { %19234 = vmatpush3.bf16.msk.msra.mxu1 %vm19233_vm14, %v26493_v14  ;;  %vm19241_vm6 = vmpackc.low %vm4382_vm2, %vm4381_vm1  ;;  %vm4383_vm14 = vcmp.eq.s32.totalorder %v20774_v29, %v22227_v62  ;;  %vm4402_vm1 = vcmp.eq.s32.totalorder %v20821_v35, %v22227_v62 }
 0x203   :  { %19240 = vmatprep.subr.msk.bf16.mxu1 %vm19239_vm9, %v26493_v14  ;;  %vm19243_vm5 = vmpackc.low %vm4400_vm7, %vm4399_vm13  ;;  %vm4401_vm9 = vcmp.eq.s32.totalorder %v20810_v34, %v22227_v62  ;;  %vm1250_vm13 = vcmp.eq.s32.totalorder %v26552_v4, %v22081_v2  ;;  %v26576_v4 = vld [vmem:[#allocation46_spill] sm:$0xff] }
 0x204   :  { %18818 = vmatpush3.bf16.msk.msra.mxu0 %vm18817_vm8, %v26493_v14  ;;  %vm18821_vm11 = vmpackc.low %vm1248_vm10, %vm1247_vm12  ;;  %vm1249_vm8 = vcmp.eq.s32.totalorder %v26551_v7, %v22081_v2  ;;  %vm4385_vm12 = vcmp.eq.s32.totalorder %v20839_v38, %v22227_v62  ;;  %vm4386_vm10 = vcmp.eq.s32.totalorder %v20842_v39, %v22227_v62  ;;  %v26565_v2 = vld [vmem:[#allocation23_spill] sm:$0xff] }
 0x205   :  { %4259 = vmatmul.mubr.f32.vlgmr.msra.gmra.mrb[40].mxu1 %v21203_v24  ;;  %18820 = vmatprep.subr.msk.bf16.mxu0 %vm18819_vm15, %v26493_v14  ;;  %vm18823_vm2 = vmpackc.low %vm1266_vm4, %vm1265_vm0  ;;  %vm4403_vm0 = vcmp.eq.s32.totalorder %v20859_v42, %v22227_v62  ;;  %vm4404_vm4 = vcmp.eq.s32.totalorder %v20872_v43, %v22227_v62  ;;  %v26577_v7 = vld [vmem:[#allocation47_spill] sm:$0xff] }
 0x206   :  { %4263 = vmatprep.mubr.f32.mxu1 %v21246_v12  ;;  %19242 = vmatpush3.bf16.msk.msra.mxu1 %vm19241_vm6, %v26493_v14  ;;  %vm19245_vm7 = vmpackc.low %vm4384_vm3, %vm4383_vm14  ;;  %vm4387_vm3 = vcmp.eq.s32.totalorder %v26564_v58, %v22227_v62 }
 0x207   :  { %19244 = vmatprep.subr.msk.bf16.mxu1 %vm19243_vm5, %v26493_v14  ;;  %vm19247_vm15 = vmpackc.low %vm4402_vm1, %vm4401_vm9  ;;  %vm4405_vm9 = vcmp.eq.s32.totalorder %v26566_v54, %v22227_v62  ;;  %vm4406_vm1 = vcmp.eq.s32.totalorder %v26567_v51, %v22227_v62 }
 0x208   :  { %18822 = vmatpush3.bf16.msk.msra.mxu0 %vm18821_vm11, %v26493_v14  ;;  %vm18825_vm6 = vmpackc.low %vm1250_vm13, %vm1249_vm8  ;;  %vm4388_vm11 = vcmp.eq.s32.totalorder %v26565_v2, %v22227_v62  ;;  %vm4389_vm13 = vcmp.eq.s32.totalorder %v26568_v18, %v22227_v62 }
 0x209   :  { %4264 = vmatmul.mubr.f32.gmra.mrb[42].mxu1 %v26553_v9  ;;  %18824 = vmatprep.subr.msk.bf16.mxu0 %vm18823_vm2, %v26493_v14  ;;  %vm19249_vm5 = vmpackc.low %vm4386_vm10, %vm4385_vm12  ;;  %vm4408_vm12 = vcmp.eq.s32.totalorder %v26571_v55, %v22227_v62 }
 0x20a   :  { %19246 = vmatpush3.bf16.msk.msra.mxu1 %vm19245_vm7, %v26493_v14  ;;  %4637 = vmatprep.mubr.f32.mxu1 %v21161_v3  ;;  %vm19251_vm14 = vmpackc.low %vm4404_vm4, %vm4403_vm0  ;;  %vm4390_vm7 = vcmp.eq.s32.totalorder %v26569_v59, %v22227_v62  ;;  %vm4391_vm0 = vcmp.eq.s32.totalorder %v26572_v47, %v22227_v62  ;;  %vm4392_vm4 = vcmp.eq.s32.totalorder %v26573_v50, %v22227_v62 }
 0x20b   :  { %19248 = vmatprep.subr.msk.bf16.mxu1 %vm19247_vm15, %v26493_v14  ;;  %vm19253_vm2 = vmpackc.low %vm4388_vm11, %vm4387_vm3  ;;  %vm4407_vm15 = vcmp.eq.s32.totalorder %v26570_v63, %v22227_v62 }
 0x20c   :  { %18826 = vmatpush3.bf16.msk.msra.mxu0 %vm18825_vm6, %v26493_v14  ;;  %vm19255_vm8 = vmpackc.low %vm4406_vm1, %vm4405_vm9  ;;  %vm4393_vm9 = vcmp.eq.s32.totalorder %v26576_v4, %v22227_v62  ;;  %vm4394_vm1 = vcmp.eq.s32.totalorder %v26577_v7, %v22227_v62 }
 0x20d   :  { %vm19257_vm10 = vmpackc.low %vm4390_vm7, %vm4389_vm13 }
 0x20e   :  { %19250 = vmatpush3.bf16.msk.msra.mxu1 %vm19249_vm5, %v26493_v14  ;;  %vm19259_vm6 = vmpackc.low %vm4408_vm12, %vm4407_vm15  ;;  %vm4409_vm5 = vcmp.eq.s32.totalorder %v26574_v46, %v22227_v62 }
 0x20f   :  { %1535 = vmatmul.mubr.f32.vlgmr.msra.gmra.mrb[16].mxu0 %v21203_v24  ;;  %19252 = vmatprep.subr.msk.bf16.mxu1 %vm19251_vm14, %v26493_v14  ;;  %vm19261_vm3 = vmpackc.low %vm4392_vm4, %vm4391_vm0 }
 0x210   :  { %1539 = vmatprep.mubr.f32.mxu0 %v21246_v12  ;;  %v26575_v12 = vld [vmem:[#allocation43_spill] sm:$0xff]  ;;  %vm19265_vm13 = vmpackc.low %vm4394_vm1, %vm4393_vm9 }
 0x211   :  { %vm4410_vm14 = vcmp.eq.s32.totalorder %v26575_v12, %v22227_v62 }
 0x212   :  { %19254 = vmatpush3.bf16.msk.msra.mxu1 %vm19253_vm2, %v26493_v14  ;;  %vm19263_vm11 = vmpackc.low %vm4410_vm14, %vm4409_vm5  ;;  %vm4411_vm2 = vcmp.eq.s32.totalorder %v26579_v17, %v22227_v62  ;;  %vm4835_vm5 = vcmp.eq.s32.totalorder %v26538_v13, %v22359_v21  ;;  %vm4836_vm14 = vcmp.eq.s32.totalorder %v26539_v25, %v22359_v21 }
 0x213   :  { %1540 = vmatmul.mubr.f32.gmra.mrb[18].mxu0 %v26553_v9  ;;  %19256 = vmatprep.subr.msk.bf16.mxu1 %vm19255_vm8, %v26493_v14  ;;  %vm4412_vm8 = vcmp.eq.s32.totalorder %v26580_v10, %v22227_v62  ;;  %vm19309_vm9 = vmpackc.low %vm4836_vm14, %vm4835_vm5 }
 0x214   :  { %vm19267_vm7 = vmpackc.low %vm4412_vm8, %vm4411_vm2  ;;  %vm4837_vm2 = vcmp.eq.s32.totalorder %v20774_v29, %v22359_v21  ;;  %vm4838_vm8 = vcmp.eq.s32.totalorder %v20787_v31, %v22359_v21 }
 0x216   :  { %19258 = vmatpush3.bf16.msk.msra.mxu1 %vm19257_vm10, %v26493_v14  ;;  %vm4851_vm10 = vcmp.eq.s32.totalorder %v26536_v8, %v22359_v21 }
 0x217   :  { %v15969_v24 = vpop.f32.mrb[16].mxu1  ;;  %19260 = vmatprep.subr.msk.bf16.mxu1 %vm19259_vm6, %v26493_v14  ;;  %vm4852_vm6 = vcmp.eq.s32.totalorder %v26537_v15, %v22359_v21 }
 0x218   :  { %v15970_v9 = vpop.f32.mrb[17].mxu1  ;;  %vm19307_vm4 = vmpackc.low %vm4852_vm6, %vm4851_vm10  ;;  %vm4839_vm10 = vcmp.eq.s32.totalorder %v20839_v38, %v22359_v21  ;;  %vm4840_vm6 = vcmp.eq.s32.totalorder %v20842_v39, %v22359_v21 }
 0x219   :  { %v22349_v11 = vadd.f32 %v15970_v9, %v15969_v24  ;;  %v26581_v24 = vld [vmem:[#allocation54_spill] sm:$0xff]  ;;  %v26582_v9 = vld [vmem:[#allocation55_spill] sm:$0xff]  ;;  %vm19317_vm5 = vmpackc.low %vm4840_vm6, %vm4839_vm10 }
 0x21a   :  { %19262 = vmatpush3.bf16.msk.msra.mxu1 %vm19261_vm3, %v26493_v14  ;;  %vm4395_vm15 = vcmp.eq.s32.totalorder %v26581_v24, %v22227_v62  ;;  %vm4396_vm12 = vcmp.eq.s32.totalorder %v26582_v9, %v22227_v62  ;;  %vm4853_vm3 = vcmp.eq.s32.totalorder %v26540_v16, %v22359_v21  ;;  %v26586_v62 = vld [vmem:[#allocation61_spill] sm:$0xff] }
 0x21b   :  { %26578 = vst [vmem:[#allocation5_spill] sm:$0xff] %v22349_v11  ;;  %v15972_v19 = vpop.f32.mrb[18].mxu1  ;;  %19264 = vmatprep.subr.msk.bf16.mxu1 %vm19263_vm11, %v26493_v14  ;;  %vm19269_vm0 = vmpackc.low %vm4396_vm12, %vm4395_vm15  ;;  %vm4854_vm11 = vcmp.eq.s32.totalorder %v26541_v6, %v22359_v21 }
 0x21c   :  { %v15973_v5 = vpop.f32.mrb[19].mxu1  ;;  %vm19311_vm1 = vmpackc.low %vm4854_vm11, %vm4853_vm3  ;;  %vm4841_vm3 = vcmp.eq.s32.totalorder %v26564_v58, %v22359_v21  ;;  %vm4842_vm11 = vcmp.eq.s32.totalorder %v26565_v2, %v22359_v21 }
 0x21d   :  { %v22366_v11 = vadd.f32 %v15973_v5, %v15972_v19  ;;  %v26584_v5 = vld [vmem:[#allocation59_spill] sm:$0xff]  ;;  %vm19313_vm15 = vmpackc.low %vm4838_vm8, %vm4837_vm2 }
 0x21e   :  { %19266 = vmatpush3.bf16.msk.msra.mxu1 %vm19265_vm13, %v26493_v14  ;;  %vm4855_vm13 = vcmp.eq.s32.totalorder %v20810_v34, %v22359_v21  ;;  %v26585_v19 = vld [vmem:[#allocation63_spill] sm:$0xff]  ;;  %vm19321_vm2 = vmpackc.low %vm4842_vm11, %vm4841_vm3 }
 0x21f   :  { %26583 = vst [vmem:[#allocation10_spill] sm:$0xff] %v22366_v11  ;;  %19268 = vmatprep.subr.msk.bf16.mxu1 %vm19267_vm7, %v26493_v14  ;;  %vm4856_vm7 = vcmp.eq.s32.totalorder %v20821_v35, %v22359_v21 }
 0x220   :  { %vm19315_vm12 = vmpackc.low %vm4856_vm7, %vm4855_vm13  ;;  %vm4843_vm13 = vcmp.eq.s32.totalorder %v26568_v18, %v22359_v21  ;;  %vm4844_vm7 = vcmp.eq.s32.totalorder %v26569_v59, %v22359_v21 }
 0x221   :  { %vm19325_vm10 = vmpackc.low %vm4844_vm7, %vm4843_vm13 }
 0x222   :  { %19270 = vmatpush3.bf16.msk.msra.mxu1 %vm19269_vm0, %v26493_v14  ;;  %vm4857_vm0 = vcmp.eq.s32.totalorder %v20859_v42, %v22359_v21 }
 0x223   :  { %19308 = vmatprep.subr.msk.bf16.mxu1 %vm19307_vm4, %v26493_v14  ;;  %vm4858_vm4 = vcmp.eq.s32.totalorder %v20872_v43, %v22359_v21 }
 0x224   :  { %vm19319_vm14 = vmpackc.low %vm4858_vm4, %vm4857_vm0  ;;  %vm4845_vm0 = vcmp.eq.s32.totalorder %v26572_v47, %v22359_v21  ;;  %vm4846_vm4 = vcmp.eq.s32.totalorder %v26573_v50, %v22359_v21 }
 0x225   :  { %4638 = vmatmul.mubr.f32.vlgmr.msra.gmra.mrb[44].mxu1 %v26584_v5  ;;  %vm19329_vm3 = vmpackc.low %vm4846_vm4, %vm4845_vm0 }
 0x226   :  { %4642 = vmatprep.mubr.f32.mxu1 %v26585_v19  ;;  %19310 = vmatpush3.bf16.msk.msra.mxu1 %vm19309_vm9, %v26493_v14  ;;  %vm4859_vm9 = vcmp.eq.s32.totalorder %v26566_v54, %v22359_v21 }
 0x227   :  { %19312 = vmatprep.subr.msk.bf16.mxu1 %vm19311_vm1, %v26493_v14  ;;  %vm4860_vm1 = vcmp.eq.s32.totalorder %v26567_v51, %v22359_v21 }
 0x228   :  { %vm19323_vm8 = vmpackc.low %vm4860_vm1, %vm4859_vm9  ;;  %vm4847_vm9 = vcmp.eq.s32.totalorder %v26576_v4, %v22359_v21  ;;  %vm4848_vm1 = vcmp.eq.s32.totalorder %v26577_v7, %v22359_v21 }
 0x229   :  { %4643 = vmatmul.mubr.f32.gmra.mrb[46].mxu1 %v26586_v62  ;;  %vm19333_vm13 = vmpackc.low %vm4848_vm1, %vm4847_vm9 }
 0x22a   :  { %19314 = vmatpush3.bf16.msk.msra.mxu1 %vm19313_vm15, %v26493_v14  ;;  %5091 = vmatprep.mubr.f32.mxu1 %v21161_v3  ;;  %vm4861_vm15 = vcmp.eq.s32.totalorder %v26570_v63, %v22359_v21 }
 0x22b   :  { %19316 = vmatprep.subr.msk.bf16.mxu1 %vm19315_vm12, %v26493_v14  ;;  %vm4862_vm12 = vcmp.eq.s32.totalorder %v26571_v55, %v22359_v21 }
 0x22c   :  { %vm19327_vm6 = vmpackc.low %vm4862_vm12, %vm4861_vm15  ;;  %vm4849_vm15 = vcmp.eq.s32.totalorder %v26581_v24, %v22359_v21  ;;  %vm4850_vm12 = vcmp.eq.s32.totalorder %v26582_v9, %v22359_v21 }
 0x22d   :  { %vm19337_vm0 = vmpackc.low %vm4850_vm12, %vm4849_vm15 }
 0x22e   :  { %19318 = vmatpush3.bf16.msk.msra.mxu1 %vm19317_vm5, %v26493_v14  ;;  %vm4863_vm5 = vcmp.eq.s32.totalorder %v26574_v46, %v22359_v21 }
 0x22f   :  { %19320 = vmatprep.subr.msk.bf16.mxu1 %vm19319_vm14, %v26493_v14  ;;  %vm4864_vm14 = vcmp.eq.s32.totalorder %v26575_v12, %v22359_v21 }
 0x230   :  { %vm19331_vm11 = vmpackc.low %vm4864_vm14, %vm4863_vm5  ;;  %vm5289_vm5 = vcmp.eq.s32.totalorder %v26538_v13, %v22452_v61  ;;  %vm5290_vm14 = vcmp.eq.s32.totalorder %v26539_v25, %v22452_v61 }
 0x231   :  { %vm19377_vm9 = vmpackc.low %vm5290_vm14, %vm5289_vm5 }
 0x232   :  { %19322 = vmatpush3.bf16.msk.msra.mxu1 %vm19321_vm2, %v26493_v14  ;;  %vm4865_vm2 = vcmp.eq.s32.totalorder %v26579_v17, %v22359_v21 }
 0x233   :  { %19324 = vmatprep.subr.msk.bf16.mxu1 %vm19323_vm8, %v26493_v14  ;;  %vm4866_vm8 = vcmp.eq.s32.totalorder %v26580_v10, %v22359_v21 }
 0x234   :  { %vm19335_vm7 = vmpackc.low %vm4866_vm8, %vm4865_vm2  ;;  %vm5291_vm2 = vcmp.eq.s32.totalorder %v20774_v29, %v22452_v61  ;;  %vm5292_vm8 = vcmp.eq.s32.totalorder %v20787_v31, %v22452_v61 }
 0x235   :  { %vm19381_vm15 = vmpackc.low %vm5292_vm8, %vm5291_vm2 }
 0x236   :  { %19326 = vmatpush3.bf16.msk.msra.mxu1 %vm19325_vm10, %v26493_v14  ;;  %vm5305_vm10 = vcmp.eq.s32.totalorder %v26536_v8, %v22452_v61 }
 0x237   :  { %v16051_v11 = vpop.f32.mrb[20].mxu1  ;;  %19328 = vmatprep.subr.msk.bf16.mxu1 %vm19327_vm6, %v26493_v14  ;;  %vm5306_vm6 = vcmp.eq.s32.totalorder %v26537_v15, %v22452_v61 }
 0x238   :  { %v16052_v1 = vpop.f32.mrb[21].mxu1  ;;  %vm19375_vm4 = vmpackc.low %vm5306_vm6, %vm5305_vm10  ;;  %vm5293_vm10 = vcmp.eq.s32.totalorder %v20839_v38, %v22452_v61  ;;  %vm5294_vm6 = vcmp.eq.s32.totalorder %v20842_v39, %v22452_v61 }
 0x239   :  { %v22442_v0 = vadd.f32 %v16052_v1, %v16051_v11  ;;  %vm19385_vm5 = vmpackc.low %vm5294_vm6, %vm5293_vm10  ;;  %v22545_v11 = vld [vmem:[%s26231_s2 + $0xc] ss:$0 sm:$0xff] }
 0x23a   :  { %19330 = vmatpush3.bf16.msk.msra.mxu1 %vm19329_vm3, %v26493_v14  ;;  %vm5307_vm3 = vcmp.eq.s32.totalorder %v26540_v16, %v22452_v61 }
 0x23b   :  { %26587 = vst [vmem:[#allocation12_spill] sm:$0xff] %v22442_v0  ;;  %v16054_v60 = vpop.f32.mrb[22].mxu1  ;;  %19332 = vmatprep.subr.msk.bf16.mxu1 %vm19331_vm11, %v26493_v14  ;;  %vm5308_vm11 = vcmp.eq.s32.totalorder %v26541_v6, %v22452_v61 }
 0x23c   :  { %v16055_v57 = vpop.f32.mrb[23].mxu1  ;;  %vm19379_vm1 = vmpackc.low %vm5308_vm11, %vm5307_vm3  ;;  %vm5295_vm3 = vcmp.eq.s32.totalorder %v26564_v58, %v22452_v61  ;;  %vm5296_vm11 = vcmp.eq.s32.totalorder %v26565_v2, %v22452_v61 }
 0x23d   :  { %v22459_v1 = vadd.f32 %v16055_v57, %v16054_v60  ;;  %vm19389_vm2 = vmpackc.low %vm5296_vm11, %vm5295_vm3 }
 0x23e   :  { %19334 = vmatpush3.bf16.msk.msra.mxu1 %vm19333_vm13, %v26493_v14  ;;  %vm5309_vm13 = vcmp.eq.s32.totalorder %v20810_v34, %v22452_v61 }
 0x23f   :  { %26588 = vst [vmem:[#allocation13_spill] sm:$0xff] %v22459_v1  ;;  %19336 = vmatprep.subr.msk.bf16.mxu1 %vm19335_vm7, %v26493_v14  ;;  %vm5310_vm7 = vcmp.eq.s32.totalorder %v20821_v35, %v22452_v61 }
 0x240   :  { %vm19383_vm12 = vmpackc.low %vm5310_vm7, %vm5309_vm13  ;;  %vm5297_vm13 = vcmp.eq.s32.totalorder %v26568_v18, %v22452_v61  ;;  %vm5298_vm7 = vcmp.eq.s32.totalorder %v26569_v59, %v22452_v61 }
 0x241   :  { %vm19393_vm10 = vmpackc.low %vm5298_vm7, %vm5297_vm13 }
 0x242   :  { %19338 = vmatpush3.bf16.msk.msra.mxu1 %vm19337_vm0, %v26493_v14  ;;  %vm5311_vm0 = vcmp.eq.s32.totalorder %v20859_v42, %v22452_v61 }
 0x243   :  { %19376 = vmatprep.subr.msk.bf16.mxu1 %vm19375_vm4, %v26493_v14  ;;  %vm5312_vm4 = vcmp.eq.s32.totalorder %v20872_v43, %v22452_v61 }
 0x244   :  { %vm19387_vm14 = vmpackc.low %vm5312_vm4, %vm5311_vm0  ;;  %vm5299_vm0 = vcmp.eq.s32.totalorder %v26572_v47, %v22452_v61  ;;  %vm5300_vm4 = vcmp.eq.s32.totalorder %v26573_v50, %v22452_v61 }
 0x245   :  { %5092 = vmatmul.mubr.f32.vlgmr.msra.gmra.mrb[48].mxu1 %v26584_v5  ;;  %vm19397_vm3 = vmpackc.low %vm5300_vm4, %vm5299_vm0 }
 0x246   :  { %5096 = vmatprep.mubr.f32.mxu1 %v26585_v19  ;;  %19378 = vmatpush3.bf16.msk.msra.mxu1 %vm19377_vm9, %v26493_v14  ;;  %vm5313_vm9 = vcmp.eq.s32.totalorder %v26566_v54, %v22452_v61 }
 0x247   :  { %19380 = vmatprep.subr.msk.bf16.mxu1 %vm19379_vm1, %v26493_v14  ;;  %vm5314_vm1 = vcmp.eq.s32.totalorder %v26567_v51, %v22452_v61 }
 0x248   :  { %vm19391_vm8 = vmpackc.low %vm5314_vm1, %vm5313_vm9  ;;  %vm5301_vm9 = vcmp.eq.s32.totalorder %v26576_v4, %v22452_v61  ;;  %vm5302_vm1 = vcmp.eq.s32.totalorder %v26577_v7, %v22452_v61 }
 0x249   :  { %5097 = vmatmul.mubr.f32.gmra.mrb[50].mxu1 %v26586_v62  ;;  %vm19401_vm13 = vmpackc.low %vm5302_vm1, %vm5301_vm9 }
 0x24a   :  { %19382 = vmatpush3.bf16.msk.msra.mxu1 %vm19381_vm15, %v26493_v14  ;;  %5545 = vmatprep.mubr.f32.mxu1 %v21161_v3  ;;  %vm5315_vm15 = vcmp.eq.s32.totalorder %v26570_v63, %v22452_v61 }
 0x24b   :  { %19384 = vmatprep.subr.msk.bf16.mxu1 %vm19383_vm12, %v26493_v14  ;;  %vm5316_vm12 = vcmp.eq.s32.totalorder %v26571_v55, %v22452_v61 }
 0x24c   :  { %vm19395_vm6 = vmpackc.low %vm5316_vm12, %vm5315_vm15  ;;  %vm5303_vm15 = vcmp.eq.s32.totalorder %v26581_v24, %v22452_v61  ;;  %vm5304_vm12 = vcmp.eq.s32.totalorder %v26582_v9, %v22452_v61 }
 0x24d   :  { %vm19405_vm0 = vmpackc.low %vm5304_vm12, %vm5303_vm15 }
 0x24e   :  { %19386 = vmatpush3.bf16.msk.msra.mxu1 %vm19385_vm5, %v26493_v14  ;;  %vm5317_vm5 = vcmp.eq.s32.totalorder %v26574_v46, %v22452_v61 }
 0x24f   :  { %19388 = vmatprep.subr.msk.bf16.mxu1 %vm19387_vm14, %v26493_v14  ;;  %vm5318_vm14 = vcmp.eq.s32.totalorder %v26575_v12, %v22452_v61 }
 0x250   :  { %vm19399_vm11 = vmpackc.low %vm5318_vm14, %vm5317_vm5  ;;  %vm5743_vm5 = vcmp.eq.s32.totalorder %v26538_v13, %v22545_v11  ;;  %vm5744_vm14 = vcmp.eq.s32.totalorder %v26539_v25, %v22545_v11 }
 0x251   :  { %vm19445_vm9 = vmpackc.low %vm5744_vm14, %vm5743_vm5 }
 0x252   :  { %19390 = vmatpush3.bf16.msk.msra.mxu1 %vm19389_vm2, %v26493_v14  ;;  %vm5319_vm2 = vcmp.eq.s32.totalorder %v26579_v17, %v22452_v61 }
 0x253   :  { %19392 = vmatprep.subr.msk.bf16.mxu1 %vm19391_vm8, %v26493_v14  ;;  %vm5320_vm8 = vcmp.eq.s32.totalorder %v26580_v10, %v22452_v61  ;;  %v13088_v61 = vld [vmem:[%s26232_s3 + $0x40] sm:$0xff] }
 0x254   :  { %vm19403_vm7 = vmpackc.low %vm5320_vm8, %vm5319_vm2  ;;  %vm5745_vm2 = vcmp.eq.s32.totalorder %v20774_v29, %v22545_v11  ;;  %vm5746_vm8 = vcmp.eq.s32.totalorder %v20787_v31, %v22545_v11 }
 0x255   :  { %vm19449_vm15 = vmpackc.low %vm5746_vm8, %vm5745_vm2 }
 0x256   :  { %19394 = vmatpush3.bf16.msk.msra.mxu1 %vm19393_vm10, %v26493_v14  ;;  %vm5759_vm10 = vcmp.eq.s32.totalorder %v26536_v8, %v22545_v11 }
 0x257   :  { %v16133_v57 = vpop.f32.mrb[24].mxu1  ;;  %19396 = vmatprep.subr.msk.bf16.mxu1 %vm19395_vm6, %v26493_v14  ;;  %vm5760_vm6 = vcmp.eq.s32.totalorder %v26537_v15, %v22545_v11 }
 0x258   :  { %v16134_v60 = vpop.f32.mrb[25].mxu1  ;;  %vm19443_vm4 = vmpackc.low %vm5760_vm6, %vm5759_vm10  ;;  %vm5747_vm10 = vcmp.eq.s32.totalorder %v20839_v38, %v22545_v11  ;;  %vm5748_vm6 = vcmp.eq.s32.totalorder %v20842_v39, %v22545_v11 }
 0x259   :  { %v22535_v21 = vadd.f32 %v16134_v60, %v16133_v57  ;;  %vm19453_vm5 = vmpackc.low %vm5748_vm6, %vm5747_vm10  ;;  %vm5770_vm10 = vcmp.eq.s32.totalorder %v26571_v55, %v22545_v11 }
 0x25a   :  { %19398 = vmatpush3.bf16.msk.msra.mxu1 %vm19397_vm3, %v26493_v14  ;;  %vm5761_vm3 = vcmp.eq.s32.totalorder %v26540_v16, %v22545_v11 }
 0x25b   :  { %v16136_v1 = vpop.f32.mrb[26].mxu1  ;;  %19400 = vmatprep.subr.msk.bf16.mxu1 %vm19399_vm11, %v26493_v14  ;;  %vm5762_vm11 = vcmp.eq.s32.totalorder %v26541_v6, %v22545_v11 }
 0x25c   :  { %v16137_v0 = vpop.f32.mrb[27].mxu1  ;;  %vm19447_vm1 = vmpackc.low %vm5762_vm11, %vm5761_vm3  ;;  %vm5749_vm3 = vcmp.eq.s32.totalorder %v26564_v58, %v22545_v11  ;;  %vm5750_vm11 = vcmp.eq.s32.totalorder %v26565_v2, %v22545_v11 }
 0x25d   :  { %v22552_v57 = vadd.f32 %v16137_v0, %v16136_v1  ;;  %vm19457_vm2 = vmpackc.low %vm5750_vm11, %vm5749_vm3  ;;  %vm5772_vm3 = vcmp.eq.s32.totalorder %v26575_v12, %v22545_v11 }
 0x25e   :  { %19402 = vmatpush3.bf16.msk.msra.mxu1 %vm19401_vm13, %v26493_v14  ;;  %vm5763_vm13 = vcmp.eq.s32.totalorder %v20810_v34, %v22545_v11 }
 0x25f   :  { %19404 = vmatprep.subr.msk.bf16.mxu1 %vm19403_vm7, %v26493_v14  ;;  %vm5764_vm7 = vcmp.eq.s32.totalorder %v20821_v35, %v22545_v11 }
 0x260   :  { %vm19451_vm12 = vmpackc.low %vm5764_vm7, %vm5763_vm13  ;;  %vm5751_vm13 = vcmp.eq.s32.totalorder %v26568_v18, %v22545_v11  ;;  %vm5752_vm7 = vcmp.eq.s32.totalorder %v26569_v59, %v22545_v11 }
 0x261   :  { %vm19461_vm6 = vmpackc.low %vm5752_vm7, %vm5751_vm13  ;;  %vm5774_vm13 = vcmp.eq.s32.totalorder %v26580_v10, %v22545_v11 }
 0x262   :  { %19406 = vmatpush3.bf16.msk.msra.mxu1 %vm19405_vm0, %v26493_v14  ;;  %vm5765_vm0 = vcmp.eq.s32.totalorder %v20859_v42, %v22545_v11 }
 0x263   :  { %19444 = vmatprep.subr.msk.bf16.mxu1 %vm19443_vm4, %v26493_v14  ;;  %vm5766_vm4 = vcmp.eq.s32.totalorder %v20872_v43, %v22545_v11 }
 0x264   :  { %vm19455_vm14 = vmpackc.low %vm5766_vm4, %vm5765_vm0  ;;  %vm5753_vm4 = vcmp.eq.s32.totalorder %v26572_v47, %v22545_v11 }
 0x265   :  { %5546 = vmatmul.mubr.f32.vlgmr.msra.gmra.mrb[52].mxu1 %v26584_v5 }
 0x266   :  { %5550 = vmatprep.mubr.f32.mxu1 %v26585_v19  ;;  %19446 = vmatpush3.bf16.msk.msra.mxu1 %vm19445_vm9, %v26493_v14  ;;  %vm5767_vm9 = vcmp.eq.s32.totalorder %v26566_v54, %v22545_v11 }
 0x267   :  { %19448 = vmatprep.subr.msk.bf16.mxu1 %vm19447_vm1, %v26493_v14  ;;  %vm5768_vm1 = vcmp.eq.s32.totalorder %v26567_v51, %v22545_v11 }
 0x268   :  { %vm19459_vm8 = vmpackc.low %vm5768_vm1, %vm5767_vm9  ;;  %vm5755_vm1 = vcmp.eq.s32.totalorder %v26576_v4, %v22545_v11 }
 0x269   :  { %5551 = vmatmul.mubr.f32.gmra.mrb[54].mxu1 %v26586_v62 }
 0x26a   :  { %19450 = vmatpush3.bf16.msk.msra.mxu1 %vm19449_vm15, %v26493_v14  ;;  %5999 = vmatprep.mubr.f32.mxu1 %v21161_v3  ;;  %vm26589_vm15 = vcmask 130048  }
 0x26b   :  { %19452 = vmatprep.subr.msk.bf16.mxu1 %vm19451_vm12, %v26493_v14  ;;  %17544 = vmatprep.mubr.msk.f32.mxu0 %vm26589_vm15, %v13088_v61  ;;  %vm5769_vm12 = vcmp.eq.s32.totalorder %v26570_v63, %v22545_v11  ;;  %v22640_v61 = vld [vmem:[%s26231_s2 + $0xd] ss:$0 sm:$0xff] }
 0x26c   :  { %vm19463_vm0 = vmpackc.low %vm5770_vm10, %vm5769_vm12  ;;  %vm5757_vm12 = vcmp.eq.s32.totalorder %v26581_v24, %v22545_v11  ;;  %vm5758_vm10 = vcmp.eq.s32.totalorder %v26582_v9, %v22545_v11 }
 0x26e   :  { %19454 = vmatpush3.bf16.msk.msra.mxu1 %vm19453_vm5, %v26493_v14  ;;  %vm5754_vm5 = vcmp.eq.s32.totalorder %v26573_v50, %v22545_v11 }
 0x26f   :  { %19456 = vmatprep.subr.msk.bf16.mxu1 %vm19455_vm14, %v26493_v14  ;;  %vm5771_vm14 = vcmp.eq.s32.totalorder %v26574_v46, %v22545_v11  ;;  %vm19465_vm11 = vmpackc.low %vm5754_vm5, %vm5753_vm4 }
 0x270   :  { %vm19467_vm9 = vmpackc.low %vm5772_vm3, %vm5771_vm14  ;;  %vm6197_vm14 = vcmp.eq.s32.totalorder %v26538_v13, %v22640_v61  ;;  %vm6198_vm3 = vcmp.eq.s32.totalorder %v26539_v25, %v22640_v61 }
 0x271   :  { %vm19473_vm4 = vmpackc.low %vm5758_vm10, %vm5757_vm12 }
 0x272   :  { %19458 = vmatpush3.bf16.msk.msra.mxu1 %vm19457_vm2, %v26493_v14  ;;  %vm5756_vm2 = vcmp.eq.s32.totalorder %v26577_v7, %v22545_v11 }
 0x273   :  { %19460 = vmatprep.subr.msk.bf16.mxu1 %vm19459_vm8, %v26493_v14  ;;  %vm5773_vm8 = vcmp.eq.s32.totalorder %v26579_v17, %v22545_v11  ;;  %vm19469_vm7 = vmpackc.low %vm5756_vm2, %vm5755_vm1 }
 0x274   :  { %vm19471_vm15 = vmpackc.low %vm5774_vm13, %vm5773_vm8  ;;  %vm6199_vm8 = vcmp.eq.s32.totalorder %v20774_v29, %v22640_v61  ;;  %vm6200_vm13 = vcmp.eq.s32.totalorder %v20787_v31, %v22640_v61 }
 0x275   :  { %vm19513_vm1 = vmpackc.low %vm6198_vm3, %vm6197_vm14 }
 0x276   :  { %19462 = vmatpush3.bf16.msk.msra.mxu1 %vm19461_vm6, %v26493_v14  ;;  %vm6213_vm6 = vcmp.eq.s32.totalorder %v26536_v8, %v22640_v61  ;;  %vm19517_vm12 = vmpackc.low %vm6200_vm13, %vm6199_vm8 }
 0x277   :  { %v16171_v0 = vpop.f32.mrb[28].mxu1  ;;  %19464 = vmatprep.subr.msk.bf16.mxu1 %vm19463_vm0, %v26493_v14  ;;  %vm6214_vm0 = vcmp.eq.s32.totalorder %v26537_v15, %v22640_v61 }
 0x278   :  { %v16172_v1 = vpop.f32.mrb[29].mxu1  ;;  %vm19511_vm5 = vmpackc.low %vm6214_vm0, %vm6213_vm6  ;;  %vm6201_vm6 = vcmp.eq.s32.totalorder %v20839_v38, %v22640_v61  ;;  %vm6202_vm0 = vcmp.eq.s32.totalorder %v20842_v39, %v22640_v61 }
 0x279   :  { %v16173_v60 = vadd.f32 %v16172_v1, %v16171_v0  ;;  %vm19521_vm14 = vmpackc.low %vm6202_vm0, %vm6201_vm6 }
 0x27a   :  { %19466 = vmatpush3.bf16.msk.msra.mxu1 %vm19465_vm11, %v26493_v14  ;;  %vm6215_vm11 = vcmp.eq.s32.totalorder %v26540_v16, %v22640_v61 }
 0x27b   :  { %v2899_v56 = vadd.f32 %v16173_v60, %v22535_v21  ;;  %v16174_v53 = vpop.f32.mrb[30].mxu1  ;;  %19468 = vmatprep.subr.msk.bf16.mxu1 %vm19467_vm9, %v26493_v14  ;;  %vm6216_vm9 = vcmp.eq.s32.totalorder %v26541_v6, %v22640_v61 }
 0x27c   :  { %v16175_v0 = vpop.f32.mrb[31].mxu1  ;;  %vm19515_vm2 = vmpackc.low %vm6216_vm9, %vm6215_vm11  ;;  %vm6203_vm11 = vcmp.eq.s32.totalorder %v26564_v58, %v22640_v61  ;;  %vm6204_vm9 = vcmp.eq.s32.totalorder %v26565_v2, %v22640_v61 }
 0x27d   :  { %v16176_v1 = vadd.f32 %v16175_v0, %v16174_v53  ;;  %vm19525_vm8 = vmpackc.low %vm6204_vm9, %vm6203_vm11 }
 0x27e   :  { %19470 = vmatpush3.bf16.msk.msra.mxu1 %vm19469_vm7, %v26493_v14  ;;  %vm6217_vm7 = vcmp.eq.s32.totalorder %v20810_v34, %v22640_v61 }
 0x27f   :  { %v2904_v21 = vadd.f32 %v16176_v1, %v22552_v57  ;;  %19472 = vmatprep.subr.msk.bf16.mxu1 %vm19471_vm15, %v26493_v14  ;;  %vm6218_vm15 = vcmp.eq.s32.totalorder %v20821_v35, %v22640_v61 }
 0x280   :  { %vm19519_vm10 = vmpackc.low %vm6218_vm15, %vm6217_vm7  ;;  %vm6205_vm7 = vcmp.eq.s32.totalorder %v26568_v18, %v22640_v61  ;;  %vm6206_vm15 = vcmp.eq.s32.totalorder %v26569_v59, %v22640_v61 }
 0x281   :  { %v22663_v53 = vpack.c.bf16 %v2904_v21, %v2899_v56  ;;  %vm19529_vm6 = vmpackc.low %vm6206_vm15, %vm6205_vm7  ;;  %v26592_v21 = vld [vmem:[#allocation29_spill] sm:$0xff] }
 0x282   :  { %19474 = vmatpush3.bf16.msk.msra.mxu1 %vm19473_vm4, %v26493_v14  ;;  %vm6219_vm4 = vcmp.eq.s32.totalorder %v20859_v42, %v22640_v61 }
 0x283   :  { %19512 = vmatprep.subr.msk.bf16.mxu1 %vm19511_vm5, %v26493_v14  ;;  %vm6220_vm5 = vcmp.eq.s32.totalorder %v20872_v43, %v22640_v61 }
 0x284   :  { %vm19523_vm3 = vmpackc.low %vm6220_vm5, %vm6219_vm4  ;;  %vm6207_vm4 = vcmp.eq.s32.totalorder %v26572_v47, %v22640_v61  ;;  %vm6208_vm5 = vcmp.eq.s32.totalorder %v26573_v50, %v22640_v61 }
 0x285   :  { %6000 = vmatmul.mubr.f32.vlgmr.msra.gmra.mrb[56].mxu1 %v26584_v5  ;;  %vm19533_vm11 = vmpackc.low %vm6208_vm5, %vm6207_vm4 }
 0x286   :  { %6004 = vmatprep.mubr.f32.mxu1 %v26585_v19  ;;  %19514 = vmatpush3.bf16.msk.msra.mxu1 %vm19513_vm1, %v26493_v14  ;;  %vm6221_vm1 = vcmp.eq.s32.totalorder %v26566_v54, %v22640_v61 }
 0x287   :  { %19516 = vmatprep.subr.msk.bf16.mxu1 %vm19515_vm2, %v26493_v14  ;;  %vm6222_vm2 = vcmp.eq.s32.totalorder %v26567_v51, %v22640_v61 }
 0x288   :  { %vm19527_vm13 = vmpackc.low %vm6222_vm2, %vm6221_vm1  ;;  %vm6209_vm1 = vcmp.eq.s32.totalorder %v26576_v4, %v22640_v61  ;;  %vm6210_vm2 = vcmp.eq.s32.totalorder %v26577_v7, %v22640_v61  ;;  %v26604_v7 = vld [vmem:[#allocation52_spill] sm:$0xff]  ;;  %v26605_v4 = vld [vmem:[#allocation53_spill] sm:$0xff] }
 0x289   :  { %6005 = vmatmul.mubr.f32.gmra.mrb[58].mxu1 %v26586_v62  ;;  %vm19537_vm7 = vmpackc.low %vm6210_vm2, %vm6209_vm1 }
 0x28a   :  { %19518 = vmatpush3.bf16.msk.msra.mxu1 %vm19517_vm12, %v26493_v14  ;;  %6453 = vmatprep.mubr.f32.mxu1 %v21161_v3  ;;  %vm6223_vm12 = vcmp.eq.s32.totalorder %v26570_v63, %v22640_v61  ;;  %v22916_v63 = vld [vmem:[%s26231_s2 + $0xf] ss:$0 sm:$0xff] }
 0x28b   :  { %19520 = vmatprep.subr.msk.bf16.mxu1 %vm19519_vm10, %v26493_v14  ;;  %vm6224_vm10 = vcmp.eq.s32.totalorder %v26571_v55, %v22640_v61 }
 0x28c   :  { %vm19531_vm0 = vmpackc.low %vm6224_vm10, %vm6223_vm12  ;;  %vm6211_vm12 = vcmp.eq.s32.totalorder %v26581_v24, %v22640_v61  ;;  %vm6212_vm10 = vcmp.eq.s32.totalorder %v26582_v9, %v22640_v61  ;;  %v26601_v24 = vld [vmem:[#allocation48_spill] sm:$0xff] }
 0x28d   :  { %vm19541_vm4 = vmpackc.low %vm6212_vm10, %vm6211_vm12 }
 0x28e   :  { %19522 = vmatpush3.bf16.msk.msra.mxu1 %vm19521_vm14, %v26493_v14  ;;  %vm6225_vm14 = vcmp.eq.s32.totalorder %v26574_v46, %v22640_v61 }
 0x28f   :  { %19524 = vmatprep.subr.msk.bf16.mxu1 %vm19523_vm3, %v26493_v14  ;;  %vm6226_vm3 = vcmp.eq.s32.totalorder %v26575_v12, %v22640_v61  ;;  %v22823_v12 = vld [vmem:[%s26231_s2 + $0xe] ss:$0 sm:$0xff] }
 0x290   :  { %vm19535_vm9 = vmpackc.low %vm6226_vm3, %vm6225_vm14  ;;  %vm6229_vm14 = vcmp.eq.s32.totalorder %v20736_v22, %v22640_v61  ;;  %vm6230_vm3 = vcmp.eq.s32.totalorder %v26545_v23, %v22640_v61 }
 0x291   :  { %vm19545_vm1 = vmpackc.low %vm6230_vm3, %vm6229_vm14 }
 0x292   :  { %19526 = vmatpush3.bf16.msk.msra.mxu1 %vm19525_vm8, %v26493_v14  ;;  %vm6227_vm8 = vcmp.eq.s32.totalorder %v26579_v17, %v22640_v61 }
 0x293   :  { %19528 = vmatprep.subr.msk.bf16.mxu1 %vm19527_vm13, %v26493_v14  ;;  %vm6228_vm13 = vcmp.eq.s32.totalorder %v26580_v10, %v22640_v61  ;;  %v26602_v10 = vld [vmem:[#allocation49_spill] sm:$0xff] }
 0x294   :  { %vm19539_vm15 = vmpackc.low %vm6228_vm13, %vm6227_vm8  ;;  %vm6231_vm8 = vcmp.eq.s32.totalorder %v20790_v32, %v22640_v61  ;;  %vm6232_vm13 = vcmp.eq.s32.totalorder %v20793_v33, %v22640_v61 }
 0x295   :  { %vm19549_vm12 = vmpackc.low %vm6232_vm13, %vm6231_vm8 }
 0x296   :  { %19530 = vmatpush3.bf16.msk.msra.mxu1 %vm19529_vm6, %v26493_v14  ;;  %vm6245_vm6 = vcmp.eq.s32.totalorder %v26543_v26, %v22640_v61 }
 0x297   :  { %v16253_v56 = vpop.f32.mrb[32].mxu1  ;;  %19532 = vmatprep.subr.msk.bf16.mxu1 %vm19531_vm0, %v26493_v14  ;;  %vm6246_vm0 = vcmp.eq.s32.totalorder %v26544_v30, %v22640_v61 }
 0x298   :  { %v16254_v11 = vpop.f32.mrb[33].mxu1  ;;  %vm19543_vm5 = vmpackc.low %vm6246_vm0, %vm6245_vm6  ;;  %vm6233_vm6 = vcmp.eq.s32.totalorder %v20845_v40, %v22640_v61  ;;  %vm6234_vm0 = vcmp.eq.s32.totalorder %v20856_v41, %v22640_v61 }
 0x299   :  { %v22725_v57 = vadd.f32 %v16254_v11, %v16253_v56  ;;  %vm19553_vm14 = vmpackc.low %vm6234_vm0, %vm6233_vm6  ;;  %v26593_v56 = vld [vmem:[#allocation32_spill] sm:$0xff]  ;;  %v26594_v11 = vld [vmem:[#allocation33_spill] sm:$0xff] }
 0x29a   :  { %19534 = vmatpush3.bf16.msk.msra.mxu1 %vm19533_vm11, %v26493_v14  ;;  %vm6247_vm11 = vcmp.eq.s32.totalorder %v20768_v27, %v22640_v61 }
 0x29b   :  { %26590 = vst [vmem:[#allocation8_spill] sm:$0xff] %v22725_v57  ;;  %v16256_v60 = vpop.f32.mrb[34].mxu1  ;;  %19536 = vmatprep.subr.msk.bf16.mxu1 %vm19535_vm9, %v26493_v14  ;;  %vm6248_vm9 = vcmp.eq.s32.totalorder %v20771_v28, %v22640_v61  ;;  %v26598_v57 = vld [vmem:[#allocation41_spill] sm:$0xff] }
 0x29c   :  { %v16257_v0 = vpop.f32.mrb[35].mxu1  ;;  %vm19547_vm2 = vmpackc.low %vm6248_vm9, %vm6247_vm11  ;;  %vm6235_vm11 = vcmp.eq.s32.totalorder %v20895_v48, %v22640_v61  ;;  %vm6236_vm9 = vcmp.eq.s32.totalorder %v20906_v49, %v22640_v61 }
 0x29d   :  { %v22737_v1 = vadd.f32 %v16257_v0, %v16256_v60  ;;  %vm19557_vm8 = vmpackc.low %vm6236_vm9, %vm6235_vm11  ;;  %v26595_v60 = vld [vmem:[#allocation36_spill] sm:$0xff]  ;;  %v26596_v0 = vld [vmem:[#allocation37_spill] sm:$0xff] }
 0x29e   :  { %19538 = vmatpush3.bf16.msk.msra.mxu1 %vm19537_vm7, %v26493_v14  ;;  %vm6249_vm7 = vcmp.eq.s32.totalorder %v20830_v36, %v22640_v61 }
 0x29f   :  { %26591 = vst [vmem:[#allocation9_spill] sm:$0xff] %v22737_v1  ;;  %19540 = vmatprep.subr.msk.bf16.mxu1 %vm19539_vm15, %v26493_v14  ;;  %vm6250_vm15 = vcmp.eq.s32.totalorder %v20833_v37, %v22640_v61  ;;  %v26597_v1 = vld [vmem:[#allocation40_spill] sm:$0xff] }
 0x2a0   :  { %vm19551_vm10 = vmpackc.low %vm6250_vm15, %vm6249_vm7  ;;  %vm6237_vm7 = vcmp.eq.s32.totalorder %v26593_v56, %v22640_v61  ;;  %vm6238_vm15 = vcmp.eq.s32.totalorder %v26594_v11, %v22640_v61 }
 0x2a1   :  { %vm19561_vm6 = vmpackc.low %vm6238_vm15, %vm6237_vm7 }
 0x2a2   :  { %19542 = vmatpush3.bf16.msk.msra.mxu1 %vm19541_vm4, %v26493_v14  ;;  %vm6251_vm4 = vcmp.eq.s32.totalorder %v20880_v44, %v22640_v61 }
 0x2a3   :  { %19544 = vmatprep.subr.msk.bf16.mxu1 %vm19543_vm5, %v26493_v14  ;;  %vm6252_vm5 = vcmp.eq.s32.totalorder %v20883_v45, %v22640_v61 }
 0x2a4   :  { %vm19555_vm3 = vmpackc.low %vm6252_vm5, %vm6251_vm4  ;;  %vm6239_vm4 = vcmp.eq.s32.totalorder %v26597_v1, %v22640_v61  ;;  %vm6240_vm5 = vcmp.eq.s32.totalorder %v26598_v57, %v22640_v61 }
 0x2a5   :  { %6454 = vmatmul.mubr.f32.vlgmr.msra.gmra.mrb[60].mxu1 %v26584_v5  ;;  %vm19565_vm11 = vmpackc.low %vm6240_vm5, %vm6239_vm4 }
 0x2a6   :  { %6458 = vmatprep.mubr.f32.mxu1 %v26585_v19  ;;  %19546 = vmatpush3.bf16.msk.msra.mxu1 %vm19545_vm1, %v26493_v14  ;;  %vm6253_vm1 = vcmp.eq.s32.totalorder %v20930_v52, %v22640_v61  ;;  %v26600_v19 = vld [vmem:[#allocation45_spill] sm:$0xff] }
 0x2a7   :  { %19548 = vmatprep.subr.msk.bf16.mxu1 %vm19547_vm2, %v26493_v14  ;;  %vm6254_vm2 = vcmp.eq.s32.totalorder %v26592_v21, %v22640_v61 }
 0x2a8   :  { %vm19559_vm13 = vmpackc.low %vm6254_vm2, %vm6253_vm1  ;;  %vm6241_vm1 = vcmp.eq.s32.totalorder %v26601_v24, %v22640_v61  ;;  %vm6242_vm2 = vcmp.eq.s32.totalorder %v26602_v10, %v22640_v61 }
 0x2a9   :  { %6459 = vmatmul.mubr.f32.gmra.mrb[62].mxu1 %v26586_v62  ;;  %v26599_v62 = vld [vmem:[#allocation44_spill] sm:$0xff]  ;;  %vm19569_vm7 = vmpackc.low %vm6242_vm2, %vm6241_vm1 }
 0x2aa   :  { %19550 = vmatpush3.bf16.msk.msra.mxu1 %vm19549_vm12, %v26493_v14  ;;  %6528 = vmatprep.mubr.f32.mxu1 %v21189_v20  ;;  %vm6255_vm12 = vcmp.eq.s32.totalorder %v26595_v60, %v22640_v61 }
 0x2ab   :  { %19552 = vmatprep.subr.msk.bf16.mxu1 %vm19551_vm10, %v26493_v14  ;;  %vm6256_vm10 = vcmp.eq.s32.totalorder %v26596_v0, %v22640_v61 }
 0x2ac   :  { %vm19563_vm0 = vmpackc.low %vm6256_vm10, %vm6255_vm12 }
 0x2ae   :  { %19554 = vmatpush3.bf16.msk.msra.mxu1 %vm19553_vm14, %v26493_v14  ;;  %vm6257_vm14 = vcmp.eq.s32.totalorder %v26599_v62, %v22640_v61 }
 0x2af   :  { %19556 = vmatprep.subr.msk.bf16.mxu1 %vm19555_vm3, %v26493_v14  ;;  %vm6258_vm3 = vcmp.eq.s32.totalorder %v26600_v19, %v22640_v61 }
 0x2b0   :  { %vm19567_vm9 = vmpackc.low %vm6258_vm3, %vm6257_vm14  ;;  %vm6683_vm14 = vcmp.eq.s32.totalorder %v20736_v22, %v22823_v12  ;;  %vm6684_vm3 = vcmp.eq.s32.totalorder %v26545_v23, %v22823_v12 }
 0x2b1   :  { %vm19613_vm1 = vmpackc.low %vm6684_vm3, %vm6683_vm14 }
 0x2b2   :  { %19558 = vmatpush3.bf16.msk.msra.mxu1 %vm19557_vm8, %v26493_v14  ;;  %vm6259_vm8 = vcmp.eq.s32.totalorder %v26604_v7, %v22640_v61 }
 0x2b3   :  { %19560 = vmatprep.subr.msk.bf16.mxu1 %vm19559_vm13, %v26493_v14  ;;  %vm6260_vm13 = vcmp.eq.s32.totalorder %v26605_v4, %v22640_v61 }
 0x2b4   :  { %vm19571_vm15 = vmpackc.low %vm6260_vm13, %vm6259_vm8  ;;  %vm6685_vm8 = vcmp.eq.s32.totalorder %v20790_v32, %v22823_v12  ;;  %vm6686_vm13 = vcmp.eq.s32.totalorder %v20793_v33, %v22823_v12 }
 0x2b6   :  { %19562 = vmatpush3.bf16.msk.msra.mxu1 %vm19561_vm6, %v26493_v14  ;;  %vm6699_vm6 = vcmp.eq.s32.totalorder %v26543_v26, %v22823_v12 }
 0x2b7   :  { %v16335_v5 = vpop.f32.mrb[36].mxu1  ;;  %19564 = vmatprep.subr.msk.bf16.mxu1 %vm19563_vm0, %v26493_v14  ;;  %vm6700_vm0 = vcmp.eq.s32.totalorder %v26544_v30, %v22823_v12 }
 0x2b8   :  { %v16336_v9 = vpop.f32.mrb[37].mxu1  ;;  %vm19611_vm5 = vmpackc.low %vm6700_vm0, %vm6699_vm6  ;;  %vm6687_vm6 = vcmp.eq.s32.totalorder %v20845_v40, %v22823_v12  ;;  %vm6688_vm0 = vcmp.eq.s32.totalorder %v20856_v41, %v22823_v12 }
 0x2b9   :  { %v22813_v17 = vadd.f32 %v16336_v9, %v16335_v5  ;;  %v26606_v9 = vld [vmem:[#allocation56_spill] sm:$0xff]  ;;  %v26607_v5 = vld [vmem:[#allocation57_spill] sm:$0xff]  ;;  %vm19621_vm14 = vmpackc.low %vm6688_vm0, %vm6687_vm6 }
 0x2ba   :  { %19566 = vmatpush3.bf16.msk.msra.mxu1 %vm19565_vm11, %v26493_v14  ;;  %vm6243_vm12 = vcmp.eq.s32.totalorder %v26606_v9, %v22640_v61  ;;  %vm6244_vm10 = vcmp.eq.s32.totalorder %v26607_v5, %v22640_v61  ;;  %vm6701_vm11 = vcmp.eq.s32.totalorder %v20768_v27, %v22823_v12  ;;  %v26611_v61 = vld [vmem:[#allocation62_spill] sm:$0xff] }
 0x2bb   :  { %26603 = vst [vmem:[#allocation11_spill] sm:$0xff] %v22813_v17  ;;  %v16338_v46 = vpop.f32.mrb[38].mxu1  ;;  %19568 = vmatprep.subr.msk.bf16.mxu1 %vm19567_vm9, %v26493_v14  ;;  %vm19573_vm4 = vmpackc.low %vm6244_vm10, %vm6243_vm12  ;;  %vm6702_vm9 = vcmp.eq.s32.totalorder %v20771_v28, %v22823_v12 }
 0x2bc   :  { %v16339_v50 = vpop.f32.mrb[39].mxu1  ;;  %vm19615_vm2 = vmpackc.low %vm6702_vm9, %vm6701_vm11  ;;  %vm6689_vm11 = vcmp.eq.s32.totalorder %v20895_v48, %v22823_v12  ;;  %vm6690_vm9 = vcmp.eq.s32.totalorder %v20906_v49, %v22823_v12 }
 0x2bd   :  { %v22830_v17 = vadd.f32 %v16339_v50, %v16338_v46  ;;  %v26609_v46 = vld [vmem:[#allocation60_spill] sm:$0xff]  ;;  %vm19617_vm12 = vmpackc.low %vm6686_vm13, %vm6685_vm8 }
 0x2be   :  { %19570 = vmatpush3.bf16.msk.msra.mxu1 %vm19569_vm7, %v26493_v14  ;;  %vm6703_vm7 = vcmp.eq.s32.totalorder %v20830_v36, %v22823_v12  ;;  %v26610_v50 = vld [vmem:[#allocation64_spill] sm:$0xff]  ;;  %vm19625_vm8 = vmpackc.low %vm6690_vm9, %vm6689_vm11 }
 0x2bf   :  { %26608 = vst [vmem:[#allocation65_spill] sm:$0xff] %v22830_v17  ;;  %19572 = vmatprep.subr.msk.bf16.mxu1 %vm19571_vm15, %v26493_v14  ;;  %vm6704_vm15 = vcmp.eq.s32.totalorder %v20833_v37, %v22823_v12 }
 0x2c0   :  { %vm19619_vm10 = vmpackc.low %vm6704_vm15, %vm6703_vm7  ;;  %vm6691_vm7 = vcmp.eq.s32.totalorder %v26593_v56, %v22823_v12  ;;  %vm6692_vm15 = vcmp.eq.s32.totalorder %v26594_v11, %v22823_v12 }
 0x2c1   :  { %vm19629_vm6 = vmpackc.low %vm6692_vm15, %vm6691_vm7 }
 0x2c2   :  { %19574 = vmatpush3.bf16.msk.msra.mxu1 %vm19573_vm4, %v26493_v14  ;;  %vm6705_vm4 = vcmp.eq.s32.totalorder %v20880_v44, %v22823_v12 }
 0x2c3   :  { %19612 = vmatprep.subr.msk.bf16.mxu1 %vm19611_vm5, %v26493_v14  ;;  %vm6706_vm5 = vcmp.eq.s32.totalorder %v20883_v45, %v22823_v12 }
 0x2c4   :  { %vm19623_vm3 = vmpackc.low %vm6706_vm5, %vm6705_vm4  ;;  %vm6693_vm4 = vcmp.eq.s32.totalorder %v26597_v1, %v22823_v12  ;;  %vm6694_vm5 = vcmp.eq.s32.totalorder %v26598_v57, %v22823_v12 }
 0x2c5   :  { %6529 = vmatmul.mubr.f32.vlgmr.msra.gmra.mrb[64].mxu1 %v26609_v46  ;;  %vm19633_vm11 = vmpackc.low %vm6694_vm5, %vm6693_vm4 }
 0x2c6   :  { %6533 = vmatprep.mubr.f32.mxu1 %v26610_v50  ;;  %19614 = vmatpush3.bf16.msk.msra.mxu1 %vm19613_vm1, %v26493_v14  ;;  %vm6707_vm1 = vcmp.eq.s32.totalorder %v20930_v52, %v22823_v12 }
 0x2c7   :  { %19616 = vmatprep.subr.msk.bf16.mxu1 %vm19615_vm2, %v26493_v14  ;;  %vm6708_vm2 = vcmp.eq.s32.totalorder %v26592_v21, %v22823_v12 }
 0x2c8   :  { %vm19627_vm13 = vmpackc.low %vm6708_vm2, %vm6707_vm1  ;;  %vm6695_vm1 = vcmp.eq.s32.totalorder %v26601_v24, %v22823_v12  ;;  %vm6696_vm2 = vcmp.eq.s32.totalorder %v26602_v10, %v22823_v12 }
 0x2c9   :  { %6534 = vmatmul.mubr.f32.gmra.mrb[66].mxu1 %v26611_v61  ;;  %vm19637_vm7 = vmpackc.low %vm6696_vm2, %vm6695_vm1 }
 0x2ca   :  { %19618 = vmatpush3.bf16.msk.msra.mxu1 %vm19617_vm12, %v26493_v14  ;;  %6982 = vmatprep.mubr.f32.mxu1 %v21189_v20  ;;  %vm6709_vm12 = vcmp.eq.s32.totalorder %v26595_v60, %v22823_v12 }
 0x2cb   :  { %19620 = vmatprep.subr.msk.bf16.mxu1 %vm19619_vm10, %v26493_v14  ;;  %vm6710_vm10 = vcmp.eq.s32.totalorder %v26596_v0, %v22823_v12 }
 0x2cc   :  { %vm19631_vm0 = vmpackc.low %vm6710_vm10, %vm6709_vm12  ;;  %vm6697_vm12 = vcmp.eq.s32.totalorder %v26606_v9, %v22823_v12  ;;  %vm6698_vm10 = vcmp.eq.s32.totalorder %v26607_v5, %v22823_v12 }
 0x2cd   :  { %vm19641_vm4 = vmpackc.low %vm6698_vm10, %vm6697_vm12 }
 0x2ce   :  { %19622 = vmatpush3.bf16.msk.msra.mxu1 %vm19621_vm14, %v26493_v14  ;;  %vm6711_vm14 = vcmp.eq.s32.totalorder %v26599_v62, %v22823_v12 }
 0x2cf   :  { %19624 = vmatprep.subr.msk.bf16.mxu1 %vm19623_vm3, %v26493_v14  ;;  %vm6712_vm3 = vcmp.eq.s32.totalorder %v26600_v19, %v22823_v12 }
 0x2d0   :  { %vm19635_vm9 = vmpackc.low %vm6712_vm3, %vm6711_vm14  ;;  %vm7137_vm14 = vcmp.eq.s32.totalorder %v20736_v22, %v22916_v63  ;;  %vm7138_vm3 = vcmp.eq.s32.totalorder %v26545_v23, %v22916_v63 }
 0x2d1   :  { %vm19681_vm1 = vmpackc.low %vm7138_vm3, %vm7137_vm14 }
 0x2d2   :  { %19626 = vmatpush3.bf16.msk.msra.mxu1 %vm19625_vm8, %v26493_v14  ;;  %vm6713_vm8 = vcmp.eq.s32.totalorder %v26604_v7, %v22823_v12 }
 0x2d3   :  { %19628 = vmatprep.subr.msk.bf16.mxu1 %vm19627_vm13, %v26493_v14  ;;  %vm6714_vm13 = vcmp.eq.s32.totalorder %v26605_v4, %v22823_v12 }
 0x2d4   :  { %vm19639_vm15 = vmpackc.low %vm6714_vm13, %vm6713_vm8  ;;  %vm7139_vm8 = vcmp.eq.s32.totalorder %v20790_v32, %v22916_v63  ;;  %vm7140_vm13 = vcmp.eq.s32.totalorder %v20793_v33, %v22916_v63 }
 0x2d5   :  { %vm19685_vm12 = vmpackc.low %vm7140_vm13, %vm7139_vm8 }
 0x2d6   :  { %19630 = vmatpush3.bf16.msk.msra.mxu1 %vm19629_vm6, %v26493_v14  ;;  %vm7153_vm6 = vcmp.eq.s32.totalorder %v26543_v26, %v22916_v63 }
 0x2d7   :  { %19632 = vmatprep.subr.msk.bf16.mxu1 %vm19631_vm0, %v26493_v14  ;;  %vm7154_vm0 = vcmp.eq.s32.totalorder %v26544_v30, %v22916_v63 }
 0x2d8   :  { %v16417_v17 = vpop.f32.mrb[40].mxu1  ;;  %vm19679_vm5 = vmpackc.low %vm7154_vm0, %vm7153_vm6  ;;  %vm7141_vm6 = vcmp.eq.s32.totalorder %v20845_v40, %v22916_v63  ;;  %vm7142_vm0 = vcmp.eq.s32.totalorder %v20856_v41, %v22916_v63 }
 0x2d9   :  { %v16418_v47 = vpop.f32.mrb[41].mxu1 }
 0x2da   :  { %v22910_v55 = vadd.f32 %v16418_v47, %v16417_v17  ;;  %19634 = vmatpush3.bf16.msk.msra.mxu1 %vm19633_vm11, %v26493_v14  ;;  %vm7155_vm11 = vcmp.eq.s32.totalorder %v20768_v27, %v22916_v63 }
 0x2db   :  { %19636 = vmatprep.subr.msk.bf16.mxu1 %vm19635_vm9, %v26493_v14  ;;  %vm7156_vm9 = vcmp.eq.s32.totalorder %v20771_v28, %v22916_v63 }
 0x2dc   :  { %26612 = vst [vmem:[#allocation66_spill] sm:$0xff] %v22910_v55  ;;  %v16420_v59 = vpop.f32.mrb[42].mxu1  ;;  %vm19683_vm2 = vmpackc.low %vm7156_vm9, %vm7155_vm11  ;;  %vm7143_vm9 = vcmp.eq.s32.totalorder %v20895_v48, %v22916_v63 }
 0x2dd   :  { %v16421_v17 = vpop.f32.mrb[43].mxu1  ;;  %vm19689_vm11 = vmpackc.low %vm7142_vm0, %vm7141_vm6 }
 0x2de   :  { %v22927_v47 = vadd.f32 %v16421_v17, %v16420_v59  ;;  %19638 = vmatpush3.bf16.msk.msra.mxu1 %vm19637_vm7, %v26493_v14  ;;  %vm7157_vm7 = vcmp.eq.s32.totalorder %v20830_v36, %v22916_v63 }
 0x2df   :  { %19640 = vmatprep.subr.msk.bf16.mxu1 %vm19639_vm15, %v26493_v14  ;;  %vm7158_vm15 = vcmp.eq.s32.totalorder %v20833_v37, %v22916_v63 }
 0x2e0   :  { %26613 = vst [vmem:[#allocation67_spill] sm:$0xff] %v22927_v47  ;;  %v26614_v47 = vld [vmem:[#allocation6_spill] sm:$0xff]  ;;  %vm19687_vm10 = vmpackc.low %vm7158_vm15, %vm7157_vm7  ;;  %vm7161_vm15 = vcmp.eq.s32.totalorder %v20930_v52, %v22916_v63 }
 0x2e2   :  { %v15925_v12 = vpop.f32.mrb[16].mxu0  ;;  %19642 = vmatpush3.bf16.msk.msra.mxu1 %vm19641_vm4, %v26493_v14  ;;  %vm7159_vm4 = vcmp.eq.s32.totalorder %v20880_v44, %v22916_v63 }
 0x2e3   :  { %v15926_v59 = vpop.f32.mrb[17].mxu0  ;;  %19680 = vmatprep.subr.msk.bf16.mxu1 %vm19679_vm5, %v26493_v14  ;;  %vm7160_vm5 = vcmp.eq.s32.totalorder %v20883_v45, %v22916_v63 }
 0x2e4   :  { %v15927_v17 = vadd.f32 %v15926_v59, %v15925_v12 }
 0x2e5   :  { %6983 = vmatmul.mubr.f32.vlgmr.msra.gmra.mrb[68].mxu1 %v26609_v46 }
 0x2e6   :  { %v1537_v55 = vadd.f32 %v15927_v17, %v26614_v47  ;;  %v15928_v18 = vpop.f32.mrb[18].mxu0  ;;  %6987 = vmatprep.mubr.f32.mxu1 %v26610_v50  ;;  %19682 = vmatpush3.bf16.msk.msra.mxu1 %vm19681_vm1, %v26493_v14  ;;  %v26615_v47 = vld [vmem:[#allocation7_spill] sm:$0xff]  ;;  %vm7144_vm1 = vcmp.eq.s32.totalorder %v20906_v49, %v22916_v63 }
 0x2e7   :  { %v15929_v12 = vpop.f32.mrb[19].mxu0  ;;  %19684 = vmatprep.subr.msk.bf16.mxu1 %vm19683_vm2, %v26493_v14  ;;  %vm19691_vm2 = vmpackc.low %vm7160_vm5, %vm7159_vm4  ;;  %vm7145_vm5 = vcmp.eq.s32.totalorder %v26593_v56, %v22916_v63 }
 0x2e8   :  { %v15930_v59 = vadd.f32 %v15929_v12, %v15928_v18  ;;  %v22969_v18 = vld [vmem:[%s26231_s2 + $0x3] ss:$0 sm:$0xff] }
 0x2e9   :  { %6988 = vmatmul.mubr.f32.gmra.mrb[70].mxu1 %v26611_v61  ;;  %vm1705_vm14 = vcmp.eq.s32.totalorder %v26543_v26, %v22969_v18  ;;  %vm1706_vm3 = vcmp.eq.s32.totalorder %v26544_v30, %v22969_v18  ;;  %vm1689_vm8 = vcmp.eq.s32.totalorder %v20736_v22, %v22969_v18  ;;  %vm1690_vm13 = vcmp.eq.s32.totalorder %v26545_v23, %v22969_v18 }
 0x2ea   :  { %v1542_v17 = vadd.f32 %v15930_v59, %v26615_v47  ;;  %19686 = vmatpush3.bf16.msk.msra.mxu1 %vm19685_vm12, %v26493_v14  ;;  %7436 = vmatprep.mubr.f32.mxu1 %v21189_v20  ;;  %vm18863_vm7 = vmpackc.low %vm1706_vm3, %vm1705_vm14  ;;  %vm7162_vm12 = vcmp.eq.s32.totalorder %v26592_v21, %v22916_v63  ;;  %vm1707_vm6 = vcmp.eq.s32.totalorder %v20768_v27, %v22969_v18  ;;  %v13091_v59 = vld [vmem:[%s26232_s3 + $0x58] sm:$0xff] }
 0x2eb   :  { %19688 = vmatprep.subr.msk.bf16.mxu1 %vm19687_vm10, %v26493_v14  ;;  %vm22989_vm10 = vmpackc.low %vm7144_vm1, %vm7143_vm9  ;;  %vm1708_vm0 = vcmp.eq.s32.totalorder %v20771_v28, %v22969_v18  ;;  %vm7146_vm14 = vcmp.eq.s32.totalorder %v26594_v11, %v22916_v63  ;;  %vm1692_vm9 = vcmp.eq.s32.totalorder %v20793_v33, %v22969_v18 }
 0x2ec   :  { %v18827_v12 = vpack.c.bf16 %v1542_v17, %v1537_v55  ;;  %v13089_v55 = vld [vmem:[%s26232_s3 + $0x48] sm:$0xff]  ;;  %vm23001_vm4 = vmpackc.low %vm1690_vm13, %vm1689_vm8  ;;  %v13090_v17 = vld [vmem:[%s26232_s3 + $0x50] sm:$0xff]  ;;  %vm7164_vm8 = vcmp.eq.s32.totalorder %v26596_v0, %v22916_v63  ;;  %vm26622_vm13 = vcmask 130048  }
 0x2ed   :  { %vm23016_vm3 = vmpackc.low %vm7162_vm12, %vm7161_vm15  ;;  %vm1709_vm15 = vcmp.eq.s32.totalorder %v20830_v36, %v22969_v18  ;;  %vm1710_vm12 = vcmp.eq.s32.totalorder %v20833_v37, %v22969_v18 }
 0x2ee   :  { %18828 = vmatprep.subr.bf16.mxu0 %v18827_v12  ;;  %19690 = vmatpush3.bf16.msk.msra.mxu1 %vm19689_vm11, %v26493_v14  ;;  %vm1691_vm11 = vcmp.eq.s32.totalorder %v20790_v32, %v22969_v18  ;;  %vm18867_vm1 = vmpackc.low %vm1708_vm0, %vm1707_vm6  ;;  %vm7147_vm0 = vcmp.eq.s32.totalorder %v26597_v1, %v22916_v63 }
 0x2ef   :  { %18830 = vmatpush3.bf16.msra.mxu0 %v18827_v12  ;;  %19692 = vmatprep.subr.msk.bf16.mxu1 %vm19691_vm2, %v26493_v14  ;;  %vm7163_vm2 = vcmp.eq.s32.totalorder %v26595_v60, %v22916_v63  ;;  %vm26625_vm6 = vmmov %vm26622_vm13 }
 0x2f0   :  { %18864 = vmatprep.subr.msk.bf16.mxu0 %vm18863_vm7, %v26493_v14  ;;  %vm23032_vm7 = vmpackc.low %vm7146_vm14, %vm7145_vm5  ;;  %vm7148_vm5 = vcmp.eq.s32.totalorder %v26598_v57, %v22916_v63  ;;  %vm1693_vm14 = vcmp.eq.s32.totalorder %v20845_v40, %v22969_v18 }
 0x2f2   :  { %17545 = vmatmul.mubr.msk.f32.vlgmr.msra.gmra.mrb[12].mxu0 %vm26622_vm13, %v13089_v55  ;;  %19694 = vmatpush3.bf16.msk.msra.mxu1 %vm22989_vm10, %v26493_v14  ;;  %vm23047_vm10 = vmpackc.low %vm1692_vm9, %vm1691_vm11  ;;  %vm1694_vm11 = vcmp.eq.s32.totalorder %v20856_v41, %v22969_v18  ;;  %vm7165_vm13 = vcmp.eq.s32.totalorder %v26599_v62, %v22916_v63 }
 0x2f3   :  { %18866 = vmatpush3.bf16.msk.msra.mxu0 %vm23001_vm4, %v26493_v14  ;;  %17547 = vmatprep.mubr.msk.f32.mxu0 %vm26625_vm6, %v13090_v17  ;;  %vm23062_vm4 = vmpackc.low %vm7164_vm8, %vm7163_vm2  ;;  %vm1711_vm8 = vcmp.eq.s32.totalorder %v20880_v44, %v22969_v18 }
 0x2f4   :  { %19696 = vmatprep.subr.msk.bf16.mxu1 %vm23016_vm3, %v26493_v14  ;;  %18868 = vmatprep.subr.msk.bf16.mxu0 %vm18867_vm1, %v26493_v14  ;;  %vm18871_vm9 = vmpackc.low %vm1710_vm12, %vm1709_vm15  ;;  %vm7166_vm3 = vcmp.eq.s32.totalorder %v26600_v19, %v22916_v63  ;;  %vm1712_vm15 = vcmp.eq.s32.totalorder %v20883_v45, %v22969_v18 }
 0x2f5   :  { %vm26630_vm1 = vmmov %vm26625_vm6  ;;  %vm7150_vm6 = vcmp.eq.s32.totalorder %v26602_v10, %v22916_v63 }
 0x2f6   :  { %17548 = vmatmul.mubr.msk.f32.gmra.mrb[14].mxu0 %vm26630_vm1, %v13091_v59  ;;  %19698 = vmatpush3.bf16.msk.msra.mxu1 %vm23032_vm7, %v26493_v14  ;;  %vm23078_vm2 = vmpackc.low %vm7148_vm5, %vm7147_vm0  ;;  %vm7149_vm7 = vcmp.eq.s32.totalorder %v26601_v24, %v22916_v63  ;;  %vm1695_vm0 = vcmp.eq.s32.totalorder %v20895_v48, %v22969_v18  ;;  %vm1696_vm5 = vcmp.eq.s32.totalorder %v20906_v49, %v22969_v18 }
 0x2f7   :  { %18870 = vmatpush3.bf16.msk.msra.mxu0 %vm23047_vm10, %v26493_v14  ;;  %1988 = vmatprep.mubr.f32.mxu0 %v21189_v20  ;;  %vm23090_vm12 = vmpackc.low %vm1694_vm11, %vm1693_vm14  ;;  %vm7167_vm11 = vcmp.eq.s32.totalorder %v26604_v7, %v22916_v63 }
 0x2f8   :  { %v16461_v51 = vpop.f32.mrb[44].mxu1  ;;  %19700 = vmatprep.subr.msk.bf16.mxu1 %vm23062_vm4, %v26493_v14  ;;  %18872 = vmatprep.subr.msk.bf16.mxu0 %vm18871_vm9, %v26493_v14  ;;  %vm19703_vm10 = vmpackc.low %vm7166_vm3, %vm7165_vm13  ;;  %vm7168_vm4 = vcmp.eq.s32.totalorder %v26605_v4, %v22916_v63  ;;  %vm1713_vm13 = vcmp.eq.s32.totalorder %v20930_v52, %v22969_v18  ;;  %vm1714_vm3 = vcmp.eq.s32.totalorder %v26592_v21, %v22969_v18 }
 0x2f9   :  { %v16462_v59 = vpop.f32.mrb[45].mxu1  ;;  %vm18875_vm14 = vmpackc.low %vm1712_vm15, %vm1711_vm8  ;;  %vm7151_vm8 = vcmp.eq.s32.totalorder %v26606_v9, %v22916_v63  ;;  %vm7152_vm15 = vcmp.eq.s32.totalorder %v26607_v5, %v22916_v63 }
 0x2fa   :  { %v23113_v55 = vadd.f32 %v16462_v59, %v16461_v51  ;;  %19702 = vmatpush3.bf16.msk.msra.mxu1 %vm23078_vm2, %v26493_v14  ;;  %vm23118_vm9 = vmpackc.low %vm7150_vm6, %vm7149_vm7  ;;  %vm1697_vm6 = vcmp.eq.s32.totalorder %v26593_v56, %v22969_v18 }
 0x2fb   :  { %18874 = vmatpush3.bf16.msk.msra.mxu0 %vm23090_vm12, %v26493_v14  ;;  %19704 = vmatprep.subr.msk.bf16.mxu1 %vm19703_vm10, %v26493_v14  ;;  %vm18877_vm1 = vmpackc.low %vm1696_vm5, %vm1695_vm0  ;;  %vm1698_vm12 = vcmp.eq.s32.totalorder %v26594_v11, %v22969_v18  ;;  %vm1715_vm10 = vcmp.eq.s32.totalorder %v26595_v60, %v22969_v18  ;;  %vm1716_vm0 = vcmp.eq.s32.totalorder %v26596_v0, %v22969_v18 }
 0x2fc   :  { %26635 = vst [vmem:[#allocation6_spill] sm:$0xff] %v23113_v55  ;;  %v16464_v51 = vpop.f32.mrb[46].mxu1  ;;  %18876 = vmatprep.subr.msk.bf16.mxu0 %vm18875_vm14, %v26493_v14  ;;  %vm19707_vm2 = vmpackc.low %vm7168_vm4, %vm7167_vm11  ;;  %vm1699_vm4 = vcmp.eq.s32.totalorder %v26597_v1, %v22969_v18 }
 0x2fd   :  { %v16465_v17 = vpop.f32.mrb[47].mxu1  ;;  %vm18879_vm7 = vmpackc.low %vm1714_vm3, %vm1713_vm13  ;;  %vm1717_vm13 = vcmp.eq.s32.totalorder %v26599_v62, %v22969_v18  ;;  %vm1718_vm3 = vcmp.eq.s32.totalorder %v26600_v19, %v22969_v18 }
 0x2fe   :  { %v23139_v12 = vadd.f32 %v16465_v17, %v16464_v51  ;;  %19706 = vmatpush3.bf16.msk.msra.mxu1 %vm23118_vm9, %v26493_v14  ;;  %vm19709_vm5 = vmpackc.low %vm7152_vm15, %vm7151_vm8  ;;  %vm1700_vm9 = vcmp.eq.s32.totalorder %v26598_v57, %v22969_v18  ;;  %vm1701_vm8 = vcmp.eq.s32.totalorder %v26601_v24, %v22969_v18  ;;  %vm1702_vm15 = vcmp.eq.s32.totalorder %v26602_v10, %v22969_v18 }
 0x2ff   :  { %18878 = vmatpush3.bf16.msk.msra.mxu0 %vm18877_vm1, %v26493_v14  ;;  %19708 = vmatprep.subr.msk.bf16.mxu1 %vm19707_vm2, %v26493_v14  ;;  %vm18881_vm14 = vmpackc.low %vm1698_vm12, %vm1697_vm6  ;;  %vm1720_vm6 = vcmp.eq.s32.totalorder %v26605_v4, %v22969_v18 }
 0x300   :  { %26638 = vst [vmem:[#allocation7_spill] sm:$0xff] %v23139_v12  ;;  %18880 = vmatprep.subr.msk.bf16.mxu0 %vm18879_vm7, %v26493_v14  ;;  %vm18883_vm11 = vmpackc.low %vm1716_vm0, %vm1715_vm10  ;;  %vm1719_vm7 = vcmp.eq.s32.totalorder %v26604_v7, %v22969_v18  ;;  %vm1703_vm0 = vcmp.eq.s32.totalorder %v26606_v9, %v22969_v18 }
 0x301   :  { %vm18885_vm1 = vmpackc.low %vm1700_vm9, %vm1699_vm4 }
 0x302   :  { %19710 = vmatpush3.bf16.msk.msra.mxu1 %vm19709_vm5, %v26493_v14  ;;  %vm18887_vm2 = vmpackc.low %vm1718_vm3, %vm1717_vm13  ;;  %vm1704_vm5 = vcmp.eq.s32.totalorder %v26607_v5, %v22969_v18 }
 0x303   :  { %18882 = vmatpush3.bf16.msk.msra.mxu0 %vm18881_vm14, %v26493_v14  ;;  %vm18889_vm12 = vmpackc.low %vm1702_vm15, %vm1701_vm8 }
 0x304   :  { %18884 = vmatprep.subr.msk.bf16.mxu0 %vm18883_vm11, %v26493_v14  ;;  %vm18891_vm10 = vmpackc.low %vm1720_vm6, %vm1719_vm7  ;;  %vm26645_vm11 = vcmask 130048  }
 0x305   :  { %7437 = vmatmul.mubr.f32.vlgmr.msra.gmra.mrb[72].mxu1 %v26609_v46  ;;  %vm18893_vm14 = vmpackc.low %vm1704_vm5, %vm1703_vm0 }
 0x306   :  { %7441 = vmatprep.mubr.f32.mxu1 %v26610_v50 }
 0x307   :  { %18886 = vmatpush3.bf16.msk.msra.mxu0 %vm18885_vm1, %v26493_v14 }
 0x308   :  { %18888 = vmatprep.subr.msk.bf16.mxu0 %vm18887_vm2, %v26493_v14 }
 0x309   :  { %7442 = vmatmul.mubr.f32.gmra.mrb[74].mxu1 %v26611_v61 }
 0x30b   :  { %18890 = vmatpush3.bf16.msk.msra.mxu0 %vm18889_vm12, %v26493_v14 }
 0x30c   :  { %18892 = vmatprep.subr.msk.bf16.mxu0 %vm18891_vm10, %v26493_v14  ;;  %vm26653_vm10 = vmmov %vm26645_vm11 }
 0x30f   :  { %18894 = vmatpush3.bf16.msk.msra.mxu0 %vm18893_vm14, %v26493_v14  ;;  %vm26654_vm14 = vmmov %vm26653_vm10 }
 0x312   :  { %1989 = vmatmul.mubr.f32.vlgmr.msra.gmra.mrb[20].mxu0 %v26609_v46 }
 0x313   :  { %1993 = vmatprep.mubr.f32.mxu0 %v26610_v50 }
 0x316   :  { %1994 = vmatmul.mubr.f32.gmra.mrb[22].mxu0 %v26611_v61 }
 0x318   :  { %v16543_v63 = vpop.f32.mrb[48].mxu1 }
 0x319   :  { %v16544_v59 = vpop.f32.mrb[49].mxu1 }
 0x31a   :  { %v23185_v47 = vadd.f32 %v16544_v59, %v16543_v63  ;;  %v13226_v59 = vld [vmem:[%s26232_s3 + $0x60] sm:$0xff] }
 0x31b   :  { %17554 = vmatprep.mubr.msk.f32.mxu0 %vm26645_vm11, %v13226_v59 }
 0x31c   :  { %26639 = vst [vmem:[#allocation68_spill] sm:$0xff] %v23185_v47  ;;  %v16546_v51 = vpop.f32.mrb[50].mxu1 }
 0x31d   :  { %v16547_v17 = vpop.f32.mrb[51].mxu1 }
 0x31e   :  { %v23187_v18 = vadd.f32 %v16547_v17, %v16546_v51 }
 0x320   :  { %26640 = vst [vmem:[#allocation69_spill] sm:$0xff] %v23187_v18 }
 0x338   :  { %v16625_v12 = vpop.f32.mrb[52].mxu1 }
 0x339   :  { %v16626_v55 = vpop.f32.mrb[53].mxu1 }
 0x33a   :  { %v23189_v54 = vadd.f32 %v16626_v55, %v16625_v12 }
 0x33c   :  { %26641 = vst [vmem:[#allocation70_spill] sm:$0xff] %v23189_v54  ;;  %v16628_v2 = vpop.f32.mrb[54].mxu1 }
 0x33d   :  { %v16629_v58 = vpop.f32.mrb[55].mxu1 }
 0x33e   :  { %v23191_v3 = vadd.f32 %v16629_v58, %v16628_v2 }
 0x340   :  { %26642 = vst [vmem:[#allocation71_spill] sm:$0xff] %v23191_v3 }
 0x358   :  { %v16707_v43 = vpop.f32.mrb[56].mxu1 }
 0x359   :  { %v16708_v42 = vpop.f32.mrb[57].mxu1 }
 0x35a   :  { %v23193_v39 = vadd.f32 %v16708_v42, %v16707_v43 }
 0x35c   :  { %26643 = vst [vmem:[#allocation72_spill] sm:$0xff] %v23193_v39  ;;  %v16710_v38 = vpop.f32.mrb[58].mxu1 }
 0x35d   :  { %v16711_v35 = vpop.f32.mrb[59].mxu1 }
 0x35e   :  { %v23195_v63 = vadd.f32 %v16711_v35, %v16710_v38 }
 0x360   :  { %26644 = vst [vmem:[#allocation73_spill] sm:$0xff] %v23195_v63 }
 0x378   :  { %v16789_v55 = vpop.f32.mrb[60].mxu1 }
 0x379   :  { %v16790_v12 = vpop.f32.mrb[61].mxu1 }
 0x37a   :  { %v16791_v51 = vadd.f32 %v16790_v12, %v16789_v55 }
 0x37c   :  { %v16792_v17 = vpop.f32.mrb[62].mxu1 }
 0x37d   :  { %v16793_v58 = vpop.f32.mrb[63].mxu1 }
 0x37e   :  { %v16794_v2 = vadd.f32 %v16793_v58, %v16792_v17 }
 0x398   :  { %v16827_v3 = vpop.f32.mrb[64].mxu1 }
 0x399   :  { %v16828_v54 = vpop.f32.mrb[65].mxu1 }
 0x39a   :  { %v16829_v42 = vadd.f32 %v16828_v54, %v16827_v3 }
 0x39c   :  { %v6531_v43 = vadd.f32 %v16829_v42, %v16791_v51  ;;  %v16830_v39 = vpop.f32.mrb[66].mxu1  ;;  %v26651_v42 = vld [vmem:[#allocation5_spill] sm:$0xff] }
 0x39d   :  { %v16831_v18 = vpop.f32.mrb[67].mxu1 }
 0x39e   :  { %v16832_v35 = vadd.f32 %v16831_v18, %v16830_v39 }
 0x3a0   :  { %v6536_v38 = vadd.f32 %v16832_v35, %v16794_v2 }
 0x3a2   :  { %v23201_v63 = vpack.c.bf16 %v6536_v38, %v6531_v43  ;;  %v26652_v38 = vld [vmem:[#allocation10_spill] sm:$0xff] }
 0x3a4   :  { %26646 = vst [vmem:[#allocation74_spill] sm:$0xff] %v23201_v63  ;;  %v26684_v63 = vld [vmem:[#allocation42_spill] sm:$0xff] }
 0x3b8   :  { %v16909_v47 = vpop.f32.mrb[68].mxu1 }
 0x3b9   :  { %v16910_v34 = vpop.f32.mrb[69].mxu1 }
 0x3ba   :  { %v23203_v31 = vadd.f32 %v16910_v34, %v16909_v47 }
 0x3bc   :  { %26647 = vst [vmem:[#allocation75_spill] sm:$0xff] %v23203_v31  ;;  %v16912_v59 = vpop.f32.mrb[70].mxu1 }
 0x3bd   :  { %v16913_v29 = vpop.f32.mrb[71].mxu1 }
 0x3be   :  { %v23205_v55 = vadd.f32 %v16913_v29, %v16912_v59  ;;  %v23216_v29 = vld [vmem:[%s26231_s2 + $0x4] ss:$0 sm:$0xff] }
 0x3bf   :  { %vm2159_vm4 = vcmp.eq.s32.totalorder %v26543_v26, %v23216_v29  ;;  %vm2160_vm9 = vcmp.eq.s32.totalorder %v26544_v30, %v23216_v29  ;;  %vm2143_vm3 = vcmp.eq.s32.totalorder %v20736_v22, %v23216_v29  ;;  %vm2144_vm1 = vcmp.eq.s32.totalorder %v26545_v23, %v23216_v29 }
 0x3c0   :  { %26648 = vst [vmem:[#allocation76_spill] sm:$0xff] %v23205_v55  ;;  %vm18931_vm13 = vmpackc.low %vm2160_vm9, %vm2159_vm4  ;;  %vm2161_vm2 = vcmp.eq.s32.totalorder %v20768_v27, %v23216_v29  ;;  %vm2162_vm8 = vcmp.eq.s32.totalorder %v20771_v28, %v23216_v29  ;;  %vm2145_vm6 = vcmp.eq.s32.totalorder %v20790_v32, %v23216_v29  ;;  %vm2146_vm12 = vcmp.eq.s32.totalorder %v20793_v33, %v23216_v29  ;;  %v26683_v55 = vld [vmem:[#allocation39_spill] sm:$0xff] }
 0x3c1   :  { %vm18933_vm15 = vmpackc.low %vm2144_vm1, %vm2143_vm3  ;;  %vm2163_vm0 = vcmp.eq.s32.totalorder %v20830_v36, %v23216_v29  ;;  %vm2164_vm5 = vcmp.eq.s32.totalorder %v20833_v37, %v23216_v29  ;;  %vm2147_vm9 = vcmp.eq.s32.totalorder %v20845_v40, %v23216_v29  ;;  %vm2165_vm1 = vcmp.eq.s32.totalorder %v20880_v44, %v23216_v29 }
 0x3c2   :  { %vm18935_vm7 = vmpackc.low %vm2162_vm8, %vm2161_vm2  ;;  %vm2166_vm2 = vcmp.eq.s32.totalorder %v20883_v45, %v23216_v29 }
 0x3c3   :  { %vm18937_vm11 = vmpackc.low %vm2146_vm12, %vm2145_vm6  ;;  %vm2150_vm6 = vcmp.eq.s32.totalorder %v20906_v49, %v23216_v29  ;;  %vm2167_vm12 = vcmp.eq.s32.totalorder %v20930_v52, %v23216_v29  ;;  %v26697_v52 = vld [vmem:[#allocation9_spill] sm:$0xff] }
 0x3c4   :  { %vm18939_vm4 = vmpackc.low %vm2164_vm5, %vm2163_vm0 }
 0x3c5   :  { %vm26655_vm3 = vmmov %vm26653_vm10 }
 0x3d8   :  { %v16991_v12 = vpop.f32.mrb[72].mxu1 }
 0x3d9   :  { %v16992_v17 = vpop.f32.mrb[73].mxu1 }
 0x3da   :  { %v23207_v58 = vadd.f32 %v16992_v17, %v16991_v12  ;;  %v13227_v12 = vld [vmem:[%s26232_s3 + $0x68] sm:$0xff]  ;;  %v13229_v17 = vld [vmem:[%s26232_s3 + $0x78] sm:$0xff] }
 0x3dc   :  { %26649 = vst [vmem:[#allocation77_spill] sm:$0xff] %v23207_v58  ;;  %v16994_v3 = vpop.f32.mrb[74].mxu1  ;;  %v26682_v58 = vld [vmem:[#allocation38_spill] sm:$0xff] }
 0x3dd   :  { %v16995_v54 = vpop.f32.mrb[75].mxu1 }
 0x3de   :  { %v23209_v51 = vadd.f32 %v16995_v54, %v16994_v3  ;;  %v13364_v3 = vld [vmem:[%s26232_s3 + $0x80] sm:$0xff] }
 0x3e0   :  { %26650 = vst [vmem:[#allocation78_spill] sm:$0xff] %v23209_v51  ;;  %v26681_v51 = vld [vmem:[#allocation35_spill] sm:$0xff] }
 0x3e5   :  { %v16007_v39 = vpop.f32.mrb[20].mxu0 }
 0x3e6   :  { %v16008_v18 = vpop.f32.mrb[21].mxu0 }
 0x3e7   :  { %v16009_v2 = vadd.f32 %v16008_v18, %v16007_v39 }
 0x3e9   :  { %v1991_v43 = vadd.f32 %v16009_v2, %v26651_v42  ;;  %v16010_v35 = vpop.f32.mrb[22].mxu0  ;;  %v26657_v2 = vld [vmem:[#allocation12_spill] sm:$0xff] }
 0x3ea   :  { %v16011_v34 = vpop.f32.mrb[23].mxu0 }
 0x3eb   :  { %v16012_v47 = vadd.f32 %v16011_v34, %v16010_v35 }
 0x3ed   :  { %v1996_v31 = vadd.f32 %v16012_v47, %v26652_v38  ;;  %v26658_v47 = vld [vmem:[#allocation13_spill] sm:$0xff] }
 0x3ef   :  { %v18895_v59 = vpack.c.bf16 %v1996_v31, %v1991_v43  ;;  %v13228_v31 = vld [vmem:[%s26232_s3 + $0x70] sm:$0xff] }
 0x3f1   :  { %18896 = vmatprep.subr.bf16.mxu0 %v18895_v59 }
 0x3f2   :  { %18898 = vmatpush3.bf16.msra.mxu0 %v18895_v59  ;;  %v23323_v59 = vld [vmem:[%s26231_s2 + $0x6] ss:$0 sm:$0xff] }
 0x3f3   :  { %18932 = vmatprep.subr.msk.bf16.mxu0 %vm18931_vm13, %v26493_v14  ;;  %vm2148_vm13 = vcmp.eq.s32.totalorder %v20856_v41, %v23216_v29 }
 0x3f4   :  { %vm18941_vm8 = vmpackc.low %vm2148_vm13, %vm2147_vm9  ;;  %vm2170_vm9 = vcmp.eq.s32.totalorder %v26596_v0, %v23216_v29  ;;  %v26696_v0 = vld [vmem:[#allocation8_spill] sm:$0xff] }
 0x3f5   :  { %17555 = vmatmul.mubr.msk.f32.vlgmr.msra.gmra.mrb[12].mxu0 %vm26653_vm10, %v13227_v12  ;;  %vm2168_vm10 = vcmp.eq.s32.totalorder %v26592_v21, %v23216_v29  ;;  %v13365_v12 = vld [vmem:[%s26232_s3 + $0x88] sm:$0xff] }
 0x3f6   :  { %18934 = vmatpush3.bf16.msk.msra.mxu0 %vm18933_vm15, %v26493_v14  ;;  %17557 = vmatprep.mubr.msk.f32.mxu0 %vm26654_vm14, %v13228_v31  ;;  %vm18943_vm15 = vmpackc.low %vm2166_vm2, %vm2165_vm1  ;;  %vm2151_vm14 = vcmp.eq.s32.totalorder %v26593_v56, %v23216_v29  ;;  %vm2153_vm1 = vcmp.eq.s32.totalorder %v26597_v1, %v23216_v29  ;;  %vm2154_vm2 = vcmp.eq.s32.totalorder %v26598_v57, %v23216_v29  ;;  %v13366_v31 = vld [vmem:[%s26232_s3 + $0x90] sm:$0xff] }
 0x3f7   :  { %18936 = vmatprep.subr.msk.bf16.mxu0 %vm18935_vm7, %v26493_v14  ;;  %vm2149_vm7 = vcmp.eq.s32.totalorder %v20895_v48, %v23216_v29  ;;  %vm18947_vm5 = vmpackc.low %vm2168_vm10, %vm2167_vm12  ;;  %vm2155_vm12 = vcmp.eq.s32.totalorder %v26601_v24, %v23216_v29  ;;  %vm2156_vm10 = vcmp.eq.s32.totalorder %v26602_v10, %v23216_v29  ;;  %v26692_v10 = vld [vmem:[#allocation59_spill] sm:$0xff]  ;;  %v23448_v48 = vld [vmem:[%s26231_s2 + $0x7] ss:$0 sm:$0xff] }
 0x3f8   :  { %vm18945_vm0 = vmpackc.low %vm2150_vm6, %vm2149_vm7  ;;  %v26693_v24 = vld [vmem:[#allocation63_spill] sm:$0xff] }
 0x3f9   :  { %17558 = vmatmul.mubr.msk.f32.gmra.mrb[14].mxu0 %vm26655_vm3, %v13229_v17  ;;  %vm18953_vm7 = vmpackc.low %vm2154_vm2, %vm2153_vm1  ;;  %vm3035_vm1 = vcmp.eq.s32.totalorder %v26536_v8, %v23323_v59  ;;  %vm3036_vm2 = vcmp.eq.s32.totalorder %v26537_v15, %v23323_v59  ;;  %v13367_v17 = vld [vmem:[%s26232_s3 + $0x98] sm:$0xff] }
 0x3fa   :  { %18938 = vmatpush3.bf16.msk.msra.mxu0 %vm18937_vm11, %v26493_v14  ;;  %2442 = vmatprep.mubr.f32.mxu0 %v21189_v20  ;;  %vm2152_vm11 = vcmp.eq.s32.totalorder %v26594_v11, %v23216_v29 }
 0x3fb   :  { %18940 = vmatprep.subr.msk.bf16.mxu0 %vm18939_vm4, %v26493_v14  ;;  %vm2169_vm4 = vcmp.eq.s32.totalorder %v26595_v60, %v23216_v29  ;;  %vm18949_vm13 = vmpackc.low %vm2152_vm11, %vm2151_vm14 }
 0x3fc   :  { %vm18951_vm3 = vmpackc.low %vm2170_vm9, %vm2169_vm4  ;;  %vm2157_vm4 = vcmp.eq.s32.totalorder %v26606_v9, %v23216_v29  ;;  %vm2158_vm9 = vcmp.eq.s32.totalorder %v26607_v5, %v23216_v29  ;;  %v26688_v5 = vld [vmem:[#allocation50_spill] sm:$0xff]  ;;  %v26689_v9 = vld [vmem:[#allocation51_spill] sm:$0xff] }
 0x3fd   :  { %vm18957_vm14 = vmpackc.low %vm2156_vm10, %vm2155_vm12  ;;  %vm3020_vm12 = vcmp.eq.s32.totalorder %v26539_v25, %v23323_v59 }
 0x3fe   :  { %18942 = vmatpush3.bf16.msk.msra.mxu0 %vm18941_vm8, %v26493_v14  ;;  %vm2171_vm8 = vcmp.eq.s32.totalorder %v26599_v62, %v23216_v29  ;;  %v13640_v62 = vld [vmem:[%s26232_s3 + $0xc0] sm:$0xff] }
 0x3ff   :  { %18944 = vmatprep.subr.msk.bf16.mxu0 %vm18943_vm15, %v26493_v14  ;;  %vm2172_vm15 = vcmp.eq.s32.totalorder %v26600_v19, %v23216_v29  ;;  %v26694_v19 = vld [vmem:[#allocation61_spill] sm:$0xff] }
 0x400   :  { %vm18955_vm6 = vmpackc.low %vm2172_vm15, %vm2171_vm8 }
 0x401   :  { %vm19035_vm8 = vmpackc.low %vm3036_vm2, %vm3035_vm1 }
 0x402   :  { %18946 = vmatpush3.bf16.msk.msra.mxu0 %vm18945_vm0, %v26493_v14  ;;  %vm2173_vm0 = vcmp.eq.s32.totalorder %v26604_v7, %v23216_v29  ;;  %v26691_v7 = vld [vmem:[#allocation55_spill] sm:$0xff] }
 0x403   :  { %18948 = vmatprep.subr.msk.bf16.mxu0 %vm18947_vm5, %v26493_v14  ;;  %vm2174_vm5 = vcmp.eq.s32.totalorder %v26605_v4, %v23216_v29  ;;  %v26690_v4 = vld [vmem:[#allocation54_spill] sm:$0xff] }
 0x404   :  { %vm18959_vm11 = vmpackc.low %vm2174_vm5, %vm2173_vm0  ;;  %vm3037_vm0 = vcmp.eq.s32.totalorder %v26540_v16, %v23323_v59  ;;  %vm3038_vm5 = vcmp.eq.s32.totalorder %v26541_v6, %v23323_v59 }
 0x406   :  { %18950 = vmatpush3.bf16.msk.msra.mxu0 %vm18949_vm13, %v26493_v14  ;;  %vm18961_vm13 = vmpackc.low %vm2158_vm9, %vm2157_vm4 }
 0x407   :  { %18952 = vmatprep.subr.msk.bf16.mxu0 %vm18951_vm3, %v26493_v14  ;;  %vm26656_vm3 = vcmask 130048   ;;  %vm19039_vm4 = vmpackc.low %vm3038_vm5, %vm3037_vm0 }
 0x408   :  { %vm26659_vm15 = vmmov %vm26656_vm3 }
 0x409   :  { %vm26661_vm10 = vmmov %vm26656_vm3 }
 0x40a   :  { %18954 = vmatpush3.bf16.msk.msra.mxu0 %vm18953_vm7, %v26493_v14  ;;  %vm26660_vm7 = vmmov %vm26656_vm3 }
 0x40b   :  { %18956 = vmatprep.subr.msk.bf16.mxu0 %vm18955_vm6, %v26493_v14  ;;  %vm3019_vm6 = vcmp.eq.s32.totalorder %v26538_v13, %v23323_v59 }
 0x40e   :  { %18958 = vmatpush3.bf16.msk.msra.mxu0 %vm18957_vm14, %v26493_v14  ;;  %vm26662_vm14 = vmmov %vm26656_vm3 }
 0x40f   :  { %18960 = vmatprep.subr.msk.bf16.mxu0 %vm18959_vm11, %v26493_v14  ;;  %vm19037_vm11 = vmpackc.low %vm3020_vm12, %vm3019_vm6 }
 0x412   :  { %18962 = vmatpush3.bf16.msk.msra.mxu0 %vm18961_vm13, %v26493_v14 }
 0x415   :  { %2443 = vmatmul.mubr.f32.vlgmr.msra.gmra.mrb[24].mxu0 %v26609_v46  ;;  %v26687_v46 = vld [vmem:[#allocation47_spill] sm:$0xff] }
 0x416   :  { %2447 = vmatprep.mubr.f32.mxu0 %v26610_v50  ;;  %v26686_v50 = vld [vmem:[#allocation46_spill] sm:$0xff] }
 0x419   :  { %2448 = vmatmul.mubr.f32.gmra.mrb[26].mxu0 %v26611_v61  ;;  %v26685_v61 = vld [vmem:[#allocation43_spill] sm:$0xff] }
 0x41a   :  { %17564 = vmatprep.mubr.msk.f32.mxu0 %vm26656_vm3, %v13364_v3  ;;  %v13502_v3 = vld [vmem:[%s26232_s3 + $0xa0] sm:$0xff] }
 0x4e8   :  { %v16089_v54 = vpop.f32.mrb[24].mxu0 }
 0x4e9   :  { %v16090_v39 = vpop.f32.mrb[25].mxu0 }
 0x4ea   :  { %v16091_v18 = vadd.f32 %v16090_v39, %v16089_v54  ;;  %v13504_v54 = vld [vmem:[%s26232_s3 + $0xb0] sm:$0xff] }
 0x4eb   :  { %v26663_v39 = vld [vmem:[#allocation14_spill] sm:$0xff] }
 0x4ec   :  { %v2445_v42 = vadd.f32 %v16091_v18, %v26657_v2  ;;  %v16092_v43 = vpop.f32.mrb[26].mxu0  ;;  %vm3021_vm9 = vcmp.eq.s32.totalorder %v26663_v39, %v23323_v59  ;;  %v26664_v18 = vld [vmem:[#allocation15_spill] sm:$0xff]  ;;  %v26665_v2 = vld [vmem:[#allocation16_spill] sm:$0xff] }
 0x4ed   :  { %v16093_v35 = vpop.f32.mrb[27].mxu0  ;;  %vm3022_vm13 = vcmp.eq.s32.totalorder %v26664_v18, %v23323_v59  ;;  %vm3039_vm1 = vcmp.eq.s32.totalorder %v26665_v2, %v23323_v59 }
 0x4ee   :  { %v16094_v34 = vadd.f32 %v16093_v35, %v16092_v43  ;;  %v13505_v43 = vld [vmem:[%s26232_s3 + $0xb8] sm:$0xff]  ;;  %v26668_v35 = vld [vmem:[#allocation18_spill] sm:$0xff] }
 0x4ef   :  { %vm3023_vm6 = vcmp.eq.s32.totalorder %v26668_v35, %v23323_v59 }
 0x4f0   :  { %v2450_v38 = vadd.f32 %v16094_v34, %v26658_v47  ;;  %v26669_v34 = vld [vmem:[#allocation19_spill] sm:$0xff]  ;;  %v26671_v47 = vld [vmem:[#allocation20_spill] sm:$0xff] }
 0x4f1   :  { %vm3024_vm12 = vcmp.eq.s32.totalorder %v26669_v34, %v23323_v59  ;;  %vm3041_vm0 = vcmp.eq.s32.totalorder %v26671_v47, %v23323_v59 }
 0x4f2   :  { %v18963_v29 = vpack.c.bf16 %v2450_v38, %v2445_v42  ;;  %v26666_v42 = vld [vmem:[#allocation17_spill] sm:$0xff] }
 0x4f3   :  { %vm3040_vm2 = vcmp.eq.s32.totalorder %v26666_v42, %v23323_v59  ;;  %v26672_v38 = vld [vmem:[#allocation21_spill] sm:$0xff] }
 0x4f4   :  { %18964 = vmatprep.subr.bf16.mxu0 %v18963_v29  ;;  %vm3042_vm5 = vcmp.eq.s32.totalorder %v26672_v38, %v23323_v59 }
 0x4f5   :  { %18966 = vmatpush3.bf16.msra.mxu0 %v18963_v29  ;;  %v26673_v29 = vld [vmem:[#allocation58_spill] sm:$0xff] }
 0x4f6   :  { %19032 = vmatprep.subr.bf16.mxu0 %v22663_v53 }
 0x4f8   :  { %17565 = vmatmul.mubr.msk.f32.vlgmr.msra.gmra.mrb[12].mxu0 %vm26659_vm15, %v13365_v12  ;;  %vm19041_vm15 = vmpackc.low %vm3022_vm13, %vm3021_vm9  ;;  %v26674_v12 = vld [vmem:[#allocation22_spill] sm:$0xff] }
 0x4f9   :  { %19034 = vmatpush3.bf16.msra.mxu0 %v22663_v53  ;;  %17567 = vmatprep.mubr.msk.f32.mxu0 %vm26660_vm7, %v13366_v31  ;;  %v13503_v53 = vld [vmem:[%s26232_s3 + $0xa8] sm:$0xff]  ;;  %vm19043_vm7 = vmpackc.low %vm3040_vm2, %vm3039_vm1  ;;  %v26675_v31 = vld [vmem:[#allocation23_spill] sm:$0xff] }
 0x4fa   :  { %19036 = vmatprep.subr.msk.bf16.mxu0 %vm19035_vm8, %v26493_v14  ;;  %vm26667_vm8 = vmmov %vm26656_vm3  ;;  %vm3026_vm9 = vcmp.eq.s32.totalorder %v26675_v31, %v23323_v59 }
 0x4fc   :  { %17568 = vmatmul.mubr.msk.f32.gmra.mrb[14].mxu0 %vm26661_vm10, %v13367_v17  ;;  %vm26670_vm10 = vmmov %vm26656_vm3  ;;  %v26676_v17 = vld [vmem:[#allocation26_spill] sm:$0xff] }
 0x4fd   :  { %17574 = vmatprep.mubr.msk.f32.mxu0 %vm26662_vm14, %v13502_v3  ;;  %vm19045_vm14 = vmpackc.low %vm3024_vm12, %vm3023_vm6  ;;  %vm3043_vm13 = vcmp.eq.s32.totalorder %v26676_v17, %v23323_v59  ;;  %v26677_v3 = vld [vmem:[#allocation27_spill] sm:$0xff]  ;;  %vm3046_vm6 = vcmp.eq.s32.totalorder %v26681_v51, %v23323_v59 }
 0x500   :  { %17575 = vmatmul.mubr.msk.f32.vlgmr.msra.gmra.mrb[12].mxu0 %vm26656_vm3, %v13503_v53  ;;  %vm3044_vm3 = vcmp.eq.s32.totalorder %v26677_v3, %v23323_v59  ;;  %v26678_v53 = vld [vmem:[#allocation30_spill] sm:$0xff] }
 0x501   :  { %19038 = vmatpush3.bf16.msk.msra.mxu0 %vm19037_vm11, %v26493_v14  ;;  %17577 = vmatprep.mubr.msk.f32.mxu0 %vm26667_vm8, %v13504_v54  ;;  %vm19047_vm11 = vmpackc.low %vm3042_vm5, %vm3041_vm0  ;;  %vm3027_vm8 = vcmp.eq.s32.totalorder %v26678_v53, %v23323_v59  ;;  %v26679_v54 = vld [vmem:[#allocation31_spill] sm:$0xff]  ;;  %vm3029_vm0 = vcmp.eq.s32.totalorder %v26682_v58, %v23323_v59  ;;  %vm3030_vm5 = vcmp.eq.s32.totalorder %v26683_v55, %v23323_v59 }
 0x502   :  { %19040 = vmatprep.subr.msk.bf16.mxu0 %vm19039_vm4, %v26493_v14  ;;  %vm3025_vm4 = vcmp.eq.s32.totalorder %v26674_v12, %v23323_v59  ;;  %vm19051_vm2 = vmpackc.low %vm3044_vm3, %vm3043_vm13  ;;  %vm3031_vm13 = vcmp.eq.s32.totalorder %v26686_v50, %v23323_v59  ;;  %vm3032_vm3 = vcmp.eq.s32.totalorder %v26687_v46, %v23323_v59 }
 0x503   :  { %vm19049_vm1 = vmpackc.low %vm3026_vm9, %vm3025_vm4 }
 0x504   :  { %17578 = vmatmul.mubr.msk.f32.gmra.mrb[14].mxu0 %vm26670_vm10, %v13505_v43  ;;  %v26680_v43 = vld [vmem:[#allocation34_spill] sm:$0xff]  ;;  %vm19057_vm4 = vmpackc.low %vm3030_vm5, %vm3029_vm0  ;;  %vm3489_vm0 = vcmp.eq.s32.totalorder %v26536_v8, %v23448_v48  ;;  %vm3490_vm5 = vcmp.eq.s32.totalorder %v26537_v15, %v23448_v48 }
 0x505   :  { %19042 = vmatpush3.bf16.msk.msra.mxu0 %vm19041_vm15, %v26493_v14  ;;  %3275 = vmatprep.mubr.f32.mxu0 %v26673_v29  ;;  %vm3028_vm15 = vcmp.eq.s32.totalorder %v26679_v54, %v23323_v59 }
 0x506   :  { %19044 = vmatprep.subr.msk.bf16.mxu0 %vm19043_vm7, %v26493_v14  ;;  %vm3045_vm7 = vcmp.eq.s32.totalorder %v26680_v43, %v23323_v59  ;;  %vm19053_vm12 = vmpackc.low %vm3028_vm15, %vm3027_vm8 }
 0x507   :  { %vm19055_vm10 = vmpackc.low %vm3046_vm6, %vm3045_vm7  ;;  %vm3033_vm7 = vcmp.eq.s32.totalorder %v26690_v4, %v23323_v59  ;;  %vm3034_vm6 = vcmp.eq.s32.totalorder %v26691_v7, %v23323_v59 }
 0x508   :  { %vm19061_vm8 = vmpackc.low %vm3032_vm3, %vm3031_vm13  ;;  %vm3492_vm13 = vcmp.eq.s32.totalorder %v26541_v6, %v23448_v48 }
 0x509   :  { %19046 = vmatpush3.bf16.msk.msra.mxu0 %vm19045_vm14, %v26493_v14  ;;  %vm3047_vm14 = vcmp.eq.s32.totalorder %v26684_v63, %v23323_v59 }
 0x50a   :  { %19048 = vmatprep.subr.msk.bf16.mxu0 %vm19047_vm11, %v26493_v14  ;;  %vm3048_vm11 = vcmp.eq.s32.totalorder %v26685_v61, %v23323_v59 }
 0x50b   :  { %vm19059_vm9 = vmpackc.low %vm3048_vm11, %vm3047_vm14  ;;  %vm3473_vm11 = vcmp.eq.s32.totalorder %v26538_v13, %v23448_v48 }
 0x50c   :  { %vm19103_vm14 = vmpackc.low %vm3490_vm5, %vm3489_vm0  ;;  %vm3477_vm5 = vcmp.eq.s32.totalorder %v26668_v35, %v23448_v48 }
 0x50d   :  { %19050 = vmatpush3.bf16.msk.msra.mxu0 %vm19049_vm1, %v26493_v14  ;;  %vm3049_vm1 = vcmp.eq.s32.totalorder %v26688_v5, %v23323_v59 }
 0x50e   :  { %19052 = vmatprep.subr.msk.bf16.mxu0 %vm19051_vm2, %v26493_v14  ;;  %vm3050_vm2 = vcmp.eq.s32.totalorder %v26689_v9, %v23323_v59 }
 0x50f   :  { %vm19063_vm15 = vmpackc.low %vm3050_vm2, %vm3049_vm1  ;;  %vm3475_vm2 = vcmp.eq.s32.totalorder %v26663_v39, %v23448_v48 }
 0x511   :  { %19054 = vmatpush3.bf16.msk.msra.mxu0 %vm19053_vm12, %v26493_v14  ;;  %vm19065_vm12 = vmpackc.low %vm3034_vm6, %vm3033_vm7  ;;  %vm3493_vm7 = vcmp.eq.s32.totalorder %v26665_v2, %v23448_v48  ;;  %vm3494_vm6 = vcmp.eq.s32.totalorder %v26666_v42, %v23448_v48 }
 0x512   :  { %19056 = vmatprep.subr.msk.bf16.mxu0 %vm19055_vm10, %v26493_v14  ;;  %vm26695_vm10 = vcmask 130048   ;;  %vm19111_vm0 = vmpackc.low %vm3494_vm6, %vm3493_vm7 }
 0x515   :  { %19058 = vmatpush3.bf16.msk.msra.mxu0 %vm19057_vm4, %v26493_v14  ;;  %vm3474_vm4 = vcmp.eq.s32.totalorder %v26539_v25, %v23448_v48 }
 0x516   :  { %19060 = vmatprep.subr.msk.bf16.mxu0 %vm19059_vm9, %v26493_v14  ;;  %vm3491_vm9 = vcmp.eq.s32.totalorder %v26540_v16, %v23448_v48  ;;  %vm19105_vm3 = vmpackc.low %vm3474_vm4, %vm3473_vm11  ;;  %vm3495_vm4 = vcmp.eq.s32.totalorder %v26671_v47, %v23448_v48 }
 0x517   :  { %vm19107_vm1 = vmpackc.low %vm3492_vm13, %vm3491_vm9  ;;  %vm3496_vm9 = vcmp.eq.s32.totalorder %v26672_v38, %v23448_v48 }
 0x519   :  { %19062 = vmatpush3.bf16.msk.msra.mxu0 %vm19061_vm8, %v26493_v14  ;;  %vm3476_vm8 = vcmp.eq.s32.totalorder %v26664_v18, %v23448_v48 }
 0x51a   :  { %19064 = vmatprep.subr.msk.bf16.mxu0 %vm19063_vm15, %v26493_v14  ;;  %vm26698_vm15 = vmmov %vm26695_vm10 }
 0x51d   :  { %19066 = vmatpush3.bf16.msk.msra.mxu0 %vm19065_vm12, %v26493_v14  ;;  %vm26699_vm12 = vmmov %vm26695_vm10 }
 0x51e   :  { %vm26700_vm11 = vmmov %vm26699_vm12 }
 0x520   :  { %3276 = vmatmul.mubr.f32.vlgmr.msra.gmra.mrb[28].mxu0 %v26692_v10 }
 0x521   :  { %3280 = vmatprep.mubr.f32.mxu0 %v26693_v24 }
 0x524   :  { %3281 = vmatmul.mubr.f32.gmra.mrb[30].mxu0 %v26694_v19 }
 0x525   :  { %17584 = vmatprep.mubr.msk.f32.mxu0 %vm26695_vm10, %v13640_v62  ;;  %vm19109_vm10 = vmpackc.low %vm3476_vm8, %vm3475_vm2  ;;  %vm3480_vm2 = vcmp.eq.s32.totalorder %v26675_v31, %v23448_v48  ;;  %vm3497_vm8 = vcmp.eq.s32.totalorder %v26676_v17, %v23448_v48 }
 0x5f3   :  { %v16215_v59 = vpop.f32.mrb[28].mxu0 }
 0x5f4   :  { %v16216_v57 = vpop.f32.mrb[29].mxu0 }
 0x5f5   :  { %v16217_v1 = vadd.f32 %v16216_v57, %v16215_v59  ;;  %v13643_v57 = vld [vmem:[%s26232_s3 + $0xd8] sm:$0xff] }
 0x5f7   :  { %v3353_v60 = vadd.f32 %v26696_v0, %v16217_v1  ;;  %v16218_v11 = vpop.f32.mrb[30].mxu0  ;;  %v13778_v1 = vld [vmem:[%s26232_s3 + $0xe0] sm:$0xff] }
 0x5f8   :  { %v16219_v56 = vpop.f32.mrb[31].mxu0 }
 0x5f9   :  { %v16220_v21 = vadd.f32 %v16219_v56, %v16218_v11  ;;  %v26702_v11 = vld [vmem:[#allocation11_spill] sm:$0xff] }
 0x5fb   :  { %v3358_v49 = vadd.f32 %v26697_v52, %v16220_v21  ;;  %v13641_v52 = vld [vmem:[%s26232_s3 + $0xc8] sm:$0xff] }
 0x5fd   :  { %v19099_v62 = vpack.c.bf16 %v3358_v49, %v3353_v60  ;;  %v13642_v49 = vld [vmem:[%s26232_s3 + $0xd0] sm:$0xff] }
 0x5ff   :  { %19100 = vmatprep.subr.bf16.mxu0 %v19099_v62 }
 0x600   :  { %19102 = vmatpush3.bf16.msra.mxu0 %v19099_v62 }
 0x601   :  { %19104 = vmatprep.subr.msk.bf16.mxu0 %vm19103_vm14, %v26493_v14  ;;  %vm3478_vm14 = vcmp.eq.s32.totalorder %v26669_v34, %v23448_v48 }
 0x602   :  { %vm19113_vm13 = vmpackc.low %vm3478_vm14, %vm3477_vm5  ;;  %vm3500_vm5 = vcmp.eq.s32.totalorder %v26681_v51, %v23448_v48 }
 0x603   :  { %17585 = vmatmul.mubr.msk.f32.vlgmr.msra.gmra.mrb[12].mxu0 %vm26698_vm15, %v13641_v52  ;;  %vm3498_vm15 = vcmp.eq.s32.totalorder %v26677_v3, %v23448_v48  ;;  %v26703_v52 = vld [vmem:[#allocation65_spill] sm:$0xff] }
 0x604   :  { %19106 = vmatpush3.bf16.msk.msra.mxu0 %vm19105_vm3, %v26493_v14  ;;  %17587 = vmatprep.mubr.msk.f32.mxu0 %vm26699_vm12, %v13642_v49  ;;  %vm19115_vm3 = vmpackc.low %vm3496_vm9, %vm3495_vm4  ;;  %vm3481_vm12 = vcmp.eq.s32.totalorder %v26678_v53, %v23448_v48  ;;  %vm3483_vm4 = vcmp.eq.s32.totalorder %v26682_v58, %v23448_v48  ;;  %vm3484_vm9 = vcmp.eq.s32.totalorder %v26683_v55, %v23448_v48 }
 0x605   :  { %19108 = vmatprep.subr.msk.bf16.mxu0 %vm19107_vm1, %v26493_v14  ;;  %vm3479_vm1 = vcmp.eq.s32.totalorder %v26674_v12, %v23448_v48  ;;  %vm19119_vm6 = vmpackc.low %vm3498_vm15, %vm3497_vm8  ;;  %vm3485_vm8 = vcmp.eq.s32.totalorder %v26686_v50, %v23448_v48  ;;  %vm3486_vm15 = vcmp.eq.s32.totalorder %v26687_v46, %v23448_v48 }
 0x606   :  { %vm19117_vm7 = vmpackc.low %vm3480_vm2, %vm3479_vm1 }
 0x607   :  { %17588 = vmatmul.mubr.msk.f32.gmra.mrb[14].mxu0 %vm26700_vm11, %v13643_v57  ;;  %vm19125_vm1 = vmpackc.low %vm3484_vm9, %vm3483_vm4  ;;  %v23555_v57 = vld [vmem:[%s26231_s2 + $0x8] ss:$0 sm:$0xff] }
 0x608   :  { %19110 = vmatpush3.bf16.msk.msra.mxu0 %vm19109_vm10, %v26493_v14  ;;  %3729 = vmatprep.mubr.f32.mxu0 %v26673_v29  ;;  %vm3482_vm10 = vcmp.eq.s32.totalorder %v26679_v54, %v23448_v48  ;;  %vm3943_vm4 = vcmp.eq.s32.totalorder %v26536_v8, %v23555_v57  ;;  %vm3944_vm9 = vcmp.eq.s32.totalorder %v26537_v15, %v23555_v57 }
 0x609   :  { %19112 = vmatprep.subr.msk.bf16.mxu0 %vm19111_vm0, %v26493_v14  ;;  %vm3499_vm0 = vcmp.eq.s32.totalorder %v26680_v43, %v23448_v48  ;;  %vm19121_vm14 = vmpackc.low %vm3482_vm10, %vm3481_vm12 }
 0x60a   :  { %vm19123_vm11 = vmpackc.low %vm3500_vm5, %vm3499_vm0  ;;  %vm3487_vm0 = vcmp.eq.s32.totalorder %v26690_v4, %v23448_v48  ;;  %vm3488_vm5 = vcmp.eq.s32.totalorder %v26691_v7, %v23448_v48 }
 0x60b   :  { %vm19129_vm12 = vmpackc.low %vm3486_vm15, %vm3485_vm8  ;;  %vm3946_vm8 = vcmp.eq.s32.totalorder %v26541_v6, %v23555_v57 }
 0x60c   :  { %19114 = vmatpush3.bf16.msk.msra.mxu0 %vm19113_vm13, %v26493_v14  ;;  %vm3501_vm13 = vcmp.eq.s32.totalorder %v26684_v63, %v23448_v48 }
 0x60d   :  { %19116 = vmatprep.subr.msk.bf16.mxu0 %vm19115_vm3, %v26493_v14  ;;  %vm3502_vm3 = vcmp.eq.s32.totalorder %v26685_v61, %v23448_v48 }
 0x60e   :  { %vm19127_vm2 = vmpackc.low %vm3502_vm3, %vm3501_vm13  ;;  %vm3927_vm3 = vcmp.eq.s32.totalorder %v26538_v13, %v23555_v57 }
 0x60f   :  { %vm19171_vm13 = vmpackc.low %vm3944_vm9, %vm3943_vm4  ;;  %vm3931_vm9 = vcmp.eq.s32.totalorder %v26668_v35, %v23555_v57 }
 0x610   :  { %19118 = vmatpush3.bf16.msk.msra.mxu0 %vm19117_vm7, %v26493_v14  ;;  %vm3503_vm7 = vcmp.eq.s32.totalorder %v26688_v5, %v23448_v48 }
 0x611   :  { %19120 = vmatprep.subr.msk.bf16.mxu0 %vm19119_vm6, %v26493_v14  ;;  %vm3504_vm6 = vcmp.eq.s32.totalorder %v26689_v9, %v23448_v48 }
 0x612   :  { %vm19131_vm10 = vmpackc.low %vm3504_vm6, %vm3503_vm7  ;;  %vm3929_vm6 = vcmp.eq.s32.totalorder %v26663_v39, %v23555_v57 }
 0x614   :  { %19122 = vmatpush3.bf16.msk.msra.mxu0 %vm19121_vm14, %v26493_v14  ;;  %vm19133_vm14 = vmpackc.low %vm3488_vm5, %vm3487_vm0  ;;  %vm3947_vm0 = vcmp.eq.s32.totalorder %v26665_v2, %v23555_v57  ;;  %vm3948_vm5 = vcmp.eq.s32.totalorder %v26666_v42, %v23555_v57 }
 0x615   :  { %19124 = vmatprep.subr.msk.bf16.mxu0 %vm19123_vm11, %v26493_v14  ;;  %vm26701_vm11 = vcmask 130048   ;;  %vm19179_vm4 = vmpackc.low %vm3948_vm5, %vm3947_vm0 }
 0x618   :  { %19126 = vmatpush3.bf16.msk.msra.mxu0 %vm19125_vm1, %v26493_v14  ;;  %vm3928_vm1 = vcmp.eq.s32.totalorder %v26539_v25, %v23555_v57 }
 0x619   :  { %19128 = vmatprep.subr.msk.bf16.mxu0 %vm19127_vm2, %v26493_v14  ;;  %vm3945_vm2 = vcmp.eq.s32.totalorder %v26540_v16, %v23555_v57  ;;  %vm19173_vm15 = vmpackc.low %vm3928_vm1, %vm3927_vm3  ;;  %vm3949_vm1 = vcmp.eq.s32.totalorder %v26671_v47, %v23555_v57 }
 0x61a   :  { %vm19175_vm7 = vmpackc.low %vm3946_vm8, %vm3945_vm2  ;;  %vm3950_vm2 = vcmp.eq.s32.totalorder %v26672_v38, %v23555_v57 }
 0x61c   :  { %19130 = vmatpush3.bf16.msk.msra.mxu0 %vm19129_vm12, %v26493_v14  ;;  %vm3930_vm12 = vcmp.eq.s32.totalorder %v26664_v18, %v23555_v57 }
 0x61d   :  { %19132 = vmatprep.subr.msk.bf16.mxu0 %vm19131_vm10, %v26493_v14  ;;  %vm26704_vm10 = vmmov %vm26701_vm11 }
 0x61e   :  { %vm26706_vm3 = vmmov %vm26704_vm10 }
 0x620   :  { %19134 = vmatpush3.bf16.msk.msra.mxu0 %vm19133_vm14, %v26493_v14  ;;  %vm26705_vm14 = vmmov %vm26704_vm10 }
 0x623   :  { %3730 = vmatmul.mubr.f32.vlgmr.msra.gmra.mrb[32].mxu0 %v26692_v10 }
 0x624   :  { %3734 = vmatprep.mubr.f32.mxu0 %v26693_v24 }
 0x627   :  { %3735 = vmatmul.mubr.f32.gmra.mrb[34].mxu0 %v26694_v19 }
 0x628   :  { %17594 = vmatprep.mubr.msk.f32.mxu0 %vm26701_vm11, %v13778_v1  ;;  %vm19177_vm11 = vmpackc.low %vm3930_vm12, %vm3929_vm6  ;;  %vm3934_vm6 = vcmp.eq.s32.totalorder %v26675_v31, %v23555_v57  ;;  %vm3951_vm12 = vcmp.eq.s32.totalorder %v26676_v17, %v23555_v57  ;;  %v26736_v17 = vld [vmem:[#allocation7_spill] sm:$0xff] }
 0x6f6   :  { %v16297_v48 = vpop.f32.mrb[32].mxu0 }
 0x6f7   :  { %v16298_v21 = vpop.f32.mrb[33].mxu0 }
 0x6f8   :  { %v16299_v56 = vadd.f32 %v16298_v21, %v16297_v48  ;;  %v13779_v48 = vld [vmem:[%s26232_s3 + $0xe8] sm:$0xff]  ;;  %v13780_v21 = vld [vmem:[%s26232_s3 + $0xf0] sm:$0xff] }
 0x6fa   :  { %v3807_v60 = vadd.f32 %v26702_v11, %v16299_v56  ;;  %v16300_v0 = vpop.f32.mrb[34].mxu0  ;;  %v13781_v56 = vld [vmem:[%s26232_s3 + $0xf8] sm:$0xff]  ;;  %v13916_v11 = vld [vmem:[%s26232_s3 + $0x100] sm:$0xff] }
 0x6fb   :  { %v16301_v59 = vpop.f32.mrb[35].mxu0 }
 0x6fc   :  { %v16302_v62 = vadd.f32 %v16301_v59, %v16300_v0 }
 0x6fe   :  { %v3812_v49 = vadd.f32 %v26703_v52, %v16302_v62  ;;  %v26708_v62 = vld [vmem:[#allocation66_spill] sm:$0xff] }
 0x700   :  { %v19167_v1 = vpack.c.bf16 %v3812_v49, %v3807_v60 }
 0x702   :  { %19168 = vmatprep.subr.bf16.mxu0 %v19167_v1 }
 0x703   :  { %19170 = vmatpush3.bf16.msra.mxu0 %v19167_v1 }
 0x704   :  { %19172 = vmatprep.subr.msk.bf16.mxu0 %vm19171_vm13, %v26493_v14  ;;  %vm3932_vm13 = vcmp.eq.s32.totalorder %v26669_v34, %v23555_v57 }
 0x705   :  { %vm19181_vm8 = vmpackc.low %vm3932_vm13, %vm3931_vm9  ;;  %vm3954_vm9 = vcmp.eq.s32.totalorder %v26681_v51, %v23555_v57  ;;  %v26735_v51 = vld [vmem:[#allocation6_spill] sm:$0xff] }
 0x706   :  { %17595 = vmatmul.mubr.msk.f32.vlgmr.msra.gmra.mrb[12].mxu0 %vm26704_vm10, %v13779_v48  ;;  %vm3952_vm10 = vcmp.eq.s32.totalorder %v26677_v3, %v23555_v57  ;;  %v26709_v48 = vld [vmem:[#allocation67_spill] sm:$0xff] }
 0x707   :  { %19174 = vmatpush3.bf16.msk.msra.mxu0 %vm19173_vm15, %v26493_v14  ;;  %17597 = vmatprep.mubr.msk.f32.mxu0 %vm26705_vm14, %v13780_v21  ;;  %vm19183_vm15 = vmpackc.low %vm3950_vm2, %vm3949_vm1  ;;  %vm3935_vm14 = vcmp.eq.s32.totalorder %v26678_v53, %v23555_v57  ;;  %vm3937_vm1 = vcmp.eq.s32.totalorder %v26682_v58, %v23555_v57  ;;  %vm3938_vm2 = vcmp.eq.s32.totalorder %v26683_v55, %v23555_v57 }
 0x708   :  { %19176 = vmatprep.subr.msk.bf16.mxu0 %vm19175_vm7, %v26493_v14  ;;  %vm3933_vm7 = vcmp.eq.s32.totalorder %v26674_v12, %v23555_v57  ;;  %vm19187_vm5 = vmpackc.low %vm3952_vm10, %vm3951_vm12  ;;  %vm3939_vm12 = vcmp.eq.s32.totalorder %v26686_v50, %v23555_v57  ;;  %vm3940_vm10 = vcmp.eq.s32.totalorder %v26687_v46, %v23555_v57  ;;  %v26731_v46 = vld [vmem:[#allocation60_spill] sm:$0xff]  ;;  %v23769_v12 = vld [vmem:[%s26231_s2 + $0xa] ss:$0 sm:$0xff] }
 0x709   :  { %vm19185_vm0 = vmpackc.low %vm3934_vm6, %vm3933_vm7  ;;  %v26732_v50 = vld [vmem:[#allocation64_spill] sm:$0xff] }
 0x70a   :  { %17598 = vmatmul.mubr.msk.f32.gmra.mrb[14].mxu0 %vm26706_vm3, %v13781_v56  ;;  %vm19193_vm7 = vmpackc.low %vm3938_vm2, %vm3937_vm1  ;;  %v23662_v56 = vld [vmem:[%s26231_s2 + $0x9] ss:$0 sm:$0xff] }
 0x70b   :  { %19178 = vmatpush3.bf16.msk.msra.mxu0 %vm19177_vm11, %v26493_v14  ;;  %4183 = vmatprep.mubr.f32.mxu0 %v26673_v29  ;;  %vm3936_vm11 = vcmp.eq.s32.totalorder %v26679_v54, %v23555_v57  ;;  %vm4429_vm1 = vcmp.eq.s32.totalorder %v26543_v26, %v23662_v56  ;;  %vm4430_vm2 = vcmp.eq.s32.totalorder %v26544_v30, %v23662_v56 }
 0x70c   :  { %19180 = vmatprep.subr.msk.bf16.mxu0 %vm19179_vm4, %v26493_v14  ;;  %vm3953_vm4 = vcmp.eq.s32.totalorder %v26680_v43, %v23555_v57  ;;  %vm19189_vm13 = vmpackc.low %vm3936_vm11, %vm3935_vm14 }
 0x70d   :  { %vm19191_vm3 = vmpackc.low %vm3954_vm9, %vm3953_vm4  ;;  %vm3941_vm4 = vcmp.eq.s32.totalorder %v26690_v4, %v23555_v57  ;;  %vm3942_vm9 = vcmp.eq.s32.totalorder %v26691_v7, %v23555_v57  ;;  %v26727_v7 = vld [vmem:[#allocation52_spill] sm:$0xff]  ;;  %v26728_v4 = vld [vmem:[#allocation53_spill] sm:$0xff] }
 0x70e   :  { %vm19197_vm14 = vmpackc.low %vm3940_vm10, %vm3939_vm12  ;;  %vm4432_vm12 = vcmp.eq.s32.totalorder %v20771_v28, %v23662_v56 }
 0x70f   :  { %19182 = vmatpush3.bf16.msk.msra.mxu0 %vm19181_vm8, %v26493_v14  ;;  %vm3955_vm8 = vcmp.eq.s32.totalorder %v26684_v63, %v23555_v57  ;;  %v14054_v63 = vld [vmem:[%s26232_s3 + $0x120] sm:$0xff] }
 0x710   :  { %19184 = vmatprep.subr.msk.bf16.mxu0 %vm19183_vm15, %v26493_v14  ;;  %vm3956_vm15 = vcmp.eq.s32.totalorder %v26685_v61, %v23555_v57  ;;  %v26733_v61 = vld [vmem:[#allocation62_spill] sm:$0xff] }
 0x711   :  { %vm19195_vm6 = vmpackc.low %vm3956_vm15, %vm3955_vm8  ;;  %vm4413_vm15 = vcmp.eq.s32.totalorder %v20736_v22, %v23662_v56 }
 0x712   :  { %vm19271_vm8 = vmpackc.low %vm4430_vm2, %vm4429_vm1  ;;  %vm4417_vm2 = vcmp.eq.s32.totalorder %v20845_v40, %v23662_v56 }
 0x713   :  { %19186 = vmatpush3.bf16.msk.msra.mxu0 %vm19185_vm0, %v26493_v14  ;;  %vm3957_vm0 = vcmp.eq.s32.totalorder %v26688_v5, %v23555_v57  ;;  %v26730_v5 = vld [vmem:[#allocation57_spill] sm:$0xff] }
 0x714   :  { %19188 = vmatprep.subr.msk.bf16.mxu0 %vm19187_vm5, %v26493_v14  ;;  %vm3958_vm5 = vcmp.eq.s32.totalorder %v26689_v9, %v23555_v57  ;;  %v26729_v9 = vld [vmem:[#allocation56_spill] sm:$0xff] }
 0x715   :  { %vm19199_vm11 = vmpackc.low %vm3958_vm5, %vm3957_vm0  ;;  %vm4415_vm5 = vcmp.eq.s32.totalorder %v20790_v32, %v23662_v56 }
 0x717   :  { %19190 = vmatpush3.bf16.msk.msra.mxu0 %vm19189_vm13, %v26493_v14  ;;  %vm19201_vm13 = vmpackc.low %vm3942_vm9, %vm3941_vm4  ;;  %vm4433_vm4 = vcmp.eq.s32.totalorder %v20830_v36, %v23662_v56  ;;  %vm4434_vm9 = vcmp.eq.s32.totalorder %v20833_v37, %v23662_v56 }
 0x718   :  { %19192 = vmatprep.subr.msk.bf16.mxu0 %vm19191_vm3, %v26493_v14  ;;  %vm26707_vm3 = vcmask 130048   ;;  %vm19279_vm1 = vmpackc.low %vm4434_vm9, %vm4433_vm4 }
 0x71b   :  { %19194 = vmatpush3.bf16.msk.msra.mxu0 %vm19193_vm7, %v26493_v14  ;;  %vm4414_vm7 = vcmp.eq.s32.totalorder %v26545_v23, %v23662_v56 }
 0x71c   :  { %19196 = vmatprep.subr.msk.bf16.mxu0 %vm19195_vm6, %v26493_v14  ;;  %vm4431_vm6 = vcmp.eq.s32.totalorder %v20768_v27, %v23662_v56  ;;  %vm19273_vm10 = vmpackc.low %vm4414_vm7, %vm4413_vm15  ;;  %vm4435_vm7 = vcmp.eq.s32.totalorder %v20880_v44, %v23662_v56 }
 0x71d   :  { %vm19275_vm0 = vmpackc.low %vm4432_vm12, %vm4431_vm6  ;;  %vm4436_vm6 = vcmp.eq.s32.totalorder %v20883_v45, %v23662_v56 }
 0x71f   :  { %19198 = vmatpush3.bf16.msk.msra.mxu0 %vm19197_vm14, %v26493_v14  ;;  %vm4416_vm14 = vcmp.eq.s32.totalorder %v20793_v33, %v23662_v56 }
 0x720   :  { %19200 = vmatprep.subr.msk.bf16.mxu0 %vm19199_vm11, %v26493_v14  ;;  %vm26710_vm11 = vmmov %vm26707_vm3 }
 0x721   :  { %vm26712_vm15 = vmmov %vm26710_vm11 }
 0x723   :  { %19202 = vmatpush3.bf16.msk.msra.mxu0 %vm19201_vm13, %v26493_v14  ;;  %vm26711_vm13 = vmmov %vm26707_vm3 }
 0x726   :  { %4184 = vmatmul.mubr.f32.vlgmr.msra.gmra.mrb[36].mxu0 %v26692_v10  ;;  %v26726_v10 = vld [vmem:[#allocation49_spill] sm:$0xff] }
 0x727   :  { %4188 = vmatprep.mubr.f32.mxu0 %v26693_v24  ;;  %v26725_v24 = vld [vmem:[#allocation48_spill] sm:$0xff] }
 0x72a   :  { %4189 = vmatmul.mubr.f32.gmra.mrb[38].mxu0 %v26694_v19  ;;  %v26724_v19 = vld [vmem:[#allocation45_spill] sm:$0xff] }
 0x72b   :  { %17604 = vmatprep.mubr.msk.f32.mxu0 %vm26707_vm3, %v13916_v11  ;;  %vm19277_vm3 = vmpackc.low %vm4416_vm14, %vm4415_vm5 }
 0x7f9   :  { %v16379_v60 = vpop.f32.mrb[36].mxu0 }
 0x7fa   :  { %v16380_v0 = vpop.f32.mrb[37].mxu0 }
 0x7fb   :  { %v16381_v59 = vadd.f32 %v16380_v0, %v16379_v60  ;;  %v13917_v60 = vld [vmem:[%s26232_s3 + $0x108] sm:$0xff]  ;;  %v13918_v0 = vld [vmem:[%s26232_s3 + $0x110] sm:$0xff] }
 0x7fd   :  { %v4261_v52 = vadd.f32 %v26708_v62, %v16381_v59  ;;  %v16382_v49 = vpop.f32.mrb[38].mxu0  ;;  %v13919_v59 = vld [vmem:[%s26232_s3 + $0x118] sm:$0xff] }
 0x7fe   :  { %v16383_v57 = vpop.f32.mrb[39].mxu0  ;;  %v26713_v62 = vld [vmem:[#allocation24_spill] sm:$0xff] }
 0x7ff   :  { %v16384_v1 = vadd.f32 %v16383_v57, %v16382_v49  ;;  %v26715_v49 = vld [vmem:[#allocation28_spill] sm:$0xff]  ;;  %v26716_v57 = vld [vmem:[#allocation29_spill] sm:$0xff] }
 0x800   :  { %vm4437_vm14 = vcmp.eq.s32.totalorder %v26715_v49, %v23662_v56 }
 0x801   :  { %v4266_v21 = vadd.f32 %v26709_v48, %v16384_v1  ;;  %v26717_v1 = vld [vmem:[#allocation32_spill] sm:$0xff]  ;;  %v26718_v48 = vld [vmem:[#allocation33_spill] sm:$0xff] }
 0x803   :  { %v19235_v11 = vpack.c.bf16 %v4266_v21, %v4261_v52  ;;  %v26714_v52 = vld [vmem:[#allocation25_spill] sm:$0xff]  ;;  %v26719_v21 = vld [vmem:[#allocation36_spill] sm:$0xff] }
 0x804   :  { %vm4420_vm5 = vcmp.eq.s32.totalorder %v26714_v52, %v23662_v56 }
 0x805   :  { %19236 = vmatprep.subr.bf16.mxu0 %v19235_v11 }
 0x806   :  { %19238 = vmatpush3.bf16.msra.mxu0 %v19235_v11  ;;  %v26720_v11 = vld [vmem:[#allocation37_spill] sm:$0xff] }
 0x807   :  { %19272 = vmatprep.subr.msk.bf16.mxu0 %vm19271_vm8, %v26493_v14  ;;  %vm4418_vm8 = vcmp.eq.s32.totalorder %v20856_v41, %v23662_v56 }
 0x808   :  { %vm19281_vm12 = vmpackc.low %vm4418_vm8, %vm4417_vm2  ;;  %vm4440_vm2 = vcmp.eq.s32.totalorder %v26720_v11, %v23662_v56 }
 0x809   :  { %17605 = vmatmul.mubr.msk.f32.vlgmr.msra.gmra.mrb[12].mxu0 %vm26710_vm11, %v13917_v60  ;;  %vm4438_vm11 = vcmp.eq.s32.totalorder %v26716_v57, %v23662_v56  ;;  %v26721_v60 = vld [vmem:[#allocation40_spill] sm:$0xff] }
 0x80a   :  { %19274 = vmatpush3.bf16.msk.msra.mxu0 %vm19273_vm10, %v26493_v14  ;;  %17607 = vmatprep.mubr.msk.f32.mxu0 %vm26711_vm13, %v13918_v0  ;;  %vm19283_vm10 = vmpackc.low %vm4436_vm6, %vm4435_vm7  ;;  %vm4421_vm13 = vcmp.eq.s32.totalorder %v26717_v1, %v23662_v56  ;;  %vm4423_vm7 = vcmp.eq.s32.totalorder %v26721_v60, %v23662_v56  ;;  %v26722_v0 = vld [vmem:[#allocation41_spill] sm:$0xff] }
 0x80b   :  { %19276 = vmatprep.subr.msk.bf16.mxu0 %vm19275_vm0, %v26493_v14  ;;  %vm4419_vm0 = vcmp.eq.s32.totalorder %v26713_v62, %v23662_v56  ;;  %vm19287_vm9 = vmpackc.low %vm4438_vm11, %vm4437_vm14  ;;  %vm4424_vm6 = vcmp.eq.s32.totalorder %v26722_v0, %v23662_v56  ;;  %vm4425_vm14 = vcmp.eq.s32.totalorder %v26725_v24, %v23662_v56  ;;  %vm4426_vm11 = vcmp.eq.s32.totalorder %v26726_v10, %v23662_v56 }
 0x80c   :  { %vm19285_vm4 = vmpackc.low %vm4420_vm5, %vm4419_vm0 }
 0x80d   :  { %17608 = vmatmul.mubr.msk.f32.gmra.mrb[14].mxu0 %vm26712_vm15, %v13919_v59  ;;  %v26723_v59 = vld [vmem:[#allocation44_spill] sm:$0xff]  ;;  %vm19293_vm0 = vmpackc.low %vm4424_vm6, %vm4423_vm7  ;;  %vm4883_vm7 = vcmp.eq.s32.totalorder %v26543_v26, %v23769_v12  ;;  %vm4884_vm6 = vcmp.eq.s32.totalorder %v26544_v30, %v23769_v12 }
 0x80e   :  { %19278 = vmatpush3.bf16.msk.msra.mxu0 %vm19277_vm3, %v26493_v14  ;;  %4712 = vmatprep.mubr.f32.mxu0 %v21189_v20  ;;  %vm4422_vm3 = vcmp.eq.s32.totalorder %v26718_v48, %v23662_v56 }
 0x80f   :  { %19280 = vmatprep.subr.msk.bf16.mxu0 %vm19279_vm1, %v26493_v14  ;;  %vm4439_vm1 = vcmp.eq.s32.totalorder %v26719_v21, %v23662_v56  ;;  %vm19289_vm8 = vmpackc.low %vm4422_vm3, %vm4421_vm13 }
 0x810   :  { %vm19291_vm15 = vmpackc.low %vm4440_vm2, %vm4439_vm1  ;;  %vm4427_vm1 = vcmp.eq.s32.totalorder %v26729_v9, %v23662_v56  ;;  %vm4428_vm2 = vcmp.eq.s32.totalorder %v26730_v5, %v23662_v56 }
 0x811   :  { %vm19297_vm13 = vmpackc.low %vm4426_vm11, %vm4425_vm14  ;;  %vm4886_vm14 = vcmp.eq.s32.totalorder %v20771_v28, %v23769_v12 }
 0x812   :  { %19282 = vmatpush3.bf16.msk.msra.mxu0 %vm19281_vm12, %v26493_v14  ;;  %vm4441_vm12 = vcmp.eq.s32.totalorder %v26723_v59, %v23662_v56 }
 0x813   :  { %19284 = vmatprep.subr.msk.bf16.mxu0 %vm19283_vm10, %v26493_v14  ;;  %vm4442_vm10 = vcmp.eq.s32.totalorder %v26724_v19, %v23662_v56 }
 0x814   :  { %vm19295_vm5 = vmpackc.low %vm4442_vm10, %vm4441_vm12  ;;  %vm4867_vm10 = vcmp.eq.s32.totalorder %v20736_v22, %v23769_v12 }
 0x815   :  { %vm19339_vm12 = vmpackc.low %vm4884_vm6, %vm4883_vm7  ;;  %vm4871_vm6 = vcmp.eq.s32.totalorder %v20845_v40, %v23769_v12 }
 0x816   :  { %19286 = vmatpush3.bf16.msk.msra.mxu0 %vm19285_vm4, %v26493_v14  ;;  %vm4443_vm4 = vcmp.eq.s32.totalorder %v26727_v7, %v23662_v56 }
 0x817   :  { %19288 = vmatprep.subr.msk.bf16.mxu0 %vm19287_vm9, %v26493_v14  ;;  %vm4444_vm9 = vcmp.eq.s32.totalorder %v26728_v4, %v23662_v56 }
 0x818   :  { %vm19299_vm3 = vmpackc.low %vm4444_vm9, %vm4443_vm4  ;;  %vm4869_vm9 = vcmp.eq.s32.totalorder %v20790_v32, %v23769_v12 }
 0x81a   :  { %19290 = vmatpush3.bf16.msk.msra.mxu0 %vm19289_vm8, %v26493_v14  ;;  %vm19301_vm8 = vmpackc.low %vm4428_vm2, %vm4427_vm1  ;;  %vm4887_vm1 = vcmp.eq.s32.totalorder %v20830_v36, %v23769_v12  ;;  %vm4888_vm2 = vcmp.eq.s32.totalorder %v20833_v37, %v23769_v12 }
 0x81b   :  { %19292 = vmatprep.subr.msk.bf16.mxu0 %vm19291_vm15, %v26493_v14  ;;  %vm26734_vm15 = vcmask 130048   ;;  %vm19347_vm7 = vmpackc.low %vm4888_vm2, %vm4887_vm1 }
 0x81e   :  { %19294 = vmatpush3.bf16.msk.msra.mxu0 %vm19293_vm0, %v26493_v14  ;;  %vm4868_vm0 = vcmp.eq.s32.totalorder %v26545_v23, %v23769_v12 }
 0x81f   :  { %19296 = vmatprep.subr.msk.bf16.mxu0 %vm19295_vm5, %v26493_v14  ;;  %vm4885_vm5 = vcmp.eq.s32.totalorder %v20768_v27, %v23769_v12  ;;  %vm19341_vm11 = vmpackc.low %vm4868_vm0, %vm4867_vm10  ;;  %vm4889_vm0 = vcmp.eq.s32.totalorder %v20880_v44, %v23769_v12 }
 0x820   :  { %vm19343_vm4 = vmpackc.low %vm4886_vm14, %vm4885_vm5  ;;  %vm4890_vm5 = vcmp.eq.s32.totalorder %v20883_v45, %v23769_v12 }
 0x822   :  { %19298 = vmatpush3.bf16.msk.msra.mxu0 %vm19297_vm13, %v26493_v14  ;;  %vm4870_vm13 = vcmp.eq.s32.totalorder %v20793_v33, %v23769_v12 }
 0x823   :  { %19300 = vmatprep.subr.msk.bf16.mxu0 %vm19299_vm3, %v26493_v14  ;;  %vm26737_vm3 = vmmov %vm26734_vm15 }
 0x824   :  { %vm26739_vm10 = vmmov %vm26737_vm3 }
 0x826   :  { %19302 = vmatpush3.bf16.msk.msra.mxu0 %vm19301_vm8, %v26493_v14  ;;  %vm26738_vm8 = vmmov %vm26737_vm3 }
 0x829   :  { %4713 = vmatmul.mubr.f32.vlgmr.msra.gmra.mrb[40].mxu0 %v26731_v46 }
 0x82a   :  { %4717 = vmatprep.mubr.f32.mxu0 %v26732_v50 }
 0x82d   :  { %4718 = vmatmul.mubr.f32.gmra.mrb[42].mxu0 %v26733_v61 }
 0x82e   :  { %17614 = vmatprep.mubr.msk.f32.mxu0 %vm26734_vm15, %v14054_v63  ;;  %vm19345_vm15 = vmpackc.low %vm4870_vm13, %vm4869_vm9  ;;  %vm4874_vm9 = vcmp.eq.s32.totalorder %v26714_v52, %v23769_v12  ;;  %vm4891_vm13 = vcmp.eq.s32.totalorder %v26715_v49, %v23769_v12 }
 0x8fc   :  { %v16499_v56 = vpop.f32.mrb[40].mxu0 }
 0x8fd   :  { %v16500_v55 = vpop.f32.mrb[41].mxu0 }
 0x8fe   :  { %v16501_v58 = vadd.f32 %v16500_v55, %v16499_v56  ;;  %v14055_v55 = vld [vmem:[%s26232_s3 + $0x128] sm:$0xff] }
 0x900   :  { %v4715_v43 = vadd.f32 %v16501_v58, %v26735_v51  ;;  %v16502_v54 = vpop.f32.mrb[42].mxu0  ;;  %v14056_v58 = vld [vmem:[%s26232_s3 + $0x130] sm:$0xff]  ;;  %v14057_v51 = vld [vmem:[%s26232_s3 + $0x138] sm:$0xff] }
 0x901   :  { %v16503_v53 = vpop.f32.mrb[43].mxu0 }
 0x902   :  { %v16504_v3 = vadd.f32 %v16503_v53, %v16502_v54  ;;  %v26741_v53 = vld [vmem:[#allocation68_spill] sm:$0xff] }
 0x904   :  { %v4720_v31 = vadd.f32 %v16504_v3, %v26736_v17 }
 0x906   :  { %v19303_v63 = vpack.c.bf16 %v4720_v31, %v4715_v43  ;;  %v14192_v31 = vld [vmem:[%s26232_s3 + $0x140] sm:$0xff] }
 0x908   :  { %19304 = vmatprep.subr.bf16.mxu0 %v19303_v63 }
 0x909   :  { %19306 = vmatpush3.bf16.msra.mxu0 %v19303_v63 }
 0x90a   :  { %19340 = vmatprep.subr.msk.bf16.mxu0 %vm19339_vm12, %v26493_v14  ;;  %vm4872_vm12 = vcmp.eq.s32.totalorder %v20856_v41, %v23769_v12 }
 0x90b   :  { %vm19349_vm14 = vmpackc.low %vm4872_vm12, %vm4871_vm6  ;;  %vm4894_vm6 = vcmp.eq.s32.totalorder %v26720_v11, %v23769_v12 }
 0x90c   :  { %17615 = vmatmul.mubr.msk.f32.vlgmr.msra.gmra.mrb[12].mxu0 %vm26737_vm3, %v14055_v55  ;;  %vm4892_vm3 = vcmp.eq.s32.totalorder %v26716_v57, %v23769_v12  ;;  %v26742_v55 = vld [vmem:[#allocation69_spill] sm:$0xff] }
 0x90d   :  { %19342 = vmatpush3.bf16.msk.msra.mxu0 %vm19341_vm11, %v26493_v14  ;;  %17617 = vmatprep.mubr.msk.f32.mxu0 %vm26738_vm8, %v14056_v58  ;;  %vm19351_vm11 = vmpackc.low %vm4890_vm5, %vm4889_vm0  ;;  %vm4875_vm8 = vcmp.eq.s32.totalorder %v26717_v1, %v23769_v12  ;;  %vm4877_vm0 = vcmp.eq.s32.totalorder %v26721_v60, %v23769_v12  ;;  %vm4878_vm5 = vcmp.eq.s32.totalorder %v26722_v0, %v23769_v12 }
 0x90e   :  { %19344 = vmatprep.subr.msk.bf16.mxu0 %vm19343_vm4, %v26493_v14  ;;  %vm4873_vm4 = vcmp.eq.s32.totalorder %v26713_v62, %v23769_v12  ;;  %vm19355_vm2 = vmpackc.low %vm4892_vm3, %vm4891_vm13  ;;  %vm4879_vm13 = vcmp.eq.s32.totalorder %v26725_v24, %v23769_v12  ;;  %vm4880_vm3 = vcmp.eq.s32.totalorder %v26726_v10, %v23769_v12 }
 0x90f   :  { %vm19353_vm1 = vmpackc.low %vm4874_vm9, %vm4873_vm4 }
 0x910   :  { %17618 = vmatmul.mubr.msk.f32.gmra.mrb[14].mxu0 %vm26739_vm10, %v14057_v51  ;;  %vm19361_vm4 = vmpackc.low %vm4878_vm5, %vm4877_vm0  ;;  %v23876_v51 = vld [vmem:[%s26231_s2 + $0xb] ss:$0 sm:$0xff] }
 0x911   :  { %19346 = vmatpush3.bf16.msk.msra.mxu0 %vm19345_vm15, %v26493_v14  ;;  %5166 = vmatprep.mubr.f32.mxu0 %v21189_v20  ;;  %vm4876_vm15 = vcmp.eq.s32.totalorder %v26718_v48, %v23769_v12  ;;  %vm5337_vm0 = vcmp.eq.s32.totalorder %v26543_v26, %v23876_v51  ;;  %vm5338_vm5 = vcmp.eq.s32.totalorder %v26544_v30, %v23876_v51 }
 0x912   :  { %19348 = vmatprep.subr.msk.bf16.mxu0 %vm19347_vm7, %v26493_v14  ;;  %vm4893_vm7 = vcmp.eq.s32.totalorder %v26719_v21, %v23769_v12  ;;  %vm19357_vm12 = vmpackc.low %vm4876_vm15, %vm4875_vm8 }
 0x913   :  { %vm19359_vm10 = vmpackc.low %vm4894_vm6, %vm4893_vm7  ;;  %vm4881_vm7 = vcmp.eq.s32.totalorder %v26729_v9, %v23769_v12  ;;  %vm4882_vm6 = vcmp.eq.s32.totalorder %v26730_v5, %v23769_v12 }
 0x914   :  { %vm19365_vm8 = vmpackc.low %vm4880_vm3, %vm4879_vm13  ;;  %vm5340_vm13 = vcmp.eq.s32.totalorder %v20771_v28, %v23876_v51 }
 0x915   :  { %19350 = vmatpush3.bf16.msk.msra.mxu0 %vm19349_vm14, %v26493_v14  ;;  %vm4895_vm14 = vcmp.eq.s32.totalorder %v26723_v59, %v23769_v12 }
 0x916   :  { %19352 = vmatprep.subr.msk.bf16.mxu0 %vm19351_vm11, %v26493_v14  ;;  %vm4896_vm11 = vcmp.eq.s32.totalorder %v26724_v19, %v23769_v12 }
 0x917   :  { %vm19363_vm9 = vmpackc.low %vm4896_vm11, %vm4895_vm14  ;;  %vm5321_vm11 = vcmp.eq.s32.totalorder %v20736_v22, %v23876_v51 }
 0x918   :  { %vm19407_vm14 = vmpackc.low %vm5338_vm5, %vm5337_vm0  ;;  %vm5325_vm5 = vcmp.eq.s32.totalorder %v20845_v40, %v23876_v51 }
 0x919   :  { %19354 = vmatpush3.bf16.msk.msra.mxu0 %vm19353_vm1, %v26493_v14  ;;  %vm4897_vm1 = vcmp.eq.s32.totalorder %v26727_v7, %v23769_v12 }
 0x91a   :  { %19356 = vmatprep.subr.msk.bf16.mxu0 %vm19355_vm2, %v26493_v14  ;;  %vm4898_vm2 = vcmp.eq.s32.totalorder %v26728_v4, %v23769_v12 }
 0x91b   :  { %vm19367_vm15 = vmpackc.low %vm4898_vm2, %vm4897_vm1  ;;  %vm5323_vm2 = vcmp.eq.s32.totalorder %v20790_v32, %v23876_v51 }
 0x91d   :  { %19358 = vmatpush3.bf16.msk.msra.mxu0 %vm19357_vm12, %v26493_v14  ;;  %vm19369_vm12 = vmpackc.low %vm4882_vm6, %vm4881_vm7  ;;  %vm5341_vm7 = vcmp.eq.s32.totalorder %v20830_v36, %v23876_v51  ;;  %vm5342_vm6 = vcmp.eq.s32.totalorder %v20833_v37, %v23876_v51 }
 0x91e   :  { %19360 = vmatprep.subr.msk.bf16.mxu0 %vm19359_vm10, %v26493_v14  ;;  %vm26740_vm10 = vcmask 130048   ;;  %vm19415_vm0 = vmpackc.low %vm5342_vm6, %vm5341_vm7 }
 0x921   :  { %19362 = vmatpush3.bf16.msk.msra.mxu0 %vm19361_vm4, %v26493_v14  ;;  %vm5322_vm4 = vcmp.eq.s32.totalorder %v26545_v23, %v23876_v51 }
 0x922   :  { %19364 = vmatprep.subr.msk.bf16.mxu0 %vm19363_vm9, %v26493_v14  ;;  %vm5339_vm9 = vcmp.eq.s32.totalorder %v20768_v27, %v23876_v51  ;;  %vm19409_vm3 = vmpackc.low %vm5322_vm4, %vm5321_vm11  ;;  %vm5343_vm4 = vcmp.eq.s32.totalorder %v20880_v44, %v23876_v51 }
 0x923   :  { %vm19411_vm1 = vmpackc.low %vm5340_vm13, %vm5339_vm9  ;;  %vm5344_vm9 = vcmp.eq.s32.totalorder %v20883_v45, %v23876_v51 }
 0x925   :  { %19366 = vmatpush3.bf16.msk.msra.mxu0 %vm19365_vm8, %v26493_v14  ;;  %vm5324_vm8 = vcmp.eq.s32.totalorder %v20793_v33, %v23876_v51 }
 0x926   :  { %19368 = vmatprep.subr.msk.bf16.mxu0 %vm19367_vm15, %v26493_v14  ;;  %vm26743_vm15 = vmmov %vm26740_vm10 }
 0x929   :  { %19370 = vmatpush3.bf16.msk.msra.mxu0 %vm19369_vm12, %v26493_v14  ;;  %vm26744_vm12 = vmmov %vm26740_vm10 }
 0x92a   :  { %vm26745_vm11 = vmmov %vm26744_vm12 }
 0x92c   :  { %5167 = vmatmul.mubr.f32.vlgmr.msra.gmra.mrb[44].mxu0 %v26731_v46 }
 0x92d   :  { %5171 = vmatprep.mubr.f32.mxu0 %v26732_v50 }
 0x930   :  { %5172 = vmatmul.mubr.f32.gmra.mrb[46].mxu0 %v26733_v61 }
 0x931   :  { %17624 = vmatprep.mubr.msk.f32.mxu0 %vm26740_vm10, %v14192_v31  ;;  %vm19413_vm10 = vmpackc.low %vm5324_vm8, %vm5323_vm2  ;;  %vm5328_vm2 = vcmp.eq.s32.totalorder %v26714_v52, %v23876_v51  ;;  %vm5345_vm8 = vcmp.eq.s32.totalorder %v26715_v49, %v23876_v51 }
 0x9ff   :  { %v16581_v12 = vpop.f32.mrb[44].mxu0 }
 0xa00   :  { %v16582_v17 = vpop.f32.mrb[45].mxu0 }
 0xa01   :  { %v16583_v3 = vadd.f32 %v16582_v17, %v16581_v12  ;;  %v14193_v12 = vld [vmem:[%s26232_s3 + $0x148] sm:$0xff]  ;;  %v14194_v17 = vld [vmem:[%s26232_s3 + $0x150] sm:$0xff] }
 0xa03   :  { %v5169_v54 = vadd.f32 %v16583_v3, %v26741_v53  ;;  %v16584_v43 = vpop.f32.mrb[46].mxu0  ;;  %v14195_v3 = vld [vmem:[%s26232_s3 + $0x158] sm:$0xff]  ;;  %v14330_v53 = vld [vmem:[%s26232_s3 + $0x160] sm:$0xff] }
 0xa04   :  { %v16585_v56 = vpop.f32.mrb[47].mxu0 }
 0xa05   :  { %v16586_v63 = vadd.f32 %v16585_v56, %v16584_v43 }
 0xa07   :  { %v5174_v58 = vadd.f32 %v16586_v63, %v26742_v55  ;;  %v26747_v63 = vld [vmem:[#allocation70_spill] sm:$0xff] }
 0xa09   :  { %v19371_v31 = vpack.c.bf16 %v5174_v58, %v5169_v54 }
 0xa0b   :  { %19372 = vmatprep.subr.bf16.mxu0 %v19371_v31 }
 0xa0c   :  { %19374 = vmatpush3.bf16.msra.mxu0 %v19371_v31 }
 0xa0d   :  { %19408 = vmatprep.subr.msk.bf16.mxu0 %vm19407_vm14, %v26493_v14  ;;  %vm5326_vm14 = vcmp.eq.s32.totalorder %v20856_v41, %v23876_v51 }
 0xa0e   :  { %vm19417_vm13 = vmpackc.low %vm5326_vm14, %vm5325_vm5  ;;  %vm5348_vm5 = vcmp.eq.s32.totalorder %v26720_v11, %v23876_v51 }
 0xa0f   :  { %17625 = vmatmul.mubr.msk.f32.vlgmr.msra.gmra.mrb[12].mxu0 %vm26743_vm15, %v14193_v12  ;;  %vm5346_vm15 = vcmp.eq.s32.totalorder %v26716_v57, %v23876_v51  ;;  %v26748_v12 = vld [vmem:[#allocation71_spill] sm:$0xff] }
 0xa10   :  { %19410 = vmatpush3.bf16.msk.msra.mxu0 %vm19409_vm3, %v26493_v14  ;;  %17627 = vmatprep.mubr.msk.f32.mxu0 %vm26744_vm12, %v14194_v17  ;;  %vm19419_vm3 = vmpackc.low %vm5344_vm9, %vm5343_vm4  ;;  %vm5329_vm12 = vcmp.eq.s32.totalorder %v26717_v1, %v23876_v51  ;;  %vm5331_vm4 = vcmp.eq.s32.totalorder %v26721_v60, %v23876_v51  ;;  %vm5332_vm9 = vcmp.eq.s32.totalorder %v26722_v0, %v23876_v51 }
 0xa11   :  { %19412 = vmatprep.subr.msk.bf16.mxu0 %vm19411_vm1, %v26493_v14  ;;  %vm5327_vm1 = vcmp.eq.s32.totalorder %v26713_v62, %v23876_v51  ;;  %vm19423_vm6 = vmpackc.low %vm5346_vm15, %vm5345_vm8  ;;  %vm5333_vm8 = vcmp.eq.s32.totalorder %v26725_v24, %v23876_v51  ;;  %vm5334_vm15 = vcmp.eq.s32.totalorder %v26726_v10, %v23876_v51 }
 0xa12   :  { %vm19421_vm7 = vmpackc.low %vm5328_vm2, %vm5327_vm1 }
 0xa13   :  { %17628 = vmatmul.mubr.msk.f32.gmra.mrb[14].mxu0 %vm26745_vm11, %v14195_v3  ;;  %vm19429_vm1 = vmpackc.low %vm5332_vm9, %vm5331_vm4  ;;  %v23983_v3 = vld [vmem:[%s26231_s2 + $0xc] ss:$0 sm:$0xff] }
 0xa14   :  { %19414 = vmatpush3.bf16.msk.msra.mxu0 %vm19413_vm10, %v26493_v14  ;;  %5620 = vmatprep.mubr.f32.mxu0 %v21189_v20  ;;  %vm5330_vm10 = vcmp.eq.s32.totalorder %v26718_v48, %v23876_v51  ;;  %vm5791_vm4 = vcmp.eq.s32.totalorder %v26543_v26, %v23983_v3  ;;  %vm5792_vm9 = vcmp.eq.s32.totalorder %v26544_v30, %v23983_v3  ;;  %v14331_v30 = vld [vmem:[%s26232_s3 + $0x168] sm:$0xff] }
 0xa15   :  { %19416 = vmatprep.subr.msk.bf16.mxu0 %vm19415_vm0, %v26493_v14  ;;  %vm5347_vm0 = vcmp.eq.s32.totalorder %v26719_v21, %v23876_v51  ;;  %vm19425_vm14 = vmpackc.low %vm5330_vm10, %vm5329_vm12  ;;  %v26755_v26 = vld [vmem:[#allocation74_spill] sm:$0xff] }
 0xa16   :  { %vm19427_vm11 = vmpackc.low %vm5348_vm5, %vm5347_vm0  ;;  %vm5335_vm0 = vcmp.eq.s32.totalorder %v26729_v9, %v23876_v51  ;;  %vm5336_vm5 = vcmp.eq.s32.totalorder %v26730_v5, %v23876_v51 }
 0xa17   :  { %vm19433_vm12 = vmpackc.low %vm5334_vm15, %vm5333_vm8  ;;  %vm5794_vm8 = vcmp.eq.s32.totalorder %v20771_v28, %v23983_v3  ;;  %v14468_v28 = vld [vmem:[%s26232_s3 + $0x180] sm:$0xff] }
 0xa18   :  { %19418 = vmatpush3.bf16.msk.msra.mxu0 %vm19417_vm13, %v26493_v14  ;;  %vm5349_vm13 = vcmp.eq.s32.totalorder %v26723_v59, %v23876_v51 }
 0xa19   :  { %19420 = vmatprep.subr.msk.bf16.mxu0 %vm19419_vm3, %v26493_v14  ;;  %vm5350_vm3 = vcmp.eq.s32.totalorder %v26724_v19, %v23876_v51 }
 0xa1a   :  { %vm19431_vm2 = vmpackc.low %vm5350_vm3, %vm5349_vm13  ;;  %vm5775_vm3 = vcmp.eq.s32.totalorder %v20736_v22, %v23983_v3  ;;  %v14332_v22 = vld [vmem:[%s26232_s3 + $0x170] sm:$0xff] }
 0xa1b   :  { %vm19475_vm13 = vmpackc.low %vm5792_vm9, %vm5791_vm4  ;;  %vm5779_vm9 = vcmp.eq.s32.totalorder %v20845_v40, %v23983_v3 }
 0xa1c   :  { %19422 = vmatpush3.bf16.msk.msra.mxu0 %vm19421_vm7, %v26493_v14  ;;  %vm5351_vm7 = vcmp.eq.s32.totalorder %v26727_v7, %v23876_v51 }
 0xa1d   :  { %19424 = vmatprep.subr.msk.bf16.mxu0 %vm19423_vm6, %v26493_v14  ;;  %vm5352_vm6 = vcmp.eq.s32.totalorder %v26728_v4, %v23876_v51 }
 0xa1e   :  { %vm19435_vm10 = vmpackc.low %vm5352_vm6, %vm5351_vm7  ;;  %vm5777_vm6 = vcmp.eq.s32.totalorder %v20790_v32, %v23983_v3 }
 0xa20   :  { %19426 = vmatpush3.bf16.msk.msra.mxu0 %vm19425_vm14, %v26493_v14  ;;  %vm19437_vm14 = vmpackc.low %vm5336_vm5, %vm5335_vm0  ;;  %vm5795_vm0 = vcmp.eq.s32.totalorder %v20830_v36, %v23983_v3  ;;  %vm5796_vm5 = vcmp.eq.s32.totalorder %v20833_v37, %v23983_v3  ;;  %v26753_v37 = vld [vmem:[#allocation72_spill] sm:$0xff] }
 0xa21   :  { %19428 = vmatprep.subr.msk.bf16.mxu0 %vm19427_vm11, %v26493_v14  ;;  %vm26746_vm11 = vcmask 130048   ;;  %vm19483_vm4 = vmpackc.low %vm5796_vm5, %vm5795_vm0 }
 0xa24   :  { %19430 = vmatpush3.bf16.msk.msra.mxu0 %vm19429_vm1, %v26493_v14  ;;  %vm5776_vm1 = vcmp.eq.s32.totalorder %v26545_v23, %v23983_v3  ;;  %v14469_v23 = vld [vmem:[%s26232_s3 + $0x188] sm:$0xff] }
 0xa25   :  { %19432 = vmatprep.subr.msk.bf16.mxu0 %vm19431_vm2, %v26493_v14  ;;  %vm5793_vm2 = vcmp.eq.s32.totalorder %v20768_v27, %v23983_v3  ;;  %vm19477_vm15 = vmpackc.low %vm5776_vm1, %vm5775_vm3  ;;  %v14333_v27 = vld [vmem:[%s26232_s3 + $0x178] sm:$0xff]  ;;  %vm5797_vm1 = vcmp.eq.s32.totalorder %v20880_v44, %v23983_v3 }
 0xa26   :  { %vm19479_vm7 = vmpackc.low %vm5794_vm8, %vm5793_vm2  ;;  %vm5798_vm2 = vcmp.eq.s32.totalorder %v20883_v45, %v23983_v3 }
 0xa28   :  { %19434 = vmatpush3.bf16.msk.msra.mxu0 %vm19433_vm12, %v26493_v14  ;;  %vm5778_vm12 = vcmp.eq.s32.totalorder %v20793_v33, %v23983_v3 }
 0xa29   :  { %19436 = vmatprep.subr.msk.bf16.mxu0 %vm19435_vm10, %v26493_v14  ;;  %vm26749_vm10 = vmmov %vm26746_vm11 }
 0xa2a   :  { %vm26751_vm3 = vmmov %vm26749_vm10 }
 0xa2c   :  { %19438 = vmatpush3.bf16.msk.msra.mxu0 %vm19437_vm14, %v26493_v14  ;;  %vm26750_vm14 = vmmov %vm26749_vm10 }
 0xa2f   :  { %5621 = vmatmul.mubr.f32.vlgmr.msra.gmra.mrb[48].mxu0 %v26731_v46 }
 0xa30   :  { %5625 = vmatprep.mubr.f32.mxu0 %v26732_v50 }
 0xa33   :  { %5626 = vmatmul.mubr.f32.gmra.mrb[50].mxu0 %v26733_v61 }
 0xa34   :  { %17634 = vmatprep.mubr.msk.f32.mxu0 %vm26746_vm11, %v14330_v53  ;;  %vm19481_vm11 = vmpackc.low %vm5778_vm12, %vm5777_vm6  ;;  %vm5782_vm6 = vcmp.eq.s32.totalorder %v26714_v52, %v23983_v3  ;;  %vm5799_vm12 = vcmp.eq.s32.totalorder %v26715_v49, %v23983_v3  ;;  %v26764_v52 = vld [vmem:[#allocation26_spill] sm:$0xff]  ;;  %v26765_v49 = vld [vmem:[#allocation27_spill] sm:$0xff] }
 0xb02   :  { %v16663_v54 = vpop.f32.mrb[48].mxu0 }
 0xb03   :  { %v16664_v43 = vpop.f32.mrb[49].mxu0 }
 0xb04   :  { %v16665_v56 = vadd.f32 %v16664_v43, %v16663_v54  ;;  %v26774_v54 = vld [vmem:[#allocation46_spill] sm:$0xff]  ;;  %v26775_v43 = vld [vmem:[#allocation47_spill] sm:$0xff] }
 0xb06   :  { %v5623_v55 = vadd.f32 %v16665_v56, %v26747_v63  ;;  %v16666_v58 = vpop.f32.mrb[50].mxu0  ;;  %v26776_v56 = vld [vmem:[#allocation50_spill] sm:$0xff]  ;;  %v26777_v63 = vld [vmem:[#allocation51_spill] sm:$0xff] }
 0xb07   :  { %v16667_v51 = vpop.f32.mrb[51].mxu0 }
 0xb08   :  { %v16668_v31 = vadd.f32 %v16667_v51, %v16666_v58  ;;  %v26779_v58 = vld [vmem:[#allocation55_spill] sm:$0xff] }
 0xb09   :  { %v26780_v51 = vld [vmem:[#allocation59_spill] sm:$0xff] }
 0xb0a   :  { %v5628_v17 = vadd.f32 %v16668_v31, %v26748_v12  ;;  %v26781_v31 = vld [vmem:[#allocation63_spill] sm:$0xff]  ;;  %v26782_v12 = vld [vmem:[#allocation61_spill] sm:$0xff] }
 0xb0c   :  { %v19439_v53 = vpack.c.bf16 %v5628_v17, %v5623_v55  ;;  %v26778_v55 = vld [vmem:[#allocation54_spill] sm:$0xff]  ;;  %v14744_v17 = vld [vmem:[%s26232_s3 + $0x1c0] sm:$0xff] }
 0xb0e   :  { %19440 = vmatprep.subr.bf16.mxu0 %v19439_v53 }
 0xb0f   :  { %19442 = vmatpush3.bf16.msra.mxu0 %v19439_v53 }
 0xb10   :  { %19476 = vmatprep.subr.msk.bf16.mxu0 %vm19475_vm13, %v26493_v14  ;;  %vm5780_vm13 = vcmp.eq.s32.totalorder %v20856_v41, %v23983_v3 }
 0xb11   :  { %vm19485_vm8 = vmpackc.low %vm5780_vm13, %vm5779_vm9  ;;  %vm5802_vm9 = vcmp.eq.s32.totalorder %v26720_v11, %v23983_v3  ;;  %v26770_v11 = vld [vmem:[#allocation38_spill] sm:$0xff] }
 0xb12   :  { %17635 = vmatmul.mubr.msk.f32.vlgmr.msra.gmra.mrb[12].mxu0 %vm26749_vm10, %v14331_v30  ;;  %vm5800_vm10 = vcmp.eq.s32.totalorder %v26716_v57, %v23983_v3  ;;  %v26766_v57 = vld [vmem:[#allocation30_spill] sm:$0xff] }
 0xb13   :  { %19478 = vmatpush3.bf16.msk.msra.mxu0 %vm19477_vm15, %v26493_v14  ;;  %17637 = vmatprep.mubr.msk.f32.mxu0 %vm26750_vm14, %v14332_v22  ;;  %vm19487_vm15 = vmpackc.low %vm5798_vm2, %vm5797_vm1  ;;  %vm5783_vm14 = vcmp.eq.s32.totalorder %v26717_v1, %v23983_v3  ;;  %vm5785_vm1 = vcmp.eq.s32.totalorder %v26721_v60, %v23983_v3  ;;  %vm5786_vm2 = vcmp.eq.s32.totalorder %v26722_v0, %v23983_v3  ;;  %v26767_v1 = vld [vmem:[#allocation31_spill] sm:$0xff]  ;;  %v26772_v0 = vld [vmem:[#allocation42_spill] sm:$0xff] }
 0xb14   :  { %19480 = vmatprep.subr.msk.bf16.mxu0 %vm19479_vm7, %v26493_v14  ;;  %vm5781_vm7 = vcmp.eq.s32.totalorder %v26713_v62, %v23983_v3  ;;  %vm19491_vm5 = vmpackc.low %vm5800_vm10, %vm5799_vm12  ;;  %vm5787_vm12 = vcmp.eq.s32.totalorder %v26725_v24, %v23983_v3  ;;  %vm5788_vm10 = vcmp.eq.s32.totalorder %v26726_v10, %v23983_v3  ;;  %v14470_v24 = vld [vmem:[%s26232_s3 + $0x190] sm:$0xff] }
 0xb15   :  { %vm19489_vm0 = vmpackc.low %vm5782_vm6, %vm5781_vm7  ;;  %v26763_v62 = vld [vmem:[#allocation23_spill] sm:$0xff] }
 0xb16   :  { %17638 = vmatmul.mubr.msk.f32.gmra.mrb[14].mxu0 %vm26751_vm3, %v14333_v27  ;;  %vm19497_vm7 = vmpackc.low %vm5786_vm2, %vm5785_vm1  ;;  %v26771_v60 = vld [vmem:[#allocation39_spill] sm:$0xff] }
 0xb17   :  { %19482 = vmatpush3.bf16.msk.msra.mxu0 %vm19481_vm11, %v26493_v14  ;;  %6074 = vmatprep.mubr.f32.mxu0 %v21189_v20  ;;  %vm5784_vm11 = vcmp.eq.s32.totalorder %v26718_v48, %v23983_v3  ;;  %v24090_v20 = vld [vmem:[%s26231_s2 + $0xe] ss:$0 sm:$0xff]  ;;  %v26784_v22 = vld [vmem:[#allocation75_spill] sm:$0xff] }
 0xb18   :  { %19484 = vmatprep.subr.msk.bf16.mxu0 %vm19483_vm4, %v26493_v14  ;;  %vm5801_vm4 = vcmp.eq.s32.totalorder %v26719_v21, %v23983_v3  ;;  %vm19493_vm13 = vmpackc.low %vm5784_vm11, %vm5783_vm14  ;;  %vm6667_vm1 = vcmp.eq.s32.totalorder %v26536_v8, %v24090_v20  ;;  %vm6668_vm2 = vcmp.eq.s32.totalorder %v26537_v15, %v24090_v20  ;;  %v26768_v48 = vld [vmem:[#allocation34_spill] sm:$0xff]  ;;  %v26769_v21 = vld [vmem:[#allocation35_spill] sm:$0xff] }
 0xb19   :  { %vm19495_vm3 = vmpackc.low %vm5802_vm9, %vm5801_vm4  ;;  %vm5789_vm4 = vcmp.eq.s32.totalorder %v26729_v9, %v23983_v3  ;;  %vm5790_vm9 = vcmp.eq.s32.totalorder %v26730_v5, %v23983_v3  ;;  %v14606_v9 = vld [vmem:[%s26232_s3 + $0x1a0] sm:$0xff]  ;;  %v14607_v5 = vld [vmem:[%s26232_s3 + $0x1a8] sm:$0xff] }
 0xb1a   :  { %vm19501_vm14 = vmpackc.low %vm5788_vm10, %vm5787_vm12  ;;  %vm6652_vm12 = vcmp.eq.s32.totalorder %v26539_v25, %v24090_v20 }
 0xb1b   :  { %19486 = vmatpush3.bf16.msk.msra.mxu0 %vm19485_vm8, %v26493_v14  ;;  %vm5803_vm8 = vcmp.eq.s32.totalorder %v26723_v59, %v23983_v3  ;;  %v26773_v59 = vld [vmem:[#allocation43_spill] sm:$0xff] }
 0xb1c   :  { %19488 = vmatprep.subr.msk.bf16.mxu0 %vm19487_vm15, %v26493_v14  ;;  %vm5804_vm15 = vcmp.eq.s32.totalorder %v26724_v19, %v23983_v3  ;;  %v14471_v19 = vld [vmem:[%s26232_s3 + $0x198] sm:$0xff] }
 0xb1d   :  { %vm19499_vm6 = vmpackc.low %vm5804_vm15, %vm5803_vm8 }
 0xb1e   :  { %vm19579_vm8 = vmpackc.low %vm6668_vm2, %vm6667_vm1  ;;  %vm6671_vm1 = vcmp.eq.s32.totalorder %v26665_v2, %v24090_v20  ;;  %vm6672_vm2 = vcmp.eq.s32.totalorder %v26666_v42, %v24090_v20 }
 0xb1f   :  { %19490 = vmatpush3.bf16.msk.msra.mxu0 %vm19489_vm0, %v26493_v14  ;;  %vm5805_vm0 = vcmp.eq.s32.totalorder %v26727_v7, %v23983_v3 }
 0xb20   :  { %19492 = vmatprep.subr.msk.bf16.mxu0 %vm19491_vm5, %v26493_v14  ;;  %vm5806_vm5 = vcmp.eq.s32.totalorder %v26728_v4, %v23983_v3  ;;  %v26754_v4 = vld [vmem:[#allocation73_spill] sm:$0xff] }
 0xb21   :  { %vm19503_vm11 = vmpackc.low %vm5806_vm5, %vm5805_vm0  ;;  %vm6669_vm0 = vcmp.eq.s32.totalorder %v26540_v16, %v24090_v20  ;;  %vm6670_vm5 = vcmp.eq.s32.totalorder %v26541_v6, %v24090_v20 }
 0xb23   :  { %19494 = vmatpush3.bf16.msk.msra.mxu0 %vm19493_vm13, %v26493_v14  ;;  %vm19505_vm13 = vmpackc.low %vm5790_vm9, %vm5789_vm4  ;;  %vm6653_vm9 = vcmp.eq.s32.totalorder %v26663_v39, %v24090_v20 }
 0xb24   :  { %19496 = vmatprep.subr.msk.bf16.mxu0 %vm19495_vm3, %v26493_v14  ;;  %vm26752_vm3 = vcmask 130048   ;;  %vm19583_vm4 = vmpackc.low %vm6670_vm5, %vm6669_vm0  ;;  %vm6673_vm0 = vcmp.eq.s32.totalorder %v26671_v47, %v24090_v20  ;;  %vm6674_vm5 = vcmp.eq.s32.totalorder %v26672_v38, %v24090_v20 }
 0xb25   :  { %vm26756_vm15 = vmmov %vm26752_vm3 }
 0xb26   :  { %vm26758_vm10 = vmmov %vm26752_vm3 }
 0xb27   :  { %19498 = vmatpush3.bf16.msk.msra.mxu0 %vm19497_vm7, %v26493_v14  ;;  %vm26757_vm7 = vmmov %vm26752_vm3 }
 0xb28   :  { %19500 = vmatprep.subr.msk.bf16.mxu0 %vm19499_vm6, %v26493_v14  ;;  %vm6651_vm6 = vcmp.eq.s32.totalorder %v26538_v13, %v24090_v20 }
 0xb2b   :  { %19502 = vmatpush3.bf16.msk.msra.mxu0 %vm19501_vm14, %v26493_v14  ;;  %vm26759_vm14 = vmmov %vm26752_vm3 }
 0xb2c   :  { %19504 = vmatprep.subr.msk.bf16.mxu0 %vm19503_vm11, %v26493_v14  ;;  %vm19581_vm11 = vmpackc.low %vm6652_vm12, %vm6651_vm6  ;;  %vm6655_vm6 = vcmp.eq.s32.totalorder %v26668_v35, %v24090_v20  ;;  %vm6656_vm12 = vcmp.eq.s32.totalorder %v26669_v34, %v24090_v20 }
 0xb2f   :  { %19506 = vmatpush3.bf16.msk.msra.mxu0 %vm19505_vm13, %v26493_v14  ;;  %vm6654_vm13 = vcmp.eq.s32.totalorder %v26664_v18, %v24090_v20 }
 0xb32   :  { %6075 = vmatmul.mubr.f32.vlgmr.msra.gmra.mrb[52].mxu0 %v26731_v46  ;;  %v14608_v46 = vld [vmem:[%s26232_s3 + $0x1b0] sm:$0xff] }
 0xb33   :  { %6079 = vmatprep.mubr.f32.mxu0 %v26732_v50  ;;  %v14609_v50 = vld [vmem:[%s26232_s3 + $0x1b8] sm:$0xff] }
 0xb36   :  { %6080 = vmatmul.mubr.f32.gmra.mrb[54].mxu0 %v26733_v61  ;;  %v26762_v61 = vld [vmem:[#allocation22_spill] sm:$0xff] }
 0xb37   :  { %17644 = vmatprep.mubr.msk.f32.mxu0 %vm26752_vm3, %v14468_v28 }
 0xc05   :  { %v16745_v32 = vpop.f32.mrb[52].mxu0 }
 0xc06   :  { %v16746_v33 = vpop.f32.mrb[53].mxu0 }
 0xc07   :  { %v16747_v36 = vadd.f32 %v16746_v33, %v16745_v32 }
 0xc09   :  { %v6077_v40 = vadd.f32 %v16747_v36, %v26753_v37  ;;  %v16748_v41 = vpop.f32.mrb[54].mxu0  ;;  %v26785_v36 = vld [vmem:[#allocation76_spill] sm:$0xff] }
 0xc0a   :  { %v16749_v44 = vpop.f32.mrb[55].mxu0 }
 0xc0b   :  { %v16750_v45 = vadd.f32 %v16749_v44, %v16748_v41 }
 0xc0d   :  { %v6082_v7 = vadd.f32 %v16750_v45, %v26754_v4 }
 0xc0f   :  { %v19507_v10 = vpack.c.bf16 %v6082_v7, %v6077_v40  ;;  %v24215_v40 = vld [vmem:[%s26231_s2 + $0xf] ss:$0 sm:$0xff] }
 0xc10   :  { %v26791_v7 = vld [vmem:[#allocation78_spill] sm:$0xff] }
 0xc11   :  { %19508 = vmatprep.subr.bf16.mxu0 %v19507_v10 }
 0xc12   :  { %19510 = vmatpush3.bf16.msra.mxu0 %v19507_v10 }
 0xc13   :  { %19576 = vmatprep.subr.bf16.mxu0 %v26755_v26 }
 0xc15   :  { %17645 = vmatmul.mubr.msk.f32.vlgmr.msra.gmra.mrb[12].mxu0 %vm26756_vm15, %v14469_v23  ;;  %vm19585_vm15 = vmpackc.low %vm6654_vm13, %vm6653_vm9  ;;  %vm6658_vm9 = vcmp.eq.s32.totalorder %v26763_v62, %v24090_v20  ;;  %vm6675_vm13 = vcmp.eq.s32.totalorder %v26764_v52, %v24090_v20  ;;  %v14883_v23 = vld [vmem:[%s26232_s3 + $0x1e8] sm:$0xff] }
 0xc16   :  { %19578 = vmatpush3.bf16.msra.mxu0 %v26755_v26  ;;  %17647 = vmatprep.mubr.msk.f32.mxu0 %vm26757_vm7, %v14470_v24  ;;  %vm19587_vm7 = vmpackc.low %vm6672_vm2, %vm6671_vm1  ;;  %v14884_v26 = vld [vmem:[%s26232_s3 + $0x1f0] sm:$0xff]  ;;  %v14885_v24 = vld [vmem:[%s26232_s3 + $0x1f8] sm:$0xff] }
 0xc17   :  { %19580 = vmatprep.subr.msk.bf16.mxu0 %vm19579_vm8, %v26493_v14  ;;  %vm26760_vm8 = vmmov %vm26752_vm3 }
 0xc19   :  { %17648 = vmatmul.mubr.msk.f32.gmra.mrb[14].mxu0 %vm26758_vm10, %v14471_v19  ;;  %vm26761_vm10 = vmmov %vm26752_vm3 }
 0xc1a   :  { %17654 = vmatprep.mubr.msk.f32.mxu0 %vm26759_vm14, %v14606_v9  ;;  %vm19589_vm14 = vmpackc.low %vm6656_vm12, %vm6655_vm6  ;;  %vm6678_vm6 = vcmp.eq.s32.totalorder %v26769_v21, %v24090_v20 }
 0xc1d   :  { %17655 = vmatmul.mubr.msk.f32.vlgmr.msra.gmra.mrb[12].mxu0 %vm26752_vm3, %v14607_v5  ;;  %vm6676_vm3 = vcmp.eq.s32.totalorder %v26765_v49, %v24090_v20 }
 0xc1e   :  { %19582 = vmatpush3.bf16.msk.msra.mxu0 %vm19581_vm11, %v26493_v14  ;;  %17657 = vmatprep.mubr.msk.f32.mxu0 %vm26760_vm8, %v14608_v46  ;;  %vm19591_vm11 = vmpackc.low %vm6674_vm5, %vm6673_vm0  ;;  %vm6659_vm8 = vcmp.eq.s32.totalorder %v26766_v57, %v24090_v20  ;;  %vm6661_vm0 = vcmp.eq.s32.totalorder %v26770_v11, %v24090_v20  ;;  %vm6662_vm5 = vcmp.eq.s32.totalorder %v26771_v60, %v24090_v20 }
 0xc1f   :  { %19584 = vmatprep.subr.msk.bf16.mxu0 %vm19583_vm4, %v26493_v14  ;;  %vm6657_vm4 = vcmp.eq.s32.totalorder %v26762_v61, %v24090_v20  ;;  %vm19595_vm2 = vmpackc.low %vm6676_vm3, %vm6675_vm13  ;;  %vm6663_vm13 = vcmp.eq.s32.totalorder %v26774_v54, %v24090_v20  ;;  %vm6664_vm3 = vcmp.eq.s32.totalorder %v26775_v43, %v24090_v20 }
 0xc20   :  { %vm19593_vm1 = vmpackc.low %vm6658_vm9, %vm6657_vm4 }
 0xc21   :  { %17658 = vmatmul.mubr.msk.f32.gmra.mrb[14].mxu0 %vm26761_vm10, %v14609_v50  ;;  %vm19601_vm4 = vmpackc.low %vm6662_vm5, %vm6661_vm0  ;;  %vm7121_vm0 = vcmp.eq.s32.totalorder %v26536_v8, %v24215_v40  ;;  %vm7122_vm5 = vcmp.eq.s32.totalorder %v26537_v15, %v24215_v40  ;;  %v14745_v15 = vld [vmem:[%s26232_s3 + $0x1c8] sm:$0xff]  ;;  %v14746_v8 = vld [vmem:[%s26232_s3 + $0x1d0] sm:$0xff] }
 0xc22   :  { %19586 = vmatpush3.bf16.msk.msra.mxu0 %vm19585_vm15, %v26493_v14  ;;  %6907 = vmatprep.mubr.f32.mxu0 %v26673_v29  ;;  %vm6660_vm15 = vcmp.eq.s32.totalorder %v26767_v1, %v24090_v20 }
 0xc23   :  { %19588 = vmatprep.subr.msk.bf16.mxu0 %vm19587_vm7, %v26493_v14  ;;  %vm6677_vm7 = vcmp.eq.s32.totalorder %v26768_v48, %v24090_v20  ;;  %vm19597_vm12 = vmpackc.low %vm6660_vm15, %vm6659_vm8 }
 0xc24   :  { %vm19599_vm10 = vmpackc.low %vm6678_vm6, %vm6677_vm7  ;;  %vm6665_vm7 = vcmp.eq.s32.totalorder %v26778_v55, %v24090_v20  ;;  %vm6666_vm6 = vcmp.eq.s32.totalorder %v26779_v58, %v24090_v20 }
 0xc25   :  { %vm19605_vm8 = vmpackc.low %vm6664_vm3, %vm6663_vm13  ;;  %vm7124_vm13 = vcmp.eq.s32.totalorder %v26541_v6, %v24215_v40  ;;  %v14747_v6 = vld [vmem:[%s26232_s3 + $0x1d8] sm:$0xff] }
 0xc26   :  { %19590 = vmatpush3.bf16.msk.msra.mxu0 %vm19589_vm14, %v26493_v14  ;;  %vm6679_vm14 = vcmp.eq.s32.totalorder %v26772_v0, %v24090_v20 }
 0xc27   :  { %19592 = vmatprep.subr.msk.bf16.mxu0 %vm19591_vm11, %v26493_v14  ;;  %vm6680_vm11 = vcmp.eq.s32.totalorder %v26773_v59, %v24090_v20 }
 0xc28   :  { %vm19603_vm9 = vmpackc.low %vm6680_vm11, %vm6679_vm14  ;;  %vm7105_vm11 = vcmp.eq.s32.totalorder %v26538_v13, %v24215_v40 }
 0xc29   :  { %vm19647_vm14 = vmpackc.low %vm7122_vm5, %vm7121_vm0  ;;  %vm7109_vm5 = vcmp.eq.s32.totalorder %v26668_v35, %v24215_v40 }
 0xc2a   :  { %19594 = vmatpush3.bf16.msk.msra.mxu0 %vm19593_vm1, %v26493_v14  ;;  %vm6681_vm1 = vcmp.eq.s32.totalorder %v26776_v56, %v24090_v20 }
 0xc2b   :  { %19596 = vmatprep.subr.msk.bf16.mxu0 %vm19595_vm2, %v26493_v14  ;;  %vm6682_vm2 = vcmp.eq.s32.totalorder %v26777_v63, %v24090_v20 }
 0xc2c   :  { %vm19607_vm15 = vmpackc.low %vm6682_vm2, %vm6681_vm1  ;;  %vm7107_vm2 = vcmp.eq.s32.totalorder %v26663_v39, %v24215_v40 }
 0xc2e   :  { %19598 = vmatpush3.bf16.msk.msra.mxu0 %vm19597_vm12, %v26493_v14  ;;  %vm19609_vm12 = vmpackc.low %vm6666_vm6, %vm6665_vm7  ;;  %vm7125_vm7 = vcmp.eq.s32.totalorder %v26665_v2, %v24215_v40  ;;  %vm7126_vm6 = vcmp.eq.s32.totalorder %v26666_v42, %v24215_v40 }
 0xc2f   :  { %19600 = vmatprep.subr.msk.bf16.mxu0 %vm19599_vm10, %v26493_v14  ;;  %vm26783_vm10 = vcmask 130048   ;;  %vm19655_vm0 = vmpackc.low %vm7126_vm6, %vm7125_vm7 }
 0xc32   :  { %19602 = vmatpush3.bf16.msk.msra.mxu0 %vm19601_vm4, %v26493_v14  ;;  %vm7106_vm4 = vcmp.eq.s32.totalorder %v26539_v25, %v24215_v40 }
 0xc33   :  { %19604 = vmatprep.subr.msk.bf16.mxu0 %vm19603_vm9, %v26493_v14  ;;  %vm7123_vm9 = vcmp.eq.s32.totalorder %v26540_v16, %v24215_v40  ;;  %vm19649_vm3 = vmpackc.low %vm7106_vm4, %vm7105_vm11  ;;  %vm7127_vm4 = vcmp.eq.s32.totalorder %v26671_v47, %v24215_v40  ;;  %v14882_v16 = vld [vmem:[%s26232_s3 + $0x1e0] sm:$0xff] }
 0xc34   :  { %vm19651_vm1 = vmpackc.low %vm7124_vm13, %vm7123_vm9  ;;  %vm7128_vm9 = vcmp.eq.s32.totalorder %v26672_v38, %v24215_v40  ;;  %v26790_v38 = vld [vmem:[#allocation77_spill] sm:$0xff] }
 0xc36   :  { %19606 = vmatpush3.bf16.msk.msra.mxu0 %vm19605_vm8, %v26493_v14  ;;  %vm7108_vm8 = vcmp.eq.s32.totalorder %v26664_v18, %v24215_v40 }
 0xc37   :  { %19608 = vmatprep.subr.msk.bf16.mxu0 %vm19607_vm15, %v26493_v14  ;;  %vm26786_vm15 = vmmov %vm26783_vm10 }
 0xc3a   :  { %19610 = vmatpush3.bf16.msk.msra.mxu0 %vm19609_vm12, %v26493_v14  ;;  %vm26787_vm12 = vmmov %vm26783_vm10 }
 0xc3b   :  { %vm26788_vm11 = vmmov %vm26787_vm12 }
 0xc3d   :  { %6908 = vmatmul.mubr.f32.vlgmr.msra.gmra.mrb[56].mxu0 %v26780_v51 }
 0xc3e   :  { %6912 = vmatprep.mubr.f32.mxu0 %v26781_v31 }
 0xc41   :  { %6913 = vmatmul.mubr.f32.gmra.mrb[58].mxu0 %v26782_v12 }
 0xc42   :  { %17664 = vmatprep.mubr.msk.f32.mxu0 %vm26783_vm10, %v14744_v17  ;;  %vm19653_vm10 = vmpackc.low %vm7108_vm8, %vm7107_vm2  ;;  %vm7112_vm2 = vcmp.eq.s32.totalorder %v26763_v62, %v24215_v40  ;;  %vm7129_vm8 = vcmp.eq.s32.totalorder %v26764_v52, %v24215_v40 }
 0xd10   :  { %v16871_v3 = vpop.f32.mrb[56].mxu0 }
 0xd11   :  { %v16872_v53 = vpop.f32.mrb[57].mxu0 }
 0xd12   :  { %v16873_v30 = vadd.f32 %v16872_v53, %v16871_v3 }
 0xd14   :  { %v6985_v27 = vadd.f32 %v26784_v22, %v16873_v30  ;;  %v16874_v28 = vpop.f32.mrb[58].mxu0 }
 0xd15   :  { %v16875_v32 = vpop.f32.mrb[59].mxu0 }
 0xd16   :  { %v16876_v33 = vadd.f32 %v16875_v32, %v16874_v28 }
 0xd18   :  { %v6990_v37 = vadd.f32 %v26785_v36, %v16876_v33 }
 0xd1a   :  { %v19643_v41 = vpack.c.bf16 %v6990_v37, %v6985_v27 }
 0xd1c   :  { %19644 = vmatprep.subr.bf16.mxu0 %v19643_v41 }
 0xd1d   :  { %19646 = vmatpush3.bf16.msra.mxu0 %v19643_v41 }
 0xd1e   :  { %19648 = vmatprep.subr.msk.bf16.mxu0 %vm19647_vm14, %v26493_v14  ;;  %vm7110_vm14 = vcmp.eq.s32.totalorder %v26669_v34, %v24215_v40 }
 0xd1f   :  { %vm19657_vm13 = vmpackc.low %vm7110_vm14, %vm7109_vm5  ;;  %vm7132_vm5 = vcmp.eq.s32.totalorder %v26769_v21, %v24215_v40  ;;  %v20616_v21 = vmov 0  }
 0xd20   :  { %17665 = vmatmul.mubr.msk.f32.vlgmr.msra.gmra.mrb[12].mxu0 %vm26786_vm15, %v14745_v15  ;;  %vm7130_vm15 = vcmp.eq.s32.totalorder %v26765_v49, %v24215_v40  ;;  %20549 = vset.pattern.permute.xlu1 %v20616_v21 }
 0xd21   :  { %19650 = vmatpush3.bf16.msk.msra.mxu0 %vm19649_vm3, %v26493_v14  ;;  %17667 = vmatprep.mubr.msk.f32.mxu0 %vm26787_vm12, %v14746_v8  ;;  %vm19659_vm3 = vmpackc.low %vm7128_vm9, %vm7127_vm4  ;;  %vm7113_vm12 = vcmp.eq.s32.totalorder %v26766_v57, %v24215_v40  ;;  %vm7115_vm4 = vcmp.eq.s32.totalorder %v26770_v11, %v24215_v40  ;;  %vm7116_vm9 = vcmp.eq.s32.totalorder %v26771_v60, %v24215_v40 }
 0xd22   :  { %19652 = vmatprep.subr.msk.bf16.mxu0 %vm19651_vm1, %v26493_v14  ;;  %vm7111_vm1 = vcmp.eq.s32.totalorder %v26762_v61, %v24215_v40  ;;  %vm19663_vm6 = vmpackc.low %vm7130_vm15, %vm7129_vm8  ;;  %vm7117_vm8 = vcmp.eq.s32.totalorder %v26774_v54, %v24215_v40  ;;  %vm7118_vm15 = vcmp.eq.s32.totalorder %v26775_v43, %v24215_v40  ;;  %20548 = vset.pattern.permute.xlu0 %v20616_v21 }
 0xd23   :  { %vm19661_vm7 = vmpackc.low %vm7112_vm2, %vm7111_vm1 }
 0xd24   :  { %17668 = vmatmul.mubr.msk.f32.gmra.mrb[14].mxu0 %vm26788_vm11, %v14747_v6  ;;  %vm19669_vm1 = vmpackc.low %vm7116_vm9, %vm7115_vm4 }
 0xd25   :  { %19654 = vmatpush3.bf16.msk.msra.mxu0 %vm19653_vm10, %v26493_v14  ;;  %7361 = vmatprep.mubr.f32.mxu0 %v26673_v29  ;;  %vm7114_vm10 = vcmp.eq.s32.totalorder %v26767_v1, %v24215_v40 }
 0xd26   :  { %19656 = vmatprep.subr.msk.bf16.mxu0 %vm19655_vm0, %v26493_v14  ;;  %vm7131_vm0 = vcmp.eq.s32.totalorder %v26768_v48, %v24215_v40  ;;  %vm19665_vm14 = vmpackc.low %vm7114_vm10, %vm7113_vm12 }
 0xd27   :  { %vm19667_vm11 = vmpackc.low %vm7132_vm5, %vm7131_vm0  ;;  %vm7119_vm0 = vcmp.eq.s32.totalorder %v26778_v55, %v24215_v40  ;;  %vm7120_vm5 = vcmp.eq.s32.totalorder %v26779_v58, %v24215_v40 }
 0xd28   :  { %vm19673_vm12 = vmpackc.low %vm7118_vm15, %vm7117_vm8 }
 0xd29   :  { %19658 = vmatpush3.bf16.msk.msra.mxu0 %vm19657_vm13, %v26493_v14  ;;  %vm7133_vm13 = vcmp.eq.s32.totalorder %v26772_v0, %v24215_v40  ;;  %v24354_v0 = vld [vmem:[%s26235_s6] ss:$0 sm:$0xff] }
 0xd2a   :  { %19660 = vmatprep.subr.msk.bf16.mxu0 %vm19659_vm3, %v26493_v14  ;;  %vm7134_vm3 = vcmp.eq.s32.totalorder %v26773_v59, %v24215_v40  ;;  %v24359_v59 = vld [vmem:[%s26235_s6 + $0x1] ss:$0 sm:$0xff] }
 0xd2b   :  { %vm19671_vm2 = vmpackc.low %vm7134_vm3, %vm7133_vm13  ;;  %vm7683_vm3 = vcmp.eq.s32.totalorder %v26538_v13, %v24354_v0  ;;  %vm7831_vm8 = vcmp.eq.s32.totalorder %v26539_v25, %v24359_v59 }
 0xd2d   :  { %19662 = vmatpush3.bf16.msk.msra.mxu0 %vm19661_vm7, %v26493_v14  ;;  %vm7135_vm7 = vcmp.eq.s32.totalorder %v26776_v56, %v24215_v40 }
 0xd2e   :  { %19664 = vmatprep.subr.msk.bf16.mxu0 %vm19663_vm6, %v26493_v14  ;;  %vm7136_vm6 = vcmp.eq.s32.totalorder %v26777_v63, %v24215_v40 }
 0xd2f   :  { %vm19675_vm10 = vmpackc.low %vm7136_vm6, %vm7135_vm7  ;;  %vm7685_vm7 = vcmp.eq.s32.totalorder %v26663_v39, %v24354_v0  ;;  %vm7686_vm6 = vcmp.eq.s32.totalorder %v26664_v18, %v24354_v0 }
 0xd31   :  { %19666 = vmatpush3.bf16.msk.msra.mxu0 %vm19665_vm14, %v26493_v14  ;;  %vm19677_vm14 = vmpackc.low %vm7120_vm5, %vm7119_vm0  ;;  %vm7687_vm5 = vcmp.eq.s32.totalorder %v26668_v35, %v24354_v0 }
 0xd32   :  { %19668 = vmatprep.subr.msk.bf16.mxu0 %vm19667_vm11, %v26493_v14  ;;  %vm26789_vm11 = vcmask 130048  }
 0xd33   :  { %vm26792_vm4 = vmmov %vm26789_vm11 }
 0xd34   :  { %vm26793_vm9 = vmmov %vm26792_vm4 }
 0xd35   :  { %19670 = vmatpush3.bf16.msk.msra.mxu0 %vm19669_vm1, %v26493_v14  ;;  %vm26794_vm13 = vmmov %vm26792_vm4  ;;  %vm7684_vm1 = vcmp.eq.s32.totalorder %v26539_v25, %v24354_v0 }
 0xd36   :  { %19672 = vmatprep.subr.msk.bf16.mxu0 %vm19671_vm2, %v26493_v14  ;;  %vm7830_vm2 = vcmp.eq.s32.totalorder %v26538_v13, %v24359_v59  ;;  %vm19715_vm15 = vmpackc.low %vm7684_vm1, %vm7683_vm3 }
 0xd37   :  { %vm19747_vm0 = vmpackc.low %vm7831_vm8, %vm7830_vm2  ;;  %vm7689_vm2 = vcmp.eq.s32.totalorder %v26762_v61, %v24354_v0  ;;  %vm7690_vm8 = vcmp.eq.s32.totalorder %v26763_v62, %v24354_v0 }
 0xd38   :  { %19748 = vmatprep.subr.msk.bf16.mxu1 %vm19747_vm0, %v26493_v14 }
 0xd39   :  { %19674 = vmatpush3.bf16.msk.msra.mxu0 %vm19673_vm12, %v26493_v14  ;;  %vm7832_vm12 = vcmp.eq.s32.totalorder %v26663_v39, %v24359_v59  ;;  %19750 = vmatpush3.bf16.msk.msra.mxu1 %vm19747_vm0, %v26493_v14  ;;  %vm7692_vm0 = vcmp.eq.s32.totalorder %v26767_v1, %v24354_v0 }
 0xd3a   :  { %19676 = vmatprep.subr.msk.bf16.mxu0 %vm19675_vm10, %v26493_v14  ;;  %vm7833_vm10 = vcmp.eq.s32.totalorder %v26664_v18, %v24359_v59 }
 0xd3d   :  { %19678 = vmatpush3.bf16.msk.msra.mxu0 %vm19677_vm14, %v26493_v14  ;;  %vm7688_vm14 = vcmp.eq.s32.totalorder %v26669_v34, %v24354_v0 }
 0xd3e   :  { %vm19723_vm3 = vmpackc.low %vm7688_vm14, %vm7687_vm5  ;;  %vm7838_vm14 = vcmp.eq.s32.totalorder %v26766_v57, %v24359_v59 }
 0xd40   :  { %7362 = vmatmul.mubr.f32.vlgmr.msra.gmra.mrb[60].mxu0 %v26780_v51 }
 0xd41   :  { %7366 = vmatprep.mubr.f32.mxu0 %v26781_v31 }
 0xd44   :  { %7367 = vmatmul.mubr.f32.gmra.mrb[62].mxu0 %v26782_v12 }
 0xd45   :  { %17674 = vmatprep.mubr.msk.f32.mxu0 %vm26789_vm11, %v14882_v16  ;;  %vm19719_vm11 = vmpackc.low %vm7686_vm6, %vm7685_vm7  ;;  %vm7837_vm6 = vcmp.eq.s32.totalorder %v26763_v62, %v24359_v59 }
 0xd46   :  { %vm19727_vm7 = vmpackc.low %vm7690_vm8, %vm7689_vm2  ;;  %vm7841_vm2 = vcmp.eq.s32.totalorder %v26771_v60, %v24359_v59 }
 0xe13   :  { %v16953_v2 = vpop.f32.mrb[60].mxu0 }
 0xe14   :  { %v16954_v42 = vpop.f32.mrb[61].mxu0 }
 0xe15   :  { %v16955_v47 = vadd.f32 %v16954_v42, %v16953_v2 }
 0xe17   :  { %v7439_v29 = vadd.f32 %v26790_v38, %v16955_v47  ;;  %v16956_v44 = vpop.f32.mrb[62].mxu0 }
 0xe18   :  { %v16957_v45 = vpop.f32.mrb[63].mxu0 }
 0xe19   :  { %v16958_v4 = vadd.f32 %v16957_v45, %v16956_v44 }
 0xe1b   :  { %v7444_v10 = vadd.f32 %v26791_v7, %v16958_v4 }
 0xe1d   :  { %v19711_v20 = vpack.c.bf16 %v7444_v10, %v7439_v29  ;;  %v7591_v29 = vld [vmem:[%s26233_s4 + $0x8] sm:$0xff] }
 0xe1e   :  { %v7607_v10 = vld [vmem:[%s26234_s5 + $0x8] sm:$0xff] }
 0xe1f   :  { %19712 = vmatprep.subr.bf16.mxu0 %v19711_v20 }
 0xe20   :  { %19714 = vmatpush3.bf16.msra.mxu0 %v19711_v20  ;;  %v7590_v20 = vld [vmem:[%s26233_s4] sm:$0xff] }
 0xe21   :  { %19716 = vmatprep.subr.msk.bf16.mxu0 %vm19715_vm15, %v26493_v14 }
 0xe23   :  { %17675 = vmatmul.mubr.msk.f32.vlgmr.msra.gmra.mrb[12].mxu0 %vm26792_vm4, %v14883_v23  ;;  %vm7834_vm4 = vcmp.eq.s32.totalorder %v26668_v35, %v24359_v59 }
 0xe24   :  { %17677 = vmatprep.mubr.msk.f32.mxu0 %vm26793_vm9, %v14884_v26  ;;  %19718 = vmatpush3.bf16.msk.msra.mxu0 %vm19715_vm15, %v26493_v14  ;;  %vm7835_vm9 = vcmp.eq.s32.totalorder %v26669_v34, %v24359_v59  ;;  %vm7836_vm15 = vcmp.eq.s32.totalorder %v26762_v61, %v24359_v59 }
 0xe25   :  { %19720 = vmatprep.subr.msk.bf16.mxu0 %vm19719_vm11, %v26493_v14  ;;  %vm19755_vm1 = vmpackc.low %vm7835_vm9, %vm7834_vm4  ;;  %vm7693_vm9 = vcmp.eq.s32.totalorder %v26770_v11, %v24354_v0 }
 0xe27   :  { %17678 = vmatmul.mubr.msk.f32.gmra.mrb[14].mxu0 %vm26794_vm13, %v14885_v24  ;;  %vm19751_vm13 = vmpackc.low %vm7833_vm10, %vm7832_vm12  ;;  %vm7691_vm10 = vcmp.eq.s32.totalorder %v26766_v57, %v24354_v0 }
 0xe28   :  { %19752 = vmatprep.subr.msk.bf16.mxu1 %vm19751_vm13, %v26493_v14  ;;  %19722 = vmatpush3.bf16.msk.msra.mxu0 %vm19719_vm11, %v26493_v14  ;;  %vm19759_vm12 = vmpackc.low %vm7837_vm6, %vm7836_vm15  ;;  %vm7839_vm11 = vcmp.eq.s32.totalorder %v26767_v1, %v24359_v59  ;;  %vm7695_vm15 = vcmp.eq.s32.totalorder %v26774_v54, %v24354_v0 }
 0xe29   :  { %19754 = vmatpush3.bf16.msk.msra.mxu1 %vm19751_vm13, %v26493_v14  ;;  %19724 = vmatprep.subr.msk.bf16.mxu0 %vm19723_vm3, %v26493_v14  ;;  %vm19731_vm5 = vmpackc.low %vm7692_vm0, %vm7691_vm10  ;;  %vm7694_vm13 = vcmp.eq.s32.totalorder %v26771_v60, %v24354_v0  ;;  %vm7843_vm10 = vcmp.eq.s32.totalorder %v26775_v43, %v24359_v59 }
 0xe2a   :  { %19756 = vmatprep.subr.msk.bf16.mxu1 %vm19755_vm1, %v26493_v14  ;;  %vm19763_vm4 = vmpackc.low %vm7839_vm11, %vm7838_vm14  ;;  %vm7698_vm14 = vcmp.eq.s32.totalorder %v26779_v58, %v24354_v0  ;;  %vm7844_vm11 = vcmp.eq.s32.totalorder %v26778_v55, %v24359_v59 }
 0xe2c   :  { %19726 = vmatpush3.bf16.msk.msra.mxu0 %vm19723_vm3, %v26493_v14  ;;  %vm7840_vm3 = vcmp.eq.s32.totalorder %v26770_v11, %v24359_v59 }
 0xe2d   :  { %19758 = vmatpush3.bf16.msk.msra.mxu1 %vm19755_vm1, %v26493_v14  ;;  %19728 = vmatprep.subr.msk.bf16.mxu0 %vm19727_vm7, %v26493_v14  ;;  %vm19735_vm1 = vmpackc.low %vm7694_vm13, %vm7693_vm9 }
 0xe2e   :  { %19760 = vmatprep.subr.msk.bf16.mxu1 %vm19759_vm12, %v26493_v14  ;;  %vm19767_vm8 = vmpackc.low %vm7841_vm2, %vm7840_vm3 }
 0xe30   :  { %19730 = vmatpush3.bf16.msk.msra.mxu0 %vm19727_vm7, %v26493_v14  ;;  %vm7696_vm7 = vcmp.eq.s32.totalorder %v26775_v43, %v24354_v0 }
 0xe31   :  { %19762 = vmatpush3.bf16.msk.msra.mxu1 %vm19759_vm12, %v26493_v14  ;;  %19732 = vmatprep.subr.msk.bf16.mxu0 %vm19731_vm5, %v26493_v14  ;;  %vm19739_vm6 = vmpackc.low %vm7696_vm7, %vm7695_vm15  ;;  %vm7842_vm12 = vcmp.eq.s32.totalorder %v26774_v54, %v24359_v59  ;;  %vm7972_vm15 = vcmask 261120  }
 0xe32   :  { %19764 = vmatprep.subr.msk.bf16.mxu1 %vm19763_vm4, %v26493_v14  ;;  %vm19771_vm0 = vmpackc.low %vm7843_vm10, %vm7842_vm12 }
 0xe34   :  { %19734 = vmatpush3.bf16.msk.msra.mxu0 %vm19731_vm5, %v26493_v14  ;;  %vm7697_vm5 = vcmp.eq.s32.totalorder %v26778_v55, %v24354_v0 }
 0xe35   :  { %19766 = vmatpush3.bf16.msk.msra.mxu1 %vm19763_vm4, %v26493_v14  ;;  %19736 = vmatprep.subr.msk.bf16.mxu0 %vm19735_vm1, %v26493_v14  ;;  %vm7845_vm4 = vcmp.eq.s32.totalorder %v26779_v58, %v24359_v59  ;;  %vm19743_vm9 = vmpackc.low %vm7698_vm14, %vm7697_vm5 }
 0xe36   :  { %19768 = vmatprep.subr.msk.bf16.mxu1 %vm19767_vm8, %v26493_v14  ;;  %vm19775_vm13 = vmpackc.low %vm7845_vm4, %vm7844_vm11 }
 0xe38   :  { %19738 = vmatpush3.bf16.msk.msra.mxu0 %vm19735_vm1, %v26493_v14 }
 0xe39   :  { %19770 = vmatpush3.bf16.msk.msra.mxu1 %vm19767_vm8, %v26493_v14  ;;  %19740 = vmatprep.subr.msk.bf16.mxu0 %vm19739_vm6, %v26493_v14 }
 0xe3a   :  { %19772 = vmatprep.subr.msk.bf16.mxu1 %vm19771_vm0, %v26493_v14 }
 0xe3c   :  { %19742 = vmatpush3.bf16.msk.msra.mxu0 %vm19739_vm6, %v26493_v14 }
 0xe3d   :  { %19774 = vmatpush3.bf16.msk.msra.mxu1 %vm19771_vm0, %v26493_v14  ;;  %19744 = vmatprep.subr.msk.bf16.mxu0 %vm19743_vm9, %v26493_v14 }
 0xe3e   :  { %19776 = vmatprep.subr.msk.bf16.mxu1 %vm19775_vm13, %v26493_v14 }
 0xe40   :  { %19746 = vmatpush3.bf16.msk.msra.mxu0 %vm19743_vm9, %v26493_v14 }
 0xe41   :  { %19778 = vmatpush3.bf16.msk.msra.mxu1 %vm19775_vm13, %v26493_v14 }
 0xef6   :  { %v24331_v19 = vpop.f32.mrb[12].mxu0 }
 0xef7   :  { %7555 = vadd.xlane.f32.xlu0 %v24331_v19  ;;  %v24334_v9 = vpop.f32.mrb[13].mxu0  ;;  %v7567_v5 = vmul.f32 %v24331_v19, %v24331_v19 }
 0xef8   :  { %v7566_v52 = vmul.f32 %v24334_v9, %v24334_v9 }
 0xef9   :  { %7572 = vadd.xlane.f32.xlu1 %v7567_v5 }
 0xefa   :  { %v24338_v46 = vpop.f32.mrb[14].mxu0 }
 0xefb   :  { %7553 = vadd.xlane.f32.xlu0 %v24334_v9  ;;  %v24341_v50 = vpop.f32.mrb[15].mxu0  ;;  %v7569_v48 = vmul.f32 %v24338_v46, %v24338_v46 }
 0xefc   :  { %v7568_v49 = vmul.f32 %v24341_v50, %v24341_v50 }
 0xefd   :  { %7570 = vadd.xlane.f32.xlu1 %v7566_v52  ;;  %v7593_v52 = vld [vmem:[%s26233_s4 + $0x18] sm:$0xff] }
 0xeff   :  { %7557 = vadd.xlane.f32.xlu0 %v24341_v50 }
 0xf01   :  { %7559 = vadd.xlane.f32.xlu1 %v24338_v46 }
 0xf03   :  { %7574 = vadd.xlane.f32.xlu0 %v7568_v49 }
 0xf05   :  { %7576 = vadd.xlane.f32.xlu1 %v7569_v48 }
 0xf84   :  { %v7556_v56 = vpop.xlane.xlu0 %7555 }
 0xf85   :  { %v7563_v63 = vmul.f32 0.0078125, %v7556_v56 }
 0xf86   :  { %v7573_v51 = vpop.xlane.xlu1 %7572 }
 0xf87   :  { %v7583_v31 = vmul.f32 %v7563_v63, %v7563_v63  ;;  %v7579_v12 = vmul.f32 0.0078125, %v7573_v51  ;;  %v7592_v51 = vld [vmem:[%s26233_s4 + $0x10] sm:$0xff] }
 0xf88   :  { %v7554_v17 = vpop.xlane.xlu0 %7553 }
 0xf89   :  { %v7587_v3 = vsub.f32 %v7579_v12, %v7583_v31  ;;  %v24397_v53 = vmul.f32 0.0078125, %v7554_v17 }
 0xf8a   :  { %v7571_v30 = vpop.xlane.xlu1 %7570 }
 0xf8b   :  { %v7595_v22 = vadd.f32 1e-05, %v7587_v3  ;;  %v7582_v27 = vmul.f32 %v24397_v53, %v24397_v53  ;;  %v7578_v28 = vmul.f32 0.0078125, %v7571_v30  ;;  %v7608_v3 = vld [vmem:[%s26234_s5 + $0x10] sm:$0xff] }
 0xf8c   :  { %v7558_v32 = vpop.xlane.xlu0 %7557 }
 0xf8d   :  { %20550 = vrsqrt.f32 %v7595_v22  ;;  %v7586_v33 = vsub.f32 %v7578_v28, %v7582_v27  ;;  %v24401_v36 = vmul.f32 0.0078125, %v7558_v32 }
 0xf8e   :  { %v7560_v37 = vpop.xlane.xlu1 %7559 }
 0xf8f   :  { %v7594_v40 = vadd.f32 1e-05, %v7586_v33  ;;  %v24403_v41 = vmul.f32 0.0078125, %v7560_v37  ;;  %v7584_v8 = vmul.f32 %v24401_v36, %v24401_v36 }
 0xf90   :  { %v7575_v15 = vpop.xlane.xlu0 %7574 }
 0xf91   :  { %20552 = vrsqrt.f32 %v7594_v40  ;;  %v7580_v6 = vmul.f32 0.0078125, %v7575_v15  ;;  %v7585_v2 = vmul.f32 %v24403_v41, %v24403_v41 }
 0xf92   :  { %v7577_v16 = vpop.xlane.xlu1 %7576 }
 0xf93   :  { %v7588_v42 = vsub.f32 %v7580_v6, %v7584_v8  ;;  %v7581_v47 = vmul.f32 0.0078125, %v7577_v16 }
 0xf95   :  { %v7589_v38 = vsub.f32 %v7581_v47, %v7585_v2  ;;  %v7596_v45 = vadd.f32 1e-05, %v7588_v42 }
 0xf97   :  { %v20551_v44 = vpop.eup %20550  ;;  %v7597_v4 = vadd.f32 1e-05, %v7589_v38 }
 0xf98   :  { %v7603_v7 = vmul.f32 %v20551_v44, %v7591_v29 }
 0xf99   :  { %20554 = vrsqrt.f32 %v7597_v4 }
 0xf9a   :  { %7625 = vperm.xlu1 %20549, %v7603_v7   ;;  %v7611_v23 = vmul.f32 %v7603_v7, %v7563_v63  ;;  %20556 = vrsqrt.f32 %v7596_v45  ;;  %v7606_v63 = vld [vmem:[%s26234_s5] sm:$0xff] }
 0xf9b   :  { %v20553_v26 = vpop.eup %20552 }
 0xf9c   :  { %v7615_v24 = vsub.f32 %v7607_v10, %v7611_v23  ;;  %v7602_v5 = vmul.f32 %v20553_v26, %v7590_v20 }
 0xf9e   :  { %7649 = vperm.xlu1 %20549, %v7615_v24   ;;  %7620 = vperm.xlu0 %20548, %v7602_v5   ;;  %v7610_v21 = vmul.f32 %v7602_v5, %v24397_v53  ;;  %v7609_v53 = vld [vmem:[%s26234_s5 + $0x18] sm:$0xff]  ;;  %v24523_v5 = vld [vmem:[%s26235_s6 + $0x2] ss:$0 sm:$0xff] }
 0xf9f   :  { %vm8237_vm7 = vcmp.eq.s32.totalorder %v26538_v13, %v24523_v5  ;;  %vm8238_vm6 = vcmp.eq.s32.totalorder %v26539_v25, %v24523_v5  ;;  %vm8239_vm10 = vcmp.eq.s32.totalorder %v26663_v39, %v24523_v5  ;;  %vm8240_vm0 = vcmp.eq.s32.totalorder %v26664_v18, %v24523_v5 }
 0xfa0   :  { %v7614_v31 = vsub.f32 %v7606_v63, %v7610_v21  ;;  %vm19795_vm12 = vmpackc.low %vm8238_vm6, %vm8237_vm7  ;;  %vm8241_vm14 = vcmp.eq.s32.totalorder %v26668_v35, %v24523_v5  ;;  %vm8242_vm11 = vcmp.eq.s32.totalorder %v26669_v34, %v24523_v5  ;;  %vm8243_vm9 = vcmp.eq.s32.totalorder %v26762_v61, %v24523_v5 }
 0xfa1   :  { %vm19799_vm5 = vmpackc.low %vm8240_vm0, %vm8239_vm10  ;;  %vm8244_vm13 = vcmp.eq.s32.totalorder %v26763_v62, %v24523_v5  ;;  %vm8247_vm7 = vcmp.eq.s32.totalorder %v26770_v11, %v24523_v5  ;;  %vm8248_vm6 = vcmp.eq.s32.totalorder %v26771_v60, %v24523_v5  ;;  %vm8249_vm10 = vcmp.eq.s32.totalorder %v26774_v54, %v24523_v5 }
 0xfa2   :  { %vm19803_vm4 = vmpackc.low %vm8242_vm11, %vm8241_vm14  ;;  %vm8250_vm0 = vcmp.eq.s32.totalorder %v26775_v43, %v24523_v5  ;;  %vm8251_vm14 = vcmp.eq.s32.totalorder %v26778_v55, %v24523_v5  ;;  %vm8252_vm11 = vcmp.eq.s32.totalorder %v26779_v58, %v24523_v5 }
 0xfa3   :  { %v20555_v49 = vpop.eup %20554 }
 0xfa4   :  { %v7605_v48 = vmul.f32 %v20555_v49, %v7593_v52  ;;  %v20557_v56 = vpop.eup %20556 }
 0xfa5   :  { %v7604_v12 = vmul.f32 %v20557_v56, %v7592_v51  ;;  %v14958_v51 = vld [vmem:[%s26236_s7 + $0x48] sm:$0xff] }
 0xfa6   :  { %7635 = vperm.xlu1 %20549, %v7605_v48   ;;  %v7613_v59 = vmul.f32 %v7605_v48, %v24403_v41 }
 0xfa7   :  { %v7612_v17 = vmul.f32 %v7604_v12, %v24401_v36 }
 0xfa8   :  { %v7617_v30 = vsub.f32 %v7609_v53, %v7613_v59  ;;  %v14964_v59 = vld [vmem:[%s26236_s7 + $0x78] sm:$0xff]  ;;  %v15032_v53 = vld [vmem:[%s26235_s6 + $0x3] ss:$0 sm:$0xff] }
 0xfa9   :  { %v7616_v0 = vsub.f32 %v7608_v3, %v7612_v17  ;;  %v14961_v17 = vld [vmem:[%s26236_s7 + $0x60] sm:$0xff]  ;;  %v14962_v3 = vld [vmem:[%s26236_s7 + $0x68] sm:$0xff] }
 0xfaa   :  { %7644 = vperm.xlu1 %20549, %v7614_v31   ;;  %v14959_v31 = vld [vmem:[%s26236_s7 + $0x50] sm:$0xff] }
 0xfae   :  { %7630 = vperm.xlu1 %20549, %v7604_v12   ;;  %v14960_v12 = vld [vmem:[%s26236_s7 + $0x58] sm:$0xff] }
 0xfb2   :  { %7654 = vperm.xlu1 %20549, %v7616_v0   ;;  %v14963_v0 = vld [vmem:[%s26236_s7 + $0x70] sm:$0xff] }
 0xfb6   :  { %7659 = vperm.xlu1 %20549, %v7617_v30   ;;  %v15132_v30 = vld [vmem:[%s26235_s6 + $0x5] ss:$0 sm:$0xff] }
0x1019   :  { %v7626_v22 = vpop.permute.xlu1 %7625 }
0x101a   :  { %v7639_v28 = vmul.f32 %v24331_v19, %v7626_v22  ;;  %v15182_v22 = vld [vmem:[%s26235_s6 + $0x6] ss:$0 sm:$0xff] }
0x101d   :  { %v7650_v27 = vpop.permute.xlu1 %7649  ;;  %v7621_v32 = vpop.permute.xlu0 %7620 }
0x101e   :  { %v7663_v36 = vadd.f32 %v7650_v27, %v7639_v28  ;;  %v7638_v37 = vmul.f32 %v7621_v32, %v24334_v9  ;;  %v24718_v27 = vld [vmem:[%s26235_s6 + $0x8] ss:$0 sm:$0xff]  ;;  %v7816_v28 = vld [vmem:[%s26236_s7] sm:$0xff] }
0x101f   :  { %v7817_v32 = vld [vmem:[%s26236_s7 + $0x8] sm:$0xff] }
0x1020   :  { %v7671_v8 = vmul.f32 0.2, %v7663_v36  ;;  %vm7667_vm3 = vcmp.gt.f32.partialorder %v7663_v36, 0.0 }
0x1022   :  { %v24500_v2 = vsel %vm7667_vm3, %v7663_v36, %v7671_v8  ;;  %vm19807_vm3 = vmpackc.low %vm8244_vm13, %vm8243_vm9  ;;  %vm8522_vm9 = vcmp.eq.s32.totalorder %v26538_v13, %v15032_v53  ;;  %vm8523_vm13 = vcmp.eq.s32.totalorder %v26539_v25, %v15032_v53  ;;  %v7819_v36 = vld [vmem:[%s26236_s7 + $0x18] sm:$0xff] }
0x1023   :  { %v7823_v8 = vld [vmem:[%s26236_s7 + $0x38] sm:$0xff] }
0x1025   :  { %v7636_v33 = vpop.permute.xlu1 %7635 }
0x1026   :  { %v7641_v47 = vmul.f32 %v24338_v46, %v7636_v33  ;;  %v14957_v46 = vld [vmem:[%s26236_s7 + $0x40] sm:$0xff]  ;;  %v7818_v33 = vld [vmem:[%s26236_s7 + $0x10] sm:$0xff] }
0x1029   :  { %v7645_v40 = vpop.permute.xlu1 %7644 }
0x102a   :  { %v7662_v15 = vadd.f32 %v7645_v40, %v7638_v37  ;;  %v7820_v37 = vld [vmem:[%s26236_s7 + $0x20] sm:$0xff]  ;;  %v7821_v40 = vld [vmem:[%s26236_s7 + $0x28] sm:$0xff] }
0x102c   :  { %vm7666_vm1 = vcmp.gt.f32.partialorder %v7662_v15, 0.0  ;;  %v7670_v41 = vmul.f32 0.2, %v7662_v15 }
0x102d   :  { %v7631_v6 = vpop.permute.xlu1 %7630 }
0x102e   :  { %v24498_v16 = vsel %vm7666_vm1, %v7662_v15, %v7670_v41  ;;  %v7640_v19 = vmul.f32 %v7631_v6, %v24341_v50  ;;  %vm8245_vm1 = vcmp.eq.s32.totalorder %v26766_v57, %v24523_v5  ;;  %v7822_v15 = vld [vmem:[%s26236_s7 + $0x30] sm:$0xff]  ;;  %v15015_v41 = vld [vmem:[%s26236_s7 + $0x80] sm:$0xff]  ;;  %v15332_v6 = vld [vmem:[%s26235_s6 + $0x9] ss:$0 sm:$0xff] }
0x102f   :  { %17712 = vmatprep.mubr.f32.mxu0 %v24498_v16  ;;  %17750 = vmatprep.mubr.f32.mxu1 %v24498_v16 }
0x1030   :  { %17713 = vmatmul.mubr.f32.vlgmr.msra.gmra.mrb[64].mxu0 %v24500_v2  ;;  %17751 = vmatmul.mubr.f32.vlgmr.msra.gmra.mrb[76].mxu1 %v24500_v2 }
0x1031   :  { %v7655_v9 = vpop.permute.xlu1 %7654 }
0x1032   :  { %v7664_v42 = vadd.f32 %v7655_v9, %v7640_v19  ;;  %v15382_v19 = vld [vmem:[%s26235_s6 + $0xa] ss:$0 sm:$0xff] }
0x1034   :  { %vm7668_vm2 = vcmp.gt.f32.partialorder %v7664_v42, 0.0  ;;  %v7672_v38 = vmul.f32 0.2, %v7664_v42 }
0x1035   :  { %v7660_v29 = vpop.permute.xlu1 %7659 }
0x1036   :  { %v24508_v44 = vsel %vm7668_vm2, %v7664_v42, %v7672_v38  ;;  %v7665_v45 = vadd.f32 %v7660_v29, %v7641_v47  ;;  %vm8246_vm2 = vcmp.eq.s32.totalorder %v26767_v1, %v24523_v5  ;;  %v15482_v47 = vld [vmem:[%s26235_s6 + $0xc] ss:$0 sm:$0xff] }
0x1037   :  { %17715 = vmatprep.mubr.f32.mxu0 %v24508_v44  ;;  %17753 = vmatprep.mubr.f32.mxu1 %v24508_v44 }
0x1038   :  { %vm7669_vm8 = vcmp.gt.f32.partialorder %v7665_v45, 0.0  ;;  %v7673_v50 = vmul.f32 0.2, %v7665_v45 }
0x103a   :  { %v24512_v4 = vsel %vm7669_vm8, %v7665_v45, %v7673_v50  ;;  %vm19811_vm8 = vmpackc.low %vm8246_vm2, %vm8245_vm1  ;;  %vm8524_vm1 = vcmp.eq.s32.totalorder %v26663_v39, %v15032_v53  ;;  %vm8525_vm2 = vcmp.eq.s32.totalorder %v26664_v18, %v15032_v53 }
0x103b   :  { %17716 = vmatmul.mubr.f32.gmra.mrb[66].mxu0 %v24512_v4  ;;  %17754 = vmatmul.mubr.f32.gmra.mrb[78].mxu1 %v24512_v4 }
0x103c   :  { %17764 = vmatprep.mubr.msk.f32.mxu1 %vm7972_vm15, %v14957_v46  ;;  %17784 = vmatprep.mubr.msk.f32.mxu0 %vm7972_vm15, %v7816_v28 }
0x1103   :  { %v17714_v7 = vpop.f32.mrb[64].mxu0  ;;  %v17752_v10 = vpop.f32.mrb[76].mxu1 }
0x1104   :  { %v7797_v20 = vpop.f32.mrb[65].mxu0  ;;  %v7944_v23 = vpop.f32.mrb[77].mxu1 }
0x1105   :  { %v19787_v26 = vpack.c.bf16 %v17714_v7, %v7797_v20  ;;  %v19779_v24 = vpack.c.bf16 %v17752_v10, %v7944_v23  ;;  %v15069_v20 = vld [vmem:[%s26236_s7 + $0xe0] sm:$0xff] }
0x1107   :  { %19780 = vmatprep.subr.bf16.mxu1 %v19779_v24  ;;  %19788 = vmatprep.subr.bf16.mxu0 %v19787_v26 }
0x1108   :  { %19782 = vmatpush3.bf16.msra.mxu1 %v19779_v24  ;;  %19790 = vmatpush3.bf16.msra.mxu0 %v19787_v26  ;;  %v24948_v24 = vld [vmem:[%s26235_s6 + $0xd] ss:$0 sm:$0xff] }
0x110e   :  { %v17717_v52 = vpop.f32.mrb[66].mxu0  ;;  %v17755_v49 = vpop.f32.mrb[78].mxu1 }
0x110f   :  { %v7807_v48 = vpop.f32.mrb[67].mxu0  ;;  %v7954_v21 = vpop.f32.mrb[79].mxu1 }
0x1110   :  { %v19791_v56 = vpack.c.bf16 %v17717_v52, %v7807_v48  ;;  %v19783_v63 = vpack.c.bf16 %v17755_v49, %v7954_v21  ;;  %v15016_v21 = vld [vmem:[%s26236_s7 + $0x88] sm:$0xff]  ;;  %v15072_v48 = vld [vmem:[%s26236_s7 + $0xf8] sm:$0xff] }
0x1112   :  { %19784 = vmatprep.subr.bf16.mxu1 %v19783_v63  ;;  %19792 = vmatprep.subr.bf16.mxu0 %v19791_v56 }
0x1113   :  { %19786 = vmatpush3.bf16.msra.mxu1 %v19783_v63  ;;  %19794 = vmatpush3.bf16.msra.mxu0 %v19791_v56  ;;  %v15017_v56 = vld [vmem:[%s26236_s7 + $0x90] sm:$0xff] }
0x1114   :  { %19796 = vmatprep.subr.msk.bf16.mxu1 %vm19795_vm12, %v26493_v14 }
0x1116   :  { %17765 = vmatmul.mubr.msk.f32.vlgmr.msra.gmra.mrb[80].mxu1 %vm7972_vm15, %v14958_v51  ;;  %17785 = vmatmul.mubr.msk.f32.vlgmr.msra.gmra.mrb[68].mxu0 %vm7972_vm15, %v7817_v32  ;;  %v15018_v51 = vld [vmem:[%s26236_s7 + $0x98] sm:$0xff]  ;;  %v25074_v32 = vld [vmem:[%s26235_s6 + $0xf] ss:$0 sm:$0xff] }
0x1117   :  { %19798 = vmatpush3.bf16.msk.msra.mxu1 %vm19795_vm12, %v26493_v14  ;;  %17767 = vmatprep.mubr.msk.f32.mxu1 %vm7972_vm15, %v14959_v31  ;;  %vm19815_vm12 = vmpackc.low %vm8248_vm6, %vm8247_vm7  ;;  %vm8526_vm7 = vcmp.eq.s32.totalorder %v26668_v35, %v15032_v53  ;;  %vm8527_vm6 = vcmp.eq.s32.totalorder %v26669_v34, %v15032_v53  ;;  %v15019_v31 = vld [vmem:[%s26236_s7 + $0xa0] sm:$0xff] }
0x1118   :  { %19800 = vmatprep.subr.msk.bf16.mxu1 %vm19799_vm5, %v26493_v14  ;;  %17787 = vmatprep.mubr.msk.f32.mxu0 %vm7972_vm15, %v7818_v33 }
0x111a   :  { %17768 = vmatmul.mubr.msk.f32.gmra.mrb[82].mxu1 %vm7972_vm15, %v14960_v12  ;;  %17788 = vmatmul.mubr.msk.f32.gmra.mrb[70].mxu0 %vm7972_vm15, %v7819_v36 }
0x111b   :  { %19802 = vmatpush3.bf16.msk.msra.mxu1 %vm19799_vm5, %v26493_v14  ;;  %17770 = vmatprep.mubr.msk.f32.mxu1 %vm7972_vm15, %v14961_v17  ;;  %vm19819_vm5 = vmpackc.low %vm8250_vm0, %vm8249_vm10  ;;  %vm8528_vm10 = vcmp.eq.s32.totalorder %v26762_v61, %v15032_v53  ;;  %vm8529_vm0 = vcmp.eq.s32.totalorder %v26763_v62, %v15032_v53  ;;  %v15020_v17 = vld [vmem:[%s26236_s7 + $0xa8] sm:$0xff] }
0x111c   :  { %19804 = vmatprep.subr.msk.bf16.mxu1 %vm19803_vm4, %v26493_v14  ;;  %17790 = vmatprep.mubr.msk.f32.mxu0 %vm7972_vm15, %v7820_v37 }
0x111e   :  { %17771 = vmatmul.mubr.msk.f32.gmra.mrb[84].mxu1 %vm7972_vm15, %v14962_v3  ;;  %17791 = vmatmul.mubr.msk.f32.gmra.mrb[72].mxu0 %vm7972_vm15, %v7821_v40  ;;  %v15021_v3 = vld [vmem:[%s26236_s7 + $0xb0] sm:$0xff] }
0x111f   :  { %19806 = vmatpush3.bf16.msk.msra.mxu1 %vm19803_vm4, %v26493_v14  ;;  %17773 = vmatprep.mubr.msk.f32.mxu1 %vm7972_vm15, %v14963_v0  ;;  %vm19823_vm4 = vmpackc.low %vm8252_vm11, %vm8251_vm14  ;;  %vm8530_vm14 = vcmp.eq.s32.totalorder %v26766_v57, %v15032_v53  ;;  %vm8531_vm11 = vcmp.eq.s32.totalorder %v26767_v1, %v15032_v53  ;;  %v15022_v0 = vld [vmem:[%s26236_s7 + $0xb8] sm:$0xff] }
0x1120   :  { %19808 = vmatprep.subr.msk.bf16.mxu1 %vm19807_vm3, %v26493_v14  ;;  %17793 = vmatprep.mubr.msk.f32.mxu0 %vm7972_vm15, %v7822_v15 }
0x1122   :  { %17774 = vmatmul.mubr.msk.f32.gmra.mrb[86].mxu1 %vm7972_vm15, %v14964_v59  ;;  %17794 = vmatmul.mubr.msk.f32.gmra.mrb[74].mxu0 %vm7972_vm15, %v7823_v8  ;;  %v15065_v59 = vld [vmem:[%s26236_s7 + $0xc0] sm:$0xff] }
0x1123   :  { %19810 = vmatpush3.bf16.msk.msra.mxu1 %vm19807_vm3, %v26493_v14  ;;  %17828 = vmatprep.mubr.f32.mxu1 %v24498_v16  ;;  %vm19835_vm3 = vmpackc.low %vm8523_vm13, %vm8522_vm9  ;;  %vm8532_vm9 = vcmp.eq.s32.totalorder %v26770_v11, %v15032_v53  ;;  %vm8533_vm13 = vcmp.eq.s32.totalorder %v26771_v60, %v15032_v53 }
0x1124   :  { %19812 = vmatprep.subr.msk.bf16.mxu1 %vm19811_vm8, %v26493_v14  ;;  %17842 = vmatprep.mubr.msk.f32.mxu0 %vm7972_vm15, %v15015_v41  ;;  %v15066_v41 = vld [vmem:[%s26236_s7 + $0xc8] sm:$0xff] }
0x1127   :  { %19814 = vmatpush3.bf16.msk.msra.mxu1 %vm19811_vm8, %v26493_v14  ;;  %vm19839_vm8 = vmpackc.low %vm8525_vm2, %vm8524_vm1  ;;  %vm8534_vm1 = vcmp.eq.s32.totalorder %v26774_v54, %v15032_v53  ;;  %vm8535_vm2 = vcmp.eq.s32.totalorder %v26775_v43, %v15032_v53 }
0x1128   :  { %19816 = vmatprep.subr.msk.bf16.mxu1 %vm19815_vm12, %v26493_v14 }
0x112b   :  { %19818 = vmatpush3.bf16.msk.msra.mxu1 %vm19815_vm12, %v26493_v14  ;;  %vm19843_vm12 = vmpackc.low %vm8527_vm6, %vm8526_vm7  ;;  %vm8536_vm7 = vcmp.eq.s32.totalorder %v26778_v55, %v15032_v53  ;;  %vm8537_vm6 = vcmp.eq.s32.totalorder %v26779_v58, %v15032_v53 }
0x112c   :  { %19820 = vmatprep.subr.msk.bf16.mxu1 %vm19819_vm5, %v26493_v14 }
0x112f   :  { %19822 = vmatpush3.bf16.msk.msra.mxu1 %vm19819_vm5, %v26493_v14  ;;  %vm19847_vm5 = vmpackc.low %vm8529_vm0, %vm8528_vm10  ;;  %vm9092_vm10 = vcmp.eq.s32.totalorder %v26538_v13, %v15132_v30  ;;  %vm9093_vm0 = vcmp.eq.s32.totalorder %v26539_v25, %v15132_v30 }
0x1130   :  { %19824 = vmatprep.subr.msk.bf16.mxu1 %vm19823_vm4, %v26493_v14 }
0x1133   :  { %19826 = vmatpush3.bf16.msk.msra.mxu1 %vm19823_vm4, %v26493_v14  ;;  %vm19851_vm4 = vmpackc.low %vm8531_vm11, %vm8530_vm14  ;;  %vm9094_vm14 = vcmp.eq.s32.totalorder %v26663_v39, %v15132_v30  ;;  %vm9095_vm11 = vcmp.eq.s32.totalorder %v26664_v18, %v15132_v30 }
0x1134   :  { %19836 = vmatprep.subr.msk.bf16.mxu1 %vm19835_vm3, %v26493_v14 }
0x1136   :  { %17829 = vmatmul.mubr.f32.vlgmr.msra.gmra.mrb[88].mxu1 %v24500_v2 }
0x1137   :  { %17831 = vmatprep.mubr.f32.mxu1 %v24508_v44  ;;  %19838 = vmatpush3.bf16.msk.msra.mxu1 %vm19835_vm3, %v26493_v14  ;;  %vm19855_vm3 = vmpackc.low %vm8533_vm13, %vm8532_vm9  ;;  %vm9096_vm9 = vcmp.eq.s32.totalorder %v26668_v35, %v15132_v30  ;;  %vm9097_vm13 = vcmp.eq.s32.totalorder %v26669_v34, %v15132_v30 }
0x1138   :  { %19840 = vmatprep.subr.msk.bf16.mxu1 %vm19839_vm8, %v26493_v14 }
0x113a   :  { %17832 = vmatmul.mubr.f32.gmra.mrb[90].mxu1 %v24512_v4 }
0x113b   :  { %19842 = vmatpush3.bf16.msk.msra.mxu1 %vm19839_vm8, %v26493_v14  ;;  %17886 = vmatprep.mubr.f32.mxu1 %v24498_v16  ;;  %vm19859_vm8 = vmpackc.low %vm8535_vm2, %vm8534_vm1  ;;  %vm9098_vm1 = vcmp.eq.s32.totalorder %v26762_v61, %v15132_v30  ;;  %vm9099_vm2 = vcmp.eq.s32.totalorder %v26763_v62, %v15132_v30 }
0x113c   :  { %19844 = vmatprep.subr.msk.bf16.mxu1 %vm19843_vm12, %v26493_v14 }
0x113f   :  { %19846 = vmatpush3.bf16.msk.msra.mxu1 %vm19843_vm12, %v26493_v14  ;;  %vm19863_vm12 = vmpackc.low %vm8537_vm6, %vm8536_vm7  ;;  %vm9100_vm7 = vcmp.eq.s32.totalorder %v26766_v57, %v15132_v30  ;;  %vm9101_vm6 = vcmp.eq.s32.totalorder %v26767_v1, %v15132_v30 }
0x1140   :  { %19848 = vmatprep.subr.msk.bf16.mxu1 %vm19847_vm5, %v26493_v14 }
0x1143   :  { %19850 = vmatpush3.bf16.msk.msra.mxu1 %vm19847_vm5, %v26493_v14  ;;  %vm19915_vm5 = vmpackc.low %vm9093_vm0, %vm9092_vm10  ;;  %vm9102_vm10 = vcmp.eq.s32.totalorder %v26770_v11, %v15132_v30  ;;  %vm9103_vm0 = vcmp.eq.s32.totalorder %v26771_v60, %v15132_v30 }
0x1144   :  { %19852 = vmatprep.subr.msk.bf16.mxu1 %vm19851_vm4, %v26493_v14 }
0x1147   :  { %19854 = vmatpush3.bf16.msk.msra.mxu1 %vm19851_vm4, %v26493_v14  ;;  %vm19919_vm4 = vmpackc.low %vm9095_vm11, %vm9094_vm14  ;;  %vm9104_vm14 = vcmp.eq.s32.totalorder %v26774_v54, %v15132_v30  ;;  %vm9105_vm11 = vcmp.eq.s32.totalorder %v26775_v43, %v15132_v30 }
0x1148   :  { %19856 = vmatprep.subr.msk.bf16.mxu1 %vm19855_vm3, %v26493_v14 }
0x114b   :  { %19858 = vmatpush3.bf16.msk.msra.mxu1 %vm19855_vm3, %v26493_v14  ;;  %vm19923_vm3 = vmpackc.low %vm9097_vm13, %vm9096_vm9  ;;  %vm9106_vm9 = vcmp.eq.s32.totalorder %v26778_v55, %v15132_v30  ;;  %vm9107_vm13 = vcmp.eq.s32.totalorder %v26779_v58, %v15132_v30 }
0x114c   :  { %19860 = vmatprep.subr.msk.bf16.mxu1 %vm19859_vm8, %v26493_v14 }
0x114f   :  { %19862 = vmatpush3.bf16.msk.msra.mxu1 %vm19859_vm8, %v26493_v14  ;;  %vm19927_vm8 = vmpackc.low %vm9099_vm2, %vm9098_vm1  ;;  %vm9377_vm1 = vcmp.eq.s32.totalorder %v26538_v13, %v15182_v22  ;;  %vm9378_vm2 = vcmp.eq.s32.totalorder %v26539_v25, %v15182_v22 }
0x1150   :  { %19864 = vmatprep.subr.msk.bf16.mxu1 %vm19863_vm12, %v26493_v14 }
0x1153   :  { %19866 = vmatpush3.bf16.msk.msra.mxu1 %vm19863_vm12, %v26493_v14  ;;  %vm19931_vm12 = vmpackc.low %vm9101_vm6, %vm9100_vm7  ;;  %vm9379_vm7 = vcmp.eq.s32.totalorder %v26663_v39, %v15182_v22  ;;  %vm9380_vm6 = vcmp.eq.s32.totalorder %v26664_v18, %v15182_v22 }
0x1154   :  { %19916 = vmatprep.subr.msk.bf16.mxu1 %vm19915_vm5, %v26493_v14 }
0x1156   :  { %17887 = vmatmul.mubr.f32.vlgmr.msra.gmra.mrb[92].mxu1 %v24500_v2 }
0x1157   :  { %17889 = vmatprep.mubr.f32.mxu1 %v24508_v44  ;;  %19918 = vmatpush3.bf16.msk.msra.mxu1 %vm19915_vm5, %v26493_v14  ;;  %vm19935_vm5 = vmpackc.low %vm9103_vm0, %vm9102_vm10  ;;  %vm9381_vm10 = vcmp.eq.s32.totalorder %v26668_v35, %v15182_v22  ;;  %vm9382_vm0 = vcmp.eq.s32.totalorder %v26669_v34, %v15182_v22 }
0x1158   :  { %19920 = vmatprep.subr.msk.bf16.mxu1 %vm19919_vm4, %v26493_v14 }
0x115a   :  { %17890 = vmatmul.mubr.f32.gmra.mrb[94].mxu1 %v24512_v4 }
0x115b   :  { %19922 = vmatpush3.bf16.msk.msra.mxu1 %vm19919_vm4, %v26493_v14  ;;  %18002 = vmatprep.mubr.f32.mxu1 %v24498_v16  ;;  %vm19939_vm4 = vmpackc.low %vm9105_vm11, %vm9104_vm14  ;;  %vm9383_vm14 = vcmp.eq.s32.totalorder %v26762_v61, %v15182_v22  ;;  %vm9384_vm11 = vcmp.eq.s32.totalorder %v26763_v62, %v15182_v22 }
0x115c   :  { %19924 = vmatprep.subr.msk.bf16.mxu1 %vm19923_vm3, %v26493_v14 }
0x115f   :  { %19926 = vmatpush3.bf16.msk.msra.mxu1 %vm19923_vm3, %v26493_v14  ;;  %vm19943_vm3 = vmpackc.low %vm9107_vm13, %vm9106_vm9  ;;  %vm9385_vm9 = vcmp.eq.s32.totalorder %v26766_v57, %v15182_v22  ;;  %vm9386_vm13 = vcmp.eq.s32.totalorder %v26767_v1, %v15182_v22 }
0x1160   :  { %19928 = vmatprep.subr.msk.bf16.mxu1 %vm19927_vm8, %v26493_v14 }
0x1163   :  { %19930 = vmatpush3.bf16.msk.msra.mxu1 %vm19927_vm8, %v26493_v14  ;;  %vm19955_vm8 = vmpackc.low %vm9378_vm2, %vm9377_vm1  ;;  %vm9387_vm1 = vcmp.eq.s32.totalorder %v26770_v11, %v15182_v22  ;;  %vm9388_vm2 = vcmp.eq.s32.totalorder %v26771_v60, %v15182_v22 }
0x1164   :  { %19932 = vmatprep.subr.msk.bf16.mxu1 %vm19931_vm12, %v26493_v14 }
0x1167   :  { %19934 = vmatpush3.bf16.msk.msra.mxu1 %vm19931_vm12, %v26493_v14  ;;  %vm19959_vm12 = vmpackc.low %vm9380_vm6, %vm9379_vm7  ;;  %vm9389_vm7 = vcmp.eq.s32.totalorder %v26774_v54, %v15182_v22  ;;  %vm9390_vm6 = vcmp.eq.s32.totalorder %v26775_v43, %v15182_v22 }
0x1168   :  { %19936 = vmatprep.subr.msk.bf16.mxu1 %vm19935_vm5, %v26493_v14 }
0x116b   :  { %19938 = vmatpush3.bf16.msk.msra.mxu1 %vm19935_vm5, %v26493_v14  ;;  %vm19963_vm5 = vmpackc.low %vm9382_vm0, %vm9381_vm10  ;;  %vm9391_vm10 = vcmp.eq.s32.totalorder %v26778_v55, %v15182_v22  ;;  %vm9392_vm0 = vcmp.eq.s32.totalorder %v26779_v58, %v15182_v22 }
0x116c   :  { %19940 = vmatprep.subr.msk.bf16.mxu1 %vm19939_vm4, %v26493_v14 }
0x116f   :  { %19942 = vmatpush3.bf16.msk.msra.mxu1 %vm19939_vm4, %v26493_v14  ;;  %vm19967_vm4 = vmpackc.low %vm9384_vm11, %vm9383_vm14  ;;  %vm9947_vm14 = vcmp.eq.s32.totalorder %v26538_v13, %v24718_v27  ;;  %vm9948_vm11 = vcmp.eq.s32.totalorder %v26539_v25, %v24718_v27 }
0x1170   :  { %19944 = vmatprep.subr.msk.bf16.mxu1 %vm19943_vm3, %v26493_v14 }
0x1173   :  { %19946 = vmatpush3.bf16.msk.msra.mxu1 %vm19943_vm3, %v26493_v14  ;;  %vm19971_vm3 = vmpackc.low %vm9386_vm13, %vm9385_vm9  ;;  %vm9949_vm9 = vcmp.eq.s32.totalorder %v26663_v39, %v24718_v27  ;;  %vm9950_vm13 = vcmp.eq.s32.totalorder %v26664_v18, %v24718_v27 }
0x1174   :  { %19956 = vmatprep.subr.msk.bf16.mxu1 %vm19955_vm8, %v26493_v14 }
0x1176   :  { %18003 = vmatmul.mubr.f32.vlgmr.msra.gmra.mrb[96].mxu1 %v24500_v2 }
0x1177   :  { %18005 = vmatprep.mubr.f32.mxu1 %v24508_v44  ;;  %19958 = vmatpush3.bf16.msk.msra.mxu1 %vm19955_vm8, %v26493_v14  ;;  %vm19975_vm8 = vmpackc.low %vm9388_vm2, %vm9387_vm1  ;;  %vm9951_vm1 = vcmp.eq.s32.totalorder %v26668_v35, %v24718_v27  ;;  %vm9952_vm2 = vcmp.eq.s32.totalorder %v26669_v34, %v24718_v27 }
0x1178   :  { %19960 = vmatprep.subr.msk.bf16.mxu1 %vm19959_vm12, %v26493_v14 }
0x117a   :  { %18006 = vmatmul.mubr.f32.gmra.mrb[98].mxu1 %v24512_v4 }
0x117b   :  { %19962 = vmatpush3.bf16.msk.msra.mxu1 %vm19959_vm12, %v26493_v14  ;;  %18060 = vmatprep.mubr.f32.mxu1 %v24498_v16  ;;  %vm19979_vm12 = vmpackc.low %vm9390_vm6, %vm9389_vm7  ;;  %vm9953_vm7 = vcmp.eq.s32.totalorder %v26762_v61, %v24718_v27  ;;  %vm9954_vm6 = vcmp.eq.s32.totalorder %v26763_v62, %v24718_v27 }
0x117c   :  { %19964 = vmatprep.subr.msk.bf16.mxu1 %vm19963_vm5, %v26493_v14 }
0x117f   :  { %19966 = vmatpush3.bf16.msk.msra.mxu1 %vm19963_vm5, %v26493_v14  ;;  %vm19983_vm5 = vmpackc.low %vm9392_vm0, %vm9391_vm10  ;;  %vm9955_vm10 = vcmp.eq.s32.totalorder %v26766_v57, %v24718_v27  ;;  %vm9956_vm0 = vcmp.eq.s32.totalorder %v26767_v1, %v24718_v27 }
0x1180   :  { %19968 = vmatprep.subr.msk.bf16.mxu1 %vm19967_vm4, %v26493_v14 }
0x1183   :  { %19970 = vmatpush3.bf16.msk.msra.mxu1 %vm19967_vm4, %v26493_v14  ;;  %vm20035_vm4 = vmpackc.low %vm9948_vm11, %vm9947_vm14  ;;  %vm9957_vm14 = vcmp.eq.s32.totalorder %v26770_v11, %v24718_v27  ;;  %vm9958_vm11 = vcmp.eq.s32.totalorder %v26771_v60, %v24718_v27 }
0x1184   :  { %19972 = vmatprep.subr.msk.bf16.mxu1 %vm19971_vm3, %v26493_v14 }
0x1187   :  { %19974 = vmatpush3.bf16.msk.msra.mxu1 %vm19971_vm3, %v26493_v14  ;;  %vm20039_vm3 = vmpackc.low %vm9950_vm13, %vm9949_vm9  ;;  %vm9959_vm9 = vcmp.eq.s32.totalorder %v26774_v54, %v24718_v27  ;;  %vm9960_vm13 = vcmp.eq.s32.totalorder %v26775_v43, %v24718_v27 }
0x1188   :  { %19976 = vmatprep.subr.msk.bf16.mxu1 %vm19975_vm8, %v26493_v14 }
0x118b   :  { %19978 = vmatpush3.bf16.msk.msra.mxu1 %vm19975_vm8, %v26493_v14  ;;  %vm20043_vm8 = vmpackc.low %vm9952_vm2, %vm9951_vm1  ;;  %vm9961_vm1 = vcmp.eq.s32.totalorder %v26778_v55, %v24718_v27  ;;  %vm9962_vm2 = vcmp.eq.s32.totalorder %v26779_v58, %v24718_v27  ;;  %v25068_v27 = vld [vmem:[%s26235_s6 + $0x4] ss:$0 sm:$0xff] }
0x118c   :  { %19980 = vmatprep.subr.msk.bf16.mxu1 %vm19979_vm12, %v26493_v14 }
0x118f   :  { %19982 = vmatpush3.bf16.msk.msra.mxu1 %vm19979_vm12, %v26493_v14  ;;  %vm20047_vm12 = vmpackc.low %vm9954_vm6, %vm9953_vm7  ;;  %vm10232_vm7 = vcmp.eq.s32.totalorder %v26538_v13, %v15332_v6  ;;  %vm10233_vm6 = vcmp.eq.s32.totalorder %v26539_v25, %v15332_v6 }
0x1190   :  { %19984 = vmatprep.subr.msk.bf16.mxu1 %vm19983_vm5, %v26493_v14 }
0x1193   :  { %19986 = vmatpush3.bf16.msk.msra.mxu1 %vm19983_vm5, %v26493_v14  ;;  %vm20051_vm5 = vmpackc.low %vm9956_vm0, %vm9955_vm10  ;;  %vm10234_vm10 = vcmp.eq.s32.totalorder %v26663_v39, %v15332_v6  ;;  %vm10235_vm0 = vcmp.eq.s32.totalorder %v26664_v18, %v15332_v6 }
0x1194   :  { %20036 = vmatprep.subr.msk.bf16.mxu1 %vm20035_vm4, %v26493_v14 }
0x1196   :  { %18061 = vmatmul.mubr.f32.vlgmr.msra.gmra.mrb[100].mxu1 %v24500_v2 }
0x1197   :  { %18063 = vmatprep.mubr.f32.mxu1 %v24508_v44  ;;  %20038 = vmatpush3.bf16.msk.msra.mxu1 %vm20035_vm4, %v26493_v14  ;;  %vm20055_vm4 = vmpackc.low %vm9958_vm11, %vm9957_vm14  ;;  %vm10236_vm14 = vcmp.eq.s32.totalorder %v26668_v35, %v15332_v6  ;;  %vm10237_vm11 = vcmp.eq.s32.totalorder %v26669_v34, %v15332_v6 }
0x1198   :  { %20040 = vmatprep.subr.msk.bf16.mxu1 %vm20039_vm3, %v26493_v14 }
0x119a   :  { %18064 = vmatmul.mubr.f32.gmra.mrb[102].mxu1 %v24512_v4 }
0x119b   :  { %20042 = vmatpush3.bf16.msk.msra.mxu1 %vm20039_vm3, %v26493_v14  ;;  %18176 = vmatprep.mubr.f32.mxu1 %v24498_v16  ;;  %vm20059_vm3 = vmpackc.low %vm9960_vm13, %vm9959_vm9  ;;  %vm10238_vm9 = vcmp.eq.s32.totalorder %v26762_v61, %v15332_v6  ;;  %vm10239_vm13 = vcmp.eq.s32.totalorder %v26763_v62, %v15332_v6 }
0x119c   :  { %20044 = vmatprep.subr.msk.bf16.mxu1 %vm20043_vm8, %v26493_v14 }
0x119f   :  { %20046 = vmatpush3.bf16.msk.msra.mxu1 %vm20043_vm8, %v26493_v14  ;;  %vm20063_vm8 = vmpackc.low %vm9962_vm2, %vm9961_vm1  ;;  %vm10240_vm1 = vcmp.eq.s32.totalorder %v26766_v57, %v15332_v6  ;;  %vm10241_vm2 = vcmp.eq.s32.totalorder %v26767_v1, %v15332_v6 }
0x11a0   :  { %20048 = vmatprep.subr.msk.bf16.mxu1 %vm20047_vm12, %v26493_v14 }
0x11a3   :  { %20050 = vmatpush3.bf16.msk.msra.mxu1 %vm20047_vm12, %v26493_v14  ;;  %vm20075_vm12 = vmpackc.low %vm10233_vm6, %vm10232_vm7  ;;  %vm10242_vm7 = vcmp.eq.s32.totalorder %v26770_v11, %v15332_v6  ;;  %vm10243_vm6 = vcmp.eq.s32.totalorder %v26771_v60, %v15332_v6 }
0x11a4   :  { %20052 = vmatprep.subr.msk.bf16.mxu1 %vm20051_vm5, %v26493_v14 }
0x11a7   :  { %20054 = vmatpush3.bf16.msk.msra.mxu1 %vm20051_vm5, %v26493_v14  ;;  %vm20079_vm5 = vmpackc.low %vm10235_vm0, %vm10234_vm10  ;;  %vm10244_vm10 = vcmp.eq.s32.totalorder %v26774_v54, %v15332_v6  ;;  %vm10245_vm0 = vcmp.eq.s32.totalorder %v26775_v43, %v15332_v6 }
0x11a8   :  { %20056 = vmatprep.subr.msk.bf16.mxu1 %vm20055_vm4, %v26493_v14 }
0x11ab   :  { %20058 = vmatpush3.bf16.msk.msra.mxu1 %vm20055_vm4, %v26493_v14  ;;  %vm20083_vm4 = vmpackc.low %vm10237_vm11, %vm10236_vm14  ;;  %vm10246_vm14 = vcmp.eq.s32.totalorder %v26778_v55, %v15332_v6  ;;  %vm10247_vm11 = vcmp.eq.s32.totalorder %v26779_v58, %v15332_v6  ;;  %v15067_v6 = vld [vmem:[%s26236_s7 + $0xd0] sm:$0xff] }
0x11ac   :  { %20060 = vmatprep.subr.msk.bf16.mxu1 %vm20059_vm3, %v26493_v14 }
0x11af   :  { %20062 = vmatpush3.bf16.msk.msra.mxu1 %vm20059_vm3, %v26493_v14  ;;  %vm20087_vm3 = vmpackc.low %vm10239_vm13, %vm10238_vm9  ;;  %vm10517_vm9 = vcmp.eq.s32.totalorder %v26538_v13, %v15382_v19  ;;  %vm10518_vm13 = vcmp.eq.s32.totalorder %v26539_v25, %v15382_v19 }
0x11b0   :  { %20064 = vmatprep.subr.msk.bf16.mxu1 %vm20063_vm8, %v26493_v14 }
0x11b3   :  { %20066 = vmatpush3.bf16.msk.msra.mxu1 %vm20063_vm8, %v26493_v14  ;;  %vm20091_vm8 = vmpackc.low %vm10241_vm2, %vm10240_vm1  ;;  %vm10519_vm1 = vcmp.eq.s32.totalorder %v26663_v39, %v15382_v19  ;;  %vm10520_vm2 = vcmp.eq.s32.totalorder %v26664_v18, %v15382_v19 }
0x11b4   :  { %20076 = vmatprep.subr.msk.bf16.mxu1 %vm20075_vm12, %v26493_v14 }
0x11b6   :  { %18177 = vmatmul.mubr.f32.vlgmr.msra.gmra.mrb[104].mxu1 %v24500_v2 }
0x11b7   :  { %18179 = vmatprep.mubr.f32.mxu1 %v24508_v44  ;;  %20078 = vmatpush3.bf16.msk.msra.mxu1 %vm20075_vm12, %v26493_v14  ;;  %vm20095_vm12 = vmpackc.low %vm10243_vm6, %vm10242_vm7  ;;  %vm10521_vm7 = vcmp.eq.s32.totalorder %v26668_v35, %v15382_v19  ;;  %vm10522_vm6 = vcmp.eq.s32.totalorder %v26669_v34, %v15382_v19 }
0x11b8   :  { %20080 = vmatprep.subr.msk.bf16.mxu1 %vm20079_vm5, %v26493_v14 }
0x11ba   :  { %18180 = vmatmul.mubr.f32.gmra.mrb[106].mxu1 %v24512_v4 }
0x11bb   :  { %20082 = vmatpush3.bf16.msk.msra.mxu1 %vm20079_vm5, %v26493_v14  ;;  %18234 = vmatprep.mubr.f32.mxu1 %v24498_v16  ;;  %vm20099_vm5 = vmpackc.low %vm10245_vm0, %vm10244_vm10  ;;  %vm10523_vm10 = vcmp.eq.s32.totalorder %v26762_v61, %v15382_v19  ;;  %vm10524_vm0 = vcmp.eq.s32.totalorder %v26763_v62, %v15382_v19 }
0x11bc   :  { %20084 = vmatprep.subr.msk.bf16.mxu1 %vm20083_vm4, %v26493_v14 }
0x11bf   :  { %20086 = vmatpush3.bf16.msk.msra.mxu1 %vm20083_vm4, %v26493_v14  ;;  %vm20103_vm4 = vmpackc.low %vm10247_vm11, %vm10246_vm14  ;;  %vm10525_vm14 = vcmp.eq.s32.totalorder %v26766_v57, %v15382_v19  ;;  %vm10526_vm11 = vcmp.eq.s32.totalorder %v26767_v1, %v15382_v19 }
0x11c0   :  { %20088 = vmatprep.subr.msk.bf16.mxu1 %vm20087_vm3, %v26493_v14 }
0x11c3   :  { %20090 = vmatpush3.bf16.msk.msra.mxu1 %vm20087_vm3, %v26493_v14  ;;  %vm20115_vm3 = vmpackc.low %vm10518_vm13, %vm10517_vm9  ;;  %vm10527_vm9 = vcmp.eq.s32.totalorder %v26770_v11, %v15382_v19  ;;  %vm10528_vm13 = vcmp.eq.s32.totalorder %v26771_v60, %v15382_v19 }
0x11c4   :  { %20092 = vmatprep.subr.msk.bf16.mxu1 %vm20091_vm8, %v26493_v14 }
0x11c7   :  { %20094 = vmatpush3.bf16.msk.msra.mxu1 %vm20091_vm8, %v26493_v14  ;;  %vm20119_vm8 = vmpackc.low %vm10520_vm2, %vm10519_vm1  ;;  %vm10529_vm1 = vcmp.eq.s32.totalorder %v26774_v54, %v15382_v19  ;;  %vm10530_vm2 = vcmp.eq.s32.totalorder %v26775_v43, %v15382_v19 }
0x11c8   :  { %20096 = vmatprep.subr.msk.bf16.mxu1 %vm20095_vm12, %v26493_v14 }
0x11cb   :  { %20098 = vmatpush3.bf16.msk.msra.mxu1 %vm20095_vm12, %v26493_v14  ;;  %vm20123_vm12 = vmpackc.low %vm10522_vm6, %vm10521_vm7  ;;  %vm10531_vm7 = vcmp.eq.s32.totalorder %v26778_v55, %v15382_v19  ;;  %vm10532_vm6 = vcmp.eq.s32.totalorder %v26779_v58, %v15382_v19 }
0x11cc   :  { %20100 = vmatprep.subr.msk.bf16.mxu1 %vm20099_vm5, %v26493_v14 }
0x11cf   :  { %20102 = vmatpush3.bf16.msk.msra.mxu1 %vm20099_vm5, %v26493_v14  ;;  %vm20127_vm5 = vmpackc.low %vm10524_vm0, %vm10523_vm10  ;;  %vm11087_vm10 = vcmp.eq.s32.totalorder %v26538_v13, %v15482_v47  ;;  %vm11088_vm0 = vcmp.eq.s32.totalorder %v26539_v25, %v15482_v47 }
0x11d0   :  { %20104 = vmatprep.subr.msk.bf16.mxu1 %vm20103_vm4, %v26493_v14 }
0x11d3   :  { %20106 = vmatpush3.bf16.msk.msra.mxu1 %vm20103_vm4, %v26493_v14  ;;  %vm20131_vm4 = vmpackc.low %vm10526_vm11, %vm10525_vm14  ;;  %vm11089_vm14 = vcmp.eq.s32.totalorder %v26663_v39, %v15482_v47  ;;  %vm11090_vm11 = vcmp.eq.s32.totalorder %v26664_v18, %v15482_v47 }
0x11d4   :  { %20116 = vmatprep.subr.msk.bf16.mxu1 %vm20115_vm3, %v26493_v14 }
0x11d6   :  { %18235 = vmatmul.mubr.f32.vlgmr.msra.gmra.mrb[108].mxu1 %v24500_v2 }
0x11d7   :  { %18237 = vmatprep.mubr.f32.mxu1 %v24508_v44  ;;  %20118 = vmatpush3.bf16.msk.msra.mxu1 %vm20115_vm3, %v26493_v14  ;;  %vm20135_vm3 = vmpackc.low %vm10528_vm13, %vm10527_vm9  ;;  %vm11091_vm9 = vcmp.eq.s32.totalorder %v26668_v35, %v15482_v47  ;;  %vm11092_vm13 = vcmp.eq.s32.totalorder %v26669_v34, %v15482_v47 }
0x11d8   :  { %20120 = vmatprep.subr.msk.bf16.mxu1 %vm20119_vm8, %v26493_v14 }
0x11da   :  { %18238 = vmatmul.mubr.f32.gmra.mrb[110].mxu1 %v24512_v4 }
0x11db   :  { %20122 = vmatpush3.bf16.msk.msra.mxu1 %vm20119_vm8, %v26493_v14  ;;  %18292 = vmatprep.mubr.f32.mxu1 %v24498_v16  ;;  %vm20139_vm8 = vmpackc.low %vm10530_vm2, %vm10529_vm1  ;;  %vm11093_vm1 = vcmp.eq.s32.totalorder %v26762_v61, %v15482_v47  ;;  %vm11094_vm2 = vcmp.eq.s32.totalorder %v26763_v62, %v15482_v47 }
0x11dc   :  { %20124 = vmatprep.subr.msk.bf16.mxu1 %vm20123_vm12, %v26493_v14 }
0x11df   :  { %20126 = vmatpush3.bf16.msk.msra.mxu1 %vm20123_vm12, %v26493_v14  ;;  %vm20143_vm12 = vmpackc.low %vm10532_vm6, %vm10531_vm7  ;;  %vm11095_vm7 = vcmp.eq.s32.totalorder %v26766_v57, %v15482_v47  ;;  %vm11096_vm6 = vcmp.eq.s32.totalorder %v26767_v1, %v15482_v47 }
0x11e0   :  { %20128 = vmatprep.subr.msk.bf16.mxu1 %vm20127_vm5, %v26493_v14 }
0x11e3   :  { %20130 = vmatpush3.bf16.msk.msra.mxu1 %vm20127_vm5, %v26493_v14  ;;  %vm20195_vm5 = vmpackc.low %vm11088_vm0, %vm11087_vm10  ;;  %vm11097_vm10 = vcmp.eq.s32.totalorder %v26770_v11, %v15482_v47  ;;  %vm11098_vm0 = vcmp.eq.s32.totalorder %v26771_v60, %v15482_v47 }
0x11e4   :  { %20132 = vmatprep.subr.msk.bf16.mxu1 %vm20131_vm4, %v26493_v14 }
0x11e7   :  { %20134 = vmatpush3.bf16.msk.msra.mxu1 %vm20131_vm4, %v26493_v14  ;;  %vm20199_vm4 = vmpackc.low %vm11090_vm11, %vm11089_vm14  ;;  %vm11099_vm14 = vcmp.eq.s32.totalorder %v26774_v54, %v15482_v47  ;;  %vm11100_vm11 = vcmp.eq.s32.totalorder %v26775_v43, %v15482_v47 }
0x11e8   :  { %20136 = vmatprep.subr.msk.bf16.mxu1 %vm20135_vm3, %v26493_v14 }
0x11e9   :  { %v24883_v9 = vpop.f32.mrb[80].mxu1 }
0x11ea   :  { %v24885_v42 = vpop.f32.mrb[81].mxu1 }
0x11eb   :  { %20138 = vmatpush3.bf16.msk.msra.mxu1 %vm20135_vm3, %v26493_v14  ;;  %vm20203_vm3 = vmpackc.low %vm11092_vm13, %vm11091_vm9  ;;  %vm11101_vm9 = vcmp.eq.s32.totalorder %v26778_v55, %v15482_v47  ;;  %vm11102_vm13 = vcmp.eq.s32.totalorder %v26779_v58, %v15482_v47  ;;  %v15068_v47 = vld [vmem:[%s26236_s7 + $0xd8] sm:$0xff] }
0x11ec   :  { %20140 = vmatprep.subr.msk.bf16.mxu1 %vm20139_vm8, %v26493_v14 }
0x11ed   :  { %v24894_v38 = vpop.f32.mrb[82].mxu1 }
0x11ee   :  { %v24898_v29 = vpop.f32.mrb[83].mxu1 }
0x11ef   :  { %20142 = vmatpush3.bf16.msk.msra.mxu1 %vm20139_vm8, %v26493_v14  ;;  %vm20207_vm8 = vmpackc.low %vm11094_vm2, %vm11093_vm1  ;;  %vm11372_vm1 = vcmp.eq.s32.totalorder %v26538_v13, %v24948_v24  ;;  %vm11373_vm2 = vcmp.eq.s32.totalorder %v26539_v25, %v24948_v24 }
0x11f0   :  { %20144 = vmatprep.subr.msk.bf16.mxu1 %vm20143_vm12, %v26493_v14 }
0x11f1   :  { %v24902_v45 = vpop.f32.mrb[84].mxu1 }
0x11f2   :  { %v24906_v50 = vpop.f32.mrb[85].mxu1 }
0x11f3   :  { %20146 = vmatpush3.bf16.msk.msra.mxu1 %vm20143_vm12, %v26493_v14  ;;  %vm20211_vm12 = vmpackc.low %vm11096_vm6, %vm11095_vm7  ;;  %vm11374_vm7 = vcmp.eq.s32.totalorder %v26663_v39, %v24948_v24  ;;  %vm11375_vm6 = vcmp.eq.s32.totalorder %v26664_v18, %v24948_v24 }
0x11f4   :  { %20196 = vmatprep.subr.msk.bf16.mxu1 %vm20195_vm5, %v26493_v14 }
0x11f5   :  { %v24910_v46 = vpop.f32.mrb[86].mxu1 }
0x11f6   :  { %18293 = vmatmul.mubr.f32.vlgmr.msra.gmra.mrb[112].mxu1 %v24500_v2  ;;  %v24915_v7 = vpop.f32.mrb[87].mxu1 }
0x11f7   :  { %18295 = vmatprep.mubr.f32.mxu1 %v24508_v44  ;;  %20198 = vmatpush3.bf16.msk.msra.mxu1 %vm20195_vm5, %v26493_v14  ;;  %vm20215_vm5 = vmpackc.low %vm11098_vm0, %vm11097_vm10  ;;  %vm11376_vm10 = vcmp.eq.s32.totalorder %v26668_v35, %v24948_v24  ;;  %vm11377_vm0 = vcmp.eq.s32.totalorder %v26669_v34, %v24948_v24 }
0x11f8   :  { %20200 = vmatprep.subr.msk.bf16.mxu1 %vm20199_vm4, %v26493_v14 }
0x11fa   :  { %18296 = vmatmul.mubr.f32.gmra.mrb[114].mxu1 %v24512_v4 }
0x11fb   :  { %20202 = vmatpush3.bf16.msk.msra.mxu1 %vm20199_vm4, %v26493_v14  ;;  %18408 = vmatprep.mubr.f32.mxu1 %v24498_v16  ;;  %vm24938_vm4 = vmpackc.low %vm11100_vm11, %vm11099_vm14  ;;  %vm11378_vm14 = vcmp.eq.s32.totalorder %v26762_v61, %v24948_v24  ;;  %vm11379_vm11 = vcmp.eq.s32.totalorder %v26763_v62, %v24948_v24 }
0x11fc   :  { %20204 = vmatprep.subr.msk.bf16.mxu1 %vm20203_vm3, %v26493_v14 }
0x11ff   :  { %20206 = vmatpush3.bf16.msk.msra.mxu1 %vm20203_vm3, %v26493_v14  ;;  %vm20223_vm3 = vmpackc.low %vm11102_vm13, %vm11101_vm9  ;;  %vm11380_vm9 = vcmp.eq.s32.totalorder %v26766_v57, %v24948_v24  ;;  %vm11381_vm13 = vcmp.eq.s32.totalorder %v26767_v1, %v24948_v24 }
0x1200   :  { %20208 = vmatprep.subr.msk.bf16.mxu1 %vm20207_vm8, %v26493_v14 }
0x1203   :  { %20210 = vmatpush3.bf16.msk.msra.mxu1 %vm20207_vm8, %v26493_v14  ;;  %vm24961_vm8 = vmpackc.low %vm11373_vm2, %vm11372_vm1  ;;  %vm11382_vm1 = vcmp.eq.s32.totalorder %v26770_v11, %v24948_v24  ;;  %vm11383_vm2 = vcmp.eq.s32.totalorder %v26771_v60, %v24948_v24 }
0x1204   :  { %20212 = vmatprep.subr.msk.bf16.mxu1 %vm20211_vm12, %v26493_v14 }
0x1207   :  { %20214 = vmatpush3.bf16.msk.msra.mxu1 %vm20211_vm12, %v26493_v14  ;;  %vm24979_vm12 = vmpackc.low %vm11375_vm6, %vm11374_vm7  ;;  %vm11384_vm7 = vcmp.eq.s32.totalorder %v26774_v54, %v24948_v24  ;;  %vm11385_vm6 = vcmp.eq.s32.totalorder %v26775_v43, %v24948_v24 }
0x1208   :  { %20216 = vmatprep.subr.msk.bf16.mxu1 %vm20215_vm5, %v26493_v14 }
0x1209   :  { %v17830_v10 = vpop.f32.mrb[88].mxu1 }
0x120a   :  { %v8351_v23 = vpop.f32.mrb[89].mxu1 }
0x120b   :  { %v19827_v26 = vpack.c.bf16 %v17830_v10, %v8351_v23  ;;  %20218 = vmatpush3.bf16.msk.msra.mxu1 %vm20215_vm5, %v26493_v14  ;;  %vm25003_vm5 = vmpackc.low %vm11377_vm0, %vm11376_vm10  ;;  %vm11386_vm10 = vcmp.eq.s32.totalorder %v26778_v55, %v24948_v24  ;;  %vm11387_vm0 = vcmp.eq.s32.totalorder %v26779_v58, %v24948_v24 }
0x120c   :  { %20220 = vmatprep.subr.msk.bf16.mxu1 %vm24938_vm4, %v26493_v14 }
0x120d   :  { %v17833_v5 = vpop.f32.mrb[90].mxu1  ;;  %19828 = vmatprep.subr.bf16.mxu0 %v19827_v26 }
0x120e   :  { %v8361_v52 = vpop.f32.mrb[91].mxu1  ;;  %19830 = vmatpush3.bf16.msra.mxu0 %v19827_v26  ;;  %v15070_v26 = vld [vmem:[%s26236_s7 + $0xe8] sm:$0xff] }
0x120f   :  { %v19831_v49 = vpack.c.bf16 %v17833_v5, %v8361_v52  ;;  %20222 = vmatpush3.bf16.msk.msra.mxu1 %vm24938_vm4, %v26493_v14  ;;  %vm20247_vm4 = vmpackc.low %vm11379_vm11, %vm11378_vm14  ;;  %vm8807_vm14 = vcmp.eq.s32.totalorder %v26538_v13, %v25068_v27  ;;  %vm8808_vm11 = vcmp.eq.s32.totalorder %v26539_v25, %v25068_v27  ;;  %v15071_v5 = vld [vmem:[%s26236_s7 + $0xf0] sm:$0xff] }
0x1210   :  { %20224 = vmatprep.subr.msk.bf16.mxu1 %vm20223_vm3, %v26493_v14 }
0x1211   :  { %19832 = vmatprep.subr.bf16.mxu0 %v19831_v49 }
0x1212   :  { %19834 = vmatpush3.bf16.msra.mxu0 %v19831_v49 }
0x1213   :  { %20226 = vmatpush3.bf16.msk.msra.mxu1 %vm20223_vm3, %v26493_v14  ;;  %vm20251_vm3 = vmpackc.low %vm11381_vm13, %vm11380_vm9  ;;  %vm11943_vm9 = vcmp.eq.s32.totalorder %v26539_v25, %v25074_v32 }
0x1214   :  { %20236 = vmatprep.subr.msk.bf16.mxu1 %vm24961_vm8, %v26493_v14  ;;  %vm25097_vm13 = vmpackc.low %vm8808_vm11, %vm8807_vm14  ;;  %vm11947_vm14 = vcmp.eq.s32.totalorder %v26669_v34, %v25074_v32 }
0x1215   :  { %17843 = vmatmul.mubr.msk.f32.vlgmr.msra.gmra.mrb[68].mxu0 %vm7972_vm15, %v15016_v21 }
0x1216   :  { %18409 = vmatmul.mubr.f32.vlgmr.msra.gmra.mrb[116].mxu1 %v24500_v2  ;;  %17845 = vmatprep.mubr.msk.f32.mxu0 %vm7972_vm15, %v15017_v56 }
0x1217   :  { %18411 = vmatprep.mubr.f32.mxu1 %v24508_v44  ;;  %20238 = vmatpush3.bf16.msk.msra.mxu1 %vm24961_vm8, %v26493_v14  ;;  %vm20255_vm8 = vmpackc.low %vm11383_vm2, %vm11382_vm1  ;;  %vm8809_vm1 = vcmp.eq.s32.totalorder %v26663_v39, %v25068_v27  ;;  %vm8810_vm2 = vcmp.eq.s32.totalorder %v26664_v18, %v25068_v27 }
0x1218   :  { %20240 = vmatprep.subr.msk.bf16.mxu1 %vm24979_vm12, %v26493_v14 }
0x1219   :  { %17846 = vmatmul.mubr.msk.f32.gmra.mrb[70].mxu0 %vm7972_vm15, %v15018_v51 }
0x121a   :  { %18412 = vmatmul.mubr.f32.gmra.mrb[118].mxu1 %v24512_v4  ;;  %17848 = vmatprep.mubr.msk.f32.mxu0 %vm7972_vm15, %v15019_v31 }
0x121b   :  { %20242 = vmatpush3.bf16.msk.msra.mxu1 %vm24979_vm12, %v26493_v14  ;;  %18466 = vmatprep.mubr.f32.mxu1 %v24498_v16  ;;  %vm25057_vm12 = vmpackc.low %vm11385_vm6, %vm11384_vm7  ;;  %vm11945_vm7 = vcmp.eq.s32.totalorder %v26664_v18, %v25074_v32 }
0x121c   :  { %20244 = vmatprep.subr.msk.bf16.mxu1 %vm25003_vm5, %v26493_v14  ;;  %vm25129_vm6 = vmpackc.low %vm8810_vm2, %vm8809_vm1  ;;  %vm11949_vm1 = vcmp.eq.s32.totalorder %v26763_v62, %v25074_v32 }
0x121d   :  { %17849 = vmatmul.mubr.msk.f32.gmra.mrb[72].mxu0 %vm7972_vm15, %v15020_v17 }
0x121e   :  { %17851 = vmatprep.mubr.msk.f32.mxu0 %vm7972_vm15, %v15021_v3 }
0x121f   :  { %20246 = vmatpush3.bf16.msk.msra.mxu1 %vm25003_vm5, %v26493_v14  ;;  %vm25079_vm5 = vmpackc.low %vm11387_vm0, %vm11386_vm10  ;;  %vm8811_vm10 = vcmp.eq.s32.totalorder %v26668_v35, %v25068_v27  ;;  %vm8812_vm0 = vcmp.eq.s32.totalorder %v26669_v34, %v25068_v27 }
0x1220   :  { %20248 = vmatprep.subr.msk.bf16.mxu1 %vm20247_vm4, %v26493_v14  ;;  %vm25167_vm11 = vmpackc.low %vm8812_vm0, %vm8811_vm10  ;;  %vm11951_vm10 = vcmp.eq.s32.totalorder %v26767_v1, %v25074_v32 }
0x1221   :  { %17852 = vmatmul.mubr.msk.f32.gmra.mrb[74].mxu0 %vm7972_vm15, %v15022_v0 }
0x1222   :  { %17900 = vmatprep.mubr.msk.f32.mxu0 %vm7972_vm15, %v15065_v59 }
0x1223   :  { %20250 = vmatpush3.bf16.msk.msra.mxu1 %vm20247_vm4, %v26493_v14  ;;  %vm11942_vm4 = vcmp.eq.s32.totalorder %v26538_v13, %v25074_v32 }
0x1224   :  { %20252 = vmatprep.subr.msk.bf16.mxu1 %vm20251_vm3, %v26493_v14 }
0x1227   :  { %20254 = vmatpush3.bf16.msk.msra.mxu1 %vm20251_vm3, %v26493_v14  ;;  %vm25101_vm3 = vmpackc.low %vm11943_vm9, %vm11942_vm4  ;;  %vm8813_vm4 = vcmp.eq.s32.totalorder %v26762_v61, %v25068_v27  ;;  %vm8814_vm9 = vcmp.eq.s32.totalorder %v26763_v62, %v25068_v27 }
0x1228   :  { %20256 = vmatprep.subr.msk.bf16.mxu1 %vm20255_vm8, %v26493_v14  ;;  %vm25201_vm2 = vmpackc.low %vm8814_vm9, %vm8813_vm4  ;;  %vm11952_vm4 = vcmp.eq.s32.totalorder %v26770_v11, %v25074_v32  ;;  %vm11953_vm9 = vcmp.eq.s32.totalorder %v26771_v60, %v25074_v32 }
0x1229   :  { %v17888_v53 = vpop.f32.mrb[92].mxu1 }
0x122a   :  { %v8636_v22 = vpop.f32.mrb[93].mxu1 }
0x122b   :  { %v19867_v28 = vpack.c.bf16 %v17888_v53, %v8636_v22  ;;  %20258 = vmatpush3.bf16.msk.msra.mxu1 %vm20255_vm8, %v26493_v14  ;;  %vm11944_vm8 = vcmp.eq.s32.totalorder %v26663_v39, %v25074_v32 }
0x122c   :  { %20260 = vmatprep.subr.msk.bf16.mxu1 %vm25057_vm12, %v26493_v14 }
0x122d   :  { %v17891_v33 = vpop.f32.mrb[94].mxu1  ;;  %19868 = vmatprep.subr.bf16.mxu0 %v19867_v28 }
0x122e   :  { %v8646_v37 = vpop.f32.mrb[95].mxu1  ;;  %19870 = vmatpush3.bf16.msra.mxu0 %v19867_v28 }
0x122f   :  { %v19871_v40 = vpack.c.bf16 %v17891_v33, %v8646_v37  ;;  %20262 = vmatpush3.bf16.msk.msra.mxu1 %vm25057_vm12, %v26493_v14  ;;  %vm25140_vm12 = vmpackc.low %vm11945_vm7, %vm11944_vm8  ;;  %vm8815_vm7 = vcmp.eq.s32.totalorder %v26766_v57, %v25068_v27 }
0x1230   :  { %20264 = vmatprep.subr.msk.bf16.mxu1 %vm25079_vm5, %v26493_v14 }
0x1231   :  { %19872 = vmatprep.subr.bf16.mxu0 %v19871_v40 }
0x1232   :  { %19874 = vmatpush3.bf16.msra.mxu0 %v19871_v40 }
0x1233   :  { %20266 = vmatpush3.bf16.msk.msra.mxu1 %vm25079_vm5, %v26493_v14  ;;  %19876 = vmatprep.subr.msk.bf16.mxu0 %vm25097_vm13, %v26493_v14  ;;  %vm11946_vm5 = vcmp.eq.s32.totalorder %v26668_v35, %v25074_v32 }
0x1234   :  { %20316 = vmatprep.subr.msk.bf16.mxu1 %vm25101_vm3, %v26493_v14 }
0x1235   :  { %17901 = vmatmul.mubr.msk.f32.vlgmr.msra.gmra.mrb[68].mxu0 %vm7972_vm15, %v15066_v41 }
0x1236   :  { %19878 = vmatpush3.bf16.msk.msra.mxu0 %vm25097_vm13, %v26493_v14  ;;  %18467 = vmatmul.mubr.f32.vlgmr.msra.gmra.mrb[120].mxu1 %v24500_v2  ;;  %vm25182_vm13 = vmpackc.low %vm11947_vm14, %vm11946_vm5  ;;  %vm8817_vm14 = vcmp.eq.s32.totalorder %v26770_v11, %v25068_v27 }
0x1237   :  { %18469 = vmatprep.mubr.f32.mxu1 %v24508_v44  ;;  %20318 = vmatpush3.bf16.msk.msra.mxu1 %vm25101_vm3, %v26493_v14  ;;  %vm11948_vm3 = vcmp.eq.s32.totalorder %v26762_v61, %v25074_v32 }
0x1238   :  { %17903 = vmatprep.mubr.msk.f32.mxu0 %vm7972_vm15, %v15067_v6  ;;  %19880 = vmatprep.subr.msk.bf16.mxu0 %vm25129_vm6, %v26493_v14  ;;  %vm25209_vm8 = vmpackc.low %vm11949_vm1, %vm11948_vm3  ;;  %vm8819_vm1 = vcmp.eq.s32.totalorder %v26774_v54, %v25068_v27 }
0x1239   :  { %17904 = vmatmul.mubr.msk.f32.gmra.mrb[70].mxu0 %vm7972_vm15, %v15068_v47  ;;  %20320 = vmatprep.subr.msk.bf16.mxu1 %vm25140_vm12, %v26493_v14  ;;  %vm25267_vm3 = vmpackc.low %vm11953_vm9, %vm11952_vm4 }
0x123a   :  { %19882 = vmatpush3.bf16.msk.msra.mxu0 %vm25129_vm6, %v26493_v14  ;;  %18470 = vmatmul.mubr.f32.gmra.mrb[122].mxu1 %v24512_v4  ;;  %vm8816_vm6 = vcmp.eq.s32.totalorder %v26767_v1, %v25068_v27 }
0x123b   :  { %20322 = vmatpush3.bf16.msk.msra.mxu1 %vm25140_vm12, %v26493_v14  ;;  %18582 = vmatprep.mubr.f32.mxu1 %v24498_v16  ;;  %vm11950_vm12 = vcmp.eq.s32.totalorder %v26766_v57, %v25074_v32  ;;  %vm25237_vm0 = vmpackc.low %vm8816_vm6, %vm8815_vm7  ;;  %vm11955_vm7 = vcmp.eq.s32.totalorder %v26775_v43, %v25074_v32 }
0x123c   :  { %17906 = vmatprep.mubr.msk.f32.mxu0 %vm7972_vm15, %v15069_v20  ;;  %19884 = vmatprep.subr.msk.bf16.mxu0 %vm25167_vm11, %v26493_v14  ;;  %vm25242_vm5 = vmpackc.low %vm11951_vm10, %vm11950_vm12  ;;  %vm8821_vm10 = vcmp.eq.s32.totalorder %v26778_v55, %v25068_v27 }
0x123d   :  { %17907 = vmatmul.mubr.msk.f32.gmra.mrb[72].mxu0 %vm7972_vm15, %v15070_v26  ;;  %20324 = vmatprep.subr.msk.bf16.mxu1 %vm25182_vm13, %v26493_v14  ;;  %v15115_v26 = vld [vmem:[%s26236_s7 + $0x100] sm:$0xff] }
0x123e   :  { %19886 = vmatpush3.bf16.msk.msra.mxu0 %vm25167_vm11, %v26493_v14  ;;  %17909 = vmatprep.mubr.msk.f32.mxu0 %vm7972_vm15, %v15071_v5  ;;  %vm8818_vm11 = vcmp.eq.s32.totalorder %v26771_v60, %v25068_v27 }
0x123f   :  { %20326 = vmatpush3.bf16.msk.msra.mxu1 %vm25182_vm13, %v26493_v14  ;;  %19888 = vmatprep.subr.msk.bf16.mxu0 %vm25201_vm2, %v26493_v14  ;;  %vm19895_vm13 = vmpackc.low %vm8818_vm11, %vm8817_vm14  ;;  %vm11957_vm14 = vcmp.eq.s32.totalorder %v26779_v58, %v25074_v32 }
0x1240   :  { %20328 = vmatprep.subr.msk.bf16.mxu1 %vm25209_vm8, %v26493_v14 }
0x1241   :  { %17910 = vmatmul.mubr.msk.f32.gmra.mrb[74].mxu0 %vm7972_vm15, %v15072_v48 }
0x1242   :  { %19890 = vmatpush3.bf16.msk.msra.mxu0 %vm25201_vm2, %v26493_v14  ;;  %17944 = vmatprep.mubr.f32.mxu0 %v24498_v16  ;;  %vm8820_vm2 = vcmp.eq.s32.totalorder %v26775_v43, %v25068_v27 }
0x1243   :  { %20330 = vmatpush3.bf16.msk.msra.mxu1 %vm25209_vm8, %v26493_v14  ;;  %19892 = vmatprep.subr.msk.bf16.mxu0 %vm25237_vm0, %v26493_v14  ;;  %vm11954_vm8 = vcmp.eq.s32.totalorder %v26774_v54, %v25074_v32  ;;  %vm25289_vm6 = vmpackc.low %vm8820_vm2, %vm8819_vm1 }
0x1244   :  { %20332 = vmatprep.subr.msk.bf16.mxu1 %vm25242_vm5, %v26493_v14  ;;  %vm25293_vm12 = vmpackc.low %vm11955_vm7, %vm11954_vm8 }
0x1246   :  { %19894 = vmatpush3.bf16.msk.msra.mxu0 %vm25237_vm0, %v26493_v14  ;;  %vm8822_vm0 = vcmp.eq.s32.totalorder %v26779_v58, %v25068_v27 }
0x1247   :  { %20334 = vmatpush3.bf16.msk.msra.mxu1 %vm25242_vm5, %v26493_v14  ;;  %19896 = vmatprep.subr.msk.bf16.mxu0 %vm19895_vm13, %v26493_v14  ;;  %vm11956_vm5 = vcmp.eq.s32.totalorder %v26778_v55, %v25074_v32  ;;  %vm19903_vm11 = vmpackc.low %vm8822_vm0, %vm8821_vm10 }
0x1248   :  { %20336 = vmatprep.subr.msk.bf16.mxu1 %vm25267_vm3, %v26493_v14  ;;  %vm20343_vm4 = vmpackc.low %vm11957_vm14, %vm11956_vm5 }
0x1249   :  { %v18004_v31 = vpop.f32.mrb[96].mxu1 }
0x124a   :  { %19898 = vmatpush3.bf16.msk.msra.mxu0 %vm19895_vm13, %v26493_v14  ;;  %v9206_v17 = vpop.f32.mrb[97].mxu1 }
0x124b   :  { %v25306_v3 = vpack.c.bf16 %v18004_v31, %v9206_v17  ;;  %20338 = vmatpush3.bf16.msk.msra.mxu1 %vm25267_vm3, %v26493_v14  ;;  %19900 = vmatprep.subr.msk.bf16.mxu0 %vm25289_vm6, %v26493_v14 }
0x124c   :  { %20340 = vmatprep.subr.msk.bf16.mxu1 %vm25293_vm12, %v26493_v14 }
0x124d   :  { %v18007_v0 = vpop.f32.mrb[98].mxu1 }
0x124e   :  { %19902 = vmatpush3.bf16.msk.msra.mxu0 %vm25289_vm6, %v26493_v14  ;;  %v9216_v59 = vpop.f32.mrb[99].mxu1 }
0x124f   :  { %v25320_v53 = vpack.c.bf16 %v18007_v0, %v9216_v59  ;;  %20342 = vmatpush3.bf16.msk.msra.mxu1 %vm25293_vm12, %v26493_v14  ;;  %19904 = vmatprep.subr.msk.bf16.mxu0 %vm19903_vm11, %v26493_v14 }
0x1250   :  { %20344 = vmatprep.subr.msk.bf16.mxu1 %vm20343_vm4, %v26493_v14 }
0x1252   :  { %19906 = vmatpush3.bf16.msk.msra.mxu0 %vm19903_vm11, %v26493_v14 }
0x1253   :  { %20346 = vmatpush3.bf16.msk.msra.mxu1 %vm20343_vm4, %v26493_v14 }
0x1255   :  { %17945 = vmatmul.mubr.f32.vlgmr.msra.gmra.mrb[76].mxu0 %v24500_v2 }
0x1256   :  { %17947 = vmatprep.mubr.f32.mxu0 %v24508_v44  ;;  %18583 = vmatmul.mubr.f32.vlgmr.msra.gmra.mrb[124].mxu1 %v24500_v2 }
0x1257   :  { %18585 = vmatprep.mubr.f32.mxu1 %v24508_v44 }
0x1259   :  { %17948 = vmatmul.mubr.f32.gmra.mrb[78].mxu0 %v24512_v4 }
0x125a   :  { %18586 = vmatmul.mubr.f32.gmra.mrb[126].mxu1 %v24512_v4  ;;  %17958 = vmatprep.mubr.msk.f32.mxu0 %vm7972_vm15, %v15115_v26 }
0x1269   :  { %v18062_v30 = vpop.f32.mrb[100].mxu1 }
0x126a   :  { %v9491_v22 = vpop.f32.mrb[101].mxu1 }
0x126b   :  { %v25335_v27 = vpack.c.bf16 %v18062_v30, %v9491_v22 }
0x126d   :  { %v18065_v28 = vpop.f32.mrb[102].mxu1 }
0x126e   :  { %v9501_v32 = vpop.f32.mrb[103].mxu1 }
0x126f   :  { %v25337_v33 = vpack.c.bf16 %v18065_v28, %v9501_v32 }
0x1289   :  { %v18178_v36 = vpop.f32.mrb[104].mxu1 }
0x128a   :  { %v10061_v37 = vpop.f32.mrb[105].mxu1 }
0x128b   :  { %v25339_v40 = vpack.c.bf16 %v18178_v36, %v10061_v37 }
0x128d   :  { %v18181_v15 = vpop.f32.mrb[106].mxu1 }
0x128e   :  { %v10071_v8 = vpop.f32.mrb[107].mxu1 }
0x128f   :  { %v25341_v41 = vpack.c.bf16 %v18181_v15, %v10071_v8 }
0x12a9   :  { %v18236_v6 = vpop.f32.mrb[108].mxu1 }
0x12aa   :  { %v10346_v19 = vpop.f32.mrb[109].mxu1 }
0x12ab   :  { %v25343_v47 = vpack.c.bf16 %v18236_v6, %v10346_v19 }
0x12ad   :  { %v18239_v10 = vpop.f32.mrb[110].mxu1 }
0x12ae   :  { %v10356_v20 = vpop.f32.mrb[111].mxu1 }
0x12af   :  { %v25345_v23 = vpack.c.bf16 %v18239_v10, %v10356_v20 }
0x12c9   :  { %v18294_v24 = vpop.f32.mrb[112].mxu1 }
0x12ca   :  { %v10631_v5 = vpop.f32.mrb[113].mxu1 }
0x12cb   :  { %v25351_v52 = vpack.c.bf16 %v18294_v24, %v10631_v5 }
0x12cd   :  { %v18297_v49 = vpop.f32.mrb[114].mxu1 }
0x12ce   :  { %v10641_v48 = vpop.f32.mrb[115].mxu1 }
0x12cf   :  { %v25353_v21 = vpack.c.bf16 %v18297_v49, %v10641_v48  ;;  %v15116_v48 = vld [vmem:[%s26236_s7 + $0x108] sm:$0xff] }
0x12e9   :  { %v18410_v56 = vpop.f32.mrb[116].mxu1 }
0x12ea   :  { %v11201_v63 = vpop.f32.mrb[117].mxu1 }
0x12eb   :  { %v25355_v51 = vpack.c.bf16 %v18410_v56, %v11201_v63  ;;  %v15117_v56 = vld [vmem:[%s26236_s7 + $0x110] sm:$0xff]  ;;  %v15118_v63 = vld [vmem:[%s26236_s7 + $0x118] sm:$0xff] }
0x12ed   :  { %v18413_v31 = vpop.f32.mrb[118].mxu1 }
0x12ee   :  { %v11211_v12 = vpop.f32.mrb[119].mxu1 }
0x12ef   :  { %v25357_v17 = vpack.c.bf16 %v18413_v31, %v11211_v12  ;;  %v15119_v31 = vld [vmem:[%s26236_s7 + $0x120] sm:$0xff]  ;;  %v15121_v12 = vld [vmem:[%s26236_s7 + $0x130] sm:$0xff] }
0x1309   :  { %v18468_v0 = vpop.f32.mrb[120].mxu1 }
0x130a   :  { %v11486_v59 = vpop.f32.mrb[121].mxu1 }
0x130b   :  { %v25359_v30 = vpack.c.bf16 %v18468_v0, %v11486_v59  ;;  %v15165_v0 = vld [vmem:[%s26236_s7 + $0x140] sm:$0xff]  ;;  %v15166_v59 = vld [vmem:[%s26236_s7 + $0x148] sm:$0xff] }
0x130d   :  { %v18471_v22 = vpop.f32.mrb[122].mxu1 }
0x130e   :  { %v11496_v28 = vpop.f32.mrb[123].mxu1 }
0x130f   :  { %v25361_v32 = vpack.c.bf16 %v18471_v22, %v11496_v28  ;;  %v25410_v22 = vld [vmem:[%s26235_s6 + $0x7] ss:$0 sm:$0xff]  ;;  %v15167_v28 = vld [vmem:[%s26236_s7 + $0x150] sm:$0xff] }
0x1310   :  { %vm9662_vm9 = vcmp.eq.s32.totalorder %v26538_v13, %v25410_v22  ;;  %vm9663_vm13 = vcmp.eq.s32.totalorder %v26539_v25, %v25410_v22  ;;  %vm9664_vm1 = vcmp.eq.s32.totalorder %v26663_v39, %v25410_v22  ;;  %vm9665_vm2 = vcmp.eq.s32.totalorder %v26664_v18, %v25410_v22 }
0x1311   :  { %vm25429_vm3 = vmpackc.low %vm9663_vm13, %vm9662_vm9  ;;  %vm9666_vm7 = vcmp.eq.s32.totalorder %v26668_v35, %v25410_v22  ;;  %vm9667_vm6 = vcmp.eq.s32.totalorder %v26669_v34, %v25410_v22  ;;  %vm9668_vm10 = vcmp.eq.s32.totalorder %v26762_v61, %v25410_v22  ;;  %vm9669_vm0 = vcmp.eq.s32.totalorder %v26763_v62, %v25410_v22 }
0x1312   :  { %vm19999_vm8 = vmpackc.low %vm9665_vm2, %vm9664_vm1  ;;  %vm9670_vm14 = vcmp.eq.s32.totalorder %v26766_v57, %v25410_v22  ;;  %vm9671_vm11 = vcmp.eq.s32.totalorder %v26767_v1, %v25410_v22  ;;  %vm9672_vm9 = vcmp.eq.s32.totalorder %v26770_v11, %v25410_v22  ;;  %vm9673_vm13 = vcmp.eq.s32.totalorder %v26771_v60, %v25410_v22 }
0x1313   :  { %vm20003_vm12 = vmpackc.low %vm9667_vm6, %vm9666_vm7  ;;  %vm9674_vm1 = vcmp.eq.s32.totalorder %v26774_v54, %v25410_v22  ;;  %vm9675_vm2 = vcmp.eq.s32.totalorder %v26775_v43, %v25410_v22  ;;  %vm9676_vm7 = vcmp.eq.s32.totalorder %v26778_v55, %v25410_v22  ;;  %vm9677_vm6 = vcmp.eq.s32.totalorder %v26779_v58, %v25410_v22  ;;  %v15266_v22 = vld [vmem:[%s26236_s7 + $0x1c8] sm:$0xff] }
0x1314   :  { %vm20007_vm5 = vmpackc.low %vm9669_vm0, %vm9668_vm10 }
0x1315   :  { %vm20011_vm4 = vmpackc.low %vm9671_vm11, %vm9670_vm14 }
0x1328   :  { %v17946_v36 = vpop.f32.mrb[76].mxu0 }
0x1329   :  { %v8921_v37 = vpop.f32.mrb[77].mxu0  ;;  %v18584_v15 = vpop.f32.mrb[124].mxu1 }
0x132a   :  { %v19907_v8 = vpack.c.bf16 %v17946_v36, %v8921_v37  ;;  %v12056_v6 = vpop.f32.mrb[125].mxu1  ;;  %v15168_v36 = vld [vmem:[%s26236_s7 + $0x158] sm:$0xff]  ;;  %v15169_v37 = vld [vmem:[%s26236_s7 + $0x160] sm:$0xff] }
0x132b   :  { %v25363_v19 = vpack.c.bf16 %v18584_v15, %v12056_v6  ;;  %v15215_v6 = vld [vmem:[%s26236_s7 + $0x180] sm:$0xff]  ;;  %v15271_v15 = vld [vmem:[%s26236_s7 + $0x1f0] sm:$0xff] }
0x132c   :  { %v17949_v10 = vpop.f32.mrb[78].mxu0  ;;  %19908 = vmatprep.subr.bf16.mxu0 %v19907_v8 }
0x132d   :  { %v8931_v20 = vpop.f32.mrb[79].mxu0  ;;  %19910 = vmatpush3.bf16.msra.mxu0 %v19907_v8  ;;  %v18587_v26 = vpop.f32.mrb[126].mxu1  ;;  %v15171_v8 = vld [vmem:[%s26236_s7 + $0x170] sm:$0xff] }
0x132e   :  { %v19911_v24 = vpack.c.bf16 %v17949_v10, %v8931_v20  ;;  %v12066_v5 = vpop.f32.mrb[127].mxu1  ;;  %v15216_v10 = vld [vmem:[%s26236_s7 + $0x188] sm:$0xff]  ;;  %v15217_v20 = vld [vmem:[%s26236_s7 + $0x190] sm:$0xff] }
0x132f   :  { %v25365_v49 = vpack.c.bf16 %v18587_v26, %v12066_v5  ;;  %v15218_v26 = vld [vmem:[%s26236_s7 + $0x198] sm:$0xff]  ;;  %v15220_v5 = vld [vmem:[%s26236_s7 + $0x1a8] sm:$0xff] }
0x1330   :  { %19912 = vmatprep.subr.bf16.mxu0 %v19911_v24 }
0x1331   :  { %19914 = vmatpush3.bf16.msra.mxu0 %v19911_v24  ;;  %v15219_v24 = vld [vmem:[%s26236_s7 + $0x1a0] sm:$0xff] }
0x1332   :  { %19948 = vmatprep.subr.bf16.mxu0 %v25306_v3 }
0x1334   :  { %17959 = vmatmul.mubr.msk.f32.vlgmr.msra.gmra.mrb[68].mxu0 %vm7972_vm15, %v15116_v48  ;;  %v15221_v48 = vld [vmem:[%s26236_s7 + $0x1b0] sm:$0xff] }
0x1335   :  { %19950 = vmatpush3.bf16.msra.mxu0 %v25306_v3  ;;  %17961 = vmatprep.mubr.msk.f32.mxu0 %vm7972_vm15, %v15117_v56  ;;  %v15120_v3 = vld [vmem:[%s26236_s7 + $0x128] sm:$0xff]  ;;  %v15222_v56 = vld [vmem:[%s26236_s7 + $0x1b8] sm:$0xff] }
0x1336   :  { %19952 = vmatprep.subr.bf16.mxu0 %v25320_v53 }
0x1338   :  { %17962 = vmatmul.mubr.msk.f32.gmra.mrb[70].mxu0 %vm7972_vm15, %v15118_v63  ;;  %v15265_v63 = vld [vmem:[%s26236_s7 + $0x1c0] sm:$0xff] }
0x1339   :  { %19954 = vmatpush3.bf16.msra.mxu0 %v25320_v53  ;;  %17964 = vmatprep.mubr.msk.f32.mxu0 %vm7972_vm15, %v15119_v31  ;;  %v15122_v53 = vld [vmem:[%s26236_s7 + $0x138] sm:$0xff] }
0x133a   :  { %19988 = vmatprep.subr.bf16.mxu0 %v25335_v27 }
0x133c   :  { %17965 = vmatmul.mubr.msk.f32.gmra.mrb[72].mxu0 %vm7972_vm15, %v15120_v3 }
0x133d   :  { %17967 = vmatprep.mubr.msk.f32.mxu0 %vm7972_vm15, %v15121_v12 }
0x1340   :  { %17968 = vmatmul.mubr.msk.f32.gmra.mrb[74].mxu0 %vm7972_vm15, %v15122_v53 }
0x1341   :  { %18016 = vmatprep.mubr.msk.f32.mxu0 %vm7972_vm15, %v15165_v0 }
0x1344   :  { %18017 = vmatmul.mubr.msk.f32.vlgmr.msra.gmra.mrb[68].mxu0 %vm7972_vm15, %v15166_v59 }
0x1345   :  { %19990 = vmatpush3.bf16.msra.mxu0 %v25335_v27  ;;  %18019 = vmatprep.mubr.msk.f32.mxu0 %vm7972_vm15, %v15167_v28  ;;  %v15170_v27 = vld [vmem:[%s26236_s7 + $0x168] sm:$0xff]  ;;  %v15267_v28 = vld [vmem:[%s26236_s7 + $0x1d0] sm:$0xff] }
0x1346   :  { %19992 = vmatprep.subr.bf16.mxu0 %v25337_v33 }
0x1348   :  { %18020 = vmatmul.mubr.msk.f32.gmra.mrb[70].mxu0 %vm7972_vm15, %v15168_v36  ;;  %v15268_v36 = vld [vmem:[%s26236_s7 + $0x1d8] sm:$0xff] }
0x1349   :  { %19994 = vmatpush3.bf16.msra.mxu0 %v25337_v33  ;;  %18022 = vmatprep.mubr.msk.f32.mxu0 %vm7972_vm15, %v15169_v37  ;;  %v15172_v33 = vld [vmem:[%s26236_s7 + $0x178] sm:$0xff]  ;;  %v15269_v37 = vld [vmem:[%s26236_s7 + $0x1e0] sm:$0xff] }
0x134a   :  { %19996 = vmatprep.subr.msk.bf16.mxu0 %vm25429_vm3, %v26493_v14 }
0x134c   :  { %18023 = vmatmul.mubr.msk.f32.gmra.mrb[72].mxu0 %vm7972_vm15, %v15170_v27  ;;  %v15315_v27 = vld [vmem:[%s26236_s7 + $0x200] sm:$0xff] }
0x134d   :  { %18025 = vmatprep.mubr.msk.f32.mxu0 %vm7972_vm15, %v15171_v8  ;;  %v15316_v8 = vld [vmem:[%s26236_s7 + $0x208] sm:$0xff] }
0x1350   :  { %18026 = vmatmul.mubr.msk.f32.gmra.mrb[74].mxu0 %vm7972_vm15, %v15172_v33  ;;  %v15317_v33 = vld [vmem:[%s26236_s7 + $0x210] sm:$0xff] }
0x1351   :  { %18074 = vmatprep.mubr.msk.f32.mxu0 %vm7972_vm15, %v15215_v6  ;;  %v15318_v6 = vld [vmem:[%s26236_s7 + $0x218] sm:$0xff] }
0x1354   :  { %18075 = vmatmul.mubr.msk.f32.vlgmr.msra.gmra.mrb[68].mxu0 %vm7972_vm15, %v15216_v10  ;;  %v15319_v10 = vld [vmem:[%s26236_s7 + $0x220] sm:$0xff] }
0x1355   :  { %19998 = vmatpush3.bf16.msk.msra.mxu0 %vm25429_vm3, %v26493_v14  ;;  %18077 = vmatprep.mubr.msk.f32.mxu0 %vm7972_vm15, %v15217_v20  ;;  %vm20015_vm3 = vmpackc.low %vm9673_vm13, %vm9672_vm9  ;;  %v15321_v20 = vld [vmem:[%s26236_s7 + $0x230] sm:$0xff] }
0x1356   :  { %20000 = vmatprep.subr.msk.bf16.mxu0 %vm19999_vm8, %v26493_v14 }
0x1358   :  { %18078 = vmatmul.mubr.msk.f32.gmra.mrb[70].mxu0 %vm7972_vm15, %v15218_v26  ;;  %v15365_v26 = vld [vmem:[%s26236_s7 + $0x240] sm:$0xff] }
0x1359   :  { %20002 = vmatpush3.bf16.msk.msra.mxu0 %vm19999_vm8, %v26493_v14  ;;  %18080 = vmatprep.mubr.msk.f32.mxu0 %vm7972_vm15, %v15219_v24  ;;  %vm20019_vm8 = vmpackc.low %vm9675_vm2, %vm9674_vm1  ;;  %v15366_v24 = vld [vmem:[%s26236_s7 + $0x248] sm:$0xff] }
0x135a   :  { %20004 = vmatprep.subr.msk.bf16.mxu0 %vm20003_vm12, %v26493_v14 }
0x135c   :  { %18081 = vmatmul.mubr.msk.f32.gmra.mrb[72].mxu0 %vm7972_vm15, %v15220_v5  ;;  %v25615_v5 = vld [vmem:[%s26235_s6 + $0xb] ss:$0 sm:$0xff] }
0x135d   :  { %20006 = vmatpush3.bf16.msk.msra.mxu0 %vm20003_vm12, %v26493_v14  ;;  %18083 = vmatprep.mubr.msk.f32.mxu0 %vm7972_vm15, %v15221_v48  ;;  %vm20023_vm12 = vmpackc.low %vm9677_vm6, %vm9676_vm7  ;;  %v15367_v48 = vld [vmem:[%s26236_s7 + $0x250] sm:$0xff]  ;;  %vm10802_vm10 = vcmp.eq.s32.totalorder %v26538_v13, %v25615_v5  ;;  %vm10803_vm0 = vcmp.eq.s32.totalorder %v26539_v25, %v25615_v5  ;;  %vm10804_vm14 = vcmp.eq.s32.totalorder %v26663_v39, %v25615_v5 }
0x135e   :  { %20008 = vmatprep.subr.msk.bf16.mxu0 %vm20007_vm5, %v26493_v14  ;;  %vm10805_vm11 = vcmp.eq.s32.totalorder %v26664_v18, %v25615_v5  ;;  %vm10806_vm9 = vcmp.eq.s32.totalorder %v26668_v35, %v25615_v5  ;;  %vm10807_vm13 = vcmp.eq.s32.totalorder %v26669_v34, %v25615_v5  ;;  %vm10808_vm1 = vcmp.eq.s32.totalorder %v26762_v61, %v25615_v5 }
0x135f   :  { %vm10809_vm2 = vcmp.eq.s32.totalorder %v26763_v62, %v25615_v5  ;;  %vm10810_vm7 = vcmp.eq.s32.totalorder %v26766_v57, %v25615_v5  ;;  %vm10811_vm6 = vcmp.eq.s32.totalorder %v26767_v1, %v25615_v5 }
0x1360   :  { %18084 = vmatmul.mubr.msk.f32.gmra.mrb[74].mxu0 %vm7972_vm15, %v15222_v56  ;;  %v15368_v56 = vld [vmem:[%s26236_s7 + $0x258] sm:$0xff] }
0x1361   :  { %20010 = vmatpush3.bf16.msk.msra.mxu0 %vm20007_vm5, %v26493_v14  ;;  %18118 = vmatprep.mubr.f32.mxu0 %v24498_v16  ;;  %vm25634_vm5 = vmpackc.low %vm10803_vm0, %vm10802_vm10  ;;  %vm10812_vm10 = vcmp.eq.s32.totalorder %v26770_v11, %v25615_v5  ;;  %vm10813_vm0 = vcmp.eq.s32.totalorder %v26771_v60, %v25615_v5 }
0x1362   :  { %20012 = vmatprep.subr.msk.bf16.mxu0 %vm20011_vm4, %v26493_v14 }
0x1365   :  { %20014 = vmatpush3.bf16.msk.msra.mxu0 %vm20011_vm4, %v26493_v14  ;;  %vm20159_vm4 = vmpackc.low %vm10805_vm11, %vm10804_vm14  ;;  %vm10814_vm14 = vcmp.eq.s32.totalorder %v26774_v54, %v25615_v5  ;;  %vm10815_vm11 = vcmp.eq.s32.totalorder %v26775_v43, %v25615_v5 }
0x1366   :  { %20016 = vmatprep.subr.msk.bf16.mxu0 %vm20015_vm3, %v26493_v14 }
0x1369   :  { %20018 = vmatpush3.bf16.msk.msra.mxu0 %vm20015_vm3, %v26493_v14  ;;  %vm20163_vm3 = vmpackc.low %vm10807_vm13, %vm10806_vm9  ;;  %vm10816_vm9 = vcmp.eq.s32.totalorder %v26778_v55, %v25615_v5  ;;  %vm10817_vm13 = vcmp.eq.s32.totalorder %v26779_v58, %v25615_v5  ;;  %v15516_v5 = vld [vmem:[%s26236_s7 + $0x308] sm:$0xff] }
0x136a   :  { %20020 = vmatprep.subr.msk.bf16.mxu0 %vm20019_vm8, %v26493_v14 }
0x136d   :  { %20022 = vmatpush3.bf16.msk.msra.mxu0 %vm20019_vm8, %v26493_v14  ;;  %vm20167_vm8 = vmpackc.low %vm10809_vm2, %vm10808_vm1 }
0x136e   :  { %20024 = vmatprep.subr.msk.bf16.mxu0 %vm20023_vm12, %v26493_v14 }
0x1371   :  { %20026 = vmatpush3.bf16.msk.msra.mxu0 %vm20023_vm12, %v26493_v14  ;;  %vm20171_vm12 = vmpackc.low %vm10811_vm6, %vm10810_vm7 }
0x1374   :  { %18119 = vmatmul.mubr.f32.vlgmr.msra.gmra.mrb[80].mxu0 %v24500_v2 }
0x1375   :  { %18121 = vmatprep.mubr.f32.mxu0 %v24508_v44 }
0x1378   :  { %18122 = vmatmul.mubr.f32.gmra.mrb[82].mxu0 %v24512_v4 }
0x1379   :  { %18132 = vmatprep.mubr.msk.f32.mxu0 %vm7972_vm15, %v15265_v63  ;;  %v15369_v63 = vld [vmem:[%s26236_s7 + $0x260] sm:$0xff] }
0x1447   :  { %v18120_v31 = vpop.f32.mrb[80].mxu0 }
0x1448   :  { %v9776_v3 = vpop.f32.mrb[81].mxu0 }
0x1449   :  { %v20027_v12 = vpack.c.bf16 %v18120_v31, %v9776_v3  ;;  %v15371_v3 = vld [vmem:[%s26236_s7 + $0x270] sm:$0xff]  ;;  %v15519_v31 = vld [vmem:[%s26236_s7 + $0x320] sm:$0xff] }
0x144b   :  { %v18123_v53 = vpop.f32.mrb[82].mxu0  ;;  %20028 = vmatprep.subr.bf16.mxu0 %v20027_v12 }
0x144c   :  { %v9786_v0 = vpop.f32.mrb[83].mxu0  ;;  %20030 = vmatpush3.bf16.msra.mxu0 %v20027_v12  ;;  %v15415_v12 = vld [vmem:[%s26236_s7 + $0x280] sm:$0xff] }
0x144d   :  { %v20031_v59 = vpack.c.bf16 %v18123_v53, %v9786_v0  ;;  %v15416_v53 = vld [vmem:[%s26236_s7 + $0x288] sm:$0xff]  ;;  %v15417_v0 = vld [vmem:[%s26236_s7 + $0x290] sm:$0xff] }
0x144f   :  { %20032 = vmatprep.subr.bf16.mxu0 %v20031_v59 }
0x1450   :  { %20034 = vmatpush3.bf16.msra.mxu0 %v20031_v59  ;;  %v15418_v59 = vld [vmem:[%s26236_s7 + $0x298] sm:$0xff] }
0x1451   :  { %20068 = vmatprep.subr.bf16.mxu0 %v25339_v40 }
0x1453   :  { %18133 = vmatmul.mubr.msk.f32.vlgmr.msra.gmra.mrb[68].mxu0 %vm7972_vm15, %v15266_v22  ;;  %v15419_v22 = vld [vmem:[%s26236_s7 + $0x2a0] sm:$0xff] }
0x1454   :  { %20070 = vmatpush3.bf16.msra.mxu0 %v25339_v40  ;;  %18135 = vmatprep.mubr.msk.f32.mxu0 %vm7972_vm15, %v15267_v28  ;;  %v15270_v40 = vld [vmem:[%s26236_s7 + $0x1e8] sm:$0xff] }
0x1455   :  { %20072 = vmatprep.subr.bf16.mxu0 %v25341_v41  ;;  %v15420_v28 = vld [vmem:[%s26236_s7 + $0x2a8] sm:$0xff] }
0x1457   :  { %18136 = vmatmul.mubr.msk.f32.gmra.mrb[70].mxu0 %vm7972_vm15, %v15268_v36  ;;  %v15421_v36 = vld [vmem:[%s26236_s7 + $0x2b0] sm:$0xff] }
0x1458   :  { %20074 = vmatpush3.bf16.msra.mxu0 %v25341_v41  ;;  %18138 = vmatprep.mubr.msk.f32.mxu0 %vm7972_vm15, %v15269_v37  ;;  %v15272_v41 = vld [vmem:[%s26236_s7 + $0x1f8] sm:$0xff] }
0x1459   :  { %20108 = vmatprep.subr.bf16.mxu0 %v25343_v47  ;;  %v15422_v37 = vld [vmem:[%s26236_s7 + $0x2b8] sm:$0xff] }
0x145b   :  { %18139 = vmatmul.mubr.msk.f32.gmra.mrb[72].mxu0 %vm7972_vm15, %v15270_v40  ;;  %v15465_v40 = vld [vmem:[%s26236_s7 + $0x2c0] sm:$0xff] }
0x145c   :  { %18141 = vmatprep.mubr.msk.f32.mxu0 %vm7972_vm15, %v15271_v15 }
0x145f   :  { %18142 = vmatmul.mubr.msk.f32.gmra.mrb[74].mxu0 %vm7972_vm15, %v15272_v41 }
0x1460   :  { %18190 = vmatprep.mubr.msk.f32.mxu0 %vm7972_vm15, %v15315_v27 }
0x1463   :  { %18191 = vmatmul.mubr.msk.f32.vlgmr.msra.gmra.mrb[68].mxu0 %vm7972_vm15, %v15316_v8 }
0x1464   :  { %20110 = vmatpush3.bf16.msra.mxu0 %v25343_v47  ;;  %18193 = vmatprep.mubr.msk.f32.mxu0 %vm7972_vm15, %v15317_v33  ;;  %v15320_v47 = vld [vmem:[%s26236_s7 + $0x228] sm:$0xff] }
0x1465   :  { %20112 = vmatprep.subr.bf16.mxu0 %v25345_v23 }
0x1467   :  { %18194 = vmatmul.mubr.msk.f32.gmra.mrb[70].mxu0 %vm7972_vm15, %v15318_v6 }
0x1468   :  { %20114 = vmatpush3.bf16.msra.mxu0 %v25345_v23  ;;  %18196 = vmatprep.mubr.msk.f32.mxu0 %vm7972_vm15, %v15319_v10  ;;  %v15322_v23 = vld [vmem:[%s26236_s7 + $0x238] sm:$0xff]  ;;  %v15466_v10 = vld [vmem:[%s26236_s7 + $0x2c8] sm:$0xff] }
0x1469   :  { %20148 = vmatprep.subr.bf16.mxu0 %v25351_v52 }
0x146b   :  { %18197 = vmatmul.mubr.msk.f32.gmra.mrb[72].mxu0 %vm7972_vm15, %v15320_v47  ;;  %v15467_v47 = vld [vmem:[%s26236_s7 + $0x2d0] sm:$0xff] }
0x146c   :  { %18199 = vmatprep.mubr.msk.f32.mxu0 %vm7972_vm15, %v15321_v20  ;;  %v15468_v20 = vld [vmem:[%s26236_s7 + $0x2d8] sm:$0xff] }
0x146f   :  { %18200 = vmatmul.mubr.msk.f32.gmra.mrb[74].mxu0 %vm7972_vm15, %v15322_v23  ;;  %v15469_v23 = vld [vmem:[%s26236_s7 + $0x2e0] sm:$0xff] }
0x1470   :  { %18248 = vmatprep.mubr.msk.f32.mxu0 %vm7972_vm15, %v15365_v26  ;;  %v15471_v26 = vld [vmem:[%s26236_s7 + $0x2f0] sm:$0xff] }
0x1473   :  { %18249 = vmatmul.mubr.msk.f32.vlgmr.msra.gmra.mrb[68].mxu0 %vm7972_vm15, %v15366_v24  ;;  %v15515_v24 = vld [vmem:[%s26236_s7 + $0x300] sm:$0xff] }
0x1474   :  { %20150 = vmatpush3.bf16.msra.mxu0 %v25351_v52  ;;  %18251 = vmatprep.mubr.msk.f32.mxu0 %vm7972_vm15, %v15367_v48  ;;  %v15370_v52 = vld [vmem:[%s26236_s7 + $0x268] sm:$0xff] }
0x1475   :  { %20152 = vmatprep.subr.bf16.mxu0 %v25353_v21  ;;  %v25784_v48 = vld [vmem:[%s26235_s6 + $0xe] ss:$0 sm:$0xff] }
0x1476   :  { %vm11657_vm1 = vcmp.eq.s32.totalorder %v26538_v13, %v25784_v48  ;;  %vm11658_vm2 = vcmp.eq.s32.totalorder %v26539_v25, %v25784_v48  ;;  %vm11659_vm7 = vcmp.eq.s32.totalorder %v26663_v39, %v25784_v48  ;;  %vm11660_vm6 = vcmp.eq.s32.totalorder %v26664_v18, %v25784_v48 }
0x1477   :  { %18252 = vmatmul.mubr.msk.f32.gmra.mrb[70].mxu0 %vm7972_vm15, %v15368_v56  ;;  %v15517_v56 = vld [vmem:[%s26236_s7 + $0x310] sm:$0xff] }
0x1478   :  { %20154 = vmatpush3.bf16.msra.mxu0 %v25353_v21  ;;  %18254 = vmatprep.mubr.msk.f32.mxu0 %vm7972_vm15, %v15369_v63  ;;  %v15372_v21 = vld [vmem:[%s26236_s7 + $0x278] sm:$0xff] }
0x1479   :  { %20156 = vmatprep.subr.msk.bf16.mxu0 %vm25634_vm5, %v26493_v14  ;;  %v15518_v63 = vld [vmem:[%s26236_s7 + $0x318] sm:$0xff] }
0x147b   :  { %18255 = vmatmul.mubr.msk.f32.gmra.mrb[72].mxu0 %vm7972_vm15, %v15370_v52 }
0x147c   :  { %18257 = vmatprep.mubr.msk.f32.mxu0 %vm7972_vm15, %v15371_v3  ;;  %v15521_v3 = vld [vmem:[%s26236_s7 + $0x330] sm:$0xff] }
0x147f   :  { %18258 = vmatmul.mubr.msk.f32.gmra.mrb[74].mxu0 %vm7972_vm15, %v15372_v21  ;;  %v15565_v21 = vld [vmem:[%s26236_s7 + $0x340] sm:$0xff] }
0x1480   :  { %18306 = vmatprep.mubr.msk.f32.mxu0 %vm7972_vm15, %v15415_v12  ;;  %v15566_v12 = vld [vmem:[%s26236_s7 + $0x348] sm:$0xff] }
0x1483   :  { %18307 = vmatmul.mubr.msk.f32.vlgmr.msra.gmra.mrb[68].mxu0 %vm7972_vm15, %v15416_v53  ;;  %v15567_v53 = vld [vmem:[%s26236_s7 + $0x350] sm:$0xff] }
0x1484   :  { %20158 = vmatpush3.bf16.msk.msra.mxu0 %vm25634_vm5, %v26493_v14  ;;  %18309 = vmatprep.mubr.msk.f32.mxu0 %vm7972_vm15, %v15417_v0  ;;  %vm20175_vm5 = vmpackc.low %vm10813_vm0, %vm10812_vm10  ;;  %vm11661_vm10 = vcmp.eq.s32.totalorder %v26668_v35, %v25784_v48  ;;  %vm11662_vm0 = vcmp.eq.s32.totalorder %v26669_v34, %v25784_v48  ;;  %v15568_v0 = vld [vmem:[%s26236_s7 + $0x358] sm:$0xff]  ;;  %v15570_v35 = vld [vmem:[%s26236_s7 + $0x368] sm:$0xff] }
0x1485   :  { %20160 = vmatprep.subr.msk.bf16.mxu0 %vm20159_vm4, %v26493_v14  ;;  %v15571_v34 = vld [vmem:[%s26236_s7 + $0x370] sm:$0xff] }
0x1487   :  { %18310 = vmatmul.mubr.msk.f32.gmra.mrb[70].mxu0 %vm7972_vm15, %v15418_v59  ;;  %v15569_v59 = vld [vmem:[%s26236_s7 + $0x360] sm:$0xff] }
0x1488   :  { %20162 = vmatpush3.bf16.msk.msra.mxu0 %vm20159_vm4, %v26493_v14  ;;  %18312 = vmatprep.mubr.msk.f32.mxu0 %vm7972_vm15, %v15419_v22  ;;  %vm20179_vm4 = vmpackc.low %vm10815_vm11, %vm10814_vm14  ;;  %vm11663_vm14 = vcmp.eq.s32.totalorder %v26762_v61, %v25784_v48  ;;  %vm11664_vm11 = vcmp.eq.s32.totalorder %v26763_v62, %v25784_v48  ;;  %v15572_v61 = vld [vmem:[%s26236_s7 + $0x378] sm:$0xff]  ;;  %v15615_v62 = vld [vmem:[%s26236_s7 + $0x380] sm:$0xff] }
0x1489   :  { %20164 = vmatprep.subr.msk.bf16.mxu0 %vm20163_vm3, %v26493_v14  ;;  %v15666_v22 = vld [vmem:[%s26236_s7 + $0x3c8] sm:$0xff] }
0x148b   :  { %18313 = vmatmul.mubr.msk.f32.gmra.mrb[72].mxu0 %vm7972_vm15, %v15420_v28  ;;  %v15667_v28 = vld [vmem:[%s26236_s7 + $0x3d0] sm:$0xff] }
0x148c   :  { %20166 = vmatpush3.bf16.msk.msra.mxu0 %vm20163_vm3, %v26493_v14  ;;  %18315 = vmatprep.mubr.msk.f32.mxu0 %vm7972_vm15, %v15421_v36  ;;  %vm20183_vm3 = vmpackc.low %vm10817_vm13, %vm10816_vm9  ;;  %vm11665_vm9 = vcmp.eq.s32.totalorder %v26766_v57, %v25784_v48  ;;  %vm11666_vm13 = vcmp.eq.s32.totalorder %v26767_v1, %v25784_v48  ;;  %v15668_v36 = vld [vmem:[%s26236_s7 + $0x3d8] sm:$0xff] }
0x148d   :  { %20168 = vmatprep.subr.msk.bf16.mxu0 %vm20167_vm8, %v26493_v14 }
0x148f   :  { %18316 = vmatmul.mubr.msk.f32.gmra.mrb[74].mxu0 %vm7972_vm15, %v15422_v37  ;;  %v15669_v37 = vld [vmem:[%s26236_s7 + $0x3e0] sm:$0xff] }
0x1490   :  { %20170 = vmatpush3.bf16.msk.msra.mxu0 %vm20167_vm8, %v26493_v14  ;;  %18350 = vmatprep.mubr.f32.mxu0 %v24498_v16  ;;  %vm25803_vm8 = vmpackc.low %vm11658_vm2, %vm11657_vm1  ;;  %vm11667_vm1 = vcmp.eq.s32.totalorder %v26770_v11, %v25784_v48  ;;  %vm11668_vm2 = vcmp.eq.s32.totalorder %v26771_v60, %v25784_v48 }
0x1491   :  { %20172 = vmatprep.subr.msk.bf16.mxu0 %vm20171_vm12, %v26493_v14 }
0x1494   :  { %20174 = vmatpush3.bf16.msk.msra.mxu0 %vm20171_vm12, %v26493_v14  ;;  %vm20279_vm12 = vmpackc.low %vm11660_vm6, %vm11659_vm7  ;;  %vm11669_vm7 = vcmp.eq.s32.totalorder %v26774_v54, %v25784_v48  ;;  %vm11670_vm6 = vcmp.eq.s32.totalorder %v26775_v43, %v25784_v48 }
0x1495   :  { %20176 = vmatprep.subr.msk.bf16.mxu0 %vm20175_vm5, %v26493_v14 }
0x1498   :  { %20178 = vmatpush3.bf16.msk.msra.mxu0 %vm20175_vm5, %v26493_v14  ;;  %vm20283_vm5 = vmpackc.low %vm11662_vm0, %vm11661_vm10  ;;  %vm11671_vm10 = vcmp.eq.s32.totalorder %v26778_v55, %v25784_v48  ;;  %vm11672_vm0 = vcmp.eq.s32.totalorder %v26779_v58, %v25784_v48  ;;  %v15616_v55 = vld [vmem:[%s26236_s7 + $0x388] sm:$0xff]  ;;  %v15617_v58 = vld [vmem:[%s26236_s7 + $0x390] sm:$0xff] }
0x1499   :  { %20180 = vmatprep.subr.msk.bf16.mxu0 %vm20179_vm4, %v26493_v14 }
0x149c   :  { %20182 = vmatpush3.bf16.msk.msra.mxu0 %vm20179_vm4, %v26493_v14  ;;  %vm20287_vm4 = vmpackc.low %vm11664_vm11, %vm11663_vm14 }
0x149d   :  { %20184 = vmatprep.subr.msk.bf16.mxu0 %vm20183_vm3, %v26493_v14 }
0x14a0   :  { %20186 = vmatpush3.bf16.msk.msra.mxu0 %vm20183_vm3, %v26493_v14  ;;  %vm20291_vm3 = vmpackc.low %vm11666_vm13, %vm11665_vm9 }
0x14a3   :  { %18351 = vmatmul.mubr.f32.vlgmr.msra.gmra.mrb[84].mxu0 %v24500_v2 }
0x14a4   :  { %18353 = vmatprep.mubr.f32.mxu0 %v24508_v44 }
0x14a7   :  { %18354 = vmatmul.mubr.f32.gmra.mrb[86].mxu0 %v24512_v4 }
0x14a8   :  { %18364 = vmatprep.mubr.msk.f32.mxu0 %vm7972_vm15, %v15465_v40  ;;  %v15670_v40 = vld [vmem:[%s26236_s7 + $0x3e8] sm:$0xff] }
0x1576   :  { %v18352_v15 = vpop.f32.mrb[84].mxu0 }
0x1577   :  { %v10916_v41 = vpop.f32.mrb[85].mxu0 }
0x1578   :  { %v20187_v27 = vpack.c.bf16 %v18352_v15, %v10916_v41  ;;  %v15671_v15 = vld [vmem:[%s26236_s7 + $0x3f0] sm:$0xff]  ;;  %v15672_v41 = vld [vmem:[%s26236_s7 + $0x3f8] sm:$0xff] }
0x157a   :  { %v18355_v8 = vpop.f32.mrb[86].mxu0  ;;  %20188 = vmatprep.subr.bf16.mxu0 %v20187_v27 }
0x157b   :  { %v10926_v33 = vpop.f32.mrb[87].mxu0  ;;  %20190 = vmatpush3.bf16.msra.mxu0 %v20187_v27 }
0x157c   :  { %v20191_v6 = vpack.c.bf16 %v18355_v8, %v10926_v33 }
0x157e   :  { %20192 = vmatprep.subr.bf16.mxu0 %v20191_v6 }
0x157f   :  { %20194 = vmatpush3.bf16.msra.mxu0 %v20191_v6 }
0x1580   :  { %20228 = vmatprep.subr.bf16.mxu0 %v25355_v51 }
0x1582   :  { %18365 = vmatmul.mubr.msk.f32.vlgmr.msra.gmra.mrb[68].mxu0 %vm7972_vm15, %v15466_v10 }
0x1583   :  { %20230 = vmatpush3.bf16.msra.mxu0 %v25355_v51  ;;  %18367 = vmatprep.mubr.msk.f32.mxu0 %vm7972_vm15, %v15467_v47  ;;  %v15470_v51 = vld [vmem:[%s26236_s7 + $0x2e8] sm:$0xff] }
0x1584   :  { %20232 = vmatprep.subr.bf16.mxu0 %v25357_v17 }
0x1586   :  { %18368 = vmatmul.mubr.msk.f32.gmra.mrb[70].mxu0 %vm7972_vm15, %v15468_v20 }
0x1587   :  { %20234 = vmatpush3.bf16.msra.mxu0 %v25357_v17  ;;  %18370 = vmatprep.mubr.msk.f32.mxu0 %vm7972_vm15, %v15469_v23  ;;  %v15472_v17 = vld [vmem:[%s26236_s7 + $0x2f8] sm:$0xff] }
0x1588   :  { %20268 = vmatprep.subr.bf16.mxu0 %v25359_v30 }
0x158a   :  { %18371 = vmatmul.mubr.msk.f32.gmra.mrb[72].mxu0 %vm7972_vm15, %v15470_v51 }
0x158b   :  { %18373 = vmatprep.mubr.msk.f32.mxu0 %vm7972_vm15, %v15471_v26 }
0x158e   :  { %18374 = vmatmul.mubr.msk.f32.gmra.mrb[74].mxu0 %vm7972_vm15, %v15472_v17 }
0x158f   :  { %18422 = vmatprep.mubr.msk.f32.mxu0 %vm7972_vm15, %v15515_v24 }
0x1592   :  { %18423 = vmatmul.mubr.msk.f32.vlgmr.msra.gmra.mrb[68].mxu0 %vm7972_vm15, %v15516_v5 }
0x1593   :  { %20270 = vmatpush3.bf16.msra.mxu0 %v25359_v30  ;;  %18425 = vmatprep.mubr.msk.f32.mxu0 %vm7972_vm15, %v15517_v56  ;;  %v15520_v30 = vld [vmem:[%s26236_s7 + $0x328] sm:$0xff] }
0x1594   :  { %20272 = vmatprep.subr.bf16.mxu0 %v25361_v32 }
0x1596   :  { %18426 = vmatmul.mubr.msk.f32.gmra.mrb[70].mxu0 %vm7972_vm15, %v15518_v63 }
0x1597   :  { %20274 = vmatpush3.bf16.msra.mxu0 %v25361_v32  ;;  %18428 = vmatprep.mubr.msk.f32.mxu0 %vm7972_vm15, %v15519_v31  ;;  %v15522_v32 = vld [vmem:[%s26236_s7 + $0x338] sm:$0xff] }
0x1598   :  { %20276 = vmatprep.subr.msk.bf16.mxu0 %vm25803_vm8, %v26493_v14 }
0x159a   :  { %18429 = vmatmul.mubr.msk.f32.gmra.mrb[72].mxu0 %vm7972_vm15, %v15520_v30 }
0x159b   :  { %18431 = vmatprep.mubr.msk.f32.mxu0 %vm7972_vm15, %v15521_v3 }
0x159e   :  { %18432 = vmatmul.mubr.msk.f32.gmra.mrb[74].mxu0 %vm7972_vm15, %v15522_v32 }
0x159f   :  { %18480 = vmatprep.mubr.msk.f32.mxu0 %vm7972_vm15, %v15565_v21 }
0x15a2   :  { %18481 = vmatmul.mubr.msk.f32.vlgmr.msra.gmra.mrb[68].mxu0 %vm7972_vm15, %v15566_v12 }
0x15a3   :  { %20278 = vmatpush3.bf16.msk.msra.mxu0 %vm25803_vm8, %v26493_v14  ;;  %18483 = vmatprep.mubr.msk.f32.mxu0 %vm7972_vm15, %v15567_v53  ;;  %vm20295_vm8 = vmpackc.low %vm11668_vm2, %vm11667_vm1 }
0x15a4   :  { %20280 = vmatprep.subr.msk.bf16.mxu0 %vm20279_vm12, %v26493_v14 }
0x15a6   :  { %18484 = vmatmul.mubr.msk.f32.gmra.mrb[70].mxu0 %vm7972_vm15, %v15568_v0 }
0x15a7   :  { %20282 = vmatpush3.bf16.msk.msra.mxu0 %vm20279_vm12, %v26493_v14  ;;  %18486 = vmatprep.mubr.msk.f32.mxu0 %vm7972_vm15, %v15569_v59  ;;  %vm20299_vm12 = vmpackc.low %vm11670_vm6, %vm11669_vm7 }
0x15a8   :  { %20284 = vmatprep.subr.msk.bf16.mxu0 %vm20283_vm5, %v26493_v14 }
0x15aa   :  { %18487 = vmatmul.mubr.msk.f32.gmra.mrb[72].mxu0 %vm7972_vm15, %v15570_v35 }
0x15ab   :  { %20286 = vmatpush3.bf16.msk.msra.mxu0 %vm20283_vm5, %v26493_v14  ;;  %18489 = vmatprep.mubr.msk.f32.mxu0 %vm7972_vm15, %v15571_v34  ;;  %vm20303_vm5 = vmpackc.low %vm11672_vm0, %vm11671_vm10 }
0x15ac   :  { %20288 = vmatprep.subr.msk.bf16.mxu0 %vm20287_vm4, %v26493_v14 }
0x15ae   :  { %18490 = vmatmul.mubr.msk.f32.gmra.mrb[74].mxu0 %vm7972_vm15, %v15572_v61 }
0x15af   :  { %20290 = vmatpush3.bf16.msk.msra.mxu0 %vm20287_vm4, %v26493_v14  ;;  %18524 = vmatprep.mubr.f32.mxu0 %v24498_v16  ;;  %v15618_v16 = vld [vmem:[%s26236_s7 + $0x398] sm:$0xff] }
0x15b0   :  { %20292 = vmatprep.subr.msk.bf16.mxu0 %vm20291_vm3, %v26493_v14 }
0x15b3   :  { %20294 = vmatpush3.bf16.msk.msra.mxu0 %vm20291_vm3, %v26493_v14 }
0x15b4   :  { %20296 = vmatprep.subr.msk.bf16.mxu0 %vm20295_vm8, %v26493_v14 }
0x15b7   :  { %20298 = vmatpush3.bf16.msk.msra.mxu0 %vm20295_vm8, %v26493_v14 }
0x15b8   :  { %20300 = vmatprep.subr.msk.bf16.mxu0 %vm20299_vm12, %v26493_v14 }
0x15bb   :  { %20302 = vmatpush3.bf16.msk.msra.mxu0 %vm20299_vm12, %v26493_v14 }
0x15bc   :  { %20304 = vmatprep.subr.msk.bf16.mxu0 %vm20303_vm5, %v26493_v14 }
0x15bf   :  { %20306 = vmatpush3.bf16.msk.msra.mxu0 %vm20303_vm5, %v26493_v14  ;;  %vm20619_vm5 = vmmov 0  }
0x15c2   :  { %18525 = vmatmul.mubr.f32.vlgmr.msra.gmra.mrb[88].mxu0 %v24500_v2  ;;  %v15619_v2 = vld [vmem:[%s26236_s7 + $0x3a0] sm:$0xff] }
0x15c3   :  { %18527 = vmatprep.mubr.f32.mxu0 %v24508_v44  ;;  %v15620_v44 = vld [vmem:[%s26236_s7 + $0x3a8] sm:$0xff] }
0x15c6   :  { %18528 = vmatmul.mubr.f32.gmra.mrb[90].mxu0 %v24512_v4  ;;  %v15621_v4 = vld [vmem:[%s26236_s7 + $0x3b0] sm:$0xff] }
0x15c7   :  { %18538 = vmatprep.mubr.msk.f32.mxu0 %vm7972_vm15, %v15615_v62 }
0x1695   :  { %v18526_v57 = vpop.f32.mrb[88].mxu0 }
0x1696   :  { %v11771_v1 = vpop.f32.mrb[89].mxu0 }
0x1697   :  { %v20307_v11 = vpack.c.bf16 %v18526_v57, %v11771_v1 }
0x1699   :  { %v18529_v60 = vpop.f32.mrb[90].mxu0  ;;  %20308 = vmatprep.subr.bf16.mxu0 %v20307_v11 }
0x169a   :  { %v11781_v54 = vpop.f32.mrb[91].mxu0  ;;  %20310 = vmatpush3.bf16.msra.mxu0 %v20307_v11  ;;  %v26041_v11 = vld [vmem:[%s26239_s10 + $0x8] sm:$0xff] }
0x169b   :  { %v20311_v43 = vpack.c.bf16 %v18529_v60, %v11781_v54  ;;  %v26048_v60 = vld [vmem:[%s26239_s10] sm:$0xff] }
0x169d   :  { %20312 = vmatprep.subr.bf16.mxu0 %v20311_v43 }
0x169e   :  { %20314 = vmatpush3.bf16.msra.mxu0 %v20311_v43 }
0x169f   :  { %20348 = vmatprep.subr.bf16.mxu0 %v25363_v19 }
0x16a1   :  { %18539 = vmatmul.mubr.msk.f32.vlgmr.msra.gmra.mrb[68].mxu0 %vm7972_vm15, %v15616_v55 }
0x16a2   :  { %20350 = vmatpush3.bf16.msra.mxu0 %v25363_v19  ;;  %18541 = vmatprep.mubr.msk.f32.mxu0 %vm7972_vm15, %v15617_v58  ;;  %v15622_v19 = vld [vmem:[%s26236_s7 + $0x3b8] sm:$0xff] }
0x16a3   :  { %20352 = vmatprep.subr.bf16.mxu0 %v25365_v49 }
0x16a5   :  { %18542 = vmatmul.mubr.msk.f32.gmra.mrb[70].mxu0 %vm7972_vm15, %v15618_v16 }
0x16a6   :  { %20354 = vmatpush3.bf16.msra.mxu0 %v25365_v49  ;;  %18544 = vmatprep.mubr.msk.f32.mxu0 %vm7972_vm15, %v15619_v2  ;;  %v15665_v49 = vld [vmem:[%s26236_s7 + $0x3c0] sm:$0xff] }
0x16a9   :  { %18545 = vmatmul.mubr.msk.f32.gmra.mrb[72].mxu0 %vm7972_vm15, %v15620_v44 }
0x16aa   :  { %18547 = vmatprep.mubr.msk.f32.mxu0 %vm7972_vm15, %v15621_v4 }
0x16ad   :  { %18548 = vmatmul.mubr.msk.f32.gmra.mrb[74].mxu0 %vm7972_vm15, %v15622_v19 }
0x16ae   :  { %18596 = vmatprep.mubr.msk.f32.mxu0 %vm7972_vm15, %v15665_v49 }
0x16b1   :  { %18597 = vmatmul.mubr.msk.f32.vlgmr.msra.gmra.mrb[68].mxu0 %vm7972_vm15, %v15666_v22 }
0x16b2   :  { %18599 = vmatprep.mubr.msk.f32.mxu0 %vm7972_vm15, %v15667_v28 }
0x16b5   :  { %18600 = vmatmul.mubr.msk.f32.gmra.mrb[70].mxu0 %vm7972_vm15, %v15668_v36 }
0x16b6   :  { %18602 = vmatprep.mubr.msk.f32.mxu0 %vm7972_vm15, %v15669_v37 }
0x16b9   :  { %18603 = vmatmul.mubr.msk.f32.gmra.mrb[72].mxu0 %vm7972_vm15, %v15670_v40 }
0x16ba   :  { %18605 = vmatprep.mubr.msk.f32.mxu0 %vm7972_vm15, %v15671_v15 }
0x16bd   :  { %18606 = vmatmul.mubr.msk.f32.gmra.mrb[74].mxu0 %vm7972_vm15, %v15672_v41 }
0x1784   :  { %v18598_v27 = vpop.f32.mrb[68].mxu0 }
0x1785   :  { %v25975_v8 = vadd.f32 %v18598_v27, %v24883_v9  ;;  %v12174_v33 = vpop.f32.mrb[69].mxu0 }
0x1786   :  { %v25978_v6 = vadd.f32 %v12174_v33, %v24885_v42 }
0x1787   :  { %v12224_v10 = vsel %vm7972_vm15, %v25975_v8, 0.0  ;;  %v12255_v47 = vmul.f32 %v25975_v8, %v25975_v8 }
0x1788   :  { %12225 = vadd.xlane.f32.xlu0 %v12224_v10  ;;  %v18601_v20 = vpop.f32.mrb[70].mxu0  ;;  %v12221_v23 = vsel %vm7972_vm15, %v25978_v6, 0.0  ;;  %v12254_v51 = vmul.f32 %v25978_v6, %v25978_v6 }
0x1789   :  { %v25989_v9 = vadd.f32 %v18601_v20, %v24894_v38  ;;  %12222 = vadd.xlane.f32.xlu1 %v12221_v23  ;;  %v12184_v42 = vpop.f32.mrb[71].mxu0  ;;  %v12265_v17 = vsel %vm7972_vm15, %v12255_v47, 0.0 }
0x178a   :  { %v25992_v26 = vadd.f32 %v12184_v42, %v24898_v29  ;;  %v12262_v5 = vsel %vm7972_vm15, %v12254_v51, 0.0 }
0x178b   :  { %v12257_v29 = vmul.f32 %v25989_v9, %v25989_v9  ;;  %v12230_v52 = vsel %vm7972_vm15, %v25989_v9, 0.0 }
0x178c   :  { %12266 = vadd.xlane.f32.xlu0 %v12265_v17  ;;  %v18604_v24 = vpop.f32.mrb[72].mxu0  ;;  %v12227_v38 = vsel %vm7972_vm15, %v25992_v26, 0.0  ;;  %v12256_v32 = vmul.f32 %v25992_v26, %v25992_v26 }
0x178d   :  { %v25997_v48 = vadd.f32 %v18604_v24, %v24902_v45  ;;  %12263 = vadd.xlane.f32.xlu1 %v12262_v5  ;;  %v12194_v56 = vpop.f32.mrb[73].mxu0 }
0x178e   :  { %v26000_v63 = vadd.f32 %v12194_v56, %v24906_v50  ;;  %v12271_v50 = vsel %vm7972_vm15, %v12257_v29, 0.0  ;;  %v12268_v12 = vsel %vm7972_vm15, %v12256_v32, 0.0  ;;  %v12311_v29 = vld [vmem:[%s26237_s8 + $0x8] sm:$0xff] }
0x178f   :  { %v12236_v21 = vsel %vm7972_vm15, %v25997_v48, 0.0 }
0x1790   :  { %12228 = vadd.xlane.f32.xlu0 %v12227_v38  ;;  %v18607_v31 = vpop.f32.mrb[74].mxu0  ;;  %v12258_v0 = vmul.f32 %v26000_v63, %v26000_v63 }
0x1791   :  { %v26009_v30 = vadd.f32 %v18607_v31, %v24910_v46  ;;  %12231 = vadd.xlane.f32.xlu1 %v12230_v52  ;;  %v12204_v45 = vpop.f32.mrb[75].mxu0  ;;  %v12259_v46 = vmul.f32 %v25997_v48, %v25997_v48  ;;  %v12310_v52 = vld [vmem:[%s26237_s8] sm:$0xff] }
0x1792   :  { %v26012_v3 = vadd.f32 %v12204_v45, %v24915_v7  ;;  %v12233_v7 = vsel %vm7972_vm15, %v26000_v63, 0.0  ;;  %v12274_v35 = vsel %vm7972_vm15, %v12258_v0, 0.0 }
0x1793   :  { %v12277_v53 = vsel %vm7972_vm15, %v12259_v46, 0.0  ;;  %v12242_v59 = vsel %vm7972_vm15, %v26009_v30, 0.0  ;;  %v12261_v62 = vmul.f32 %v26009_v30, %v26009_v30 }
0x1794   :  { %12272 = vadd.xlane.f32.xlu0 %v12271_v50  ;;  %v12260_v34 = vmul.f32 %v26012_v3, %v26012_v3  ;;  %v12239_v61 = vsel %vm7972_vm15, %v26012_v3, 0.0 }
0x1795   :  { %12237 = vadd.xlane.f32.xlu1 %v12236_v21  ;;  %v12283_v1 = vsel %vm7972_vm15, %v12261_v62, 0.0 }
0x1796   :  { %v12280_v57 = vsel %vm7972_vm15, %v12260_v34, 0.0 }
0x1798   :  { %12269 = vadd.xlane.f32.xlu0 %v12268_v12 }
0x1799   :  { %12234 = vadd.xlane.f32.xlu1 %v12233_v7 }
0x179c   :  { %12278 = vadd.xlane.f32.xlu0 %v12277_v53 }
0x179d   :  { %12243 = vadd.xlane.f32.xlu1 %v12242_v59 }
0x17a0   :  { %12275 = vadd.xlane.f32.xlu0 %v12274_v35  ;;  %v12343_v35 = vld [vmem:[%s26238_s9 + $0x8] sm:$0xff] }
0x17a1   :  { %12240 = vadd.xlane.f32.xlu1 %v12239_v61 }
0x17a4   :  { %12281 = vadd.xlane.f32.xlu0 %v12280_v57 }
0x17a5   :  { %12284 = vadd.xlane.f32.xlu1 %v12283_v1 }
0x17b6   :  { %12504 = vrot.lane.b32.xlu1 %v26041_v11, %s20617_s13 }
0x17ba   :  { %12502 = vrot.lane.b32.xlu0 %v26048_v60, %s20617_s13 }
0x1815   :  { %v12226_v54 = vpop.xlane.xlu0 %12225 }
0x1816   :  { %v12247_v43 = vmul.f32 0.03125, %v12226_v54  ;;  %v12223_v55 = vpop.xlane.xlu1 %12222 }
0x1817   :  { %v26052_v58 = vmul.f32 0.03125, %v12223_v55 }
0x1818   :  { %v12295_v2 = vmul.f32 %v12247_v43, %v12247_v43 }
0x1819   :  { %v12267_v16 = vpop.xlane.xlu0 %12266  ;;  %v12294_v19 = vmul.f32 %v26052_v58, %v26052_v58 }
0x181a   :  { %v12287_v44 = vmul.f32 0.03125, %v12267_v16  ;;  %v12264_v4 = vpop.xlane.xlu1 %12263 }
0x181b   :  { %v12286_v49 = vmul.f32 0.03125, %v12264_v4  ;;  %v12313_v4 = vld [vmem:[%s26237_s8 + $0x18] sm:$0xff] }
0x181c   :  { %v12303_v22 = vsub.f32 %v12287_v44, %v12295_v2 }
0x181d   :  { %v12302_v28 = vsub.f32 %v12286_v49, %v12294_v19  ;;  %v12229_v36 = vpop.xlane.xlu0 %12228 }
0x181e   :  { %v12319_v37 = vadd.f32 1e-05, %v12303_v22  ;;  %v12232_v40 = vpop.xlane.xlu1 %12231  ;;  %v26060_v10 = vmul.f32 0.03125, %v12229_v36 }
0x181f   :  { %v12318_v15 = vadd.f32 1e-05, %v12302_v28  ;;  %v26056_v41 = vmul.f32 0.03125, %v12232_v40 }
0x1820   :  { %20558 = vrsqrt.f32 %v12319_v37  ;;  %v12296_v42 = vmul.f32 %v26060_v10, %v26060_v10 }
0x1821   :  { %20560 = vrsqrt.f32 %v12318_v15  ;;  %v12297_v27 = vmul.f32 %v26056_v41, %v26056_v41  ;;  %v12273_v33 = vpop.xlane.xlu0 %12272 }
0x1822   :  { %v12289_v47 = vmul.f32 0.03125, %v12273_v33  ;;  %v12238_v20 = vpop.xlane.xlu1 %12237 }
0x1823   :  { %v26064_v24 = vmul.f32 0.03125, %v12238_v20  ;;  %v12312_v20 = vld [vmem:[%s26237_s8 + $0x10] sm:$0xff] }
0x1824   :  { %v12305_v23 = vsub.f32 %v12289_v47, %v12297_v27  ;;  %v12342_v47 = vld [vmem:[%s26238_s9] sm:$0xff] }
0x1825   :  { %v12270_v51 = vpop.xlane.xlu0 %12269  ;;  %v12299_v50 = vmul.f32 %v26064_v24, %v26064_v24 }
0x1826   :  { %v12321_v17 = vadd.f32 1e-05, %v12305_v23  ;;  %v12288_v5 = vmul.f32 0.03125, %v12270_v51  ;;  %v12235_v56 = vpop.xlane.xlu1 %12234 }
0x1827   :  { %v26074_v21 = vmul.f32 0.03125, %v12235_v56 }
0x1828   :  { %20562 = vrsqrt.f32 %v12321_v17  ;;  %v12304_v38 = vsub.f32 %v12288_v5, %v12296_v42 }
0x1829   :  { %v12279_v31 = vpop.xlane.xlu0 %12278  ;;  %v12298_v62 = vmul.f32 %v26074_v21, %v26074_v21 }
0x182a   :  { %v20559_v45 = vpop.eup %20558  ;;  %v12320_v32 = vadd.f32 1e-05, %v12304_v38  ;;  %v12291_v12 = vmul.f32 0.03125, %v12279_v31  ;;  %v12244_v46 = vpop.xlane.xlu1 %12243 }
0x182b   :  { %v20561_v7 = vpop.eup %20560  ;;  %v12335_v53 = vmul.f32 %v20559_v45, %v12311_v29  ;;  %v26081_v55 = vmul.f32 0.03125, %v12244_v46  ;;  %v12345_v29 = vld [vmem:[%s26238_s9 + $0x18] sm:$0xff] }
0x182c   :  { %20564 = vrsqrt.f32 %v12320_v32  ;;  %v12307_v0 = vsub.f32 %v12291_v12, %v12299_v50  ;;  %v12334_v59 = vmul.f32 %v20561_v7, %v12310_v52  ;;  %v12344_v32 = vld [vmem:[%s26238_s9 + $0x10] sm:$0xff] }
0x182d   :  { %v12276_v34 = vpop.xlane.xlu0 %12275  ;;  %12373 = vperm.xlu1 %20549, %v12335_v53   ;;  %v12351_v61 = vmul.f32 %v12335_v53, %v12247_v43  ;;  %v12301_v37 = vmul.f32 %v26081_v55, %v26081_v55 }
0x182e   :  { %v12323_v57 = vadd.f32 1e-05, %v12307_v0  ;;  %v12290_v1 = vmul.f32 0.03125, %v12276_v34  ;;  %12368 = vperm.xlu0 %20548, %v12334_v59   ;;  %v12241_v54 = vpop.xlane.xlu1 %12240  ;;  %v12350_v27 = vmul.f32 %v12334_v59, %v26052_v58  ;;  %v12315_v58 = vld [vmem:[%s26237_s8 + $0x28] sm:$0xff]  ;;  %v12317_v59 = vld [vmem:[%s26237_s8 + $0x38] sm:$0xff] }
0x182f   :  { %v12252_v16 = vmul.f32 0.03125, %v12241_v54  ;;  %v12359_v2 = vsub.f32 %v12343_v35, %v12351_v61  ;;  %v12347_v0 = vld [vmem:[%s26238_s9 + $0x28] sm:$0xff] }
0x1830   :  { %20566 = vrsqrt.f32 %v12323_v57  ;;  %v12306_v44 = vsub.f32 %v12290_v1, %v12298_v62  ;;  %v12358_v5 = vsub.f32 %v12342_v47, %v12350_v27  ;;  %v12346_v1 = vld [vmem:[%s26238_s9 + $0x20] sm:$0xff]  ;;  %v20618_v47 = vmov 0.0|0.0  }
0x1831   :  { %v12300_v19 = vmul.f32 %v12252_v16, %v12252_v16  ;;  %v12282_v49 = vpop.xlane.xlu0 %12281  ;;  %12421 = vperm.xlu1 %20549, %v12359_v2   ;;  %20355 = vmatprep.subr.bf16.mxu1 %v20618_v47 }
0x1832   :  { %v20563_v43 = vpop.eup %20562  ;;  %v12322_v22 = vadd.f32 1e-05, %v12306_v44  ;;  %v12292_v28 = vmul.f32 0.03125, %v12282_v49  ;;  %v12285_v36 = vpop.xlane.xlu1 %12284  ;;  %v12348_v44 = vld [vmem:[%s26238_s9 + $0x30] sm:$0xff] }
0x1833   :  { %v12293_v40 = vmul.f32 0.03125, %v12285_v36  ;;  %v12337_v15 = vmul.f32 %v20563_v43, %v12313_v4  ;;  %v26138_v43 = vld [vmem:[%s26239_s10 + $0x18] sm:$0xff] }
0x1834   :  { %20568 = vrsqrt.f32 %v12322_v22  ;;  %v12308_v33 = vsub.f32 %v12292_v28, %v12300_v19  ;;  %v26152_v22 = vld [vmem:[%s26239_s10 + $0x28] sm:$0xff]  ;;  %v26161_v28 = vld [vmem:[%s26239_s10 + $0x30] sm:$0xff]  ;;  %v26166_v36 = vld [vmem:[%s26239_s10 + $0x38] sm:$0xff] }
0x1835   :  { %v12309_v23 = vsub.f32 %v12293_v40, %v12301_v37  ;;  %12383 = vperm.xlu0 %20548, %v12337_v15   ;;  %v12353_v38 = vmul.f32 %v12337_v15, %v26056_v41  ;;  %v12314_v41 = vld [vmem:[%s26237_s8 + $0x20] sm:$0xff]  ;;  %v26839_v37 = vlaneseq }
0x1836   :  { %v20565_v51 = vpop.eup %20564  ;;  %v12324_v42 = vadd.f32 1e-05, %v12308_v33 }
0x1837   :  { %v12325_v17 = vadd.f32 1e-05, %v12309_v23  ;;  %v12336_v56 = vmul.f32 %v20565_v51, %v12312_v20  ;;  %v12361_v45 = vsub.f32 %v12345_v29, %v12353_v38  ;;  %v12564_v40 = vand.u32 127, %v26839_v37  ;;  %v12503_v20 = vpop.permute.xlu0 %12502 }
0x1838   :  { %20570 = vrsqrt.f32 %v12324_v42 }
0x1839   :  { %20572 = vrsqrt.f32 %v12325_v17  ;;  %12416 = vperm.xlu0 %20548, %v12358_v5   ;;  %12378 = vperm.xlu1 %20549, %v12336_v56   ;;  %v12352_v50 = vmul.f32 %v12336_v56, %v26060_v10  ;;  %v12316_v10 = vld [vmem:[%s26237_s8 + $0x30] sm:$0xff]  ;;  %v12570_v15 = vadd.s32 1, %v12564_v40  ;;  %v12565_v27 = vmul.u32 16, %v12564_v40 }
0x183a   :  { %v20567_v31 = vpop.eup %20566 }
0x183b   :  { %v12339_v52 = vmul.f32 %v20567_v31, %v12315_v58  ;;  %v12360_v7 = vsub.f32 %v12344_v32, %v12352_v50  ;;  %v12571_v33 = vmul.u32 16, %v12570_v15  ;;  %vm12566_vm14 = vcmp.ge.s32.totalorder %v26538_v13, %v12565_v27 }
0x183c   :  { %vm12567_vm11 = vcmp.ge.s32.totalorder %v26539_v25, %v12565_v27  ;;  %vm12568_vm2 = vcmp.ge.s32.totalorder %v26663_v39, %v12565_v27  ;;  %vm12569_vm8 = vcmp.ge.s32.totalorder %v26664_v18, %v12565_v27 }
0x183d   :  { %12393 = vperm.xlu0 %20548, %v12339_v52   ;;  %12431 = vperm.xlu1 %20549, %v12361_v45   ;;  %v12355_v53 = vmul.f32 %v12339_v52, %v26064_v24  ;;  %vm12572_vm4 = vcmp.lt.s32.totalorder %v26538_v13, %v12571_v33  ;;  %vm12573_vm9 = vcmp.lt.s32.totalorder %v26539_v25, %v12571_v33  ;;  %v26840_v13 = vmov 0.0   ;;  %v12505_v25 = vpop.permute.xlu1 %12504 }
0x183e   :  { %v20569_v12 = vpop.eup %20568  ;;  %vm12576_vm13 = vmand %vm12566_vm14, %vm12572_vm4  ;;  %vm12574_vm7 = vcmp.lt.s32.totalorder %v26663_v39, %v12571_v33  ;;  %vm12575_vm6 = vcmp.lt.s32.totalorder %v26664_v18, %v12571_v33  ;;  %18616 = vmatprep.mubr.msk.f32.mxu1 %vm20619_vm5, %v26840_v13  ;;  %vm26841_vm4 = vcmask 130048  }
0x183f   :  { %v12338_v46 = vmul.f32 %v20569_v12, %v12314_v41  ;;  %v12363_v61 = vsub.f32 %v12347_v0, %v12355_v53  ;;  %vm12577_vm3 = vmand %vm12567_vm11, %vm12573_vm9 }
0x1840   :  { %vm20356_vm1 = vmpackc.low %vm12577_vm3, %vm12576_vm13 }
0x1841   :  { %12388 = vperm.xlu0 %20548, %v12338_v46   ;;  %12426 = vperm.xlu1 %20549, %v12360_v7   ;;  %v12354_v62 = vmul.f32 %v12338_v46, %v26074_v21  ;;  %v12349_v21 = vld [vmem:[%s26238_s9 + $0x38] sm:$0xff]  ;;  %vm12578_vm12 = vmand %vm12568_vm2, %vm12574_vm7 }
0x1842   :  { %v20571_v35 = vpop.eup %20570  ;;  %20357 = vmatpush3.bf16.msk.msra.mxu1 %vm20356_vm1, %v26493_v14  ;;  %vm12579_vm10 = vmand %vm12569_vm8, %vm12575_vm6 }
0x1843   :  { %v20573_v34 = vpop.eup %20572  ;;  %v12340_v24 = vmul.f32 %v20571_v35, %v12316_v10  ;;  %v12362_v54 = vsub.f32 %v12346_v1, %v12354_v62  ;;  %20358 = vmatprep.subr.bf16.mxu1 %v20618_v47  ;;  %vm20359_vm0 = vmpackc.low %vm12579_vm10, %vm12578_vm12 }
0x1844   :  { %v12341_v57 = vmul.f32 %v20573_v34, %v12317_v59  ;;  %vm26842_vm9 = vmmov %vm26841_vm4 }
0x1845   :  { %12441 = vperm.xlu1 %20549, %v12363_v61   ;;  %v12356_v2 = vmul.f32 %v12340_v24, %v12252_v16  ;;  %v26133_v16 = vld [vmem:[%s26239_s10 + $0x10] sm:$0xff]  ;;  %v12527_v59 = vsel %vm26842_vm9, %v26041_v11, %v12505_v25  ;;  %vm26843_vm8 = vmmov %vm26841_vm4 }
0x1846   :  { %12403 = vperm.xlu0 %20548, %v12341_v57   ;;  %v12357_v4 = vmul.f32 %v12341_v57, %v26081_v55  ;;  %v26147_v55 = vld [vmem:[%s26239_s10 + $0x20] sm:$0xff]  ;;  %20360 = vmatpush3.bf16.msk.msra.mxu1 %vm20359_vm0, %v26493_v14  ;;  %vm26844_vm7 = vmmov %vm26841_vm4  ;;  %s20620_s10 = smov [#allocation2]  }
0x1847   :  { %v12364_v19 = vsub.f32 %v12348_v44, %v12356_v2  ;;  %vm26845_vm6 = vmmov %vm26841_vm4 }
0x1848   :  { %v12365_v49 = vsub.f32 %v12349_v21, %v12357_v4  ;;  %vm26846_vm10 = vmmov %vm26841_vm4 }
0x1849   :  { %12436 = vperm.xlu1 %20549, %v12362_v54   ;;  %vm26847_vm5 = vmmov %vm26841_vm4 }
0x184a   :  { %12398 = vperm.xlu0 %20548, %v12340_v24  }
0x184d   :  { %12446 = vperm.xlu1 %20549, %v12364_v19  }
0x184e   :  { %12451 = vperm.xlu0 %20548, %v12365_v49  }
0x1851   :  { %12506 = vrot.lane.b32.xlu1 %v26133_v16, %s20617_s13 }
0x1852   :  { %12508 = vrot.lane.b32.xlu0 %v26138_v43, %s20617_s13 }
0x1855   :  { %12510 = vrot.lane.b32.xlu1 %v26147_v55, %s20617_s13 }
0x1856   :  { %12512 = vrot.lane.b32.xlu0 %v26152_v22, %s20617_s13 }
0x1859   :  { %12514 = vrot.lane.b32.xlu1 %v26161_v28, %s20617_s13 }
0x185a   :  { %12516 = vrot.lane.b32.xlu0 %v26166_v36, %s20617_s13  ;;  %s12675_s13 = sshll.u32 %s20620_s10, 4  ;;  %s12676_s13 = int_to_ptr.vmem [resolvable:$true] %s12675_s13 }
0x185b   :  { %s20590_s27 = scalar_lea.vmem %s12676_s13, 16  ;;  %s20594_s28 = scalar_lea.vmem %s12676_s13, 32 }
0x185c   :  { %p20591_p0 = scmp.ne.s32.totalorder %s12676_s13, %s20590_s27  ;;  %p20595_p1 = scmp.lt.s32.totalorder %s12676_s13, %s12676_s13 }
0x185d   :  { %p20596_p2 = scmp.lt.s32.totalorder %s20594_s28, %s20590_s27 }
0x185f   :  { %p20597_p3 = por %p20596_p2, %p20595_p1 }
0x1861   :  { %p20598_p4 = pnand %p20597_p3, %p20591_p0 }
0x18ac   :  { %v12374_v23 = vpop.permute.xlu1 %12373 }
0x18ad   :  { %v12369_v51 = vpop.permute.xlu0 %12368  ;;  %v12407_v18 = vmul.f32 %v25975_v8, %v12374_v23 }
0x18ae   :  { %v12406_v58 = vmul.f32 %v25978_v6, %v12369_v51  ;;  %v12526_v6 = vsel %vm26841_vm4, %v26048_v60, %v12503_v20 }
0x18b0   :  { %v12422_v42 = vpop.permute.xlu1 %12421 }
0x18b1   :  { %v12455_v29 = vadd.f32 %v12422_v42, %v12407_v18 }
0x18b3   :  { %v12471_v45 = vmul.f32 0.2, %v12455_v29  ;;  %vm12463_vm14 = vcmp.gt.f32.partialorder %v12455_v29, 0.0 }
0x18b4   :  { %v12384_v17 = vpop.permute.xlu0 %12383 }
0x18b5   :  { %v12479_v46 = vsel %vm12463_vm14, %v12455_v29, %v12471_v45  ;;  %v12409_v7 = vmul.f32 %v25989_v9, %v12384_v17  ;;  %vm26848_vm14 = vmmov %vm26841_vm4 }
0x18b6   :  { %v12535_v62 = vmul.f32 %v12527_v59, %v12479_v46 }
0x18b8   :  { %v12417_v5 = vpop.permute.xlu0 %12416  ;;  %v12379_v56 = vpop.permute.xlu1 %12378  ;;  %v12543_v44 = vsel %vm7972_vm15, %v12535_v62, 0.0 }
0x18b9   :  { %v12454_v31 = vadd.f32 %v12417_v5, %v12406_v58  ;;  %v12408_v12 = vmul.f32 %v25992_v26, %v12379_v56 }
0x18bb   :  { %v12470_v50 = vmul.f32 0.2, %v12454_v31  ;;  %vm12462_vm11 = vcmp.gt.f32.partialorder %v12454_v31, 0.0 }
0x18bc   :  { %v12394_v39 = vpop.permute.xlu0 %12393  ;;  %v12432_v38 = vpop.permute.xlu1 %12431 }
0x18bd   :  { %v12478_v53 = vsel %vm12462_vm11, %v12454_v31, %v12470_v50  ;;  %v12411_v35 = vmul.f32 %v25997_v48, %v12394_v39  ;;  %v12457_v34 = vadd.f32 %v12432_v38, %v12409_v7  ;;  %vm12667_vm11 = vcmask 8192  }
0x18be   :  { %v12534_v26 = vmul.f32 %v12526_v6, %v12478_v53 }
0x18bf   :  { %v12473_v60 = vmul.f32 0.2, %v12457_v34  ;;  %vm12465_vm3 = vcmp.gt.f32.partialorder %v12457_v34, 0.0 }
0x18c0   :  { %v12389_v14 = vpop.permute.xlu0 %12388  ;;  %v12427_v52 = vpop.permute.xlu1 %12426  ;;  %v12542_v11 = vsel %vm7972_vm15, %v12534_v26, 0.0 }
0x18c1   :  { %v12456_v0 = vadd.f32 %v12427_v52, %v12408_v12  ;;  %v12410_v61 = vmul.f32 %v26000_v63, %v12389_v14  ;;  %v12481_v27 = vsel %vm12465_vm3, %v12457_v34, %v12473_v60  ;;  %v12544_v47 = vadd.f32 %v12543_v44, %v12542_v11 }
0x18c3   :  { %v12472_v24 = vmul.f32 0.2, %v12456_v0  ;;  %vm12464_vm13 = vcmp.gt.f32.partialorder %v12456_v0, 0.0 }
0x18c4   :  { %v12442_v41 = vpop.permute.xlu1 %12441 }
0x18c5   :  { %v12404_v32 = vpop.permute.xlu0 %12403  ;;  %v12459_v57 = vadd.f32 %v12442_v41, %v12411_v35  ;;  %v12480_v21 = vsel %vm12464_vm13, %v12456_v0, %v12472_v24 }
0x18c6   :  { %v12413_v4 = vmul.f32 %v26009_v30, %v12404_v32 }
0x18c7   :  { %v12475_v48 = vmul.f32 0.2, %v12459_v57  ;;  %vm12467_vm1 = vcmp.gt.f32.partialorder %v12459_v57, 0.0 }
0x18c8   :  { %v12437_v8 = vpop.permute.xlu1 %12436 }
0x18c9   :  { %v12399_v10 = vpop.permute.xlu0 %12398  ;;  %v12458_v9 = vadd.f32 %v12437_v8, %v12410_v61  ;;  %v12483_v23 = vsel %vm12467_vm1, %v12459_v57, %v12475_v48 }
0x18ca   :  { %v12412_v54 = vmul.f32 %v26012_v3, %v12399_v10 }
0x18cb   :  { %v12474_v63 = vmul.f32 0.2, %v12458_v9  ;;  %vm12466_vm2 = vcmp.gt.f32.partialorder %v12458_v9, 0.0 }
0x18cc   :  { %v12447_v1 = vpop.permute.xlu1 %12446 }
0x18cd   :  { %v12452_v2 = vpop.permute.xlu0 %12451  ;;  %v12460_v49 = vadd.f32 %v12447_v1, %v12412_v54  ;;  %v12482_v25 = vsel %vm12466_vm2, %v12458_v9, %v12474_v63 }
0x18ce   :  { %v12461_v40 = vadd.f32 %v12452_v2, %v12413_v4 }
0x18cf   :  { %v12476_v51 = vmul.f32 0.2, %v12460_v49  ;;  %vm12468_vm12 = vcmp.gt.f32.partialorder %v12460_v49, 0.0 }
0x18d0   :  { %v12507_v19 = vpop.permute.xlu1 %12506  ;;  %v12477_v56 = vmul.f32 0.2, %v12461_v40  ;;  %vm12469_vm0 = vcmp.gt.f32.partialorder %v12461_v40, 0.0 }
0x18d1   :  { %v12528_v37 = vsel %vm26843_vm8, %v26133_v16, %v12507_v19  ;;  %v12509_v3 = vpop.permute.xlu0 %12508  ;;  %v12484_v52 = vsel %vm12468_vm12, %v12460_v49, %v12476_v51 }
0x18d2   :  { %v12536_v15 = vmul.f32 %v12528_v37, %v12480_v21  ;;  %v12529_v33 = vsel %vm26844_vm7, %v26138_v43, %v12509_v3  ;;  %v12485_v41 = vsel %vm12469_vm0, %v12461_v40, %v12477_v56 }
0x18d3   :  { %v12537_v13 = vmul.f32 %v12529_v33, %v12481_v27 }
0x18d4   :  { %v12545_v30 = vsel %vm7972_vm15, %v12536_v15, 0.0  ;;  %v12511_v20 = vpop.permute.xlu1 %12510 }
0x18d5   :  { %v12546_v42 = vadd.f32 %v12545_v30, %v12544_v47  ;;  %v12547_v17 = vsel %vm7972_vm15, %v12537_v13, 0.0  ;;  %v12530_v16 = vsel %vm26845_vm6, %v26147_v55, %v12511_v20  ;;  %v12513_v5 = vpop.permute.xlu0 %12512 }
0x18d6   :  { %v12538_v39 = vmul.f32 %v12530_v16, %v12482_v25  ;;  %v12531_v43 = vsel %vm26846_vm10, %v26152_v22, %v12513_v5 }
0x18d7   :  { %v12548_v38 = vadd.f32 %v12547_v17, %v12546_v42  ;;  %v12539_v18 = vmul.f32 %v12531_v43, %v12483_v23 }
0x18d8   :  { %v12549_v58 = vsel %vm7972_vm15, %v12538_v39, 0.0  ;;  %v12515_v29 = vpop.permute.xlu1 %12514 }
0x18d9   :  { %v12550_v31 = vadd.f32 %v12549_v58, %v12548_v38  ;;  %v12551_v14 = vsel %vm7972_vm15, %v12539_v18, 0.0  ;;  %v12532_v55 = vsel %vm26847_vm5, %v26161_v28, %v12515_v29  ;;  %v12517_v45 = vpop.permute.xlu0 %12516 }
0x18da   :  { %v12540_v50 = vmul.f32 %v12532_v55, %v12484_v52  ;;  %v12533_v32 = vsel %vm26848_vm14, %v26166_v36, %v12517_v45 }
0x18db   :  { %v12552_v22 = vadd.f32 %v12551_v14, %v12550_v31  ;;  %v12541_v12 = vmul.f32 %v12533_v32, %v12485_v41 }
0x18dc   :  { %v12553_v46 = vsel %vm7972_vm15, %v12540_v50, 0.0 }
0x18dd   :  { %v12554_v7 = vadd.f32 %v12553_v46, %v12552_v22  ;;  %v12555_v53 = vsel %vm7972_vm15, %v12541_v12, 0.0 }
0x18df   :  { %v12556_v0 = vadd.f32 %v12555_v53, %v12554_v7 }
0x18e1   :  { %v12557_v8 = vrot.slane %v12556_v0, 4 }
0x18e3   :  { %v12558_v6 = vadd.f32 %v12557_v8, %v12556_v0 }
0x18e5   :  { %v12559_v10 = vrot.slane %v12558_v6, 2 }
0x18e7   :  { %v12560_v59 = vadd.f32 %v12559_v10, %v12558_v6 }
0x18e9   :  { %v12561_v35 = vrot.slane %v12560_v59, 1 }
0x18eb   :  { %v12562_v28 = vadd.f32 %v12561_v35, %v12560_v59 }
0x18ed   :  { %18617 = vmatmul.mubr.msk.f32.vlgmr.msra.gmra.mrb[128].mxu1 %vm7972_vm15, %v12562_v28 }
0x19c0   :  { %v12657_v34 = vpop.f32.mrb[128].mxu1 }
0x19c1   :  { %v15690_v61 = vmul.f32 -1.442695, %v12657_v34  ;;  %v18618_v62 = vpop.f32.mrb[129].mxu1 }
0x19c3   :  { %20574 = vpow2.f32 %v15690_v61 }
0x19cd   :  { %v20575_v36 = vpop.eup %20574 }
0x19ce   :  { %v12664_v26 = vadd.f32 1.0, %v20575_v36 }
0x19d0   :  { %20576 = vrcp.f32 %v12664_v26 }
0x19da   :  { %v20577_v24 = vpop.eup %20576 }
0x19db   :  { %12668 = vst.msk [vmem:[#allocation2] sm:$0x1] %vm12667_vm11, %v20577_v24 }
0x19dc   :  { %20601 = shalt.err (!%p20598_p4)
}
0x19dd   :  { %s20602_s30 = scalar_lea.hbm %s26240_s11, 16 }
0x19de   :  { %p20603_p5 = scmp.ne.s32.totalorder %s26240_s11, %s20602_s30  ;;  %p20606_p6 = scmp.lt.u32.totalorder %s20602_s30, %s26240_s11 }
0x19e0   :  { %p20608_p7 = pnand %p20606_p6, %p20603_p5 }
0x19e2   :  { %20611 = shalt.err (!%p20608_p7)
}
0x19e3   :  { %12678 = dma.vmem_to_hbm [thread:$0]  %s12676_s13, 16, %s26240_s11, [#allocation3]  }
0x19e4   :  { %20612 = dma.done.wait [#allocation3], 16  }
0x19e5   :  { %20613 = vsyncadd [#allocation3], 4294967280 }
0x19e6   :  { %12682 = vsyncpa [#allocation3], 1 }

</bundles_post_ra>
